<compile_context>
chip_gen: v7x
topology: tpu7x:2x2x1
jax: 0.10.0
libtpu: 0.0.40
codegen_flags: <defaults>
</compile_context>

<pallas_src>
import functools
import math

import jax
import jax.numpy as jnp
from jax.experimental import pallas as pl
from jax.experimental.pallas import tpu as pltpu


def _round_up(x, m):
    return (x + m - 1) // m * m


# ---------------------------------------------------------------------------
# Tiled matmul + bias + ReLU kernel (used for every encoder conv via im2col)
# ---------------------------------------------------------------------------
def _mm_kernel(a_ref, w_ref, b_ref, o_ref, acc_ref, *, relu):
    @pl.when(pl.program_id(2) == 0)
    def _():
        # initialize the accumulator with the bias (added exactly once)
        acc_ref[...] = jnp.broadcast_to(b_ref[...], acc_ref.shape)

    acc_ref[...] += jnp.dot(
        a_ref[...], w_ref[...], preferred_element_type=jnp.float32
    )

    @pl.when(pl.program_id(2) == pl.num_programs(2) - 1)
    def _():
        acc = acc_ref[...]
        if relu:
            acc = jnp.maximum(acc, 0.0)
        o_ref[...] = acc.astype(o_ref.dtype)


def matmul_bias(a, w, b, relu, out_dtype=jnp.bfloat16):
    """a: (M, K), w: (K, N), b: (N,) -> (M, N) in `out_dtype` (bf16 MXU, f32 acc)."""
    M, K = a.shape
    _, N = w.shape
    TM = min(512, _round_up(M, 8))
    TN = min(256, _round_up(N, 128))
    TK = min(256, _round_up(K, 128))
    Mp, Np, Kp = _round_up(M, TM), _round_up(N, TN), _round_up(K, TK)

    a_p = jnp.pad(a.astype(jnp.bfloat16), ((0, Mp - M), (0, Kp - K)))
    w_p = jnp.pad(w.astype(jnp.bfloat16), ((0, Kp - K), (0, Np - N)))
    b_p = jnp.pad(b.reshape(1, N).astype(jnp.float32), ((0, 0), (0, Np - N)))

    out = pl.pallas_call(
        functools.partial(_mm_kernel, relu=relu),
        out_shape=jax.ShapeDtypeStruct((Mp, Np), out_dtype),
        grid=(Mp // TM, Np // TN, Kp // TK),
        in_specs=[
            pl.BlockSpec((TM, TK), lambda m, n, k: (m, k)),
            pl.BlockSpec((TK, TN), lambda m, n, k: (k, n)),   # W independent of m
            pl.BlockSpec((1, TN), lambda m, n, k: (0, n)),    # bias independent of m,k
        ],
        out_specs=pl.BlockSpec((TM, TN), lambda m, n, k: (m, n)),
        scratch_shapes=[pltpu.VMEM((TM, TN), jnp.float32)],
        compiler_params=pltpu.CompilerParams(
            dimension_semantics=("parallel", "parallel", "arbitrary")
        ),
    )(a_p, w_p, b_p)
    return out[:M, :N]


# ---------------------------------------------------------------------------
# Fused Head kernel: all 1x1 convs + residual adds + homogeneous divide.
# Weights stay resident in VMEM; M (pixel) tiles stream through the chain.
# ---------------------------------------------------------------------------
def _head_kernel(*refs, num_blocks, has_skip, use_homog, beta, max_inv, min_inv):
    it = iter(refs)
    feat_ref = next(it)
    n_layers = 3 + (1 if has_skip else 0) + 3 * num_blocks + 3
    wb = [(next(it), next(it)) for _ in range(n_layers)]
    mean_ref = next(it)
    o_ref = next(it)

    def mm(x_f, w_ref, b_ref, relu=True):
        acc = jnp.dot(
            x_f.astype(jnp.bfloat16), w_ref[...], preferred_element_type=jnp.float32
        )
        acc = acc + b_ref[...]
        if relu:
            acc = jnp.maximum(acc, 0.0)
        return acc

    feat = feat_ref[...]  # (TM, fd) bf16

    li = 0
    x = mm(feat, *wb[li]); li += 1          # res3_conv1
    x = mm(x, *wb[li]); li += 1             # res3_conv2
    x = mm(x, *wb[li]); li += 1             # res3_conv3
    if has_skip:
        skip = mm(feat, *wb[li], relu=False); li += 1
    else:
        skip = feat.astype(jnp.float32)
    res = skip + x

    for _ in range(num_blocks):
        x = mm(res, *wb[li]); li += 1
        x = mm(x, *wb[li]); li += 1
        x = mm(x, *wb[li]); li += 1
        res = res + x

    sc = mm(res, *wb[li]); li += 1          # fc1
    sc = mm(sc, *wb[li]); li += 1           # fc2
    sc = mm(sc, *wb[li], relu=False)        # fc3 (padded to 128 lanes)

    if use_homog:
        h = sc[:, 3:4]
        bh = beta * h
        # PyTorch softplus(x, beta) with threshold=20 on beta*x
        soft = jnp.where(
            bh > 20.0, h, jnp.log(1.0 + jnp.exp(jnp.minimum(bh, 20.0))) / beta
        )
        # clamp_(max=min_inv_scale): min_inv (1/0.01=100) is the *upper* bound.
        denom = jnp.minimum(soft + max_inv, min_inv)
        sc = sc / denom

    o_ref[...] = sc + mean_ref[...]         # lane-dense (TM, 128) store


def head_fused(feat_flat, layers, mean_pad, cfg, has_skip):
    M, fd = feat_flat.shape
    TM = min(256, _round_up(M, 8))
    Mp = _round_up(M, TM)
    feat_p = jnp.pad(feat_flat.astype(jnp.bfloat16), ((0, Mp - M), (0, 0)))

    use_homog = bool(cfg["use_homogeneous"])
    if use_homog:
        max_inv = 1.0 / cfg["homogeneous_max_scale"]
        min_inv = 1.0 / cfg["homogeneous_min_scale"]
        beta = math.log(2.0) / (1.0 - max_inv)
    else:
        max_inv = min_inv = beta = 1.0

    in_specs = [pl.BlockSpec((TM, fd), lambda m: (m, 0))]
    args = [feat_p]
    for w, b in layers:
        in_specs.append(pl.BlockSpec(w.shape, lambda m: (0, 0)))  # resident weight
        in_specs.append(pl.BlockSpec(b.shape, lambda m: (0, 0)))  # resident bias
        args.append(w)
        args.append(b)
    in_specs.append(pl.BlockSpec((1, 128), lambda m: (0, 0)))
    args.append(mean_pad)

    kernel = functools.partial(
        _head_kernel,
        num_blocks=cfg["num_head_blocks"],
        has_skip=has_skip,
        use_homog=use_homog,
        beta=beta,
        max_inv=max_inv,
        min_inv=min_inv,
    )
    out = pl.pallas_call(
        kernel,
        out_shape=jax.ShapeDtypeStruct((Mp, 128), jnp.float32),
        grid=(Mp // TM,),
        in_specs=in_specs,
        out_specs=pl.BlockSpec((TM, 128), lambda m: (m, 0)),
        compiler_params=pltpu.CompilerParams(dimension_semantics=("parallel",)),
    )(*args)
    return out[:M, :3]


# ---------------------------------------------------------------------------
# Conv lowering (im2col glue in plain JAX, matmul in Pallas)
# ---------------------------------------------------------------------------
# TODO(synk): avoid materializing im2col patches in HBM for the 3x3 convs by
# accumulating the 9 taps inside the matmul kernel (element-offset index_map on
# the padded NHWC input); currently patches are built in bf16 to halve traffic.
def _im2col(x_nhwc, k, stride, pad):
    B, H, W, C = x_nhwc.shape
    if pad > 0:
        x_nhwc = jnp.pad(x_nhwc, ((0, 0), (pad, pad), (pad, pad), (0, 0)))
    Ho = (H + 2 * pad - k) // stride + 1
    Wo = (W + 2 * pad - k) // stride + 1
    cols = []
    for dy in range(k):
        for dx in range(k):
            cols.append(
                x_nhwc[
                    :,
                    dy : dy + stride * (Ho - 1) + 1 : stride,
                    dx : dx + stride * (Wo - 1) + 1 : stride,
                    :,
                ]
            )
    patches = jnp.concatenate(cols, axis=-1)  # (B, Ho, Wo, k*k*C)
    return patches.reshape(B * Ho * Wo, k * k * C), Ho, Wo


def conv2d(x_nhwc, p, stride, pad, relu):
    """PyTorch-style conv. Weight p['w'] has layout (O, I, kH, kW). bf16 in/out."""
    w, b = p["w"], p["b"]
    O, I, kh, kw = w.shape
    B = x_nhwc.shape[0]
    if kh == 1 and kw == 1 and stride == 1 and pad == 0:
        H, W = x_nhwc.shape[1], x_nhwc.shape[2]
        patches, Ho, Wo = x_nhwc.reshape(B * H * W, I), H, W
        w_mat = w.reshape(O, I).T
    else:
        patches, Ho, Wo = _im2col(x_nhwc, kh, stride, pad)
        # patch ordering is (dy, dx, c) -> reorder weight to match
        w_mat = jnp.transpose(w, (2, 3, 1, 0)).reshape(kh * kw * I, O)
    y = matmul_bias(patches, w_mat, b, relu)
    return y.reshape(B, Ho, Wo, O)


# ---------------------------------------------------------------------------
# Parameter construction (deterministic, PyTorch default-ish uniform init)
# ---------------------------------------------------------------------------
def make_conv_params(key, in_c, out_c, k):
    kw, kb = jax.random.split(key)
    s = 1.0 / math.sqrt(in_c * k * k)
    return {
        "w": jax.random.uniform(kw, (out_c, in_c, k, k), jnp.float32, -s, s),
        "b": jax.random.uniform(kb, (out_c,), jnp.float32, -s, s),
    }


def init_regressor_params(key, cfg):
    fd = cfg["feature_dim"]
    hc = 512  # Head.head_channels
    keys = iter(jax.random.split(key, 64))
    enc = {
        "conv1": make_conv_params(next(keys), 1, 32, 3),
        "conv2": make_conv_params(next(keys), 32, 64, 3),
        "conv3": make_conv_params(next(keys), 64, 128, 3),
        "conv4": make_conv_params(next(keys), 128, 256, 3),
        "res1_conv1": make_conv_params(next(keys), 256, 256, 3),
        "res1_conv2": make_conv_params(next(keys), 256, 256, 1),
        "res1_conv3": make_conv_params(next(keys), 256, 256, 3),
        "res2_conv1": make_conv_params(next(keys), 256, 512, 3),
        "res2_conv2": make_conv_params(next(keys), 512, 512, 1),
        "res2_conv3": make_conv_params(next(keys), 512, fd, 3),
        "res2_skip": make_conv_params(next(keys), 256, fd, 1),
    }
    head = {
        "res3_conv1": make_conv_params(next(keys), fd, hc, 1),
        "res3_conv2": make_conv_params(next(keys), hc, hc, 1),
        "res3_conv3": make_conv_params(next(keys), hc, hc, 1),
        "res_blocks": [
            (
                make_conv_params(next(keys), hc, hc, 1),
                make_conv_params(next(keys), hc, hc, 1),
                make_conv_params(next(keys), hc, hc, 1),
            )
            for _ in range(cfg["num_head_blocks"])
        ],
        "fc1": make_conv_params(next(keys), hc, hc, 1),
        "fc2": make_conv_params(next(keys), hc, hc, 1),
        "fc3": make_conv_params(
            next(keys), hc, 4 if cfg["use_homogeneous"] else 3, 1
        ),
        "mean": jnp.zeros((1, 3), jnp.float32),  # Regressor default: mean = 0
    }
    if fd != hc:
        head["head_skip"] = make_conv_params(next(keys), fd, hc, 1)
    return {"encoder": enc, "head": head}


# ---------------------------------------------------------------------------
# Forward passes
# ---------------------------------------------------------------------------
def encoder_forward(p, x):
    x = conv2d(x, p["conv1"], 1, 1, True)
    x = conv2d(x, p["conv2"], 2, 1, True)
    x = conv2d(x, p["conv3"], 2, 1, True)
    res = conv2d(x, p["conv4"], 2, 1, True)
    x = conv2d(res, p["res1_conv1"], 1, 1, True)
    x = conv2d(x, p["res1_conv2"], 1, 0, True)
    x = conv2d(x, p["res1_conv3"], 1, 1, True)
    res = res + x
    x = conv2d(res, p["res2_conv1"], 1, 1, True)
    x = conv2d(x, p["res2_conv2"], 1, 0, True)
    x = conv2d(x, p["res2_conv3"], 1, 1, True)
    x = conv2d(res, p["res2_skip"], 1, 0, False) + x
    return x


def _lin(p, out_pad=None):
    """1x1 conv params -> (I, O) bf16 weight matrix + (1, O) f32 bias, optionally
    padded along O so the fused head writes lane-dense (128) outputs."""
    O, I = p["w"].shape[0], p["w"].shape[1]
    w = p["w"].reshape(O, I).T.astype(jnp.bfloat16)
    b = p["b"].reshape(1, O).astype(jnp.float32)
    if out_pad is not None and out_pad > O:
        w = jnp.pad(w, ((0, 0), (0, out_pad - O)))
        b = jnp.pad(b, ((0, 0), (0, out_pad - O)))
    return w, b


def head_forward(p, feat_nhwc, cfg):
    B, Ho, Wo, fd = feat_nhwc.shape
    feat_flat = feat_nhwc.reshape(B * Ho * Wo, fd)
    has_skip = "head_skip" in p

    layers = [_lin(p["res3_conv1"]), _lin(p["res3_conv2"]), _lin(p["res3_conv3"])]
    if has_skip:
        layers.append(_lin(p["head_skip"]))
    for blk in p["res_blocks"]:
        layers += [_lin(blk[0]), _lin(blk[1]), _lin(blk[2])]
    layers += [_lin(p["fc1"]), _lin(p["fc2"]), _lin(p["fc3"], out_pad=128)]

    mean_pad = jnp.pad(p["mean"].astype(jnp.float32), ((0, 0), (0, 128 - 3)))
    out = head_fused(feat_flat, layers, mean_pad, cfg, has_skip)  # (M, 3) f32
    return out.reshape(B, Ho, Wo, 3)


def regressor_forward(params, x_nchw, cfg):
    x = jnp.transpose(x_nchw, (0, 2, 3, 1)).astype(jnp.bfloat16)  # NCHW -> NHWC bf16
    feat = encoder_forward(params["encoder"], x)                  # (B, H/8, W/8, fd)
    sc = head_forward(params["head"], feat, cfg)                  # (B, H/8, W/8, 3)
    return jnp.transpose(sc, (0, 3, 1, 2))                        # back to NCHW f32


# ---------------------------------------------------------------------------
if __name__ == "__main__":
    cfg = {
        "num_head_blocks": 1,
        "use_homogeneous": True,
        "feature_dim": 128,  # num_encoder_features (exercises head_skip conv)
        "homogeneous_min_scale": 0.01,
        "homogeneous_max_scale": 4.0,
    }
    key = jax.random.PRNGKey(0)
    pkey, xkey = jax.random.split(key)
    params = init_regressor_params(pkey, cfg)

    # grayscale input, NCHW like the PyTorch module (Conv2d(1, 32, ...))
    x = jax.random.normal(xkey, (2, 1, 16, 16), jnp.float32)

    fwd = jax.jit(lambda p, inp: regressor_forward(p, inp, cfg))
    out = fwd(params, x)
    out = jax.block_until_ready(out)

    assert out.shape == (2, 3, 16 // 8, 16 // 8), out.shape
    assert out.dtype == jnp.float32
    assert bool(jnp.all(jnp.isfinite(out)))
    print("KERNEL_OK")
</pallas_src>

<mosaic_0001>
module attributes {stable_mosaic.version = 11 : i64} {
  func.func @_mm_kernel(%arg0: i32, %arg1: i32, %arg2: i32, %arg3: memref<512x128xbf16, #tpu.memory_space<vmem>>, %arg4: memref<128x128xbf16, #tpu.memory_space<vmem>>, %arg5: memref<1x128xf32, #tpu.memory_space<vmem>>, %arg6: memref<512x128xbf16, #tpu.memory_space<vmem>>, %arg7: memref<512x128xf32, #tpu.memory_space<vmem>>) attributes {dimension_semantics = [#tpu.dimension_semantics<parallel>, #tpu.dimension_semantics<parallel>, #tpu.dimension_semantics<arbitrary>], iteration_bounds = array<i64: 1, 1, 1>, scalar_prefetch = 0 : i64, scratch_operands = 1 : i64, tpu.core_type = #tpu.core_type<tc>, window_params = [{transform_indices = @transform_0, window_bounds = array<i64: 512, 128>}, {transform_indices = @transform_1, window_bounds = array<i64: 128, 128>}, {transform_indices = @transform_2, window_bounds = array<i64: 1, 128>}, {transform_indices = @transform_3, window_bounds = array<i64: 512, 128>}]} {
    %c0_i32 = arith.constant 0 : i32
    %0 = arith.cmpi eq, %arg2, %c0_i32 : i32
    %1 = arith.extui %0 : i1 to i32
    %c0_i32_0 = arith.constant 0 : i32
    %2 = arith.cmpi ne, %1, %c0_i32_0 : i32
    scf.if %2 {
      %c0_10 = arith.constant 0 : index
      %c0_11 = arith.constant 0 : index
      %12 = vector.load %arg5[%c0_10, %c0_11] : memref<1x128xf32, #tpu.memory_space<vmem>>, vector<1x128xf32>
      %13 = vector.shape_cast %12 : vector<1x128xf32> to vector<1x128xf32>
      %14 = vector.broadcast %13 : vector<1x128xf32> to vector<512x128xf32>
      %c0_12 = arith.constant 0 : index
      %c0_13 = arith.constant 0 : index
      %15 = vector.load %arg7[%c0_12, %c0_13] : memref<512x128xf32, #tpu.memory_space<vmem>>, vector<512x128xf32>
      tpu.vector_store %arg7[%c0_12, %c0_13], %14 {strides = array<i32>} : memref<512x128xf32, #tpu.memory_space<vmem>>, vector<512x128xf32>,
    } else {
    }
    %c0 = arith.constant 0 : index
    %c0_1 = arith.constant 0 : index
    %3 = vector.load %arg7[%c0, %c0_1] : memref<512x128xf32, #tpu.memory_space<vmem>>, vector<512x128xf32>
    %c0_2 = arith.constant 0 : index
    %c0_3 = arith.constant 0 : index
    %4 = vector.load %arg3[%c0_2, %c0_3] : memref<512x128xbf16, #tpu.memory_space<vmem>>, vector<512x128xbf16>
    %c0_4 = arith.constant 0 : index
    %c0_5 = arith.constant 0 : index
    %5 = vector.load %arg4[%c0_4, %c0_5] : memref<128x128xbf16, #tpu.memory_space<vmem>>, vector<128x128xbf16>
    %cst = arith.constant dense<0.000000e+00> : vector<512x128xf32>
    %6 = tpu.matmul %4, %5, %cst {dimension_numbers = #tpu.dot_dimension_numbers<[1], [0], [0], [1], [0, 0, 1, 1], [], []>} : vector<512x128xbf16>, vector<128x128xbf16>, vector<512x128xf32> -> vector<512x128xf32>
    %7 = arith.addf %3, %6 : vector<512x128xf32>
    %c0_6 = arith.constant 0 : index
    %c0_7 = arith.constant 0 : index
    %8 = vector.load %arg7[%c0_6, %c0_7] : memref<512x128xf32, #tpu.memory_space<vmem>>, vector<512x128xf32>
    tpu.vector_store %arg7[%c0_6, %c0_7], %7 {strides = array<i32>} : memref<512x128xf32, #tpu.memory_space<vmem>>, vector<512x128xf32>,
    %c0_i32_8 = arith.constant 0 : i32
    %9 = arith.cmpi eq, %arg2, %c0_i32_8 : i32
    %10 = arith.extui %9 : i1 to i32
    %c0_i32_9 = arith.constant 0 : i32
    %11 = arith.cmpi ne, %10, %c0_i32_9 : i32
    scf.if %11 {
      %c0_10 = arith.constant 0 : index
      %c0_11 = arith.constant 0 : index
      %12 = vector.load %arg7[%c0_10, %c0_11] : memref<512x128xf32, #tpu.memory_space<vmem>>, vector<512x128xf32>
      %cst_12 = arith.constant 0.000000e+00 : f32
      %13 = vector.broadcast %cst_12 : f32 to vector<512x128xf32>
      %14 = arith.maximumf %12, %13 : vector<512x128xf32>
      %15 = arith.truncf %14 : vector<512x128xf32> to vector<512x128xbf16>
      %c0_13 = arith.constant 0 : index
      %c0_14 = arith.constant 0 : index
      %16 = vector.load %arg6[%c0_13, %c0_14] : memref<512x128xbf16, #tpu.memory_space<vmem>>, vector<512x128xbf16>
      tpu.vector_store %arg6[%c0_13, %c0_14], %15 {strides = array<i32>} : memref<512x128xbf16, #tpu.memory_space<vmem>>, vector<512x128xbf16>,
    } else {
    }
    return
  }
  func.func @transform_0(%arg0: i32, %arg1: i32, %arg2: i32) -> (i32, i32) {
    %c0_i32 = arith.constant 0 : i32
    return %arg0, %arg2 : i32, i32
  }
  func.func @transform_1(%arg0: i32, %arg1: i32, %arg2: i32) -> (i32, i32) {
    %c0_i32 = arith.constant 0 : i32
    return %arg2, %arg1 : i32, i32
  }
  func.func @transform_2(%arg0: i32, %arg1: i32, %arg2: i32) -> (i32, i32) {
    %c0_i32 = arith.constant 0 : i32
    %c0_i32_0 = arith.constant 0 : i32
    return %c0_i32, %arg1 : i32, i32
  }
  func.func @transform_3(%arg0: i32, %arg1: i32, %arg2: i32) -> (i32, i32) {
    %c0_i32 = arith.constant 0 : i32
    return %arg0, %arg1 : i32, i32
  }
}

module attributes {stable_mosaic.version = 11 : i64} {
  func.func @_mm_kernel(%arg0: i32, %arg1: i32, %arg2: i32, %arg3: memref<128x256xbf16, #tpu.memory_space<vmem>>, %arg4: memref<256x128xbf16, #tpu.memory_space<vmem>>, %arg5: memref<1x128xf32, #tpu.memory_space<vmem>>, %arg6: memref<128x128xbf16, #tpu.memory_space<vmem>>, %arg7: memref<128x128xf32, #tpu.memory_space<vmem>>) attributes {dimension_semantics = [#tpu.dimension_semantics<parallel>, #tpu.dimension_semantics<parallel>, #tpu.dimension_semantics<arbitrary>], iteration_bounds = array<i64: 1, 1, 2>, scalar_prefetch = 0 : i64, scratch_operands = 1 : i64, tpu.core_type = #tpu.core_type<tc>, window_params = [{transform_indices = @transform_0, window_bounds = array<i64: 128, 256>}, {transform_indices = @transform_1, window_bounds = array<i64: 256, 128>}, {transform_indices = @transform_2, window_bounds = array<i64: 1, 128>}, {transform_indices = @transform_3, window_bounds = array<i64: 128, 128>}]} {
    %c0_i32 = arith.constant 0 : i32
    %0 = arith.cmpi eq, %arg2, %c0_i32 : i32
    %1 = arith.extui %0 : i1 to i32
    %c0_i32_0 = arith.constant 0 : i32
    %2 = arith.cmpi ne, %1, %c0_i32_0 : i32
    scf.if %2 {
      %c0_9 = arith.constant 0 : index
      %c0_10 = arith.constant 0 : index
      %12 = vector.load %arg5[%c0_9, %c0_10] : memref<1x128xf32, #tpu.memory_space<vmem>>, vector<1x128xf32>
      %13 = vector.shape_cast %12 : vector<1x128xf32> to vector<1x128xf32>
      %14 = vector.broadcast %13 : vector<1x128xf32> to vector<128x128xf32>
      %c0_11 = arith.constant 0 : index
      %c0_12 = arith.constant 0 : index
      %15 = vector.load %arg7[%c0_11, %c0_12] : memref<128x128xf32, #tpu.memory_space<vmem>>, vector<128x128xf32>
      tpu.vector_store %arg7[%c0_11, %c0_12], %14 {strides = array<i32>} : memref<128x128xf32, #tpu.memory_space<vmem>>, vector<128x128xf32>,
    } else {
    }
    %c0 = arith.constant 0 : index
    %c0_1 = arith.constant 0 : index
    %3 = vector.load %arg7[%c0, %c0_1] : memref<128x128xf32, #tpu.memory_space<vmem>>, vector<128x128xf32>
    %c0_2 = arith.constant 0 : index
    %c0_3 = arith.constant 0 : index
    %4 = vector.load %arg3[%c0_2, %c0_3] : memref<128x256xbf16, #tpu.memory_space<vmem>>, vector<128x256xbf16>
    %c0_4 = arith.constant 0 : index
    %c0_5 = arith.constant 0 : index
    %5 = vector.load %arg4[%c0_4, %c0_5] : memref<256x128xbf16, #tpu.memory_space<vmem>>, vector<256x128xbf16>
    %cst = arith.constant dense<0.000000e+00> : vector<128x128xf32>
    %6 = tpu.matmul %4, %5, %cst {dimension_numbers = #tpu.dot_dimension_numbers<[1], [0], [0], [1], [0, 0, 1, 1], [], []>} : vector<128x256xbf16>, vector<256x128xbf16>, vector<128x128xf32> -> vector<128x128xf32>
    %7 = arith.addf %3, %6 : vector<128x128xf32>
    %c0_6 = arith.constant 0 : index
    %c0_7 = arith.constant 0 : index
    %8 = vector.load %arg7[%c0_6, %c0_7] : memref<128x128xf32, #tpu.memory_space<vmem>>, vector<128x128xf32>
    tpu.vector_store %arg7[%c0_6, %c0_7], %7 {strides = array<i32>} : memref<128x128xf32, #tpu.memory_space<vmem>>, vector<128x128xf32>,
    %c1_i32 = arith.constant 1 : i32
    %9 = arith.cmpi eq, %arg2, %c1_i32 : i32
    %10 = arith.extui %9 : i1 to i32
    %c0_i32_8 = arith.constant 0 : i32
    %11 = arith.cmpi ne, %10, %c0_i32_8 : i32
    scf.if %11 {
      %c0_9 = arith.constant 0 : index
      %c0_10 = arith.constant 0 : index
      %12 = vector.load %arg7[%c0_9, %c0_10] : memref<128x128xf32, #tpu.memory_space<vmem>>, vector<128x128xf32>
      %cst_11 = arith.constant 0.000000e+00 : f32
      %13 = vector.broadcast %cst_11 : f32 to vector<128x128xf32>
      %14 = arith.maximumf %12, %13 : vector<128x128xf32>
      %15 = arith.truncf %14 : vector<128x128xf32> to vector<128x128xbf16>
      %c0_12 = arith.constant 0 : index
      %c0_13 = arith.constant 0 : index
      %16 = vector.load %arg6[%c0_12, %c0_13] : memref<128x128xbf16, #tpu.memory_space<vmem>>, vector<128x128xbf16>
      tpu.vector_store %arg6[%c0_12, %c0_13], %15 {strides = array<i32>} : memref<128x128xbf16, #tpu.memory_space<vmem>>, vector<128x128xbf16>,
    } else {
    }
    return
  }
  func.func @transform_0(%arg0: i32, %arg1: i32, %arg2: i32) -> (i32, i32) {
    %c0_i32 = arith.constant 0 : i32
    return %arg0, %arg2 : i32, i32
  }
  func.func @transform_1(%arg0: i32, %arg1: i32, %arg2: i32) -> (i32, i32) {
    %c0_i32 = arith.constant 0 : i32
    return %arg2, %arg1 : i32, i32
  }
  func.func @transform_2(%arg0: i32, %arg1: i32, %arg2: i32) -> (i32, i32) {
    %c0_i32 = arith.constant 0 : i32
    %c0_i32_0 = arith.constant 0 : i32
    return %c0_i32, %arg1 : i32, i32
  }
  func.func @transform_3(%arg0: i32, %arg1: i32, %arg2: i32) -> (i32, i32) {
    %c0_i32 = arith.constant 0 : i32
    return %arg0, %arg1 : i32, i32
  }
}

module attributes {stable_mosaic.version = 11 : i64} {
  func.func @_mm_kernel(%arg0: i32, %arg1: i32, %arg2: i32, %arg3: memref<32x256xbf16, #tpu.memory_space<vmem>>, %arg4: memref<256x128xbf16, #tpu.memory_space<vmem>>, %arg5: memref<1x128xf32, #tpu.memory_space<vmem>>, %arg6: memref<32x128xbf16, #tpu.memory_space<vmem>>, %arg7: memref<32x128xf32, #tpu.memory_space<vmem>>) attributes {dimension_semantics = [#tpu.dimension_semantics<parallel>, #tpu.dimension_semantics<parallel>, #tpu.dimension_semantics<arbitrary>], iteration_bounds = array<i64: 1, 1, 3>, scalar_prefetch = 0 : i64, scratch_operands = 1 : i64, tpu.core_type = #tpu.core_type<tc>, window_params = [{transform_indices = @transform_0, window_bounds = array<i64: 32, 256>}, {transform_indices = @transform_1, window_bounds = array<i64: 256, 128>}, {transform_indices = @transform_2, window_bounds = array<i64: 1, 128>}, {transform_indices = @transform_3, window_bounds = array<i64: 32, 128>}]} {
    %c0_i32 = arith.constant 0 : i32
    %0 = arith.cmpi eq, %arg2, %c0_i32 : i32
    %1 = arith.extui %0 : i1 to i32
    %c0_i32_0 = arith.constant 0 : i32
    %2 = arith.cmpi ne, %1, %c0_i32_0 : i32
    scf.if %2 {
      %c0_9 = arith.constant 0 : index
      %c0_10 = arith.constant 0 : index
      %12 = vector.load %arg5[%c0_9, %c0_10] : memref<1x128xf32, #tpu.memory_space<vmem>>, vector<1x128xf32>
      %13 = vector.shape_cast %12 : vector<1x128xf32> to vector<1x128xf32>
      %14 = vector.broadcast %13 : vector<1x128xf32> to vector<32x128xf32>
      %c0_11 = arith.constant 0 : index
      %c0_12 = arith.constant 0 : index
      %15 = vector.load %arg7[%c0_11, %c0_12] : memref<32x128xf32, #tpu.memory_space<vmem>>, vector<32x128xf32>
      tpu.vector_store %arg7[%c0_11, %c0_12], %14 {strides = array<i32>} : memref<32x128xf32, #tpu.memory_space<vmem>>, vector<32x128xf32>,
    } else {
    }
    %c0 = arith.constant 0 : index
    %c0_1 = arith.constant 0 : index
    %3 = vector.load %arg7[%c0, %c0_1] : memref<32x128xf32, #tpu.memory_space<vmem>>, vector<32x128xf32>
    %c0_2 = arith.constant 0 : index
    %c0_3 = arith.constant 0 : index
    %4 = vector.load %arg3[%c0_2, %c0_3] : memref<32x256xbf16, #tpu.memory_space<vmem>>, vector<32x256xbf16>
    %c0_4 = arith.constant 0 : index
    %c0_5 = arith.constant 0 : index
    %5 = vector.load %arg4[%c0_4, %c0_5] : memref<256x128xbf16, #tpu.memory_space<vmem>>, vector<256x128xbf16>
    %cst = arith.constant dense<0.000000e+00> : vector<32x128xf32>
    %6 = tpu.matmul %4, %5, %cst {dimension_numbers = #tpu.dot_dimension_numbers<[1], [0], [0], [1], [0, 0, 1, 1], [], []>} : vector<32x256xbf16>, vector<256x128xbf16>, vector<32x128xf32> -> vector<32x128xf32>
    %7 = arith.addf %3, %6 : vector<32x128xf32>
    %c0_6 = arith.constant 0 : index
    %c0_7 = arith.constant 0 : index
    %8 = vector.load %arg7[%c0_6, %c0_7] : memref<32x128xf32, #tpu.memory_space<vmem>>, vector<32x128xf32>
    tpu.vector_store %arg7[%c0_6, %c0_7], %7 {strides = array<i32>} : memref<32x128xf32, #tpu.memory_space<vmem>>, vector<32x128xf32>,
    %c2_i32 = arith.constant 2 : i32
    %9 = arith.cmpi eq, %arg2, %c2_i32 : i32
    %10 = arith.extui %9 : i1 to i32
    %c0_i32_8 = arith.constant 0 : i32
    %11 = arith.cmpi ne, %10, %c0_i32_8 : i32
    scf.if %11 {
      %c0_9 = arith.constant 0 : index
      %c0_10 = arith.constant 0 : index
      %12 = vector.load %arg7[%c0_9, %c0_10] : memref<32x128xf32, #tpu.memory_space<vmem>>, vector<32x128xf32>
      %cst_11 = arith.constant 0.000000e+00 : f32
      %13 = vector.broadcast %cst_11 : f32 to vector<32x128xf32>
      %14 = arith.maximumf %12, %13 : vector<32x128xf32>
      %15 = arith.truncf %14 : vector<32x128xf32> to vector<32x128xbf16>
      %c0_12 = arith.constant 0 : index
      %c0_13 = arith.constant 0 : index
      %16 = vector.load %arg6[%c0_12, %c0_13] : memref<32x128xbf16, #tpu.memory_space<vmem>>, vector<32x128xbf16>
      tpu.vector_store %arg6[%c0_12, %c0_13], %15 {strides = array<i32>} : memref<32x128xbf16, #tpu.memory_space<vmem>>, vector<32x128xbf16>,
    } else {
    }
    return
  }
  func.func @transform_0(%arg0: i32, %arg1: i32, %arg2: i32) -> (i32, i32) {
    %c0_i32 = arith.constant 0 : i32
    return %arg0, %arg2 : i32, i32
  }
  func.func @transform_1(%arg0: i32, %arg1: i32, %arg2: i32) -> (i32, i32) {
    %c0_i32 = arith.constant 0 : i32
    return %arg2, %arg1 : i32, i32
  }
  func.func @transform_2(%arg0: i32, %arg1: i32, %arg2: i32) -> (i32, i32) {
    %c0_i32 = arith.constant 0 : i32
    %c0_i32_0 = arith.constant 0 : i32
    return %c0_i32, %arg1 : i32, i32
  }
  func.func @transform_3(%arg0: i32, %arg1: i32, %arg2: i32) -> (i32, i32) {
    %c0_i32 = arith.constant 0 : i32
    return %arg0, %arg1 : i32, i32
  }
}

module attributes {stable_mosaic.version = 11 : i64} {
  func.func @_mm_kernel(%arg0: i32, %arg1: i32, %arg2: i32, %arg3: memref<8x256xbf16, #tpu.memory_space<vmem>>, %arg4: memref<256x256xbf16, #tpu.memory_space<vmem>>, %arg5: memref<1x256xf32, #tpu.memory_space<vmem>>, %arg6: memref<8x256xbf16, #tpu.memory_space<vmem>>, %arg7: memref<8x256xf32, #tpu.memory_space<vmem>>) attributes {dimension_semantics = [#tpu.dimension_semantics<parallel>, #tpu.dimension_semantics<parallel>, #tpu.dimension_semantics<arbitrary>], iteration_bounds = array<i64: 1, 1, 5>, scalar_prefetch = 0 : i64, scratch_operands = 1 : i64, tpu.core_type = #tpu.core_type<tc>, window_params = [{transform_indices = @transform_0, window_bounds = array<i64: 8, 256>}, {transform_indices = @transform_1, window_bounds = array<i64: 256, 256>}, {transform_indices = @transform_2, window_bounds = array<i64: 1, 256>}, {transform_indices = @transform_3, window_bounds = array<i64: 8, 256>}]} {
    %c0_i32 = arith.constant 0 : i32
    %0 = arith.cmpi eq, %arg2, %c0_i32 : i32
    %1 = arith.extui %0 : i1 to i32
    %c0_i32_0 = arith.constant 0 : i32
    %2 = arith.cmpi ne, %1, %c0_i32_0 : i32
    scf.if %2 {
      %c0_9 = arith.constant 0 : index
      %c0_10 = arith.constant 0 : index
      %12 = vector.load %arg5[%c0_9, %c0_10] : memref<1x256xf32, #tpu.memory_space<vmem>>, vector<1x256xf32>
      %13 = vector.shape_cast %12 : vector<1x256xf32> to vector<1x256xf32>
      %14 = vector.broadcast %13 : vector<1x256xf32> to vector<8x256xf32>
      %c0_11 = arith.constant 0 : index
      %c0_12 = arith.constant 0 : index
      %15 = vector.load %arg7[%c0_11, %c0_12] : memref<8x256xf32, #tpu.memory_space<vmem>>, vector<8x256xf32>
      tpu.vector_store %arg7[%c0_11, %c0_12], %14 {strides = array<i32>} : memref<8x256xf32, #tpu.memory_space<vmem>>, vector<8x256xf32>,
    } else {
    }
    %c0 = arith.constant 0 : index
    %c0_1 = arith.constant 0 : index
    %3 = vector.load %arg7[%c0, %c0_1] : memref<8x256xf32, #tpu.memory_space<vmem>>, vector<8x256xf32>
    %c0_2 = arith.constant 0 : index
    %c0_3 = arith.constant 0 : index
    %4 = vector.load %arg3[%c0_2, %c0_3] : memref<8x256xbf16, #tpu.memory_space<vmem>>, vector<8x256xbf16>
    %c0_4 = arith.constant 0 : index
    %c0_5 = arith.constant 0 : index
    %5 = vector.load %arg4[%c0_4, %c0_5] : memref<256x256xbf16, #tpu.memory_space<vmem>>, vector<256x256xbf16>
    %cst = arith.constant dense<0.000000e+00> : vector<8x256xf32>
    %6 = tpu.matmul %4, %5, %cst {dimension_numbers = #tpu.dot_dimension_numbers<[1], [0], [0], [1], [0, 0, 1, 1], [], []>} : vector<8x256xbf16>, vector<256x256xbf16>, vector<8x256xf32> -> vector<8x256xf32>
    %7 = arith.addf %3, %6 : vector<8x256xf32>
    %c0_6 = arith.constant 0 : index
    %c0_7 = arith.constant 0 : index
    %8 = vector.load %arg7[%c0_6, %c0_7] : memref<8x256xf32, #tpu.memory_space<vmem>>, vector<8x256xf32>
    tpu.vector_store %arg7[%c0_6, %c0_7], %7 {strides = array<i32>} : memref<8x256xf32, #tpu.memory_space<vmem>>, vector<8x256xf32>,
    %c4_i32 = arith.constant 4 : i32
    %9 = arith.cmpi eq, %arg2, %c4_i32 : i32
    %10 = arith.extui %9 : i1 to i32
    %c0_i32_8 = arith.constant 0 : i32
    %11 = arith.cmpi ne, %10, %c0_i32_8 : i32
    scf.if %11 {
      %c0_9 = arith.constant 0 : index
      %c0_10 = arith.constant 0 : index
      %12 = vector.load %arg7[%c0_9, %c0_10] : memref<8x256xf32, #tpu.memory_space<vmem>>, vector<8x256xf32>
      %cst_11 = arith.constant 0.000000e+00 : f32
      %13 = vector.broadcast %cst_11 : f32 to vector<8x256xf32>
      %14 = arith.maximumf %12, %13 : vector<8x256xf32>
      %15 = arith.truncf %14 : vector<8x256xf32> to vector<8x256xbf16>
      %c0_12 = arith.constant 0 : index
      %c0_13 = arith.constant 0 : index
      %16 = vector.load %arg6[%c0_12, %c0_13] : memref<8x256xbf16, #tpu.memory_space<vmem>>, vector<8x256xbf16>
      tpu.vector_store %arg6[%c0_12, %c0_13], %15 {strides = array<i32>} : memref<8x256xbf16, #tpu.memory_space<vmem>>, vector<8x256xbf16>,
    } else {
    }
    return
  }
  func.func @transform_0(%arg0: i32, %arg1: i32, %arg2: i32) -> (i32, i32) {
    %c0_i32 = arith.constant 0 : i32
    return %arg0, %arg2 : i32, i32
  }
  func.func @transform_1(%arg0: i32, %arg1: i32, %arg2: i32) -> (i32, i32) {
    %c0_i32 = arith.constant 0 : i32
    return %arg2, %arg1 : i32, i32
  }
  func.func @transform_2(%arg0: i32, %arg1: i32, %arg2: i32) -> (i32, i32) {
    %c0_i32 = arith.constant 0 : i32
    %c0_i32_0 = arith.constant 0 : i32
    return %c0_i32, %arg1 : i32, i32
  }
  func.func @transform_3(%arg0: i32, %arg1: i32, %arg2: i32) -> (i32, i32) {
    %c0_i32 = arith.constant 0 : i32
    return %arg0, %arg1 : i32, i32
  }
}

module attributes {stable_mosaic.version = 11 : i64} {
  func.func @_mm_kernel(%arg0: i32, %arg1: i32, %arg2: i32, %arg3: memref<8x256xbf16, #tpu.memory_space<vmem>>, %arg4: memref<256x256xbf16, #tpu.memory_space<vmem>>, %arg5: memref<1x256xf32, #tpu.memory_space<vmem>>, %arg6: memref<8x256xbf16, #tpu.memory_space<vmem>>, %arg7: memref<8x256xf32, #tpu.memory_space<vmem>>) attributes {dimension_semantics = [#tpu.dimension_semantics<parallel>, #tpu.dimension_semantics<parallel>, #tpu.dimension_semantics<arbitrary>], iteration_bounds = array<i64: 1, 1, 9>, scalar_prefetch = 0 : i64, scratch_operands = 1 : i64, tpu.core_type = #tpu.core_type<tc>, window_params = [{transform_indices = @transform_0, window_bounds = array<i64: 8, 256>}, {transform_indices = @transform_1, window_bounds = array<i64: 256, 256>}, {transform_indices = @transform_2, window_bounds = array<i64: 1, 256>}, {transform_indices = @transform_3, window_bounds = array<i64: 8, 256>}]} {
    %c0_i32 = arith.constant 0 : i32
    %0 = arith.cmpi eq, %arg2, %c0_i32 : i32
    %1 = arith.extui %0 : i1 to i32
    %c0_i32_0 = arith.constant 0 : i32
    %2 = arith.cmpi ne, %1, %c0_i32_0 : i32
    scf.if %2 {
      %c0_9 = arith.constant 0 : index
      %c0_10 = arith.constant 0 : index
      %12 = vector.load %arg5[%c0_9, %c0_10] : memref<1x256xf32, #tpu.memory_space<vmem>>, vector<1x256xf32>
      %13 = vector.shape_cast %12 : vector<1x256xf32> to vector<1x256xf32>
      %14 = vector.broadcast %13 : vector<1x256xf32> to vector<8x256xf32>
      %c0_11 = arith.constant 0 : index
      %c0_12 = arith.constant 0 : index
      %15 = vector.load %arg7[%c0_11, %c0_12] : memref<8x256xf32, #tpu.memory_space<vmem>>, vector<8x256xf32>
      tpu.vector_store %arg7[%c0_11, %c0_12], %14 {strides = array<i32>} : memref<8x256xf32, #tpu.memory_space<vmem>>, vector<8x256xf32>,
    } else {
    }
    %c0 = arith.constant 0 : index
    %c0_1 = arith.constant 0 : index
    %3 = vector.load %arg7[%c0, %c0_1] : memref<8x256xf32, #tpu.memory_space<vmem>>, vector<8x256xf32>
    %c0_2 = arith.constant 0 : index
    %c0_3 = arith.constant 0 : index
    %4 = vector.load %arg3[%c0_2, %c0_3] : memref<8x256xbf16, #tpu.memory_space<vmem>>, vector<8x256xbf16>
    %c0_4 = arith.constant 0 : index
    %c0_5 = arith.constant 0 : index
    %5 = vector.load %arg4[%c0_4, %c0_5] : memref<256x256xbf16, #tpu.memory_space<vmem>>, vector<256x256xbf16>
    %cst = arith.constant dense<0.000000e+00> : vector<8x256xf32>
    %6 = tpu.matmul %4, %5, %cst {dimension_numbers = #tpu.dot_dimension_numbers<[1], [0], [0], [1], [0, 0, 1, 1], [], []>} : vector<8x256xbf16>, vector<256x256xbf16>, vector<8x256xf32> -> vector<8x256xf32>
    %7 = arith.addf %3, %6 : vector<8x256xf32>
    %c0_6 = arith.constant 0 : index
    %c0_7 = arith.constant 0 : index
    %8 = vector.load %arg7[%c0_6, %c0_7] : memref<8x256xf32, #tpu.memory_space<vmem>>, vector<8x256xf32>
    tpu.vector_store %arg7[%c0_6, %c0_7], %7 {strides = array<i32>} : memref<8x256xf32, #tpu.memory_space<vmem>>, vector<8x256xf32>,
    %c8_i32 = arith.constant 8 : i32
    %9 = arith.cmpi eq, %arg2, %c8_i32 : i32
    %10 = arith.extui %9 : i1 to i32
    %c0_i32_8 = arith.constant 0 : i32
    %11 = arith.cmpi ne, %10, %c0_i32_8 : i32
    scf.if %11 {
      %c0_9 = arith.constant 0 : index
      %c0_10 = arith.constant 0 : index
      %12 = vector.load %arg7[%c0_9, %c0_10] : memref<8x256xf32, #tpu.memory_space<vmem>>, vector<8x256xf32>
      %cst_11 = arith.constant 0.000000e+00 : f32
      %13 = vector.broadcast %cst_11 : f32 to vector<8x256xf32>
      %14 = arith.maximumf %12, %13 : vector<8x256xf32>
      %15 = arith.truncf %14 : vector<8x256xf32> to vector<8x256xbf16>
      %c0_12 = arith.constant 0 : index
      %c0_13 = arith.constant 0 : index
      %16 = vector.load %arg6[%c0_12, %c0_13] : memref<8x256xbf16, #tpu.memory_space<vmem>>, vector<8x256xbf16>
      tpu.vector_store %arg6[%c0_12, %c0_13], %15 {strides = array<i32>} : memref<8x256xbf16, #tpu.memory_space<vmem>>, vector<8x256xbf16>,
    } else {
    }
    return
  }
  func.func @transform_0(%arg0: i32, %arg1: i32, %arg2: i32) -> (i32, i32) {
    %c0_i32 = arith.constant 0 : i32
    return %arg0, %arg2 : i32, i32
  }
  func.func @transform_1(%arg0: i32, %arg1: i32, %arg2: i32) -> (i32, i32) {
    %c0_i32 = arith.constant 0 : i32
    return %arg2, %arg1 : i32, i32
  }
  func.func @transform_2(%arg0: i32, %arg1: i32, %arg2: i32) -> (i32, i32) {
    %c0_i32 = arith.constant 0 : i32
    %c0_i32_0 = arith.constant 0 : i32
    return %c0_i32, %arg1 : i32, i32
  }
  func.func @transform_3(%arg0: i32, %arg1: i32, %arg2: i32) -> (i32, i32) {
    %c0_i32 = arith.constant 0 : i32
    return %arg0, %arg1 : i32, i32
  }
}

module attributes {stable_mosaic.version = 11 : i64} {
  func.func @_mm_kernel(%arg0: i32, %arg1: i32, %arg2: i32, %arg3: memref<8x256xbf16, #tpu.memory_space<vmem>>, %arg4: memref<256x256xbf16, #tpu.memory_space<vmem>>, %arg5: memref<1x256xf32, #tpu.memory_space<vmem>>, %arg6: memref<8x256xbf16, #tpu.memory_space<vmem>>, %arg7: memref<8x256xf32, #tpu.memory_space<vmem>>) attributes {dimension_semantics = [#tpu.dimension_semantics<parallel>, #tpu.dimension_semantics<parallel>, #tpu.dimension_semantics<arbitrary>], iteration_bounds = array<i64: 1, 1, 1>, scalar_prefetch = 0 : i64, scratch_operands = 1 : i64, tpu.core_type = #tpu.core_type<tc>, window_params = [{transform_indices = @transform_0, window_bounds = array<i64: 8, 256>}, {transform_indices = @transform_1, window_bounds = array<i64: 256, 256>}, {transform_indices = @transform_2, window_bounds = array<i64: 1, 256>}, {transform_indices = @transform_3, window_bounds = array<i64: 8, 256>}]} {
    %c0_i32 = arith.constant 0 : i32
    %0 = arith.cmpi eq, %arg2, %c0_i32 : i32
    %1 = arith.extui %0 : i1 to i32
    %c0_i32_0 = arith.constant 0 : i32
    %2 = arith.cmpi ne, %1, %c0_i32_0 : i32
    scf.if %2 {
      %c0_10 = arith.constant 0 : index
      %c0_11 = arith.constant 0 : index
      %12 = vector.load %arg5[%c0_10, %c0_11] : memref<1x256xf32, #tpu.memory_space<vmem>>, vector<1x256xf32>
      %13 = vector.shape_cast %12 : vector<1x256xf32> to vector<1x256xf32>
      %14 = vector.broadcast %13 : vector<1x256xf32> to vector<8x256xf32>
      %c0_12 = arith.constant 0 : index
      %c0_13 = arith.constant 0 : index
      %15 = vector.load %arg7[%c0_12, %c0_13] : memref<8x256xf32, #tpu.memory_space<vmem>>, vector<8x256xf32>
      tpu.vector_store %arg7[%c0_12, %c0_13], %14 {strides = array<i32>} : memref<8x256xf32, #tpu.memory_space<vmem>>, vector<8x256xf32>,
    } else {
    }
    %c0 = arith.constant 0 : index
    %c0_1 = arith.constant 0 : index
    %3 = vector.load %arg7[%c0, %c0_1] : memref<8x256xf32, #tpu.memory_space<vmem>>, vector<8x256xf32>
    %c0_2 = arith.constant 0 : index
    %c0_3 = arith.constant 0 : index
    %4 = vector.load %arg3[%c0_2, %c0_3] : memref<8x256xbf16, #tpu.memory_space<vmem>>, vector<8x256xbf16>
    %c0_4 = arith.constant 0 : index
    %c0_5 = arith.constant 0 : index
    %5 = vector.load %arg4[%c0_4, %c0_5] : memref<256x256xbf16, #tpu.memory_space<vmem>>, vector<256x256xbf16>
    %cst = arith.constant dense<0.000000e+00> : vector<8x256xf32>
    %6 = tpu.matmul %4, %5, %cst {dimension_numbers = #tpu.dot_dimension_numbers<[1], [0], [0], [1], [0, 0, 1, 1], [], []>} : vector<8x256xbf16>, vector<256x256xbf16>, vector<8x256xf32> -> vector<8x256xf32>
    %7 = arith.addf %3, %6 : vector<8x256xf32>
    %c0_6 = arith.constant 0 : index
    %c0_7 = arith.constant 0 : index
    %8 = vector.load %arg7[%c0_6, %c0_7] : memref<8x256xf32, #tpu.memory_space<vmem>>, vector<8x256xf32>
    tpu.vector_store %arg7[%c0_6, %c0_7], %7 {strides = array<i32>} : memref<8x256xf32, #tpu.memory_space<vmem>>, vector<8x256xf32>,
    %c0_i32_8 = arith.constant 0 : i32
    %9 = arith.cmpi eq, %arg2, %c0_i32_8 : i32
    %10 = arith.extui %9 : i1 to i32
    %c0_i32_9 = arith.constant 0 : i32
    %11 = arith.cmpi ne, %10, %c0_i32_9 : i32
    scf.if %11 {
      %c0_10 = arith.constant 0 : index
      %c0_11 = arith.constant 0 : index
      %12 = vector.load %arg7[%c0_10, %c0_11] : memref<8x256xf32, #tpu.memory_space<vmem>>, vector<8x256xf32>
      %cst_12 = arith.constant 0.000000e+00 : f32
      %13 = vector.broadcast %cst_12 : f32 to vector<8x256xf32>
      %14 = arith.maximumf %12, %13 : vector<8x256xf32>
      %15 = arith.truncf %14 : vector<8x256xf32> to vector<8x256xbf16>
      %c0_13 = arith.constant 0 : index
      %c0_14 = arith.constant 0 : index
      %16 = vector.load %arg6[%c0_13, %c0_14] : memref<8x256xbf16, #tpu.memory_space<vmem>>, vector<8x256xbf16>
      tpu.vector_store %arg6[%c0_13, %c0_14], %15 {strides = array<i32>} : memref<8x256xbf16, #tpu.memory_space<vmem>>, vector<8x256xbf16>,
    } else {
    }
    return
  }
  func.func @transform_0(%arg0: i32, %arg1: i32, %arg2: i32) -> (i32, i32) {
    %c0_i32 = arith.constant 0 : i32
    return %arg0, %arg2 : i32, i32
  }
  func.func @transform_1(%arg0: i32, %arg1: i32, %arg2: i32) -> (i32, i32) {
    %c0_i32 = arith.constant 0 : i32
    return %arg2, %arg1 : i32, i32
  }
  func.func @transform_2(%arg0: i32, %arg1: i32, %arg2: i32) -> (i32, i32) {
    %c0_i32 = arith.constant 0 : i32
    %c0_i32_0 = arith.constant 0 : i32
    return %c0_i32, %arg1 : i32, i32
  }
  func.func @transform_3(%arg0: i32, %arg1: i32, %arg2: i32) -> (i32, i32) {
    %c0_i32 = arith.constant 0 : i32
    return %arg0, %arg1 : i32, i32
  }
}

module attributes {stable_mosaic.version = 11 : i64} {
  func.func @_mm_kernel(%arg0: i32, %arg1: i32, %arg2: i32, %arg3: memref<8x256xbf16, #tpu.memory_space<vmem>>, %arg4: memref<256x128xbf16, #tpu.memory_space<vmem>>, %arg5: memref<1x128xf32, #tpu.memory_space<vmem>>, %arg6: memref<8x128xbf16, #tpu.memory_space<vmem>>, %arg7: memref<8x128xf32, #tpu.memory_space<vmem>>) attributes {dimension_semantics = [#tpu.dimension_semantics<parallel>, #tpu.dimension_semantics<parallel>, #tpu.dimension_semantics<arbitrary>], iteration_bounds = array<i64: 1, 1, 1>, scalar_prefetch = 0 : i64, scratch_operands = 1 : i64, tpu.core_type = #tpu.core_type<tc>, window_params = [{transform_indices = @transform_0, window_bounds = array<i64: 8, 256>}, {transform_indices = @transform_1, window_bounds = array<i64: 256, 128>}, {transform_indices = @transform_2, window_bounds = array<i64: 1, 128>}, {transform_indices = @transform_3, window_bounds = array<i64: 8, 128>}]} {
    %c0_i32 = arith.constant 0 : i32
    %0 = arith.cmpi eq, %arg2, %c0_i32 : i32
    %1 = arith.extui %0 : i1 to i32
    %c0_i32_0 = arith.constant 0 : i32
    %2 = arith.cmpi ne, %1, %c0_i32_0 : i32
    scf.if %2 {
      %c0_10 = arith.constant 0 : index
      %c0_11 = arith.constant 0 : index
      %12 = vector.load %arg5[%c0_10, %c0_11] : memref<1x128xf32, #tpu.memory_space<vmem>>, vector<1x128xf32>
      %13 = vector.shape_cast %12 : vector<1x128xf32> to vector<1x128xf32>
      %14 = vector.broadcast %13 : vector<1x128xf32> to vector<8x128xf32>
      %c0_12 = arith.constant 0 : index
      %c0_13 = arith.constant 0 : index
      %15 = vector.load %arg7[%c0_12, %c0_13] : memref<8x128xf32, #tpu.memory_space<vmem>>, vector<8x128xf32>
      tpu.vector_store %arg7[%c0_12, %c0_13], %14 {strides = array<i32>} : memref<8x128xf32, #tpu.memory_space<vmem>>, vector<8x128xf32>,
    } else {
    }
    %c0 = arith.constant 0 : index
    %c0_1 = arith.constant 0 : index
    %3 = vector.load %arg7[%c0, %c0_1] : memref<8x128xf32, #tpu.memory_space<vmem>>, vector<8x128xf32>
    %c0_2 = arith.constant 0 : index
    %c0_3 = arith.constant 0 : index
    %4 = vector.load %arg3[%c0_2, %c0_3] : memref<8x256xbf16, #tpu.memory_space<vmem>>, vector<8x256xbf16>
    %c0_4 = arith.constant 0 : index
    %c0_5 = arith.constant 0 : index
    %5 = vector.load %arg4[%c0_4, %c0_5] : memref<256x128xbf16, #tpu.memory_space<vmem>>, vector<256x128xbf16>
    %cst = arith.constant dense<0.000000e+00> : vector<8x128xf32>
    %6 = tpu.matmul %4, %5, %cst {dimension_numbers = #tpu.dot_dimension_numbers<[1], [0], [0], [1], [0, 0, 1, 1], [], []>} : vector<8x256xbf16>, vector<256x128xbf16>, vector<8x128xf32> -> vector<8x128xf32>
    %7 = arith.addf %3, %6 : vector<8x128xf32>
    %c0_6 = arith.constant 0 : index
    %c0_7 = arith.constant 0 : index
    %8 = vector.load %arg7[%c0_6, %c0_7] : memref<8x128xf32, #tpu.memory_space<vmem>>, vector<8x128xf32>
    tpu.vector_store %arg7[%c0_6, %c0_7], %7 {strides = array<i32>} : memref<8x128xf32, #tpu.memory_space<vmem>>, vector<8x128xf32>,
    %c0_i32_8 = arith.constant 0 : i32
    %9 = arith.cmpi eq, %arg2, %c0_i32_8 : i32
    %10 = arith.extui %9 : i1 to i32
    %c0_i32_9 = arith.constant 0 : i32
    %11 = arith.cmpi ne, %10, %c0_i32_9 : i32
    scf.if %11 {
      %c0_10 = arith.constant 0 : index
      %c0_11 = arith.constant 0 : index
      %12 = vector.load %arg7[%c0_10, %c0_11] : memref<8x128xf32, #tpu.memory_space<vmem>>, vector<8x128xf32>
      %13 = arith.truncf %12 : vector<8x128xf32> to vector<8x128xbf16>
      %c0_12 = arith.constant 0 : index
      %c0_13 = arith.constant 0 : index
      %14 = vector.load %arg6[%c0_12, %c0_13] : memref<8x128xbf16, #tpu.memory_space<vmem>>, vector<8x128xbf16>
      tpu.vector_store %arg6[%c0_12, %c0_13], %13 {strides = array<i32>} : memref<8x128xbf16, #tpu.memory_space<vmem>>, vector<8x128xbf16>,
    } else {
    }
    return
  }
  func.func @transform_0(%arg0: i32, %arg1: i32, %arg2: i32) -> (i32, i32) {
    %c0_i32 = arith.constant 0 : i32
    return %arg0, %arg2 : i32, i32
  }
  func.func @transform_1(%arg0: i32, %arg1: i32, %arg2: i32) -> (i32, i32) {
    %c0_i32 = arith.constant 0 : i32
    return %arg2, %arg1 : i32, i32
  }
  func.func @transform_2(%arg0: i32, %arg1: i32, %arg2: i32) -> (i32, i32) {
    %c0_i32 = arith.constant 0 : i32
    %c0_i32_0 = arith.constant 0 : i32
    return %c0_i32, %arg1 : i32, i32
  }
  func.func @transform_3(%arg0: i32, %arg1: i32, %arg2: i32) -> (i32, i32) {
    %c0_i32 = arith.constant 0 : i32
    return %arg0, %arg1 : i32, i32
  }
}

module attributes {stable_mosaic.version = 11 : i64} {
  func.func @_mm_kernel(%arg0: i32, %arg1: i32, %arg2: i32, %arg3: memref<8x256xbf16, #tpu.memory_space<vmem>>, %arg4: memref<256x256xbf16, #tpu.memory_space<vmem>>, %arg5: memref<1x256xf32, #tpu.memory_space<vmem>>, %arg6: memref<8x256xbf16, #tpu.memory_space<vmem>>, %arg7: memref<8x256xf32, #tpu.memory_space<vmem>>) attributes {dimension_semantics = [#tpu.dimension_semantics<parallel>, #tpu.dimension_semantics<parallel>, #tpu.dimension_semantics<arbitrary>], iteration_bounds = array<i64: 1, 2, 9>, scalar_prefetch = 0 : i64, scratch_operands = 1 : i64, tpu.core_type = #tpu.core_type<tc>, window_params = [{transform_indices = @transform_0, window_bounds = array<i64: 8, 256>}, {transform_indices = @transform_1, window_bounds = array<i64: 256, 256>}, {transform_indices = @transform_2, window_bounds = array<i64: 1, 256>}, {transform_indices = @transform_3, window_bounds = array<i64: 8, 256>}]} {
    %c0_i32 = arith.constant 0 : i32
    %0 = arith.cmpi eq, %arg2, %c0_i32 : i32
    %1 = arith.extui %0 : i1 to i32
    %c0_i32_0 = arith.constant 0 : i32
    %2 = arith.cmpi ne, %1, %c0_i32_0 : i32
    scf.if %2 {
      %c0_9 = arith.constant 0 : index
      %c0_10 = arith.constant 0 : index
      %12 = vector.load %arg5[%c0_9, %c0_10] : memref<1x256xf32, #tpu.memory_space<vmem>>, vector<1x256xf32>
      %13 = vector.shape_cast %12 : vector<1x256xf32> to vector<1x256xf32>
      %14 = vector.broadcast %13 : vector<1x256xf32> to vector<8x256xf32>
      %c0_11 = arith.constant 0 : index
      %c0_12 = arith.constant 0 : index
      %15 = vector.load %arg7[%c0_11, %c0_12] : memref<8x256xf32, #tpu.memory_space<vmem>>, vector<8x256xf32>
      tpu.vector_store %arg7[%c0_11, %c0_12], %14 {strides = array<i32>} : memref<8x256xf32, #tpu.memory_space<vmem>>, vector<8x256xf32>,
    } else {
    }
    %c0 = arith.constant 0 : index
    %c0_1 = arith.constant 0 : index
    %3 = vector.load %arg7[%c0, %c0_1] : memref<8x256xf32, #tpu.memory_space<vmem>>, vector<8x256xf32>
    %c0_2 = arith.constant 0 : index
    %c0_3 = arith.constant 0 : index
    %4 = vector.load %arg3[%c0_2, %c0_3] : memref<8x256xbf16, #tpu.memory_space<vmem>>, vector<8x256xbf16>
    %c0_4 = arith.constant 0 : index
    %c0_5 = arith.constant 0 : index
    %5 = vector.load %arg4[%c0_4, %c0_5] : memref<256x256xbf16, #tpu.memory_space<vmem>>, vector<256x256xbf16>
    %cst = arith.constant dense<0.000000e+00> : vector<8x256xf32>
    %6 = tpu.matmul %4, %5, %cst {dimension_numbers = #tpu.dot_dimension_numbers<[1], [0], [0], [1], [0, 0, 1, 1], [], []>} : vector<8x256xbf16>, vector<256x256xbf16>, vector<8x256xf32> -> vector<8x256xf32>
    %7 = arith.addf %3, %6 : vector<8x256xf32>
    %c0_6 = arith.constant 0 : index
    %c0_7 = arith.constant 0 : index
    %8 = vector.load %arg7[%c0_6, %c0_7] : memref<8x256xf32, #tpu.memory_space<vmem>>, vector<8x256xf32>
    tpu.vector_store %arg7[%c0_6, %c0_7], %7 {strides = array<i32>} : memref<8x256xf32, #tpu.memory_space<vmem>>, vector<8x256xf32>,
    %c8_i32 = arith.constant 8 : i32
    %9 = arith.cmpi eq, %arg2, %c8_i32 : i32
    %10 = arith.extui %9 : i1 to i32
    %c0_i32_8 = arith.constant 0 : i32
    %11 = arith.cmpi ne, %10, %c0_i32_8 : i32
    scf.if %11 {
      %c0_9 = arith.constant 0 : index
      %c0_10 = arith.constant 0 : index
      %12 = vector.load %arg7[%c0_9, %c0_10] : memref<8x256xf32, #tpu.memory_space<vmem>>, vector<8x256xf32>
      %cst_11 = arith.constant 0.000000e+00 : f32
      %13 = vector.broadcast %cst_11 : f32 to vector<8x256xf32>
      %14 = arith.maximumf %12, %13 : vector<8x256xf32>
      %15 = arith.truncf %14 : vector<8x256xf32> to vector<8x256xbf16>
      %c0_12 = arith.constant 0 : index
      %c0_13 = arith.constant 0 : index
      %16 = vector.load %arg6[%c0_12, %c0_13] : memref<8x256xbf16, #tpu.memory_space<vmem>>, vector<8x256xbf16>
      tpu.vector_store %arg6[%c0_12, %c0_13], %15 {strides = array<i32>} : memref<8x256xbf16, #tpu.memory_space<vmem>>, vector<8x256xbf16>,
    } else {
    }
    return
  }
  func.func @transform_0(%arg0: i32, %arg1: i32, %arg2: i32) -> (i32, i32) {
    %c0_i32 = arith.constant 0 : i32
    return %arg0, %arg2 : i32, i32
  }
  func.func @transform_1(%arg0: i32, %arg1: i32, %arg2: i32) -> (i32, i32) {
    %c0_i32 = arith.constant 0 : i32
    return %arg2, %arg1 : i32, i32
  }
  func.func @transform_2(%arg0: i32, %arg1: i32, %arg2: i32) -> (i32, i32) {
    %c0_i32 = arith.constant 0 : i32
    %c0_i32_0 = arith.constant 0 : i32
    return %c0_i32, %arg1 : i32, i32
  }
  func.func @transform_3(%arg0: i32, %arg1: i32, %arg2: i32) -> (i32, i32) {
    %c0_i32 = arith.constant 0 : i32
    return %arg0, %arg1 : i32, i32
  }
}

module attributes {stable_mosaic.version = 11 : i64} {
  func.func @_mm_kernel(%arg0: i32, %arg1: i32, %arg2: i32, %arg3: memref<8x256xbf16, #tpu.memory_space<vmem>>, %arg4: memref<256x256xbf16, #tpu.memory_space<vmem>>, %arg5: memref<1x256xf32, #tpu.memory_space<vmem>>, %arg6: memref<8x256xbf16, #tpu.memory_space<vmem>>, %arg7: memref<8x256xf32, #tpu.memory_space<vmem>>) attributes {dimension_semantics = [#tpu.dimension_semantics<parallel>, #tpu.dimension_semantics<parallel>, #tpu.dimension_semantics<arbitrary>], iteration_bounds = array<i64: 1, 2, 2>, scalar_prefetch = 0 : i64, scratch_operands = 1 : i64, tpu.core_type = #tpu.core_type<tc>, window_params = [{transform_indices = @transform_0, window_bounds = array<i64: 8, 256>}, {transform_indices = @transform_1, window_bounds = array<i64: 256, 256>}, {transform_indices = @transform_2, window_bounds = array<i64: 1, 256>}, {transform_indices = @transform_3, window_bounds = array<i64: 8, 256>}]} {
    %c0_i32 = arith.constant 0 : i32
    %0 = arith.cmpi eq, %arg2, %c0_i32 : i32
    %1 = arith.extui %0 : i1 to i32
    %c0_i32_0 = arith.constant 0 : i32
    %2 = arith.cmpi ne, %1, %c0_i32_0 : i32
    scf.if %2 {
      %c0_9 = arith.constant 0 : index
      %c0_10 = arith.constant 0 : index
      %12 = vector.load %arg5[%c0_9, %c0_10] : memref<1x256xf32, #tpu.memory_space<vmem>>, vector<1x256xf32>
      %13 = vector.shape_cast %12 : vector<1x256xf32> to vector<1x256xf32>
      %14 = vector.broadcast %13 : vector<1x256xf32> to vector<8x256xf32>
      %c0_11 = arith.constant 0 : index
      %c0_12 = arith.constant 0 : index
      %15 = vector.load %arg7[%c0_11, %c0_12] : memref<8x256xf32, #tpu.memory_space<vmem>>, vector<8x256xf32>
      tpu.vector_store %arg7[%c0_11, %c0_12], %14 {strides = array<i32>} : memref<8x256xf32, #tpu.memory_space<vmem>>, vector<8x256xf32>,
    } else {
    }
    %c0 = arith.constant 0 : index
    %c0_1 = arith.constant 0 : index
    %3 = vector.load %arg7[%c0, %c0_1] : memref<8x256xf32, #tpu.memory_space<vmem>>, vector<8x256xf32>
    %c0_2 = arith.constant 0 : index
    %c0_3 = arith.constant 0 : index
    %4 = vector.load %arg3[%c0_2, %c0_3] : memref<8x256xbf16, #tpu.memory_space<vmem>>, vector<8x256xbf16>
    %c0_4 = arith.constant 0 : index
    %c0_5 = arith.constant 0 : index
    %5 = vector.load %arg4[%c0_4, %c0_5] : memref<256x256xbf16, #tpu.memory_space<vmem>>, vector<256x256xbf16>
    %cst = arith.constant dense<0.000000e+00> : vector<8x256xf32>
    %6 = tpu.matmul %4, %5, %cst {dimension_numbers = #tpu.dot_dimension_numbers<[1], [0], [0], [1], [0, 0, 1, 1], [], []>} : vector<8x256xbf16>, vector<256x256xbf16>, vector<8x256xf32> -> vector<8x256xf32>
    %7 = arith.addf %3, %6 : vector<8x256xf32>
    %c0_6 = arith.constant 0 : index
    %c0_7 = arith.constant 0 : index
    %8 = vector.load %arg7[%c0_6, %c0_7] : memref<8x256xf32, #tpu.memory_space<vmem>>, vector<8x256xf32>
    tpu.vector_store %arg7[%c0_6, %c0_7], %7 {strides = array<i32>} : memref<8x256xf32, #tpu.memory_space<vmem>>, vector<8x256xf32>,
    %c1_i32 = arith.constant 1 : i32
    %9 = arith.cmpi eq, %arg2, %c1_i32 : i32
    %10 = arith.extui %9 : i1 to i32
    %c0_i32_8 = arith.constant 0 : i32
    %11 = arith.cmpi ne, %10, %c0_i32_8 : i32
    scf.if %11 {
      %c0_9 = arith.constant 0 : index
      %c0_10 = arith.constant 0 : index
      %12 = vector.load %arg7[%c0_9, %c0_10] : memref<8x256xf32, #tpu.memory_space<vmem>>, vector<8x256xf32>
      %cst_11 = arith.constant 0.000000e+00 : f32
      %13 = vector.broadcast %cst_11 : f32 to vector<8x256xf32>
      %14 = arith.maximumf %12, %13 : vector<8x256xf32>
      %15 = arith.truncf %14 : vector<8x256xf32> to vector<8x256xbf16>
      %c0_12 = arith.constant 0 : index
      %c0_13 = arith.constant 0 : index
      %16 = vector.load %arg6[%c0_12, %c0_13] : memref<8x256xbf16, #tpu.memory_space<vmem>>, vector<8x256xbf16>
      tpu.vector_store %arg6[%c0_12, %c0_13], %15 {strides = array<i32>} : memref<8x256xbf16, #tpu.memory_space<vmem>>, vector<8x256xbf16>,
    } else {
    }
    return
  }
  func.func @transform_0(%arg0: i32, %arg1: i32, %arg2: i32) -> (i32, i32) {
    %c0_i32 = arith.constant 0 : i32
    return %arg0, %arg2 : i32, i32
  }
  func.func @transform_1(%arg0: i32, %arg1: i32, %arg2: i32) -> (i32, i32) {
    %c0_i32 = arith.constant 0 : i32
    return %arg2, %arg1 : i32, i32
  }
  func.func @transform_2(%arg0: i32, %arg1: i32, %arg2: i32) -> (i32, i32) {
    %c0_i32 = arith.constant 0 : i32
    %c0_i32_0 = arith.constant 0 : i32
    return %c0_i32, %arg1 : i32, i32
  }
  func.func @transform_3(%arg0: i32, %arg1: i32, %arg2: i32) -> (i32, i32) {
    %c0_i32 = arith.constant 0 : i32
    return %arg0, %arg1 : i32, i32
  }
}

module attributes {stable_mosaic.version = 11 : i64} {
  func.func @_mm_kernel(%arg0: i32, %arg1: i32, %arg2: i32, %arg3: memref<8x256xbf16, #tpu.memory_space<vmem>>, %arg4: memref<256x128xbf16, #tpu.memory_space<vmem>>, %arg5: memref<1x128xf32, #tpu.memory_space<vmem>>, %arg6: memref<8x128xbf16, #tpu.memory_space<vmem>>, %arg7: memref<8x128xf32, #tpu.memory_space<vmem>>) attributes {dimension_semantics = [#tpu.dimension_semantics<parallel>, #tpu.dimension_semantics<parallel>, #tpu.dimension_semantics<arbitrary>], iteration_bounds = array<i64: 1, 1, 18>, scalar_prefetch = 0 : i64, scratch_operands = 1 : i64, tpu.core_type = #tpu.core_type<tc>, window_params = [{transform_indices = @transform_0, window_bounds = array<i64: 8, 256>}, {transform_indices = @transform_1, window_bounds = array<i64: 256, 128>}, {transform_indices = @transform_2, window_bounds = array<i64: 1, 128>}, {transform_indices = @transform_3, window_bounds = array<i64: 8, 128>}]} {
    %c0_i32 = arith.constant 0 : i32
    %0 = arith.cmpi eq, %arg2, %c0_i32 : i32
    %1 = arith.extui %0 : i1 to i32
    %c0_i32_0 = arith.constant 0 : i32
    %2 = arith.cmpi ne, %1, %c0_i32_0 : i32
    scf.if %2 {
      %c0_9 = arith.constant 0 : index
      %c0_10 = arith.constant 0 : index
      %12 = vector.load %arg5[%c0_9, %c0_10] : memref<1x128xf32, #tpu.memory_space<vmem>>, vector<1x128xf32>
      %13 = vector.shape_cast %12 : vector<1x128xf32> to vector<1x128xf32>
      %14 = vector.broadcast %13 : vector<1x128xf32> to vector<8x128xf32>
      %c0_11 = arith.constant 0 : index
      %c0_12 = arith.constant 0 : index
      %15 = vector.load %arg7[%c0_11, %c0_12] : memref<8x128xf32, #tpu.memory_space<vmem>>, vector<8x128xf32>
      tpu.vector_store %arg7[%c0_11, %c0_12], %14 {strides = array<i32>} : memref<8x128xf32, #tpu.memory_space<vmem>>, vector<8x128xf32>,
    } else {
    }
    %c0 = arith.constant 0 : index
    %c0_1 = arith.constant 0 : index
    %3 = vector.load %arg7[%c0, %c0_1] : memref<8x128xf32, #tpu.memory_space<vmem>>, vector<8x128xf32>
    %c0_2 = arith.constant 0 : index
    %c0_3 = arith.constant 0 : index
    %4 = vector.load %arg3[%c0_2, %c0_3] : memref<8x256xbf16, #tpu.memory_space<vmem>>, vector<8x256xbf16>
    %c0_4 = arith.constant 0 : index
    %c0_5 = arith.constant 0 : index
    %5 = vector.load %arg4[%c0_4, %c0_5] : memref<256x128xbf16, #tpu.memory_space<vmem>>, vector<256x128xbf16>
    %cst = arith.constant dense<0.000000e+00> : vector<8x128xf32>
    %6 = tpu.matmul %4, %5, %cst {dimension_numbers = #tpu.dot_dimension_numbers<[1], [0], [0], [1], [0, 0, 1, 1], [], []>} : vector<8x256xbf16>, vector<256x128xbf16>, vector<8x128xf32> -> vector<8x128xf32>
    %7 = arith.addf %3, %6 : vector<8x128xf32>
    %c0_6 = arith.constant 0 : index
    %c0_7 = arith.constant 0 : index
    %8 = vector.load %arg7[%c0_6, %c0_7] : memref<8x128xf32, #tpu.memory_space<vmem>>, vector<8x128xf32>
    tpu.vector_store %arg7[%c0_6, %c0_7], %7 {strides = array<i32>} : memref<8x128xf32, #tpu.memory_space<vmem>>, vector<8x128xf32>,
    %c17_i32 = arith.constant 17 : i32
    %9 = arith.cmpi eq, %arg2, %c17_i32 : i32
    %10 = arith.extui %9 : i1 to i32
    %c0_i32_8 = arith.constant 0 : i32
    %11 = arith.cmpi ne, %10, %c0_i32_8 : i32
    scf.if %11 {
      %c0_9 = arith.constant 0 : index
      %c0_10 = arith.constant 0 : index
      %12 = vector.load %arg7[%c0_9, %c0_10] : memref<8x128xf32, #tpu.memory_space<vmem>>, vector<8x128xf32>
      %cst_11 = arith.constant 0.000000e+00 : f32
      %13 = vector.broadcast %cst_11 : f32 to vector<8x128xf32>
      %14 = arith.maximumf %12, %13 : vector<8x128xf32>
      %15 = arith.truncf %14 : vector<8x128xf32> to vector<8x128xbf16>
      %c0_12 = arith.constant 0 : index
      %c0_13 = arith.constant 0 : index
      %16 = vector.load %arg6[%c0_12, %c0_13] : memref<8x128xbf16, #tpu.memory_space<vmem>>, vector<8x128xbf16>
      tpu.vector_store %arg6[%c0_12, %c0_13], %15 {strides = array<i32>} : memref<8x128xbf16, #tpu.memory_space<vmem>>, vector<8x128xbf16>,
    } else {
    }
    return
  }
  func.func @transform_0(%arg0: i32, %arg1: i32, %arg2: i32) -> (i32, i32) {
    %c0_i32 = arith.constant 0 : i32
    return %arg0, %arg2 : i32, i32
  }
  func.func @transform_1(%arg0: i32, %arg1: i32, %arg2: i32) -> (i32, i32) {
    %c0_i32 = arith.constant 0 : i32
    return %arg2, %arg1 : i32, i32
  }
  func.func @transform_2(%arg0: i32, %arg1: i32, %arg2: i32) -> (i32, i32) {
    %c0_i32 = arith.constant 0 : i32
    %c0_i32_0 = arith.constant 0 : i32
    return %c0_i32, %arg1 : i32, i32
  }
  func.func @transform_3(%arg0: i32, %arg1: i32, %arg2: i32) -> (i32, i32) {
    %c0_i32 = arith.constant 0 : i32
    return %arg0, %arg1 : i32, i32
  }
}

module attributes {stable_mosaic.version = 11 : i64} {
  func.func @_head_kernel(%arg0: i32, %arg1: memref<8x128xbf16, #tpu.memory_space<vmem>>, %arg2: memref<128x512xbf16, #tpu.memory_space<vmem>>, %arg3: memref<1x512xf32, #tpu.memory_space<vmem>>, %arg4: memref<512x512xbf16, #tpu.memory_space<vmem>>, %arg5: memref<1x512xf32, #tpu.memory_space<vmem>>, %arg6: memref<512x512xbf16, #tpu.memory_space<vmem>>, %arg7: memref<1x512xf32, #tpu.memory_space<vmem>>, %arg8: memref<128x512xbf16, #tpu.memory_space<vmem>>, %arg9: memref<1x512xf32, #tpu.memory_space<vmem>>, %arg10: memref<512x512xbf16, #tpu.memory_space<vmem>>, %arg11: memref<1x512xf32, #tpu.memory_space<vmem>>, %arg12: memref<512x512xbf16, #tpu.memory_space<vmem>>, %arg13: memref<1x512xf32, #tpu.memory_space<vmem>>, %arg14: memref<512x512xbf16, #tpu.memory_space<vmem>>, %arg15: memref<1x512xf32, #tpu.memory_space<vmem>>, %arg16: memref<512x512xbf16, #tpu.memory_space<vmem>>, %arg17: memref<1x512xf32, #tpu.memory_space<vmem>>, %arg18: memref<512x512xbf16, #tpu.memory_space<vmem>>, %arg19: memref<1x512xf32, #tpu.memory_space<vmem>>, %arg20: memref<512x128xbf16, #tpu.memory_space<vmem>>, %arg21: memref<1x128xf32, #tpu.memory_space<vmem>>, %arg22: memref<1x128xf32, #tpu.memory_space<vmem>>, %arg23: memref<8x128xf32, #tpu.memory_space<vmem>>) attributes {dimension_semantics = [#tpu.dimension_semantics<parallel>], iteration_bounds = array<i64: 1>, scalar_prefetch = 0 : i64, scratch_operands = 0 : i64, tpu.core_type = #tpu.core_type<tc>, window_params = [{transform_indices = @transform_0, window_bounds = array<i64: 8, 128>}, {pipeline_mode = #tpu.pipeline_mode<synchronous>, transform_indices = @transform_1, window_bounds = array<i64: 128, 512>}, {pipeline_mode = #tpu.pipeline_mode<synchronous>, transform_indices = @transform_2, window_bounds = array<i64: 1, 512>}, {pipeline_mode = #tpu.pipeline_mode<synchronous>, transform_indices = @transform_3, window_bounds = array<i64: 512, 512>}, {pipeline_mode = #tpu.pipeline_mode<synchronous>, transform_indices = @transform_4, window_bounds = array<i64: 1, 512>}, {pipeline_mode = #tpu.pipeline_mode<synchronous>, transform_indices = @transform_5, window_bounds = array<i64: 512, 512>}, {pipeline_mode = #tpu.pipeline_mode<synchronous>, transform_indices = @transform_6, window_bounds = array<i64: 1, 512>}, {pipeline_mode = #tpu.pipeline_mode<synchronous>, transform_indices = @transform_7, window_bounds = array<i64: 128, 512>}, {pipeline_mode = #tpu.pipeline_mode<synchronous>, transform_indices = @transform_8, window_bounds = array<i64: 1, 512>}, {pipeline_mode = #tpu.pipeline_mode<synchronous>, transform_indices = @transform_9, window_bounds = array<i64: 512, 512>}, {pipeline_mode = #tpu.pipeline_mode<synchronous>, transform_indices = @transform_10, window_bounds = array<i64: 1, 512>}, {pipeline_mode = #tpu.pipeline_mode<synchronous>, transform_indices = @transform_11, window_bounds = array<i64: 512, 512>}, {pipeline_mode = #tpu.pipeline_mode<synchronous>, transform_indices = @transform_12, window_bounds = array<i64: 1, 512>}, {pipeline_mode = #tpu.pipeline_mode<synchronous>, transform_indices = @transform_13, window_bounds = array<i64: 512, 512>}, {pipeline_mode = #tpu.pipeline_mode<synchronous>, transform_indices = @transform_14, window_bounds = array<i64: 1, 512>}, {pipeline_mode = #tpu.pipeline_mode<synchronous>, transform_indices = @transform_15, window_bounds = array<i64: 512, 512>}, {pipeline_mode = #tpu.pipeline_mode<synchronous>, transform_indices = @transform_16, window_bounds = array<i64: 1, 512>}, {pipeline_mode = #tpu.pipeline_mode<synchronous>, transform_indices = @transform_17, window_bounds = array<i64: 512, 512>}, {pipeline_mode = #tpu.pipeline_mode<synchronous>, transform_indices = @transform_18, window_bounds = array<i64: 1, 512>}, {pipeline_mode = #tpu.pipeline_mode<synchronous>, transform_indices = @transform_19, window_bounds = array<i64: 512, 128>}, {pipeline_mode = #tpu.pipeline_mode<synchronous>, transform_indices = @transform_20, window_bounds = array<i64: 1, 128>}, {pipeline_mode = #tpu.pipeline_mode<synchronous>, transform_indices = @transform_21, window_bounds = array<i64: 1, 128>}, {transform_indices = @transform_22, window_bounds = array<i64: 8, 128>}]} {
    %c0 = arith.constant 0 : index
    %c0_0 = arith.constant 0 : index
    %0 = vector.load %arg1[%c0, %c0_0] : memref<8x128xbf16, #tpu.memory_space<vmem>>, vector<8x128xbf16>
    %c0_1 = arith.constant 0 : index
    %c0_2 = arith.constant 0 : index
    %1 = vector.load %arg2[%c0_1, %c0_2] : memref<128x512xbf16, #tpu.memory_space<vmem>>, vector<128x512xbf16>
    %cst = arith.constant dense<0.000000e+00> : vector<8x512xf32>
    %2 = tpu.matmul %0, %1, %cst {dimension_numbers = #tpu.dot_dimension_numbers<[1], [0], [0], [1], [0, 0, 1, 1], [], []>} : vector<8x128xbf16>, vector<128x512xbf16>, vector<8x512xf32> -> vector<8x512xf32>
    %c0_3 = arith.constant 0 : index
    %c0_4 = arith.constant 0 : index
    %3 = vector.load %arg3[%c0_3, %c0_4] : memref<1x512xf32, #tpu.memory_space<vmem>>, vector<1x512xf32>
    %4 = vector.broadcast %3 : vector<1x512xf32> to vector<8x512xf32>
    %5 = arith.addf %2, %4 : vector<8x512xf32>
    %cst_5 = arith.constant 0.000000e+00 : f32
    %6 = vector.broadcast %cst_5 : f32 to vector<8x512xf32>
    %7 = arith.maximumf %5, %6 : vector<8x512xf32>
    %8 = arith.truncf %7 : vector<8x512xf32> to vector<8x512xbf16>
    %c0_6 = arith.constant 0 : index
    %c0_7 = arith.constant 0 : index
    %9 = vector.load %arg4[%c0_6, %c0_7] : memref<512x512xbf16, #tpu.memory_space<vmem>>, vector<512x512xbf16>
    %cst_8 = arith.constant dense<0.000000e+00> : vector<8x512xf32>
    %10 = tpu.matmul %8, %9, %cst_8 {dimension_numbers = #tpu.dot_dimension_numbers<[1], [0], [0], [1], [0, 0, 1, 1], [], []>} : vector<8x512xbf16>, vector<512x512xbf16>, vector<8x512xf32> -> vector<8x512xf32>
    %c0_9 = arith.constant 0 : index
    %c0_10 = arith.constant 0 : index
    %11 = vector.load %arg5[%c0_9, %c0_10] : memref<1x512xf32, #tpu.memory_space<vmem>>, vector<1x512xf32>
    %12 = vector.broadcast %11 : vector<1x512xf32> to vector<8x512xf32>
    %13 = arith.addf %10, %12 : vector<8x512xf32>
    %cst_11 = arith.constant 0.000000e+00 : f32
    %14 = vector.broadcast %cst_11 : f32 to vector<8x512xf32>
    %15 = arith.maximumf %13, %14 : vector<8x512xf32>
    %16 = arith.truncf %15 : vector<8x512xf32> to vector<8x512xbf16>
    %c0_12 = arith.constant 0 : index
    %c0_13 = arith.constant 0 : index
    %17 = vector.load %arg6[%c0_12, %c0_13] : memref<512x512xbf16, #tpu.memory_space<vmem>>, vector<512x512xbf16>
    %cst_14 = arith.constant dense<0.000000e+00> : vector<8x512xf32>
    %18 = tpu.matmul %16, %17, %cst_14 {dimension_numbers = #tpu.dot_dimension_numbers<[1], [0], [0], [1], [0, 0, 1, 1], [], []>} : vector<8x512xbf16>, vector<512x512xbf16>, vector<8x512xf32> -> vector<8x512xf32>
    %c0_15 = arith.constant 0 : index
    %c0_16 = arith.constant 0 : index
    %19 = vector.load %arg7[%c0_15, %c0_16] : memref<1x512xf32, #tpu.memory_space<vmem>>, vector<1x512xf32>
    %20 = vector.broadcast %19 : vector<1x512xf32> to vector<8x512xf32>
    %21 = arith.addf %18, %20 : vector<8x512xf32>
    %cst_17 = arith.constant 0.000000e+00 : f32
    %22 = vector.broadcast %cst_17 : f32 to vector<8x512xf32>
    %23 = arith.maximumf %21, %22 : vector<8x512xf32>
    %c0_18 = arith.constant 0 : index
    %c0_19 = arith.constant 0 : index
    %24 = vector.load %arg8[%c0_18, %c0_19] : memref<128x512xbf16, #tpu.memory_space<vmem>>, vector<128x512xbf16>
    %cst_20 = arith.constant dense<0.000000e+00> : vector<8x512xf32>
    %25 = tpu.matmul %0, %24, %cst_20 {dimension_numbers = #tpu.dot_dimension_numbers<[1], [0], [0], [1], [0, 0, 1, 1], [], []>} : vector<8x128xbf16>, vector<128x512xbf16>, vector<8x512xf32> -> vector<8x512xf32>
    %c0_21 = arith.constant 0 : index
    %c0_22 = arith.constant 0 : index
    %26 = vector.load %arg9[%c0_21, %c0_22] : memref<1x512xf32, #tpu.memory_space<vmem>>, vector<1x512xf32>
    %27 = vector.broadcast %26 : vector<1x512xf32> to vector<8x512xf32>
    %28 = arith.addf %25, %27 : vector<8x512xf32>
    %29 = arith.addf %28, %23 : vector<8x512xf32>
    %30 = arith.truncf %29 : vector<8x512xf32> to vector<8x512xbf16>
    %c0_23 = arith.constant 0 : index
    %c0_24 = arith.constant 0 : index
    %31 = vector.load %arg10[%c0_23, %c0_24] : memref<512x512xbf16, #tpu.memory_space<vmem>>, vector<512x512xbf16>
    %cst_25 = arith.constant dense<0.000000e+00> : vector<8x512xf32>
    %32 = tpu.matmul %30, %31, %cst_25 {dimension_numbers = #tpu.dot_dimension_numbers<[1], [0], [0], [1], [0, 0, 1, 1], [], []>} : vector<8x512xbf16>, vector<512x512xbf16>, vector<8x512xf32> -> vector<8x512xf32>
    %c0_26 = arith.constant 0 : index
    %c0_27 = arith.constant 0 : index
    %33 = vector.load %arg11[%c0_26, %c0_27] : memref<1x512xf32, #tpu.memory_space<vmem>>, vector<1x512xf32>
    %34 = vector.broadcast %33 : vector<1x512xf32> to vector<8x512xf32>
    %35 = arith.addf %32, %34 : vector<8x512xf32>
    %cst_28 = arith.constant 0.000000e+00 : f32
    %36 = vector.broadcast %cst_28 : f32 to vector<8x512xf32>
    %37 = arith.maximumf %35, %36 : vector<8x512xf32>
    %38 = arith.truncf %37 : vector<8x512xf32> to vector<8x512xbf16>
    %c0_29 = arith.constant 0 : index
    %c0_30 = arith.constant 0 : index
    %39 = vector.load %arg12[%c0_29, %c0_30] : memref<512x512xbf16, #tpu.memory_space<vmem>>, vector<512x512xbf16>
    %cst_31 = arith.constant dense<0.000000e+00> : vector<8x512xf32>
    %40 = tpu.matmul %38, %39, %cst_31 {dimension_numbers = #tpu.dot_dimension_numbers<[1], [0], [0], [1], [0, 0, 1, 1], [], []>} : vector<8x512xbf16>, vector<512x512xbf16>, vector<8x512xf32> -> vector<8x512xf32>
    %c0_32 = arith.constant 0 : index
    %c0_33 = arith.constant 0 : index
    %41 = vector.load %arg13[%c0_32, %c0_33] : memref<1x512xf32, #tpu.memory_space<vmem>>, vector<1x512xf32>
    %42 = vector.broadcast %41 : vector<1x512xf32> to vector<8x512xf32>
    %43 = arith.addf %40, %42 : vector<8x512xf32>
    %cst_34 = arith.constant 0.000000e+00 : f32
    %44 = vector.broadcast %cst_34 : f32 to vector<8x512xf32>
    %45 = arith.maximumf %43, %44 : vector<8x512xf32>
    %46 = arith.truncf %45 : vector<8x512xf32> to vector<8x512xbf16>
    %c0_35 = arith.constant 0 : index
    %c0_36 = arith.constant 0 : index
    %47 = vector.load %arg14[%c0_35, %c0_36] : memref<512x512xbf16, #tpu.memory_space<vmem>>, vector<512x512xbf16>
    %cst_37 = arith.constant dense<0.000000e+00> : vector<8x512xf32>
    %48 = tpu.matmul %46, %47, %cst_37 {dimension_numbers = #tpu.dot_dimension_numbers<[1], [0], [0], [1], [0, 0, 1, 1], [], []>} : vector<8x512xbf16>, vector<512x512xbf16>, vector<8x512xf32> -> vector<8x512xf32>
    %c0_38 = arith.constant 0 : index
    %c0_39 = arith.constant 0 : index
    %49 = vector.load %arg15[%c0_38, %c0_39] : memref<1x512xf32, #tpu.memory_space<vmem>>, vector<1x512xf32>
    %50 = vector.broadcast %49 : vector<1x512xf32> to vector<8x512xf32>
    %51 = arith.addf %48, %50 : vector<8x512xf32>
    %cst_40 = arith.constant 0.000000e+00 : f32
    %52 = vector.broadcast %cst_40 : f32 to vector<8x512xf32>
    %53 = arith.maximumf %51, %52 : vector<8x512xf32>
    %54 = arith.addf %29, %53 : vector<8x512xf32>
    %55 = arith.truncf %54 : vector<8x512xf32> to vector<8x512xbf16>
    %c0_41 = arith.constant 0 : index
    %c0_42 = arith.constant 0 : index
    %56 = vector.load %arg16[%c0_41, %c0_42] : memref<512x512xbf16, #tpu.memory_space<vmem>>, vector<512x512xbf16>
    %cst_43 = arith.constant dense<0.000000e+00> : vector<8x512xf32>
    %57 = tpu.matmul %55, %56, %cst_43 {dimension_numbers = #tpu.dot_dimension_numbers<[1], [0], [0], [1], [0, 0, 1, 1], [], []>} : vector<8x512xbf16>, vector<512x512xbf16>, vector<8x512xf32> -> vector<8x512xf32>
    %c0_44 = arith.constant 0 : index
    %c0_45 = arith.constant 0 : index
    %58 = vector.load %arg17[%c0_44, %c0_45] : memref<1x512xf32, #tpu.memory_space<vmem>>, vector<1x512xf32>
    %59 = vector.broadcast %58 : vector<1x512xf32> to vector<8x512xf32>
    %60 = arith.addf %57, %59 : vector<8x512xf32>
    %cst_46 = arith.constant 0.000000e+00 : f32
    %61 = vector.broadcast %cst_46 : f32 to vector<8x512xf32>
    %62 = arith.maximumf %60, %61 : vector<8x512xf32>
    %63 = arith.truncf %62 : vector<8x512xf32> to vector<8x512xbf16>
    %c0_47 = arith.constant 0 : index
    %c0_48 = arith.constant 0 : index
    %64 = vector.load %arg18[%c0_47, %c0_48] : memref<512x512xbf16, #tpu.memory_space<vmem>>, vector<512x512xbf16>
    %cst_49 = arith.constant dense<0.000000e+00> : vector<8x512xf32>
    %65 = tpu.matmul %63, %64, %cst_49 {dimension_numbers = #tpu.dot_dimension_numbers<[1], [0], [0], [1], [0, 0, 1, 1], [], []>} : vector<8x512xbf16>, vector<512x512xbf16>, vector<8x512xf32> -> vector<8x512xf32>
    %c0_50 = arith.constant 0 : index
    %c0_51 = arith.constant 0 : index
    %66 = vector.load %arg19[%c0_50, %c0_51] : memref<1x512xf32, #tpu.memory_space<vmem>>, vector<1x512xf32>
    %67 = vector.broadcast %66 : vector<1x512xf32> to vector<8x512xf32>
    %68 = arith.addf %65, %67 : vector<8x512xf32>
    %cst_52 = arith.constant 0.000000e+00 : f32
    %69 = vector.broadcast %cst_52 : f32 to vector<8x512xf32>
    %70 = arith.maximumf %68, %69 : vector<8x512xf32>
    %71 = arith.truncf %70 : vector<8x512xf32> to vector<8x512xbf16>
    %c0_53 = arith.constant 0 : index
    %c0_54 = arith.constant 0 : index
    %72 = vector.load %arg20[%c0_53, %c0_54] : memref<512x128xbf16, #tpu.memory_space<vmem>>, vector<512x128xbf16>
    %cst_55 = arith.constant dense<0.000000e+00> : vector<8x128xf32>
    %73 = tpu.matmul %71, %72, %cst_55 {dimension_numbers = #tpu.dot_dimension_numbers<[1], [0], [0], [1], [0, 0, 1, 1], [], []>} : vector<8x512xbf16>, vector<512x128xbf16>, vector<8x128xf32> -> vector<8x128xf32>
    %c0_56 = arith.constant 0 : index
    %c0_57 = arith.constant 0 : index
    %74 = vector.load %arg21[%c0_56, %c0_57] : memref<1x128xf32, #tpu.memory_space<vmem>>, vector<1x128xf32>
    %75 = vector.broadcast %74 : vector<1x128xf32> to vector<8x128xf32>
    %76 = arith.addf %73, %75 : vector<8x128xf32>
    %77 = vector.extract_strided_slice %76 {offsets = [0, 3], sizes = [8, 1], strides = [1, 1]} : vector<8x128xf32> to vector<8x1xf32>
    %cst_58 = arith.constant 0.924196243 : f32
    %78 = vector.broadcast %cst_58 : f32 to vector<8x1xf32>
    %79 = arith.mulf %78, %77 : vector<8x1xf32>
    %cst_59 = arith.constant 2.000000e+01 : f32
    %80 = vector.broadcast %cst_59 : f32 to vector<8x1xf32>
    %81 = arith.cmpf ogt, %79, %80 : vector<8x1xf32>
    %cst_60 = arith.constant 2.000000e+01 : f32
    %82 = vector.broadcast %cst_60 : f32 to vector<8x1xf32>
    %83 = arith.minimumf %79, %82 : vector<8x1xf32>
    %84 = math.exp %83 : vector<8x1xf32>
    %cst_61 = arith.constant 1.000000e+00 : f32
    %85 = vector.broadcast %cst_61 : f32 to vector<8x1xf32>
    %86 = arith.addf %85, %84 : vector<8x1xf32>
    %87 = math.log %86 : vector<8x1xf32>
    %cst_62 = arith.constant 0.924196243 : f32
    %88 = vector.broadcast %cst_62 : f32 to vector<8x1xf32>
    %89 = arith.divf %87, %88 : vector<8x1xf32>
    %90 = arith.select %81, %77, %89 : vector<8x1xi1>, vector<8x1xf32>
    %cst_63 = arith.constant 2.500000e-01 : f32
    %91 = vector.broadcast %cst_63 : f32 to vector<8x1xf32>
    %92 = arith.addf %90, %91 : vector<8x1xf32>
    %cst_64 = arith.constant 1.000000e+02 : f32
    %93 = vector.broadcast %cst_64 : f32 to vector<8x1xf32>
    %94 = arith.minimumf %92, %93 : vector<8x1xf32>
    %95 = vector.broadcast %94 : vector<8x1xf32> to vector<8x128xf32>
    %96 = arith.divf %76, %95 : vector<8x128xf32>
    %c0_65 = arith.constant 0 : index
    %c0_66 = arith.constant 0 : index
    %97 = vector.load %arg22[%c0_65, %c0_66] : memref<1x128xf32, #tpu.memory_space<vmem>>, vector<1x128xf32>
    %98 = vector.broadcast %97 : vector<1x128xf32> to vector<8x128xf32>
    %99 = arith.addf %96, %98 : vector<8x128xf32>
    %c0_67 = arith.constant 0 : index
    %c0_68 = arith.constant 0 : index
    %100 = vector.load %arg23[%c0_67, %c0_68] : memref<8x128xf32, #tpu.memory_space<vmem>>, vector<8x128xf32>
    tpu.vector_store %arg23[%c0_67, %c0_68], %99 {strides = array<i32>} : memref<8x128xf32, #tpu.memory_space<vmem>>, vector<8x128xf32>,
    return
  }
  func.func @transform_0(%arg0: i32) -> (i32, i32) {
    %c0_i32 = arith.constant 0 : i32
    %c0_i32_0 = arith.constant 0 : i32
    return %arg0, %c0_i32 : i32, i32
  }
  func.func @transform_1(%arg0: i32) -> (i32, i32) {
    %c0_i32 = arith.constant 0 : i32
    %c0_i32_0 = arith.constant 0 : i32
    %c0_i32_1 = arith.constant 0 : i32
    return %c0_i32, %c0_i32_0 : i32, i32
  }
  func.func @transform_2(%arg0: i32) -> (i32, i32) {
    %c0_i32 = arith.constant 0 : i32
    %c0_i32_0 = arith.constant 0 : i32
    %c0_i32_1 = arith.constant 0 : i32
    return %c0_i32, %c0_i32_0 : i32, i32
  }
  func.func @transform_3(%arg0: i32) -> (i32, i32) {
    %c0_i32 = arith.constant 0 : i32
    %c0_i32_0 = arith.constant 0 : i32
    %c0_i32_1 = arith.constant 0 : i32
    return %c0_i32, %c0_i32_0 : i32, i32
  }
  func.func @transform_4(%arg0: i32) -> (i32, i32) {
    %c0_i32 = arith.constant 0 : i32
    %c0_i32_0 = arith.constant 0 : i32
    %c0_i32_1 = arith.constant 0 : i32
    return %c0_i32, %c0_i32_0 : i32, i32
  }
  func.func @transform_5(%arg0: i32) -> (i32, i32) {
    %c0_i32 = arith.constant 0 : i32
    %c0_i32_0 = arith.constant 0 : i32
    %c0_i32_1 = arith.constant 0 : i32
    return %c0_i32, %c0_i32_0 : i32, i32
  }
  func.func @transform_6(%arg0: i32) -> (i32, i32) {
    %c0_i32 = arith.constant 0 : i32
    %c0_i32_0 = arith.constant 0 : i32
    %c0_i32_1 = arith.constant 0 : i32
    return %c0_i32, %c0_i32_0 : i32, i32
  }
  func.func @transform_7(%arg0: i32) -> (i32, i32) {
    %c0_i32 = arith.constant 0 : i32
    %c0_i32_0 = arith.constant 0 : i32
    %c0_i32_1 = arith.constant 0 : i32
    return %c0_i32, %c0_i32_0 : i32, i32
  }
  func.func @transform_8(%arg0: i32) -> (i32, i32) {
    %c0_i32 = arith.constant 0 : i32
    %c0_i32_0 = arith.constant 0 : i32
    %c0_i32_1 = arith.constant 0 : i32
    return %c0_i32, %c0_i32_0 : i32, i32
  }
  func.func @transform_9(%arg0: i32) -> (i32, i32) {
    %c0_i32 = arith.constant 0 : i32
    %c0_i32_0 = arith.constant 0 : i32
    %c0_i32_1 = arith.constant 0 : i32
    return %c0_i32, %c0_i32_0 : i32, i32
  }
  func.func @transform_10(%arg0: i32) -> (i32, i32) {
    %c0_i32 = arith.constant 0 : i32
    %c0_i32_0 = arith.constant 0 : i32
    %c0_i32_1 = arith.constant 0 : i32
    return %c0_i32, %c0_i32_0 : i32, i32
  }
  func.func @transform_11(%arg0: i32) -> (i32, i32) {
    %c0_i32 = arith.constant 0 : i32
    %c0_i32_0 = arith.constant 0 : i32
    %c0_i32_1 = arith.constant 0 : i32
    return %c0_i32, %c0_i32_0 : i32, i32
  }
  func.func @transform_12(%arg0: i32) -> (i32, i32) {
    %c0_i32 = arith.constant 0 : i32
    %c0_i32_0 = arith.constant 0 : i32
    %c0_i32_1 = arith.constant 0 : i32
    return %c0_i32, %c0_i32_0 : i32, i32
  }
  func.func @transform_13(%arg0: i32) -> (i32, i32) {
    %c0_i32 = arith.constant 0 : i32
    %c0_i32_0 = arith.constant 0 : i32
    %c0_i32_1 = arith.constant 0 : i32
    return %c0_i32, %c0_i32_0 : i32, i32
  }
  func.func @transform_14(%arg0: i32) -> (i32, i32) {
    %c0_i32 = arith.constant 0 : i32
    %c0_i32_0 = arith.constant 0 : i32
    %c0_i32_1 = arith.constant 0 : i32
    return %c0_i32, %c0_i32_0 : i32, i32
  }
  func.func @transform_15(%arg0: i32) -> (i32, i32) {
    %c0_i32 = arith.constant 0 : i32
    %c0_i32_0 = arith.constant 0 : i32
    %c0_i32_1 = arith.constant 0 : i32
    return %c0_i32, %c0_i32_0 : i32, i32
  }
  func.func @transform_16(%arg0: i32) -> (i32, i32) {
    %c0_i32 = arith.constant 0 : i32
    %c0_i32_0 = arith.constant 0 : i32
    %c0_i32_1 = arith.constant 0 : i32
    return %c0_i32, %c0_i32_0 : i32, i32
  }
  func.func @transform_17(%arg0: i32) -> (i32, i32) {
    %c0_i32 = arith.constant 0 : i32
    %c0_i32_0 = arith.constant 0 : i32
    %c0_i32_1 = arith.constant 0 : i32
    return %c0_i32, %c0_i32_0 : i32, i32
  }
  func.func @transform_18(%arg0: i32) -> (i32, i32) {
    %c0_i32 = arith.constant 0 : i32
    %c0_i32_0 = arith.constant 0 : i32
    %c0_i32_1 = arith.constant 0 : i32
    return %c0_i32, %c0_i32_0 : i32, i32
  }
  func.func @transform_19(%arg0: i32) -> (i32, i32) {
    %c0_i32 = arith.constant 0 : i32
    %c0_i32_0 = arith.constant 0 : i32
    %c0_i32_1 = arith.constant 0 : i32
    return %c0_i32, %c0_i32_0 : i32, i32
  }
  func.func @transform_20(%arg0: i32) -> (i32, i32) {
    %c0_i32 = arith.constant 0 : i32
    %c0_i32_0 = arith.constant 0 : i32
    %c0_i32_1 = arith.constant 0 : i32
    return %c0_i32, %c0_i32_0 : i32, i32
  }
  func.func @transform_21(%arg0: i32) -> (i32, i32) {
    %c0_i32 = arith.constant 0 : i32
    %c0_i32_0 = arith.constant 0 : i32
    %c0_i32_1 = arith.constant 0 : i32
    return %c0_i32, %c0_i32_0 : i32, i32
  }
  func.func @transform_22(%arg0: i32) -> (i32, i32) {
    %c0_i32 = arith.constant 0 : i32
    %c0_i32_0 = arith.constant 0 : i32
    return %arg0, %c0_i32 : i32, i32
  }
}

</mosaic_0001>

<bundles_post_ra>
// kernel: _lambda_.13
= control target key start
LH: loop header
LB: loop body
LE: loop exit
PB: predicated region body
PF: predicated region fallthrough
CT: control target
= control target key end

     0   :  { %s1322_s12 = smov 0   ;;  %s1324_s13 = smov 0   ;;  %s1470_s0 = inlined_call_operand.vmem [shape: bf16[128,512], index: 0, kind: input, shape index: {}]   ;;  %s1471_s1 = inlined_call_operand.vmem [shape: bf16[512,128], index: 1, kind: input, shape index: {}]   ;;  %s1472_s2 = inlined_call_operand.vmem [shape: f32[1,128], index: 2, kind: input, shape index: {}]   ;;  %s1473_s3 = inlined_call_operand.vmem [shape: bf16[128,128], index: 3, kind: output, shape index: {}]  }
   0x1   :  { %s1326_s14 = smov 0   ;;  %s1328_s15 = smov 0  }
   0x2   :  { %s1330_s16 = smov 0  }
   0x3 LB: > { %s25_s17 = sadd.s32 1, %s1296_s15  ;;  %p48_p1 = scmp.ne.s32.totalorder %s1288_s13, %s1284_s12  ;;  %s1300_s16 = sphi %s1330_s16, %s13_s16   ;;  %s1296_s15 = sphi %s1328_s15, %s1477_s15   ;;  %s1292_s14 = sphi %s1326_s14, %s1476_s14   ;;  %s1288_s13 = sphi %s1324_s13, %s1475_s13   ;;  %s1284_s12 = sphi %s1322_s12, %s1474_s12  }
   0x4   : > { %p26_p0 = scmp.ge.s32.totalorder %s25_s17, 2  ;;  %p49_p2 = scmp.eq.s32.totalorder %s1300_s16, 0 }
   0x5   : > { %s41_s19 = sadd.s32 1, %s1288_s13  ;;  %p975_p5 = scmp.ge.s32.totalorder %s1300_s16, 2 }
   0x6   : > { %s1479_s17 = smov (%p26_p0, %s25_s17), 0  ;;  %p50_p3 = por %p49_p2, %p48_p1 }
   0x7   : > { %s37_s18 = ssub.s32 %s1296_s15, %s1479_s17  ;;  %162 = sbr.rel (%p975_p5) target bundleno = 26 (0x1a), region = 20 }
   0x8   : > { %p39_p4 = scmp.eq.s32.totalorder %s37_s18, 0 }
   0xa   : > { %s1357_s20 = scalar_select %p39_p4, %s1288_s13, %s41_s19  }
   0xe   : > { %165 = sbr.rel (!%p50_p3) target bundleno = 26 (0x1a), region = 24  ;;  %s167_s21 = sand.u32 (%p50_p3), 1, %s1288_s13  }
   0xf   : > { %s1038_s22 = sshll.u32 (%p50_p3), %s1296_s15, 3  ;;  %s976_s23 = sshll.u32 (%p50_p3), %s167_s21, 7 }
  0x10   : > { %s1365_s26 = scalar_lea.vmem (%p50_p3), %s1470_s0, %s1038_s22  ;;  %s169_s27 = scalar_lea.vmem (%p50_p3), [#allocation3], %s976_s23 }
  0x11   : > { %v233_v0 = vld [vmem:[%s1365_s26] sm:$0xff] (%p50_p3)  ;;  %v235_v1 = vld [vmem:[%s1365_s26 + $0x10] sm:$0xff] (%p50_p3) }
  0x12   : > { %v237_v2 = vld [vmem:[%s1365_s26 + $0x20] sm:$0xff] (%p50_p3)  ;;  %234 = vst [vmem:[%s169_s27] sm:$0xff] (%p50_p3), %v233_v0  ;;  %236 = vst [vmem:[%s169_s27 + $0x8] sm:$0xff] (%p50_p3), %v235_v1  ;;  %v239_v3 = vld [vmem:[%s1365_s26 + $0x30] sm:$0xff] (%p50_p3) }
  0x13   : > { %238 = vst [vmem:[%s169_s27 + $0x10] sm:$0xff] (%p50_p3), %v237_v2  ;;  %v241_v4 = vld [vmem:[%s1365_s26 + $0x40] sm:$0xff] (%p50_p3)  ;;  %v243_v5 = vld [vmem:[%s1365_s26 + $0x50] sm:$0xff] (%p50_p3)  ;;  %240 = vst [vmem:[%s169_s27 + $0x18] sm:$0xff] (%p50_p3), %v239_v3 }
  0x14   : > { %242 = vst [vmem:[%s169_s27 + $0x20] sm:$0xff] (%p50_p3), %v241_v4  ;;  %244 = vst [vmem:[%s169_s27 + $0x28] sm:$0xff] (%p50_p3), %v243_v5  ;;  %v245_v6 = vld [vmem:[%s1365_s26 + $0x60] sm:$0xff] (%p50_p3)  ;;  %v247_v7 = vld [vmem:[%s1365_s26 + $0x70] sm:$0xff] (%p50_p3) }
  0x15   : > { %v249_v8 = vld [vmem:[%s1365_s26 + $0x80] sm:$0xff]  ;;  %246 = vst [vmem:[%s169_s27 + $0x30] sm:$0xff] %v245_v6  ;;  %248 = vst [vmem:[%s169_s27 + $0x38] sm:$0xff] %v247_v7  ;;  %v251_v9 = vld [vmem:[%s1365_s26 + $0x90] sm:$0xff] }
  0x16   : > { %250 = vst [vmem:[%s169_s27 + $0x40] sm:$0xff] %v249_v8  ;;  %v253_v10 = vld [vmem:[%s1365_s26 + $0xa0] sm:$0xff]  ;;  %v255_v11 = vld [vmem:[%s1365_s26 + $0xb0] sm:$0xff]  ;;  %252 = vst [vmem:[%s169_s27 + $0x48] sm:$0xff] %v251_v9 }
  0x17   : > { %254 = vst [vmem:[%s169_s27 + $0x50] sm:$0xff] %v253_v10  ;;  %256 = vst [vmem:[%s169_s27 + $0x58] sm:$0xff] %v255_v11  ;;  %v257_v12 = vld [vmem:[%s1365_s26 + $0xc0] sm:$0xff]  ;;  %v259_v13 = vld [vmem:[%s1365_s26 + $0xd0] sm:$0xff] }
  0x18   : > { %v261_v14 = vld [vmem:[%s1365_s26 + $0xe0] sm:$0xff]  ;;  %258 = vst [vmem:[%s169_s27 + $0x60] sm:$0xff] %v257_v12  ;;  %260 = vst [vmem:[%s169_s27 + $0x68] sm:$0xff] %v259_v13  ;;  %v263_v15 = vld [vmem:[%s1365_s26 + $0xf0] sm:$0xff] }
  0x19   : > { %262 = vst [vmem:[%s169_s27 + $0x70] sm:$0xff] %v261_v14  ;;  %264 = vst [vmem:[%s169_s27 + $0x78] sm:$0xff] %v263_v15 }
  0x1a PF: > { %p979_p6 = scmp.ge.s32.totalorder %s1300_s16, 1  ;;  %p281_p7 = scmp.lt.s32.totalorder %s1300_s16, 3 }
  0x1c   : > { %p282_p8 = pnand %p979_p6, %p281_p7 }
  0x1d   : > { %s288_s28 = sand.u32 (!%p282_p8), 1, %s1284_s12   ;;  %s981_s29 = sshll.u32 (!%p282_p8), %s1292_s14, 5 }
  0x1e   : > { %285 = sbr.rel (%p282_p8) target bundleno = 337 (0x151), region = 66  ;;  %s980_s30 = sshll.u32 (!%p282_p8), %s288_s28, 7 }
  0x1f   : > { %p328_p9 = scmp.lt.s32.totalorder (!%p282_p8), %s981_s29, 63  ;;  %s1392_s8 = scalar_lea.vmem (!%p282_p8), [#allocation3], %s980_s30 }
  0x20   : > { %p983_p10 = scmp.ne.s32.totalorder (!%p282_p8), %s1292_s14, 0 }
  0x25   : > { %s1481_s29 = smov (!%p328_p9, %s981_s29), 63  ;;  %352 = sbr.rel (%p983_p10) target bundleno = 47 (0x2f), region = 74 }
  0x26   : > { %s982_s4 = sshll.u32 %s1481_s29, 2  ;;  %v984_v16 = vld [vmem:[%s1472_s2] ss:$0 sm:$0xff] (!%p983_p10) }
  0x27   : > { %s1390_s7 = scalar_lea.vmem %s1471_s1, %s982_s4  ;;  %360 = vst [vmem:[#allocation2] sm:$0xff] (!%p983_p10), %v984_v16  ;;  %361 = vst [vmem:[#allocation2 + $0x8] sm:$0xff] (!%p983_p10), %v984_v16 }
  0x28   : > { %362 = vst [vmem:[#allocation2 + $0x10] sm:$0xff] (!%p983_p10), %v984_v16  ;;  %363 = vst [vmem:[#allocation2 + $0x18] sm:$0xff] (!%p983_p10), %v984_v16 }
  0x29   : > { %364 = vst [vmem:[#allocation2 + $0x20] sm:$0xff] (!%p983_p10), %v984_v16  ;;  %365 = vst [vmem:[#allocation2 + $0x28] sm:$0xff] (!%p983_p10), %v984_v16 }
  0x2a   : > { %366 = vst [vmem:[#allocation2 + $0x30] sm:$0xff] (!%p983_p10), %v984_v16  ;;  %367 = vst [vmem:[#allocation2 + $0x38] sm:$0xff] (!%p983_p10), %v984_v16 }
  0x2b   : > { %368 = vst [vmem:[#allocation2 + $0x40] sm:$0xff] (!%p983_p10), %v984_v16  ;;  %369 = vst [vmem:[#allocation2 + $0x48] sm:$0xff] (!%p983_p10), %v984_v16 }
  0x2c   : > { %370 = vst [vmem:[#allocation2 + $0x50] sm:$0xff] %v984_v16  ;;  %371 = vst [vmem:[#allocation2 + $0x58] sm:$0xff] %v984_v16 }
  0x2d   : > { %372 = vst [vmem:[#allocation2 + $0x60] sm:$0xff] %v984_v16  ;;  %373 = vst [vmem:[#allocation2 + $0x68] sm:$0xff] %v984_v16 }
  0x2e   : > { %374 = vst [vmem:[#allocation2 + $0x70] sm:$0xff] %v984_v16  ;;  %375 = vst [vmem:[#allocation2 + $0x78] sm:$0xff] %v984_v16 }
  0x2f PF: > { %v1222_v17 = vld [vmem:[%s1390_s7 + $0x40] sm:$0xff]   ;;  %v1224_v19 = vld [vmem:[%s1390_s7 + $0x48] sm:$0xff]   ;;  %v1226_v21 = vld [vmem:[%s1390_s7 + $0x50] sm:$0xff]   ;;  %p1017_p11 = scmp.ne.s32.totalorder %s1292_s14, 1 }
  0x30   : > { %v1223_v18 = vld [vmem:[%s1390_s7] sm:$0xff]   ;;  %1102 = vmatprep.subr.bf16.mxu0 %v1222_v17  ;;  %1166 = vmatprep.subr.bf16.mxu1 %v1222_v17  ;;  %v1225_v20 = vld [vmem:[%s1390_s7 + $0x8] sm:$0xff]   ;;  %v1227_v22 = vld [vmem:[%s1390_s7 + $0x10] sm:$0xff]  }
  0x31   : > { %1103 = vmatpush3.bf16.msra.mxu0 %v1223_v18  ;;  %1174 = vmatpush3.bf16.msra.mxu1 %v1223_v18  ;;  %v1228_v23 = vld [vmem:[%s1390_s7 + $0x58] sm:$0xff]   ;;  %v1230_v25 = vld [vmem:[%s1390_s7 + $0x60] sm:$0xff]   ;;  %v1232_v27 = vld [vmem:[%s1390_s7 + $0x68] sm:$0xff]  }
  0x32   : > { %1104 = vmatprep.subr.bf16.mxu0 %v1224_v19  ;;  %1167 = vmatprep.subr.bf16.mxu1 %v1224_v19  ;;  %v1229_v24 = vld [vmem:[%s1390_s7 + $0x18] sm:$0xff]   ;;  %v1231_v26 = vld [vmem:[%s1390_s7 + $0x20] sm:$0xff]   ;;  %v1233_v30 = vld [vmem:[%s1390_s7 + $0x28] sm:$0xff]  }
  0x33   : > { %v1240_v28 = vld [vmem:[%s1392_s8 + $0x4] ss:$8 sps:$4 sm:$0xff]   ;;  %v1234_v31 = vld [vmem:[%s1390_s7 + $0x70] sm:$0xff]   ;;  %v1236_v33 = vld [vmem:[%s1390_s7 + $0x78] sm:$0xff]  }
  0x34   : > { %v1243_v29 = vld [vmem:[%s1392_s8 + $0x44] ss:$8 sps:$4 sm:$0xff]   ;;  %648 = vmatprep.mubr.bf16.mxu0 %v1240_v28  ;;  %v1235_v32 = vld [vmem:[%s1390_s7 + $0x30] sm:$0xff]   ;;  %v1237_v34 = vld [vmem:[%s1390_s7 + $0x38] sm:$0xff]  }
  0x35   : > { %1105 = vmatpush3.bf16.msra.mxu0 %v1225_v20  ;;  %1175 = vmatpush3.bf16.msra.mxu1 %v1225_v20  ;;  %v1238_v35 = vld [vmem:[%s1392_s8] ss:$8 sps:$4 sm:$0xff]   ;;  %v1244_v37 = vld [vmem:[%s1392_s8 + $0x14] ss:$8 sps:$4 sm:$0xff]   ;;  %v1248_v39 = vld [vmem:[%s1392_s8 + $0x10] ss:$8 sps:$4 sm:$0xff]  }
  0x36   : > { %1106 = vmatprep.subr.bf16.mxu0 %v1226_v21  ;;  %1168 = vmatprep.subr.bf16.mxu1 %v1226_v21  ;;  %v1241_v36 = vld [vmem:[%s1392_s8 + $0x40] ss:$8 sps:$4 sm:$0xff]   ;;  %v1246_v38 = vld [vmem:[%s1392_s8 + $0x54] ss:$8 sps:$4 sm:$0xff]   ;;  %v1249_v40 = vld [vmem:[%s1392_s8 + $0x50] ss:$8 sps:$4 sm:$0xff]  }
  0x37   : > { %680 = vmatprep.mubr.bf16.mxu1 %v1243_v29  ;;  %v1250_v41 = vld [vmem:[%s1392_s8 + $0x24] ss:$8 sps:$4 sm:$0xff]   ;;  %v1254_v43 = vld [vmem:[%s1392_s8 + $0x20] ss:$8 sps:$4 sm:$0xff]   ;;  %v1256_v45 = vld [vmem:[%s1392_s8 + $0x34] ss:$8 sps:$4 sm:$0xff]  }
  0x38   : > { %v1252_v42 = vld [vmem:[%s1392_s8 + $0x64] ss:$8 sps:$4 sm:$0xff]   ;;  %v1255_v44 = vld [vmem:[%s1392_s8 + $0x60] ss:$8 sps:$4 sm:$0xff]   ;;  %v1258_v46 = vld [vmem:[%s1392_s8 + $0x74] ss:$8 sps:$4 sm:$0xff]  }
  0x39   : > { %1107 = vmatpush3.bf16.msra.mxu0 %v1227_v22  ;;  %1176 = vmatpush3.bf16.msra.mxu1 %v1227_v22  ;;  %v1260_v47 = vld [vmem:[%s1392_s8 + $0x30] ss:$8 sps:$4 sm:$0xff]   ;;  %v376_v51 = vld [vmem:[#allocation2] sm:$0xff]  ;;  %v377_v59 = vld [vmem:[#allocation2 + $0x8] sm:$0xff] }
  0x3a   : > { %1108 = vmatprep.subr.bf16.mxu0 %v1228_v23  ;;  %1169 = vmatprep.subr.bf16.mxu1 %v1228_v23  ;;  %v1261_v48 = vld [vmem:[%s1392_s8 + $0x70] ss:$8 sps:$4 sm:$0xff]   ;;  %v384_v53 = vld [vmem:[#allocation2 + $0x40] sm:$0xff]  ;;  %v385_v61 = vld [vmem:[#allocation2 + $0x48] sm:$0xff] }
  0x3b   : > { %v378_v7 = vld [vmem:[#allocation2 + $0x10] sm:$0xff]  ;;  %v379_v15 = vld [vmem:[#allocation2 + $0x18] sm:$0xff]  ;;  %v388_v29 = vld [vmem:[#allocation2 + $0x60] sm:$0xff] }
  0x3c   : > { %v386_v9 = vld [vmem:[#allocation2 + $0x50] sm:$0xff]  ;;  %v387_v17 = vld [vmem:[#allocation2 + $0x58] sm:$0xff] }
  0x3d   : > { %1109 = vmatpush3.bf16.msra.mxu0 %v1229_v24  ;;  %1177 = vmatpush3.bf16.msra.mxu1 %v1229_v24 }
  0x3e   : > { %1110 = vmatprep.subr.bf16.mxu0 %v1230_v25  ;;  %1170 = vmatprep.subr.bf16.mxu1 %v1230_v25 }
  0x41   : > { %1111 = vmatpush3.bf16.msra.mxu0 %v1231_v26  ;;  %1178 = vmatpush3.bf16.msra.mxu1 %v1231_v26 }
  0x42   : > { %1112 = vmatprep.subr.bf16.mxu0 %v1232_v27  ;;  %1171 = vmatprep.subr.bf16.mxu1 %v1232_v27  ;;  %v380_v27 = vld [vmem:[#allocation2 + $0x20] sm:$0xff] }
  0x45   : > { %1113 = vmatpush3.bf16.msra.mxu0 %v1233_v30  ;;  %1179 = vmatpush3.bf16.msra.mxu1 %v1233_v30 }
  0x46   : > { %1114 = vmatprep.subr.bf16.mxu0 %v1234_v31  ;;  %1172 = vmatprep.subr.bf16.mxu1 %v1234_v31 }
  0x49   : > { %1115 = vmatpush3.bf16.msra.mxu0 %v1235_v32  ;;  %1180 = vmatpush3.bf16.msra.mxu1 %v1235_v32 }
  0x4a   : > { %1116 = vmatprep.subr.bf16.mxu0 %v1236_v33  ;;  %1173 = vmatprep.subr.bf16.mxu1 %v1236_v33 }
  0x4d   : > { %1117 = vmatpush3.bf16.msra.mxu0 %v1237_v34  ;;  %1181 = vmatpush3.bf16.msra.mxu1 %v1237_v34 }
  0x50   : > { %649 = vmatmul.mubr.bf16.vlgmr.msra.gmra.mrb[0].mxu0 %v1238_v35  ;;  %681 = vmatmul.mubr.bf16.vlgmr.msra.gmra.mrb[0].mxu1 %v1241_v36  ;;  %v381_v35 = vld [vmem:[#allocation2 + $0x28] sm:$0xff] }
  0x51   : > { %656 = vmatprep.mubr.bf16.mxu0 %v1244_v37  ;;  %688 = vmatprep.mubr.bf16.mxu1 %v1246_v38  ;;  %v389_v37 = vld [vmem:[#allocation2 + $0x68] sm:$0xff] }
  0x58   : > { %657 = vmatmul.mubr.bf16.gmra.mrb[4].mxu0 %v1248_v39  ;;  %689 = vmatmul.mubr.bf16.gmra.mrb[4].mxu1 %v1249_v40 }
  0x59   : > { %664 = vmatprep.mubr.bf16.mxu0 %v1250_v41  ;;  %696 = vmatprep.mubr.bf16.mxu1 %v1252_v42 }
  0x60   : > { %665 = vmatmul.mubr.bf16.gmra.mrb[8].mxu0 %v1254_v43  ;;  %697 = vmatmul.mubr.bf16.gmra.mrb[8].mxu1 %v1255_v44 }
  0x61   : > { %672 = vmatprep.mubr.bf16.mxu0 %v1256_v45  ;;  %704 = vmatprep.mubr.bf16.mxu1 %v1258_v46 }
  0x68   : > { %673 = vmatmul.mubr.bf16.gmra.mrb[12].mxu0 %v1260_v47  ;;  %705 = vmatmul.mubr.bf16.gmra.mrb[12].mxu1 %v1261_v48  ;;  %v382_v47 = vld [vmem:[#allocation2 + $0x30] sm:$0xff] }
 0x123   : > { %v1118_v49 = vpop.f32.mrb[0].mxu0  ;;  %v1142_v50 = vpop.f32.mrb[0].mxu1 }
 0x124   : > { %v1119_v52 = vpop.f32.mrb[1].mxu0  ;;  %v1143_v54 = vpop.f32.mrb[1].mxu1 }
 0x125   : > { %v1120_v55 = vadd.f32 %v1119_v52, %v1118_v49  ;;  %v1144_v56 = vadd.f32 %v1143_v54, %v1142_v50  ;;  %v1121_v57 = vpop.f32.mrb[2].mxu0  ;;  %v1145_v58 = vpop.f32.mrb[2].mxu1  ;;  %v390_v49 = vld [vmem:[#allocation2 + $0x70] sm:$0xff] }
 0x126   : > { %v1122_v60 = vpop.f32.mrb[3].mxu0  ;;  %v1146_v62 = vpop.f32.mrb[3].mxu1 }
 0x127   : > { %v713_v63 = vadd.f32 %v1120_v55, %v376_v51  ;;  %v721_v0 = vadd.f32 %v1144_v56, %v384_v53  ;;  %v1123_v1 = vadd.f32 %v1122_v60, %v1121_v57  ;;  %v1147_v2 = vadd.f32 %v1146_v62, %v1145_v58  ;;  %v383_v55 = vld [vmem:[#allocation2 + $0x38] sm:$0xff] }
 0x128   : > { %v391_v57 = vld [vmem:[#allocation2 + $0x78] sm:$0xff] }
 0x129   : > { %729 = vst [vmem:[#allocation2] sm:$0xff] %v713_v63  ;;  %737 = vst [vmem:[#allocation2 + $0x40] sm:$0xff] %v721_v0  ;;  %v714_v3 = vadd.f32 %v1123_v1, %v377_v59  ;;  %v722_v4 = vadd.f32 %v1147_v2, %v385_v61 }
 0x12b   : > { %730 = vst [vmem:[#allocation2 + $0x8] sm:$0xff] %v714_v3  ;;  %738 = vst [vmem:[#allocation2 + $0x48] sm:$0xff] %v722_v4  ;;  %v1124_v5 = vpop.f32.mrb[4].mxu0  ;;  %v1148_v6 = vpop.f32.mrb[4].mxu1 }
 0x12c   : > { %v1125_v8 = vpop.f32.mrb[5].mxu0  ;;  %v1149_v10 = vpop.f32.mrb[5].mxu1 }
 0x12d   : > { %v1126_v11 = vadd.f32 %v1125_v8, %v1124_v5  ;;  %v1150_v12 = vadd.f32 %v1149_v10, %v1148_v6  ;;  %v1127_v13 = vpop.f32.mrb[6].mxu0  ;;  %v1151_v14 = vpop.f32.mrb[6].mxu1 }
 0x12e   : > { %v1128_v16 = vpop.f32.mrb[7].mxu0  ;;  %v1152_v18 = vpop.f32.mrb[7].mxu1 }
 0x12f   : > { %v715_v19 = vadd.f32 %v1126_v11, %v378_v7  ;;  %v723_v20 = vadd.f32 %v1150_v12, %v386_v9  ;;  %v1129_v21 = vadd.f32 %v1128_v16, %v1127_v13  ;;  %v1153_v22 = vadd.f32 %v1152_v18, %v1151_v14 }
 0x130   : > { %v749_v1 = vld [vmem:[#allocation2] sm:$0xff] (!%p1017_p11) }
 0x131   : > { %731 = vst [vmem:[#allocation2 + $0x10] sm:$0xff] %v715_v19  ;;  %739 = vst [vmem:[#allocation2 + $0x50] sm:$0xff] %v723_v20  ;;  %v716_v23 = vadd.f32 %v1129_v21, %v379_v15  ;;  %v724_v24 = vadd.f32 %v1153_v22, %v387_v17  ;;  %v765_v4 = vmax.f32 (!%p1017_p11), %v749_v1, 0.0  ;;  %v757_v15 = vld [vmem:[#allocation2 + $0x40] sm:$0xff] (!%p1017_p11) }
 0x132   : > { %v750_v2 = vld [vmem:[#allocation2 + $0x8] sm:$0xff] (!%p1017_p11)  ;;  %v773_v20 = vmax.f32 (!%p1017_p11), %v757_v15, 0.0 }
 0x133   : > { %732 = vst [vmem:[#allocation2 + $0x18] sm:$0xff] %v716_v23  ;;  %740 = vst [vmem:[#allocation2 + $0x58] sm:$0xff] %v724_v24  ;;  %v1130_v25 = vpop.f32.mrb[8].mxu0  ;;  %v1154_v26 = vpop.f32.mrb[8].mxu1  ;;  %v766_v5 = vmax.f32 (!%p1017_p11), %v750_v2, 0.0  ;;  %v758_v19 = vld [vmem:[#allocation2 + $0x48] sm:$0xff] (!%p1017_p11) }
 0x134   : > { %v1131_v28 = vpop.f32.mrb[9].mxu0  ;;  %v1155_v30 = vpop.f32.mrb[9].mxu1 }
 0x135   : > { %v1132_v31 = vadd.f32 %v1131_v28, %v1130_v25  ;;  %v1156_v32 = vadd.f32 %v1155_v30, %v1154_v26  ;;  %v1133_v33 = vpop.f32.mrb[10].mxu0  ;;  %v1157_v34 = vpop.f32.mrb[10].mxu1  ;;  %v1058_v16 = vpack.c.bf16 (!%p1017_p11), %v766_v5, %v765_v4  ;;  %v774_v25 = vmax.f32 (!%p1017_p11), %v758_v19, 0.0 }
 0x136   : > { %v1134_v36 = vpop.f32.mrb[11].mxu0  ;;  %v1158_v38 = vpop.f32.mrb[11].mxu1 }
 0x137   : > { %v717_v39 = vadd.f32 %v1132_v31, %v380_v27  ;;  %v725_v40 = vadd.f32 %v1156_v32, %v388_v29  ;;  %v1135_v41 = vadd.f32 %v1134_v36, %v1133_v33  ;;  %v1159_v42 = vadd.f32 %v1158_v38, %v1157_v34  ;;  %1059 = vst [vmem:[%s1473_s3] sm:$0xff] (!%p1017_p11), %v1058_v16  }
 0x138   : > { %v751_v3 = vld [vmem:[#allocation2 + $0x10] sm:$0xff] (!%p1017_p11) }
 0x139   : > { %733 = vst [vmem:[#allocation2 + $0x20] sm:$0xff] %v717_v39  ;;  %741 = vst [vmem:[#allocation2 + $0x60] sm:$0xff] %v725_v40  ;;  %v718_v43 = vadd.f32 %v1135_v41, %v381_v35  ;;  %v726_v44 = vadd.f32 %v1159_v42, %v389_v37  ;;  %v767_v7 = vmax.f32 (!%p1017_p11), %v751_v3, 0.0  ;;  %v759_v21 = vld [vmem:[#allocation2 + $0x50] sm:$0xff] (!%p1017_p11)  ;;  %v1078_v35 = vpack.c.bf16 (!%p1017_p11), %v774_v25, %v773_v20 }
 0x13a   : > { %v752_v6 = vld [vmem:[#allocation2 + $0x18] sm:$0xff] (!%p1017_p11)  ;;  %v775_v26 = vmax.f32 (!%p1017_p11), %v759_v21, 0.0 }
 0x13b   : > { %734 = vst [vmem:[#allocation2 + $0x28] sm:$0xff] %v718_v43  ;;  %742 = vst [vmem:[#allocation2 + $0x68] sm:$0xff] %v726_v44  ;;  %v1136_v45 = vpop.f32.mrb[12].mxu0  ;;  %v1160_v46 = vpop.f32.mrb[12].mxu1  ;;  %v768_v10 = vmax.f32 (!%p1017_p11), %v752_v6, 0.0  ;;  %v760_v22 = vld [vmem:[#allocation2 + $0x58] sm:$0xff] (!%p1017_p11) }
 0x13c   : > { %v1137_v48 = vpop.f32.mrb[13].mxu0  ;;  %v1161_v50 = vpop.f32.mrb[13].mxu1  ;;  %v776_v31 = vmax.f32 (!%p1017_p11), %v760_v22, 0.0  ;;  %1098 = vst [vmem:[%s1473_s3 + $0x20] sm:$0xff] (!%p1017_p11), %v1078_v35  }
 0x13d   : > { %v1138_v51 = vadd.f32 %v1137_v48, %v1136_v45  ;;  %v1162_v52 = vadd.f32 %v1161_v50, %v1160_v46  ;;  %v1139_v53 = vpop.f32.mrb[14].mxu0  ;;  %v1163_v54 = vpop.f32.mrb[14].mxu1  ;;  %748 = sbr.rel (%p1017_p11) target bundleno = 337 (0x151), region = 78  ;;  %v1063_v23 = vpack.c.bf16 (!%p1017_p11), %v768_v10, %v767_v7 }
 0x13e   : > { %v1140_v56 = vpop.f32.mrb[15].mxu0  ;;  %v1164_v58 = vpop.f32.mrb[15].mxu1  ;;  %v1083_v38 = vpack.c.bf16 (!%p1017_p11), %v776_v31, %v775_v26 }
 0x13f   : > { %v719_v59 = vadd.f32 %v1138_v51, %v382_v47  ;;  %v727_v60 = vadd.f32 %v1162_v52, %v390_v49  ;;  %v1141_v61 = vadd.f32 %v1140_v56, %v1139_v53  ;;  %v1165_v62 = vadd.f32 %v1164_v58, %v1163_v54  ;;  %1095 = vst [vmem:[%s1473_s3 + $0x8] sm:$0xff] (!%p1017_p11), %v1063_v23  }
 0x140   : > { %v753_v8 = vld [vmem:[#allocation2 + $0x20] sm:$0xff] (!%p1017_p11)  ;;  %1099 = vst [vmem:[%s1473_s3 + $0x28] sm:$0xff] (!%p1017_p11), %v1083_v38  }
 0x141   : > { %735 = vst [vmem:[#allocation2 + $0x30] sm:$0xff] %v719_v59  ;;  %743 = vst [vmem:[#allocation2 + $0x70] sm:$0xff] %v727_v60  ;;  %v720_v63 = vadd.f32 %v1141_v61, %v383_v55  ;;  %v728_v0 = vadd.f32 %v1165_v62, %v391_v57  ;;  %v769_v11 = vmax.f32 (!%p1017_p11), %v753_v8, 0.0  ;;  %v761_v27 = vld [vmem:[#allocation2 + $0x60] sm:$0xff] (!%p1017_p11) }
 0x142   : > { %v754_v9 = vld [vmem:[#allocation2 + $0x28] sm:$0xff] (!%p1017_p11)  ;;  %v777_v32 = vmax.f32 (!%p1017_p11), %v761_v27, 0.0 }
 0x143   : > { %736 = vst [vmem:[#allocation2 + $0x38] sm:$0xff] %v720_v63  ;;  %744 = vst [vmem:[#allocation2 + $0x78] sm:$0xff] %v728_v0  ;;  %v770_v12 = vmax.f32 (!%p1017_p11), %v754_v9, 0.0  ;;  %v762_v28 = vld [vmem:[#allocation2 + $0x68] sm:$0xff] (!%p1017_p11) }
 0x144   : > { %v778_v33 = vmax.f32 %v762_v28, 0.0 }
 0x145   : > { %v1068_v24 = vpack.c.bf16 %v770_v12, %v769_v11 }
 0x146   : > { %v1088_v39 = vpack.c.bf16 %v778_v33, %v777_v32 }
 0x147   : > { %1096 = vst [vmem:[%s1473_s3 + $0x10] sm:$0xff] %v1068_v24  }
 0x148   : > { %v755_v13 = vld [vmem:[#allocation2 + $0x30] sm:$0xff]  ;;  %1100 = vst [vmem:[%s1473_s3 + $0x30] sm:$0xff] %v1088_v39  }
 0x149   : > { %v771_v17 = vmax.f32 %v755_v13, 0.0  ;;  %v763_v29 = vld [vmem:[#allocation2 + $0x70] sm:$0xff] }
 0x14a   : > { %v756_v14 = vld [vmem:[#allocation2 + $0x38] sm:$0xff]  ;;  %v779_v36 = vmax.f32 %v763_v29, 0.0 }
 0x14b   : > { %v772_v18 = vmax.f32 %v756_v14, 0.0  ;;  %v764_v34 = vld [vmem:[#allocation2 + $0x78] sm:$0xff] }
 0x14c   : > { %v780_v37 = vmax.f32 %v764_v34, 0.0 }
 0x14d   : > { %v1073_v30 = vpack.c.bf16 %v772_v18, %v771_v17 }
 0x14e   : > { %v1093_v40 = vpack.c.bf16 %v780_v37, %v779_v36 }
 0x14f   : > { %1097 = vst [vmem:[%s1473_s3 + $0x18] sm:$0xff] %v1073_v30  }
 0x150   : > { %1101 = vst [vmem:[%s1473_s3 + $0x38] sm:$0xff] %v1093_v40  }
 0x151 PF: > { %s13_s16 = sadd.s32 1, %s1300_s16   ;;  %s1474_s12 = smov %s1288_s13 }
 0x152   : > { %p10_p12 = scmp.ge.s32.totalorder %s13_s16, 4   ;;  %s1475_s13 = smov %s1357_s20 }
 0x153   : > { %s1476_s14 = smov %s1296_s15  ;;  %s1477_s15 = smov %s1479_s17 }
 0x154   :  { %12 = sbr.rel (!%p10_p12) target bundleno = 3 (0x3), region = 119 }

// kernel: _lambda_.12
= control target key start
LH: loop header
LB: loop body
LE: loop exit
PB: predicated region body
PF: predicated region fallthrough
CT: control target
= control target key end

     0   :  { %s2187_s1 = inlined_call_operand.vmem [shape: bf16[128,128], index: 1, kind: input, shape index: {}]   ;;  %s2188_s0 = inlined_call_operand.vmem [shape: bf16[512,128], index: 0, kind: input, shape index: {}]   ;;  %s2189_s2 = inlined_call_operand.vmem [shape: f32[1,128], index: 2, kind: input, shape index: {}]   ;;  %s2190_s3 = inlined_call_operand.vmem [shape: bf16[512,128], index: 3, kind: output, shape index: {}]  }
   0x1   :  { %v1842_v0 = vld [vmem:[%s2187_s1] sm:$0xff]   ;;  %v1843_v1 = vld [vmem:[%s2187_s1 + $0x8] sm:$0xff]   ;;  %v1844_v2 = vld [vmem:[%s2187_s1 + $0x10] sm:$0xff]  }
   0x2   :  { %1746 = vmatprep.subr.bf16.mxu0 %v1842_v0  ;;  %1826 = vmatprep.subr.bf16.mxu1 %v1842_v0  ;;  %v1845_v3 = vld [vmem:[%s2187_s1 + $0x18] sm:$0xff]   ;;  %v1850_v4 = vld [vmem:[%s2188_s0] sm:$0xff]   ;;  %v1847_v7 = vld [vmem:[%s2187_s1 + $0x28] sm:$0xff]  }
   0x3   :  { %1747 = vmatpush3.bf16.msra.mxu0 %v1842_v0  ;;  %1834 = vmatpush3.bf16.msra.mxu1 %v1842_v0  ;;  %v1851_v5 = vld [vmem:[%s2188_s0 + $0x80] sm:$0xff]   ;;  %v1848_v8 = vld [vmem:[%s2187_s1 + $0x30] sm:$0xff]   ;;  %v1849_v9 = vld [vmem:[%s2187_s1 + $0x38] sm:$0xff]  }
   0x4   :  { %1748 = vmatprep.subr.bf16.mxu0 %v1843_v1  ;;  %1827 = vmatprep.subr.bf16.mxu1 %v1843_v1  ;;  %v1846_v6 = vld [vmem:[%s2187_s1 + $0x20] sm:$0xff]   ;;  %v1852_v10 = vld [vmem:[%s2188_s0 + $0x8] sm:$0xff]   ;;  %v1854_v12 = vld [vmem:[%s2188_s0 + $0x10] sm:$0xff]  }
   0x5   :  { %1762 = vmatprep.mubr.bf16.mxu0 %v1850_v4  ;;  %1794 = vmatprep.mubr.bf16.mxu1 %v1851_v5  ;;  %v1853_v11 = vld [vmem:[%s2188_s0 + $0x88] sm:$0xff]   ;;  %v1855_v13 = vld [vmem:[%s2188_s0 + $0x90] sm:$0xff]   ;;  %v1856_v14 = vld [vmem:[%s2188_s0 + $0x18] sm:$0xff]  }
   0x6   :  { %v1857_v15 = vld [vmem:[%s2188_s0 + $0x98] sm:$0xff]   ;;  %v1858_v16 = vld [vmem:[%s2188_s0 + $0x20] sm:$0xff]   ;;  %v1860_v18 = vld [vmem:[%s2188_s0 + $0x28] sm:$0xff]  }
   0x7   :  { %1749 = vmatpush3.bf16.msra.mxu0 %v1843_v1  ;;  %1835 = vmatpush3.bf16.msra.mxu1 %v1843_v1  ;;  %v1859_v17 = vld [vmem:[%s2188_s0 + $0xa0] sm:$0xff]   ;;  %v1861_v19 = vld [vmem:[%s2188_s0 + $0xa8] sm:$0xff]   ;;  %v1862_v20 = vld [vmem:[%s2188_s0 + $0x30] sm:$0xff]  }
   0x8   :  { %1750 = vmatprep.subr.bf16.mxu0 %v1844_v2  ;;  %1828 = vmatprep.subr.bf16.mxu1 %v1844_v2  ;;  %v1863_v21 = vld [vmem:[%s2188_s0 + $0xb0] sm:$0xff]   ;;  %v1864_v22 = vld [vmem:[%s2188_s0 + $0x38] sm:$0xff]   ;;  %v1866_v24 = vld [vmem:[%s2188_s0 + $0x40] sm:$0xff]  }
   0x9   :  { %v1865_v23 = vld [vmem:[%s2188_s0 + $0xb8] sm:$0xff]   ;;  %v1867_v25 = vld [vmem:[%s2188_s0 + $0xc0] sm:$0xff]   ;;  %v1868_v26 = vld [vmem:[%s2188_s0 + $0x48] sm:$0xff]  }
   0xa   :  { %v1869_v27 = vld [vmem:[%s2188_s0 + $0xc8] sm:$0xff]   ;;  %v1870_v28 = vld [vmem:[%s2188_s0 + $0x50] sm:$0xff]   ;;  %v1872_v30 = vld [vmem:[%s2188_s0 + $0x58] sm:$0xff]  }
   0xb   :  { %1751 = vmatpush3.bf16.msra.mxu0 %v1844_v2  ;;  %1836 = vmatpush3.bf16.msra.mxu1 %v1844_v2  ;;  %v1871_v29 = vld [vmem:[%s2188_s0 + $0xd0] sm:$0xff]   ;;  %v1873_v31 = vld [vmem:[%s2188_s0 + $0xd8] sm:$0xff]   ;;  %v1874_v32 = vld [vmem:[%s2188_s0 + $0x60] sm:$0xff]  }
   0xc   :  { %1752 = vmatprep.subr.bf16.mxu0 %v1845_v3  ;;  %1829 = vmatprep.subr.bf16.mxu1 %v1845_v3  ;;  %v1875_v33 = vld [vmem:[%s2188_s0 + $0xe0] sm:$0xff]   ;;  %v1876_v34 = vld [vmem:[%s2188_s0 + $0x68] sm:$0xff]   ;;  %v1878_v36 = vld [vmem:[%s2188_s0 + $0x70] sm:$0xff]  }
   0xd   :  { %v1877_v35 = vld [vmem:[%s2188_s0 + $0xe8] sm:$0xff]   ;;  %v1879_v37 = vld [vmem:[%s2188_s0 + $0xf0] sm:$0xff]   ;;  %v1880_v38 = vld [vmem:[%s2188_s0 + $0x78] sm:$0xff]  }
   0xe   :  { %v1881_v39 = vld [vmem:[%s2188_s0 + $0xf8] sm:$0xff]   ;;  %v2025_v40 = vld [vmem:[%s2189_s2] ss:$0 sm:$0xff] }
   0xf   :  { %1753 = vmatpush3.bf16.msra.mxu0 %v1845_v3  ;;  %1837 = vmatpush3.bf16.msra.mxu1 %v1845_v3 }
  0x10   :  { %1754 = vmatprep.subr.bf16.mxu0 %v1846_v6  ;;  %1830 = vmatprep.subr.bf16.mxu1 %v1846_v6 }
  0x13   :  { %1755 = vmatpush3.bf16.msra.mxu0 %v1846_v6  ;;  %1838 = vmatpush3.bf16.msra.mxu1 %v1846_v6 }
  0x14   :  { %1756 = vmatprep.subr.bf16.mxu0 %v1847_v7  ;;  %1831 = vmatprep.subr.bf16.mxu1 %v1847_v7 }
  0x17   :  { %1757 = vmatpush3.bf16.msra.mxu0 %v1847_v7  ;;  %1839 = vmatpush3.bf16.msra.mxu1 %v1847_v7 }
  0x18   :  { %1758 = vmatprep.subr.bf16.mxu0 %v1848_v8  ;;  %1832 = vmatprep.subr.bf16.mxu1 %v1848_v8 }
  0x1b   :  { %1759 = vmatpush3.bf16.msra.mxu0 %v1848_v8  ;;  %1840 = vmatpush3.bf16.msra.mxu1 %v1848_v8 }
  0x1c   :  { %1760 = vmatprep.subr.bf16.mxu0 %v1849_v9  ;;  %1833 = vmatprep.subr.bf16.mxu1 %v1849_v9 }
  0x1f   :  { %1761 = vmatpush3.bf16.msra.mxu0 %v1849_v9  ;;  %1841 = vmatpush3.bf16.msra.mxu1 %v1849_v9 }
  0x22   :  { %1763 = vmatmul.mubr.bf16.vlgmr.msra.gmra.mrb[0].mxu0 %v1852_v10  ;;  %1795 = vmatmul.mubr.bf16.vlgmr.msra.gmra.mrb[0].mxu1 %v1853_v11 }
  0x23   :  { %1766 = vmatprep.mubr.bf16.mxu0 %v1854_v12  ;;  %1798 = vmatprep.mubr.bf16.mxu1 %v1855_v13 }
  0x2a   :  { %1767 = vmatmul.mubr.bf16.gmra.mrb[4].mxu0 %v1856_v14  ;;  %1799 = vmatmul.mubr.bf16.gmra.mrb[4].mxu1 %v1857_v15 }
  0x2b   :  { %1770 = vmatprep.mubr.bf16.mxu0 %v1858_v16  ;;  %1802 = vmatprep.mubr.bf16.mxu1 %v1859_v17 }
  0x32   :  { %1771 = vmatmul.mubr.bf16.gmra.mrb[8].mxu0 %v1860_v18  ;;  %1803 = vmatmul.mubr.bf16.gmra.mrb[8].mxu1 %v1861_v19 }
  0x33   :  { %1774 = vmatprep.mubr.bf16.mxu0 %v1862_v20  ;;  %1806 = vmatprep.mubr.bf16.mxu1 %v1863_v21 }
  0x3a   :  { %1775 = vmatmul.mubr.bf16.gmra.mrb[12].mxu0 %v1864_v22  ;;  %1807 = vmatmul.mubr.bf16.gmra.mrb[12].mxu1 %v1865_v23 }
  0x3b   :  { %1778 = vmatprep.mubr.bf16.mxu0 %v1866_v24  ;;  %1810 = vmatprep.mubr.bf16.mxu1 %v1867_v25 }
  0x42   :  { %1779 = vmatmul.mubr.bf16.gmra.mrb[16].mxu0 %v1868_v26  ;;  %1811 = vmatmul.mubr.bf16.gmra.mrb[16].mxu1 %v1869_v27 }
  0x43   :  { %1782 = vmatprep.mubr.bf16.mxu0 %v1870_v28  ;;  %1814 = vmatprep.mubr.bf16.mxu1 %v1871_v29 }
  0x4a   :  { %1783 = vmatmul.mubr.bf16.gmra.mrb[20].mxu0 %v1872_v30  ;;  %1815 = vmatmul.mubr.bf16.gmra.mrb[20].mxu1 %v1873_v31 }
  0x4b   :  { %1786 = vmatprep.mubr.bf16.mxu0 %v1874_v32  ;;  %1818 = vmatprep.mubr.bf16.mxu1 %v1875_v33 }
  0x52   :  { %1787 = vmatmul.mubr.bf16.gmra.mrb[24].mxu0 %v1876_v34  ;;  %1819 = vmatmul.mubr.bf16.gmra.mrb[24].mxu1 %v1877_v35 }
  0x53   :  { %1790 = vmatprep.mubr.bf16.mxu0 %v1878_v36  ;;  %1822 = vmatprep.mubr.bf16.mxu1 %v1879_v37 }
  0x5a   :  { %1791 = vmatmul.mubr.bf16.gmra.mrb[28].mxu0 %v1880_v38  ;;  %1823 = vmatmul.mubr.bf16.gmra.mrb[28].mxu1 %v1881_v39 }
  0xf5   :  { %v1764_v41 = vpop.f32.mrb[0].mxu0  ;;  %v1796_v42 = vpop.f32.mrb[0].mxu1 }
  0xf6   :  { %v765_v43 = vadd.f32 %v1764_v41, %v2025_v40  ;;  %v797_v44 = vadd.f32 %v1796_v42, %v2025_v40  ;;  %v508_v45 = vpop.f32.mrb[1].mxu0  ;;  %v636_v46 = vpop.f32.mrb[1].mxu1 }
  0xf7   :  { %v763_v47 = vadd.f32 %v2025_v40, %v508_v45  ;;  %v795_v48 = vadd.f32 %v2025_v40, %v636_v46  ;;  %v1765_v49 = vpop.f32.mrb[2].mxu0  ;;  %v1797_v50 = vpop.f32.mrb[2].mxu1 }
  0xf8   :  { %v766_v51 = vadd.f32 %v1765_v49, %v2025_v40  ;;  %v798_v52 = vadd.f32 %v1797_v50, %v2025_v40  ;;  %v511_v53 = vpop.f32.mrb[3].mxu0  ;;  %v639_v54 = vpop.f32.mrb[3].mxu1  ;;  %v960_v57 = vmax.f32 %v765_v43, 0.0  ;;  %v992_v58 = vmax.f32 %v797_v44, 0.0 }
  0xf9   :  { %v764_v55 = vadd.f32 %v2025_v40, %v511_v53  ;;  %v796_v56 = vadd.f32 %v2025_v40, %v639_v54  ;;  %v958_v61 = vmax.f32 %v763_v47, 0.0  ;;  %v990_v62 = vmax.f32 %v795_v48, 0.0 }
  0xfa   :  { %v961_v59 = vmax.f32 %v766_v51, 0.0  ;;  %v993_v60 = vmax.f32 %v798_v52, 0.0 }
  0xfb   :  { %v959_v63 = vmax.f32 %v764_v55, 0.0  ;;  %v991_v0 = vmax.f32 %v796_v56, 0.0 }
  0xfc   :  { %v1523_v1 = vpack.c.bf16 %v961_v59, %v960_v57  ;;  %v1603_v2 = vpack.c.bf16 %v993_v60, %v992_v58 }
  0xfd   :  { %v1518_v3 = vpack.c.bf16 %v959_v63, %v958_v61  ;;  %v1598_v4 = vpack.c.bf16 %v991_v0, %v990_v62  ;;  %v1768_v5 = vpop.f32.mrb[4].mxu0  ;;  %v1800_v6 = vpop.f32.mrb[4].mxu1 }
  0xfe   :  { %1675 = vst [vmem:[%s2190_s3 + $0x8] sm:$0xff] %v1523_v1   ;;  %1691 = vst [vmem:[%s2190_s3 + $0x88] sm:$0xff] %v1603_v2   ;;  %v769_v7 = vadd.f32 %v1768_v5, %v2025_v40  ;;  %v801_v8 = vadd.f32 %v1800_v6, %v2025_v40  ;;  %v524_v9 = vpop.f32.mrb[5].mxu0  ;;  %v652_v10 = vpop.f32.mrb[5].mxu1 }
  0xff   :  { %1519 = vst [vmem:[%s2190_s3] sm:$0xff] %v1518_v3   ;;  %1690 = vst [vmem:[%s2190_s3 + $0x80] sm:$0xff] %v1598_v4   ;;  %v767_v11 = vadd.f32 %v2025_v40, %v524_v9  ;;  %v799_v12 = vadd.f32 %v2025_v40, %v652_v10  ;;  %v1769_v13 = vpop.f32.mrb[6].mxu0  ;;  %v1801_v14 = vpop.f32.mrb[6].mxu1 }
 0x100   :  { %v770_v15 = vadd.f32 %v1769_v13, %v2025_v40  ;;  %v802_v16 = vadd.f32 %v1801_v14, %v2025_v40  ;;  %v527_v17 = vpop.f32.mrb[7].mxu0  ;;  %v655_v18 = vpop.f32.mrb[7].mxu1  ;;  %v964_v21 = vmax.f32 %v769_v7, 0.0  ;;  %v996_v22 = vmax.f32 %v801_v8, 0.0 }
 0x101   :  { %v768_v19 = vadd.f32 %v2025_v40, %v527_v17  ;;  %v800_v20 = vadd.f32 %v2025_v40, %v655_v18  ;;  %v962_v25 = vmax.f32 %v767_v11, 0.0  ;;  %v994_v26 = vmax.f32 %v799_v12, 0.0 }
 0x102   :  { %v965_v23 = vmax.f32 %v770_v15, 0.0  ;;  %v997_v24 = vmax.f32 %v802_v16, 0.0 }
 0x103   :  { %v963_v27 = vmax.f32 %v768_v19, 0.0  ;;  %v995_v28 = vmax.f32 %v800_v20, 0.0 }
 0x104   :  { %v1533_v29 = vpack.c.bf16 %v965_v23, %v964_v21  ;;  %v1613_v30 = vpack.c.bf16 %v997_v24, %v996_v22 }
 0x105   :  { %v1528_v31 = vpack.c.bf16 %v963_v27, %v962_v25  ;;  %v1608_v32 = vpack.c.bf16 %v995_v28, %v994_v26  ;;  %v1772_v33 = vpop.f32.mrb[8].mxu0  ;;  %v1804_v34 = vpop.f32.mrb[8].mxu1 }
 0x106   :  { %1677 = vst [vmem:[%s2190_s3 + $0x18] sm:$0xff] %v1533_v29   ;;  %1693 = vst [vmem:[%s2190_s3 + $0x98] sm:$0xff] %v1613_v30   ;;  %v773_v35 = vadd.f32 %v1772_v33, %v2025_v40  ;;  %v805_v36 = vadd.f32 %v1804_v34, %v2025_v40  ;;  %v540_v37 = vpop.f32.mrb[9].mxu0  ;;  %v668_v38 = vpop.f32.mrb[9].mxu1 }
 0x107   :  { %1676 = vst [vmem:[%s2190_s3 + $0x10] sm:$0xff] %v1528_v31   ;;  %1692 = vst [vmem:[%s2190_s3 + $0x90] sm:$0xff] %v1608_v32   ;;  %v771_v39 = vadd.f32 %v2025_v40, %v540_v37  ;;  %v803_v41 = vadd.f32 %v2025_v40, %v668_v38  ;;  %v1773_v42 = vpop.f32.mrb[10].mxu0  ;;  %v1805_v43 = vpop.f32.mrb[10].mxu1 }
 0x108   :  { %v774_v44 = vadd.f32 %v1773_v42, %v2025_v40  ;;  %v806_v45 = vadd.f32 %v1805_v43, %v2025_v40  ;;  %v543_v46 = vpop.f32.mrb[11].mxu0  ;;  %v671_v47 = vpop.f32.mrb[11].mxu1  ;;  %v968_v50 = vmax.f32 %v773_v35, 0.0  ;;  %v1000_v51 = vmax.f32 %v805_v36, 0.0 }
 0x109   :  { %v772_v48 = vadd.f32 %v2025_v40, %v543_v46  ;;  %v804_v49 = vadd.f32 %v2025_v40, %v671_v47  ;;  %v966_v54 = vmax.f32 %v771_v39, 0.0  ;;  %v998_v55 = vmax.f32 %v803_v41, 0.0 }
 0x10a   :  { %v969_v52 = vmax.f32 %v774_v44, 0.0  ;;  %v1001_v53 = vmax.f32 %v806_v45, 0.0 }
 0x10b   :  { %v967_v56 = vmax.f32 %v772_v48, 0.0  ;;  %v999_v57 = vmax.f32 %v804_v49, 0.0 }
 0x10c   :  { %v1543_v58 = vpack.c.bf16 %v969_v52, %v968_v50  ;;  %v1623_v59 = vpack.c.bf16 %v1001_v53, %v1000_v51 }
 0x10d   :  { %v1538_v60 = vpack.c.bf16 %v967_v56, %v966_v54  ;;  %v1618_v61 = vpack.c.bf16 %v999_v57, %v998_v55  ;;  %v1776_v62 = vpop.f32.mrb[12].mxu0  ;;  %v1808_v63 = vpop.f32.mrb[12].mxu1 }
 0x10e   :  { %1679 = vst [vmem:[%s2190_s3 + $0x28] sm:$0xff] %v1543_v58   ;;  %1695 = vst [vmem:[%s2190_s3 + $0xa8] sm:$0xff] %v1623_v59   ;;  %v777_v0 = vadd.f32 %v1776_v62, %v2025_v40  ;;  %v809_v1 = vadd.f32 %v1808_v63, %v2025_v40  ;;  %v556_v2 = vpop.f32.mrb[13].mxu0  ;;  %v684_v3 = vpop.f32.mrb[13].mxu1 }
 0x10f   :  { %1678 = vst [vmem:[%s2190_s3 + $0x20] sm:$0xff] %v1538_v60   ;;  %1694 = vst [vmem:[%s2190_s3 + $0xa0] sm:$0xff] %v1618_v61   ;;  %v775_v4 = vadd.f32 %v2025_v40, %v556_v2  ;;  %v807_v5 = vadd.f32 %v2025_v40, %v684_v3  ;;  %v1777_v6 = vpop.f32.mrb[14].mxu0  ;;  %v1809_v7 = vpop.f32.mrb[14].mxu1 }
 0x110   :  { %v778_v8 = vadd.f32 %v1777_v6, %v2025_v40  ;;  %v810_v9 = vadd.f32 %v1809_v7, %v2025_v40  ;;  %v559_v10 = vpop.f32.mrb[15].mxu0  ;;  %v687_v11 = vpop.f32.mrb[15].mxu1  ;;  %v972_v14 = vmax.f32 %v777_v0, 0.0  ;;  %v1004_v15 = vmax.f32 %v809_v1, 0.0 }
 0x111   :  { %v776_v12 = vadd.f32 %v2025_v40, %v559_v10  ;;  %v808_v13 = vadd.f32 %v2025_v40, %v687_v11  ;;  %v970_v18 = vmax.f32 %v775_v4, 0.0  ;;  %v1002_v19 = vmax.f32 %v807_v5, 0.0 }
 0x112   :  { %v973_v16 = vmax.f32 %v778_v8, 0.0  ;;  %v1005_v17 = vmax.f32 %v810_v9, 0.0 }
 0x113   :  { %v971_v20 = vmax.f32 %v776_v12, 0.0  ;;  %v1003_v21 = vmax.f32 %v808_v13, 0.0 }
 0x114   :  { %v1553_v22 = vpack.c.bf16 %v973_v16, %v972_v14  ;;  %v1633_v23 = vpack.c.bf16 %v1005_v17, %v1004_v15 }
 0x115   :  { %v1548_v24 = vpack.c.bf16 %v971_v20, %v970_v18  ;;  %v1628_v25 = vpack.c.bf16 %v1003_v21, %v1002_v19  ;;  %v1780_v26 = vpop.f32.mrb[16].mxu0  ;;  %v1812_v27 = vpop.f32.mrb[16].mxu1 }
 0x116   :  { %1681 = vst [vmem:[%s2190_s3 + $0x38] sm:$0xff] %v1553_v22   ;;  %1697 = vst [vmem:[%s2190_s3 + $0xb8] sm:$0xff] %v1633_v23   ;;  %v781_v28 = vadd.f32 %v1780_v26, %v2025_v40  ;;  %v813_v29 = vadd.f32 %v1812_v27, %v2025_v40  ;;  %v572_v30 = vpop.f32.mrb[17].mxu0  ;;  %v700_v31 = vpop.f32.mrb[17].mxu1 }
 0x117   :  { %1680 = vst [vmem:[%s2190_s3 + $0x30] sm:$0xff] %v1548_v24   ;;  %1696 = vst [vmem:[%s2190_s3 + $0xb0] sm:$0xff] %v1628_v25   ;;  %v779_v32 = vadd.f32 %v2025_v40, %v572_v30  ;;  %v811_v33 = vadd.f32 %v2025_v40, %v700_v31  ;;  %v1781_v34 = vpop.f32.mrb[18].mxu0  ;;  %v1813_v35 = vpop.f32.mrb[18].mxu1 }
 0x118   :  { %v782_v36 = vadd.f32 %v1781_v34, %v2025_v40  ;;  %v814_v37 = vadd.f32 %v1813_v35, %v2025_v40  ;;  %v575_v38 = vpop.f32.mrb[19].mxu0  ;;  %v703_v39 = vpop.f32.mrb[19].mxu1  ;;  %v976_v43 = vmax.f32 %v781_v28, 0.0  ;;  %v1008_v44 = vmax.f32 %v813_v29, 0.0 }
 0x119   :  { %v780_v41 = vadd.f32 %v2025_v40, %v575_v38  ;;  %v812_v42 = vadd.f32 %v2025_v40, %v703_v39  ;;  %v974_v47 = vmax.f32 %v779_v32, 0.0  ;;  %v1006_v48 = vmax.f32 %v811_v33, 0.0 }
 0x11a   :  { %v977_v45 = vmax.f32 %v782_v36, 0.0  ;;  %v1009_v46 = vmax.f32 %v814_v37, 0.0 }
 0x11b   :  { %v975_v49 = vmax.f32 %v780_v41, 0.0  ;;  %v1007_v50 = vmax.f32 %v812_v42, 0.0 }
 0x11c   :  { %v1563_v51 = vpack.c.bf16 %v977_v45, %v976_v43  ;;  %v1643_v52 = vpack.c.bf16 %v1009_v46, %v1008_v44 }
 0x11d   :  { %v1558_v53 = vpack.c.bf16 %v975_v49, %v974_v47  ;;  %v1638_v54 = vpack.c.bf16 %v1007_v50, %v1006_v48  ;;  %v1784_v55 = vpop.f32.mrb[20].mxu0  ;;  %v1816_v56 = vpop.f32.mrb[20].mxu1 }
 0x11e   :  { %1683 = vst [vmem:[%s2190_s3 + $0x48] sm:$0xff] %v1563_v51   ;;  %1699 = vst [vmem:[%s2190_s3 + $0xc8] sm:$0xff] %v1643_v52   ;;  %v785_v57 = vadd.f32 %v1784_v55, %v2025_v40  ;;  %v817_v58 = vadd.f32 %v1816_v56, %v2025_v40  ;;  %v588_v59 = vpop.f32.mrb[21].mxu0  ;;  %v716_v60 = vpop.f32.mrb[21].mxu1 }
 0x11f   :  { %1682 = vst [vmem:[%s2190_s3 + $0x40] sm:$0xff] %v1558_v53   ;;  %1698 = vst [vmem:[%s2190_s3 + $0xc0] sm:$0xff] %v1638_v54   ;;  %v783_v61 = vadd.f32 %v2025_v40, %v588_v59  ;;  %v815_v62 = vadd.f32 %v2025_v40, %v716_v60  ;;  %v1785_v63 = vpop.f32.mrb[22].mxu0  ;;  %v1817_v0 = vpop.f32.mrb[22].mxu1 }
 0x120   :  { %v786_v1 = vadd.f32 %v1785_v63, %v2025_v40  ;;  %v818_v2 = vadd.f32 %v1817_v0, %v2025_v40  ;;  %v591_v3 = vpop.f32.mrb[23].mxu0  ;;  %v719_v4 = vpop.f32.mrb[23].mxu1  ;;  %v980_v7 = vmax.f32 %v785_v57, 0.0  ;;  %v1012_v8 = vmax.f32 %v817_v58, 0.0 }
 0x121   :  { %v784_v5 = vadd.f32 %v2025_v40, %v591_v3  ;;  %v816_v6 = vadd.f32 %v2025_v40, %v719_v4  ;;  %v978_v11 = vmax.f32 %v783_v61, 0.0  ;;  %v1010_v12 = vmax.f32 %v815_v62, 0.0 }
 0x122   :  { %v981_v9 = vmax.f32 %v786_v1, 0.0  ;;  %v1013_v10 = vmax.f32 %v818_v2, 0.0 }
 0x123   :  { %v979_v13 = vmax.f32 %v784_v5, 0.0  ;;  %v1011_v14 = vmax.f32 %v816_v6, 0.0 }
 0x124   :  { %v1573_v15 = vpack.c.bf16 %v981_v9, %v980_v7  ;;  %v1653_v16 = vpack.c.bf16 %v1013_v10, %v1012_v8 }
 0x125   :  { %v1568_v17 = vpack.c.bf16 %v979_v13, %v978_v11  ;;  %v1648_v18 = vpack.c.bf16 %v1011_v14, %v1010_v12  ;;  %v1788_v19 = vpop.f32.mrb[24].mxu0  ;;  %v1820_v20 = vpop.f32.mrb[24].mxu1 }
 0x126   :  { %1685 = vst [vmem:[%s2190_s3 + $0x58] sm:$0xff] %v1573_v15   ;;  %1701 = vst [vmem:[%s2190_s3 + $0xd8] sm:$0xff] %v1653_v16   ;;  %v789_v21 = vadd.f32 %v1788_v19, %v2025_v40  ;;  %v821_v22 = vadd.f32 %v1820_v20, %v2025_v40  ;;  %v604_v23 = vpop.f32.mrb[25].mxu0  ;;  %v732_v24 = vpop.f32.mrb[25].mxu1 }
 0x127   :  { %1684 = vst [vmem:[%s2190_s3 + $0x50] sm:$0xff] %v1568_v17   ;;  %1700 = vst [vmem:[%s2190_s3 + $0xd0] sm:$0xff] %v1648_v18   ;;  %v787_v25 = vadd.f32 %v2025_v40, %v604_v23  ;;  %v819_v26 = vadd.f32 %v2025_v40, %v732_v24  ;;  %v1789_v27 = vpop.f32.mrb[26].mxu0  ;;  %v1821_v28 = vpop.f32.mrb[26].mxu1 }
 0x128   :  { %v790_v29 = vadd.f32 %v1789_v27, %v2025_v40  ;;  %v822_v30 = vadd.f32 %v1821_v28, %v2025_v40  ;;  %v607_v31 = vpop.f32.mrb[27].mxu0  ;;  %v735_v32 = vpop.f32.mrb[27].mxu1  ;;  %v984_v35 = vmax.f32 %v789_v21, 0.0  ;;  %v1016_v36 = vmax.f32 %v821_v22, 0.0 }
 0x129   :  { %v788_v33 = vadd.f32 %v2025_v40, %v607_v31  ;;  %v820_v34 = vadd.f32 %v2025_v40, %v735_v32  ;;  %v982_v39 = vmax.f32 %v787_v25, 0.0  ;;  %v1014_v41 = vmax.f32 %v819_v26, 0.0 }
 0x12a   :  { %v985_v37 = vmax.f32 %v790_v29, 0.0  ;;  %v1017_v38 = vmax.f32 %v822_v30, 0.0 }
 0x12b   :  { %v983_v42 = vmax.f32 %v788_v33, 0.0  ;;  %v1015_v43 = vmax.f32 %v820_v34, 0.0 }
 0x12c   :  { %v1583_v44 = vpack.c.bf16 %v985_v37, %v984_v35  ;;  %v1663_v45 = vpack.c.bf16 %v1017_v38, %v1016_v36 }
 0x12d   :  { %v1578_v46 = vpack.c.bf16 %v983_v42, %v982_v39  ;;  %v1658_v47 = vpack.c.bf16 %v1015_v43, %v1014_v41  ;;  %v1792_v48 = vpop.f32.mrb[28].mxu0  ;;  %v1824_v49 = vpop.f32.mrb[28].mxu1 }
 0x12e   :  { %1687 = vst [vmem:[%s2190_s3 + $0x68] sm:$0xff] %v1583_v44   ;;  %1703 = vst [vmem:[%s2190_s3 + $0xe8] sm:$0xff] %v1663_v45   ;;  %v793_v50 = vadd.f32 %v1792_v48, %v2025_v40  ;;  %v825_v51 = vadd.f32 %v1824_v49, %v2025_v40  ;;  %v620_v52 = vpop.f32.mrb[29].mxu0  ;;  %v748_v53 = vpop.f32.mrb[29].mxu1 }
 0x12f   :  { %1686 = vst [vmem:[%s2190_s3 + $0x60] sm:$0xff] %v1578_v46   ;;  %1702 = vst [vmem:[%s2190_s3 + $0xe0] sm:$0xff] %v1658_v47   ;;  %v791_v54 = vadd.f32 %v2025_v40, %v620_v52  ;;  %v823_v55 = vadd.f32 %v2025_v40, %v748_v53  ;;  %v1793_v56 = vpop.f32.mrb[30].mxu0  ;;  %v1825_v57 = vpop.f32.mrb[30].mxu1 }
 0x130   :  { %v794_v58 = vadd.f32 %v1793_v56, %v2025_v40  ;;  %v826_v59 = vadd.f32 %v1825_v57, %v2025_v40  ;;  %v623_v60 = vpop.f32.mrb[31].mxu0  ;;  %v751_v61 = vpop.f32.mrb[31].mxu1  ;;  %v988_v0 = vmax.f32 %v793_v50, 0.0  ;;  %v1020_v1 = vmax.f32 %v825_v51, 0.0 }
 0x131   :  { %v792_v62 = vadd.f32 %v2025_v40, %v623_v60  ;;  %v824_v63 = vadd.f32 %v2025_v40, %v751_v61  ;;  %v986_v4 = vmax.f32 %v791_v54, 0.0  ;;  %v1018_v5 = vmax.f32 %v823_v55, 0.0 }
 0x132   :  { %v989_v2 = vmax.f32 %v794_v58, 0.0  ;;  %v1021_v3 = vmax.f32 %v826_v59, 0.0 }
 0x133   :  { %v987_v6 = vmax.f32 %v792_v62, 0.0  ;;  %v1019_v7 = vmax.f32 %v824_v63, 0.0 }
 0x134   :  { %v1593_v8 = vpack.c.bf16 %v989_v2, %v988_v0  ;;  %v1673_v9 = vpack.c.bf16 %v1021_v3, %v1020_v1 }
 0x135   :  { %v1588_v10 = vpack.c.bf16 %v987_v6, %v986_v4  ;;  %v1668_v11 = vpack.c.bf16 %v1019_v7, %v1018_v5 }
 0x136   :  { %1689 = vst [vmem:[%s2190_s3 + $0x78] sm:$0xff] %v1593_v8   ;;  %1705 = vst [vmem:[%s2190_s3 + $0xf8] sm:$0xff] %v1673_v9  }
 0x137   :  { %1688 = vst [vmem:[%s2190_s3 + $0x70] sm:$0xff] %v1588_v10   ;;  %1704 = vst [vmem:[%s2190_s3 + $0xf0] sm:$0xff] %v1668_v11  }

// kernel: _lambda_.14
= control target key start
LH: loop header
LB: loop body
LE: loop exit
PB: predicated region body
PF: predicated region fallthrough
CT: control target
= control target key end

     0   :  { %s896_s12 = smov 0   ;;  %s898_s13 = smov 0   ;;  %s996_s0 = inlined_call_operand.vmem [shape: bf16[32,768], index: 0, kind: input, shape index: {}]   ;;  %s997_s1 = inlined_call_operand.vmem [shape: bf16[768,128], index: 1, kind: input, shape index: {}]   ;;  %s998_s2 = inlined_call_operand.vmem [shape: f32[1,128], index: 2, kind: input, shape index: {}]   ;;  %s999_s3 = inlined_call_operand.vmem [shape: bf16[32,128], index: 3, kind: output, shape index: {}]  }
   0x1   :  { %s900_s14 = smov 0   ;;  %s902_s15 = smov 0  }
   0x2   :  { %s904_s16 = smov 0  }
   0x3 LB: > { %s25_s17 = sadd.s32 1, %s870_s15  ;;  %p48_p1 = scmp.ne.s32.totalorder %s862_s13, %s858_s12  ;;  %s874_s16 = sphi %s904_s16, %s13_s16   ;;  %s870_s15 = sphi %s902_s15, %s1003_s15   ;;  %s866_s14 = sphi %s900_s14, %s1002_s14   ;;  %s862_s13 = sphi %s898_s13, %s1001_s13   ;;  %s858_s12 = sphi %s896_s12, %s1000_s12  }
   0x4   : > { %p26_p0 = scmp.ge.s32.totalorder %s25_s17, 3  ;;  %p49_p2 = scmp.eq.s32.totalorder %s874_s16, 0 }
   0x5   : > { %s41_s19 = sadd.s32 1, %s862_s13  ;;  %p675_p5 = scmp.ge.s32.totalorder %s874_s16, 3 }
   0x6   : > { %s1005_s17 = smov (%p26_p0, %s25_s17), 0  ;;  %p50_p3 = por %p49_p2, %p48_p1 }
   0x7   : > { %s37_s18 = ssub.s32 %s870_s15, %s1005_s17  ;;  %162 = sbr.rel (%p675_p5) target bundleno = 21 (0x15), region = 20 }
   0x8   : > { %p39_p4 = scmp.eq.s32.totalorder %s37_s18, 0 }
   0xa   : > { %s931_s20 = scalar_select %p39_p4, %s862_s13, %s41_s19  }
   0xe   : > { %165 = sbr.rel (!%p50_p3) target bundleno = 21 (0x15), region = 24  ;;  %s167_s21 = sand.u32 (%p50_p3), 1, %s862_s13  }
   0xf   : > { %s714_s22 = sshll.u32 (%p50_p3), %s870_s15, 3  ;;  %s676_s23 = sshll.u32 (%p50_p3), %s167_s21, 5 }
  0x10   : > { %s175_s26 = scalar_lea.vmem (%p50_p3), %s996_s0, %s714_s22  ;;  %s169_s27 = scalar_lea.vmem (%p50_p3), [#allocation3], %s676_s23 }
  0x11   : > { %v209_v0 = vld [vmem:[%s175_s26] sm:$0xff] (%p50_p3)  ;;  %v211_v1 = vld [vmem:[%s175_s26 + $0x18] sm:$0xff] (%p50_p3)  ;;  %v213_v2 = vld [vmem:[%s175_s26 + $0x30] sm:$0xff] (%p50_p3) }
  0x12   : > { %210 = vst [vmem:[%s169_s27] sm:$0xff] (%p50_p3), %v209_v0  ;;  %212 = vst [vmem:[%s169_s27 + $0x8] sm:$0xff] (%p50_p3), %v211_v1  ;;  %v215_v3 = vld [vmem:[%s175_s26 + $0x48] sm:$0xff] (%p50_p3) }
  0x13   : > { %214 = vst [vmem:[%s169_s27 + $0x10] sm:$0xff] (%p50_p3), %v213_v2  ;;  %216 = vst [vmem:[%s169_s27 + $0x18] sm:$0xff] (%p50_p3), %v215_v3 }
  0x15 PF: > { %p679_p6 = scmp.ge.s32.totalorder %s874_s16, 1  ;;  %p233_p7 = scmp.lt.s32.totalorder %s874_s16, 4 }
  0x17   : > { %p234_p8 = pnand %p679_p6, %p233_p7 }
  0x18   : > { %s240_s28 = sand.u32 (!%p234_p8), 1, %s858_s12   ;;  %s681_s29 = sshll.u32 (!%p234_p8), %s866_s14, 5 }
  0x19   : > { %237 = sbr.rel (%p234_p8) target bundleno = 304 (0x130), region = 66  ;;  %s680_s30 = sshll.u32 (!%p234_p8), %s240_s28, 5 }
  0x1a   : > { %p280_p9 = scmp.lt.s32.totalorder (!%p234_p8), %s681_s29, 95  ;;  %s948_s8 = scalar_lea.vmem (!%p234_p8), [#allocation3], %s680_s30 }
  0x1b   : > { %p683_p10 = scmp.ne.s32.totalorder (!%p234_p8), %s866_s14, 0 }
  0x20   : > { %s1007_s29 = smov (!%p280_p9, %s681_s29), 95  ;;  %304 = sbr.rel (%p683_p10) target bundleno = 39 (0x27), region = 74 }
  0x21   : > { %s682_s4 = sshll.u32 %s1007_s29, 2  ;;  %v684_v4 = vld [vmem:[%s998_s2] ss:$0 sm:$0xff] (!%p683_p10) }
  0x22   : > { %s946_s7 = scalar_lea.vmem %s997_s1, %s682_s4  ;;  %312 = vst [vmem:[#allocation2] sm:$0xff] (!%p683_p10), %v684_v4  ;;  %313 = vst [vmem:[#allocation2 + $0x8] sm:$0xff] (!%p683_p10), %v684_v4 }
  0x23   : > { %314 = vst [vmem:[#allocation2 + $0x10] sm:$0xff] (!%p683_p10), %v684_v4  ;;  %315 = vst [vmem:[#allocation2 + $0x18] sm:$0xff] (!%p683_p10), %v684_v4 }
  0x27 PF: > { %v814_v5 = vld [vmem:[%s946_s7 + $0x40] sm:$0xff]   ;;  %v816_v7 = vld [vmem:[%s946_s7 + $0x48] sm:$0xff]   ;;  %v818_v9 = vld [vmem:[%s946_s7 + $0x50] sm:$0xff]   ;;  %p705_p11 = scmp.ne.s32.totalorder %s866_s14, 2 }
  0x28   : > { %v815_v6 = vld [vmem:[%s946_s7] sm:$0xff]   ;;  %730 = vmatprep.subr.bf16.mxu0 %v814_v5  ;;  %758 = vmatprep.subr.bf16.mxu1 %v814_v5  ;;  %v817_v8 = vld [vmem:[%s946_s7 + $0x8] sm:$0xff]   ;;  %v819_v10 = vld [vmem:[%s946_s7 + $0x10] sm:$0xff]  }
  0x29   : > { %731 = vmatpush3.bf16.msra.mxu0 %v815_v6  ;;  %766 = vmatpush3.bf16.msra.mxu1 %v815_v6  ;;  %v820_v11 = vld [vmem:[%s946_s7 + $0x58] sm:$0xff]   ;;  %v822_v13 = vld [vmem:[%s946_s7 + $0x60] sm:$0xff]   ;;  %v824_v15 = vld [vmem:[%s946_s7 + $0x68] sm:$0xff]  }
  0x2a   : > { %732 = vmatprep.subr.bf16.mxu0 %v816_v7  ;;  %759 = vmatprep.subr.bf16.mxu1 %v816_v7  ;;  %v821_v12 = vld [vmem:[%s946_s7 + $0x18] sm:$0xff]   ;;  %v823_v14 = vld [vmem:[%s946_s7 + $0x20] sm:$0xff]   ;;  %v825_v18 = vld [vmem:[%s946_s7 + $0x28] sm:$0xff]  }
  0x2b   : > { %v832_v16 = vld [vmem:[%s948_s8 + $0x4] ss:$8 sps:$4 sm:$0xff]   ;;  %v835_v17 = vld [vmem:[%s948_s8 + $0x14] ss:$8 sps:$4 sm:$0xff]   ;;  %v830_v23 = vld [vmem:[%s948_s8] ss:$8 sps:$4 sm:$0xff]  }
  0x2c   : > { %v826_v19 = vld [vmem:[%s946_s7 + $0x70] sm:$0xff]   ;;  %504 = vmatprep.mubr.bf16.mxu0 %v832_v16  ;;  %512 = vmatprep.mubr.bf16.mxu1 %v835_v17  ;;  %v828_v21 = vld [vmem:[%s946_s7 + $0x78] sm:$0xff]   ;;  %v316_v27 = vld [vmem:[#allocation2] sm:$0xff] }
  0x2d   : > { %733 = vmatpush3.bf16.msra.mxu0 %v817_v8  ;;  %767 = vmatpush3.bf16.msra.mxu1 %v817_v8  ;;  %v827_v20 = vld [vmem:[%s946_s7 + $0x30] sm:$0xff]   ;;  %v829_v22 = vld [vmem:[%s946_s7 + $0x38] sm:$0xff]   ;;  %v317_v35 = vld [vmem:[#allocation2 + $0x8] sm:$0xff] }
  0x2e   : > { %734 = vmatprep.subr.bf16.mxu0 %v818_v9  ;;  %760 = vmatprep.subr.bf16.mxu1 %v818_v9  ;;  %v833_v24 = vld [vmem:[%s948_s8 + $0x10] ss:$8 sps:$4 sm:$0xff]  }
  0x2f   : > { %v318_v29 = vld [vmem:[#allocation2 + $0x10] sm:$0xff]  ;;  %v319_v37 = vld [vmem:[#allocation2 + $0x18] sm:$0xff] }
  0x31   : > { %735 = vmatpush3.bf16.msra.mxu0 %v819_v10  ;;  %768 = vmatpush3.bf16.msra.mxu1 %v819_v10 }
  0x32   : > { %736 = vmatprep.subr.bf16.mxu0 %v820_v11  ;;  %761 = vmatprep.subr.bf16.mxu1 %v820_v11 }
  0x35   : > { %737 = vmatpush3.bf16.msra.mxu0 %v821_v12  ;;  %769 = vmatpush3.bf16.msra.mxu1 %v821_v12 }
  0x36   : > { %738 = vmatprep.subr.bf16.mxu0 %v822_v13  ;;  %762 = vmatprep.subr.bf16.mxu1 %v822_v13 }
  0x39   : > { %739 = vmatpush3.bf16.msra.mxu0 %v823_v14  ;;  %770 = vmatpush3.bf16.msra.mxu1 %v823_v14 }
  0x3a   : > { %740 = vmatprep.subr.bf16.mxu0 %v824_v15  ;;  %763 = vmatprep.subr.bf16.mxu1 %v824_v15 }
  0x3d   : > { %741 = vmatpush3.bf16.msra.mxu0 %v825_v18  ;;  %771 = vmatpush3.bf16.msra.mxu1 %v825_v18 }
  0x3e   : > { %742 = vmatprep.subr.bf16.mxu0 %v826_v19  ;;  %764 = vmatprep.subr.bf16.mxu1 %v826_v19 }
  0x41   : > { %743 = vmatpush3.bf16.msra.mxu0 %v827_v20  ;;  %772 = vmatpush3.bf16.msra.mxu1 %v827_v20 }
  0x42   : > { %744 = vmatprep.subr.bf16.mxu0 %v828_v21  ;;  %765 = vmatprep.subr.bf16.mxu1 %v828_v21 }
  0x45   : > { %745 = vmatpush3.bf16.msra.mxu0 %v829_v22  ;;  %773 = vmatpush3.bf16.msra.mxu1 %v829_v22 }
  0x48   : > { %505 = vmatmul.mubr.bf16.vlgmr.msra.gmra.mrb[0].mxu0 %v830_v23  ;;  %513 = vmatmul.mubr.bf16.vlgmr.msra.gmra.mrb[0].mxu1 %v833_v24 }
 0x11b   : > { %v746_v25 = vpop.f32.mrb[0].mxu0  ;;  %v752_v26 = vpop.f32.mrb[0].mxu1 }
 0x11c   : > { %v747_v28 = vpop.f32.mrb[1].mxu0  ;;  %v753_v30 = vpop.f32.mrb[1].mxu1 }
 0x11d   : > { %v748_v31 = vadd.f32 %v747_v28, %v746_v25  ;;  %v754_v32 = vadd.f32 %v753_v30, %v752_v26  ;;  %v749_v33 = vpop.f32.mrb[2].mxu0  ;;  %v755_v34 = vpop.f32.mrb[2].mxu1  ;;  %532 = sbr.rel (%p705_p11) target bundleno = 304 (0x130), region = 78 }
 0x11e   : > { %v750_v36 = vpop.f32.mrb[3].mxu0  ;;  %v756_v38 = vpop.f32.mrb[3].mxu1 }
 0x11f   : > { %v521_v39 = vadd.f32 %v748_v31, %v316_v27  ;;  %v523_v40 = vadd.f32 %v754_v32, %v318_v29  ;;  %v751_v41 = vadd.f32 %v750_v36, %v749_v33  ;;  %v757_v42 = vadd.f32 %v756_v38, %v755_v34 }
 0x121   : > { %525 = vst [vmem:[#allocation2] sm:$0xff] %v521_v39  ;;  %527 = vst [vmem:[#allocation2 + $0x10] sm:$0xff] %v523_v40  ;;  %v522_v43 = vadd.f32 %v751_v41, %v317_v35  ;;  %v524_v44 = vadd.f32 %v757_v42, %v319_v37 }
 0x123   : > { %526 = vst [vmem:[#allocation2 + $0x8] sm:$0xff] %v522_v43  ;;  %528 = vst [vmem:[#allocation2 + $0x18] sm:$0xff] %v524_v44 }
 0x128   : > { %v533_v45 = vld [vmem:[#allocation2] sm:$0xff]  ;;  %v535_v47 = vld [vmem:[#allocation2 + $0x10] sm:$0xff] }
 0x129   : > { %v537_v48 = vmax.f32 %v533_v45, 0.0  ;;  %v539_v51 = vmax.f32 %v535_v47, 0.0 }
 0x12a   : > { %v534_v46 = vld [vmem:[#allocation2 + $0x8] sm:$0xff]  ;;  %v536_v50 = vld [vmem:[#allocation2 + $0x18] sm:$0xff] }
 0x12b   : > { %v538_v49 = vmax.f32 %v534_v46, 0.0  ;;  %v540_v52 = vmax.f32 %v536_v50, 0.0 }
 0x12d   : > { %v722_v53 = vpack.c.bf16 %v538_v49, %v537_v48  ;;  %v727_v54 = vpack.c.bf16 %v540_v52, %v539_v51 }
 0x12f   : > { %723 = vst [vmem:[%s999_s3] sm:$0xff] %v722_v53   ;;  %729 = vst [vmem:[%s999_s3 + $0x8] sm:$0xff] %v727_v54  }
 0x130 PF: > { %s13_s16 = sadd.s32 1, %s874_s16   ;;  %s1000_s12 = smov %s862_s13 }
 0x131   : > { %p10_p12 = scmp.ge.s32.totalorder %s13_s16, 5   ;;  %s1001_s13 = smov %s931_s20 }
 0x132   : > { %s1002_s14 = smov %s870_s15  ;;  %s1003_s15 = smov %s1005_s17 }
 0x133   :  { %12 = sbr.rel (!%p10_p12) target bundleno = 3 (0x3), region = 119 }

// kernel: _lambda_.15
= control target key start
LH: loop header
LB: loop body
LE: loop exit
PB: predicated region body
PF: predicated region fallthrough
CT: control target
= control target key end

     0   :  { %s847_s12 = smov 0   ;;  %s849_s13 = smov 0   ;;  %s929_s0 = inlined_call_operand.vmem [shape: bf16[8,1280], index: 0, kind: input, shape index: {}]   ;;  %s930_s1 = inlined_call_operand.vmem [shape: bf16[1280,256], index: 1, kind: input, shape index: {}]   ;;  %s931_s2 = inlined_call_operand.vmem [shape: f32[1,256], index: 2, kind: input, shape index: {}]   ;;  %s932_s3 = inlined_call_operand.vmem [shape: bf16[8,256], index: 3, kind: output, shape index: {}]  }
   0x1   :  { %s851_s14 = smov 0  }
   0x2 LB: > { %s25_s15 = sadd.s32 1, %s821_s13  ;;  %p680_p0 = scmp.ge.s32.totalorder %s825_s14, 1  ;;  %s825_s14 = sphi %s851_s14, %s13_s14   ;;  %s821_s13 = sphi %s849_s13, %s934_s13   ;;  %s817_s12 = sphi %s847_s12, %s933_s12  }
   0x3   : > { %p26_p1 = scmp.ge.s32.totalorder %s25_s15, 5  ;;  %p194_p2 = scmp.lt.s32.totalorder %s825_s14, 6 }
   0x5   : > { %s936_s15 = smov (%p26_p1, %s25_s15), 0  ;;  %p195_p3 = pnand %p680_p0, %p194_p2 }
   0x6   : > { %s681_s16 = sshll.u32 (!%p195_p3), %s817_s12, 1  ;;  %s683_s17 = sshll.u32 (!%p195_p3), %s817_s12, 5 }
   0x7   : > { %198 = sbr.rel (%p195_p3) target bundleno = 317 (0x13d), region = 32  ;;  %p243_p4 = scmp.lt.s32.totalorder (!%p195_p3), %s681_s16, 9 }
   0x8   : > { %p252_p5 = scmp.lt.s32.totalorder (!%p195_p3), %s683_s17, 159  ;;  %p686_p6 = scmp.ne.s32.totalorder (!%p195_p3), %s817_s12, 0 }
   0xe   : > { %s938_s16 = smov (!%p243_p4, %s681_s16), 9  ;;  %s940_s17 = smov (!%p252_p5, %s683_s17), 159 }
   0xf   : > { %s682_s18 = sshll.u32 %s938_s16, 2  ;;  %s727_s22 = sshll.u32 %s940_s17, 3  ;;  %v283_v0 = vlaneseq (!%p686_p6)  ;;  %v281_v2 = vld [vmem:[%s931_s2] sm:$0x3] (!%p686_p6) }
  0x10   : > { %s872_s21 = scalar_lea.vmem %s929_s0, %s682_s18  ;;  %s877_s25 = scalar_lea.vmem %s930_s1, %s727_s22 }
  0x11   : > { %280 = sbr.rel (%p686_p6) target bundleno = 24 (0x18), region = 36  ;;  %v284_v1 = vshrl.u32 (!%p686_p6), %v283_v0, 7 }
  0x13   : > { %v285_v3 = vsub.s32 (!%p686_p6), 0, %v284_v1  ;;  %v289_v4 = vsub.s32 (!%p686_p6), 1, %v284_v1 }
  0x15   : > { %v286_v5 = vrot.slane (!%p686_p6), %v281_v2, %v285_v3  ;;  %v290_v6 = vrot.slane (!%p686_p6), %v281_v2, %v289_v4 }
  0x17   : > { %293 = vst [vmem:[#allocation2] sm:$0xff] (!%p686_p6), %v286_v5  ;;  %294 = vst [vmem:[#allocation2 + $0x8] sm:$0xff] (!%p686_p6), %v290_v6 }
  0x18 PF: > { %v753_v7 = vld [vmem:[%s877_s25 + $0x4] ss:$8 sps:$4 sm:$0xff]   ;;  %v755_v8 = vld [vmem:[%s877_s25] ss:$8 sps:$4 sm:$0xff]   ;;  %v756_v9 = vld [vmem:[%s877_s25 + $0x14] ss:$8 sps:$4 sm:$0xff]  }
  0x19   : > { %497 = vmatprep.subr.bf16.mxu0 %v753_v7  ;;  %v758_v10 = vld [vmem:[%s877_s25 + $0x10] ss:$8 sps:$4 sm:$0xff]   ;;  %v759_v11 = vld [vmem:[%s877_s25 + $0x24] ss:$8 sps:$4 sm:$0xff]   ;;  %v761_v12 = vld [vmem:[%s877_s25 + $0x20] ss:$8 sps:$4 sm:$0xff]  }
  0x1a   : > { %498 = vmatpush1.bf16.msra.mxu0 %v755_v8  ;;  %v762_v13 = vld [vmem:[%s877_s25 + $0x34] ss:$8 sps:$4 sm:$0xff]   ;;  %v764_v14 = vld [vmem:[%s877_s25 + $0x30] ss:$8 sps:$4 sm:$0xff]   ;;  %v765_v15 = vld [vmem:[%s877_s25 + $0x44] ss:$8 sps:$4 sm:$0xff]  }
  0x1b   : > { %499 = vmatprep.subr.bf16.mxu0 %v756_v9  ;;  %v767_v16 = vld [vmem:[%s877_s25 + $0x40] ss:$8 sps:$4 sm:$0xff]   ;;  %v768_v17 = vld [vmem:[%s877_s25 + $0x54] ss:$8 sps:$4 sm:$0xff]   ;;  %v770_v18 = vld [vmem:[%s877_s25 + $0x50] ss:$8 sps:$4 sm:$0xff]  }
  0x1c   : > { %v771_v19 = vld [vmem:[%s877_s25 + $0x64] ss:$8 sps:$4 sm:$0xff]   ;;  %v773_v22 = vld [vmem:[%s877_s25 + $0x60] ss:$8 sps:$4 sm:$0xff]   ;;  %v774_v23 = vld [vmem:[%s877_s25 + $0x74] ss:$8 sps:$4 sm:$0xff]  }
  0x1d   : > { %v297_v20 = vld [vmem:[%s872_s21] sm:$0xff]  ;;  %v776_v24 = vld [vmem:[%s877_s25 + $0x70] ss:$8 sps:$4 sm:$0xff]   ;;  %v780_v27 = vld [vmem:[%s877_s25 + $0x94] ss:$8 sps:$4 sm:$0xff]   ;;  %p721_p7 = scmp.ne.s32.totalorder %s817_s12, 4 }
  0x1e   : > { %500 = vmatpush1.bf16.msra.mxu0 %v758_v10  ;;  %v688_v21 = vcombine.high %v297_v20, %v297_v20  ;;  %v777_v25 = vld [vmem:[%s877_s25 + $0x84] ss:$8 sps:$4 sm:$0xff]   ;;  %v779_v26 = vld [vmem:[%s877_s25 + $0x80] ss:$8 sps:$4 sm:$0xff]   ;;  %v782_v28 = vld [vmem:[%s877_s25 + $0x90] ss:$8 sps:$4 sm:$0xff]   ;;  %v687_v41 = vcombine.low %v297_v20, %v297_v20 }
  0x1f   : > { %501 = vmatprep.subr.bf16.mxu0 %v759_v11  ;;  %v783_v29 = vld [vmem:[%s877_s25 + $0xa4] ss:$8 sps:$4 sm:$0xff]   ;;  %v785_v30 = vld [vmem:[%s877_s25 + $0xa0] ss:$8 sps:$4 sm:$0xff]   ;;  %v786_v31 = vld [vmem:[%s877_s25 + $0xb4] ss:$8 sps:$4 sm:$0xff]  }
  0x20   : > { %529 = vmatprep.mubr.bf16.mxu0 %v688_v21  ;;  %v788_v32 = vld [vmem:[%s877_s25 + $0xb0] ss:$8 sps:$4 sm:$0xff]   ;;  %v789_v33 = vld [vmem:[%s877_s25 + $0xc4] ss:$8 sps:$4 sm:$0xff]   ;;  %v791_v34 = vld [vmem:[%s877_s25 + $0xc0] ss:$8 sps:$4 sm:$0xff]  }
  0x21   : > { %v792_v35 = vld [vmem:[%s877_s25 + $0xd4] ss:$8 sps:$4 sm:$0xff]   ;;  %v794_v36 = vld [vmem:[%s877_s25 + $0xd0] ss:$8 sps:$4 sm:$0xff]   ;;  %v795_v37 = vld [vmem:[%s877_s25 + $0xe4] ss:$8 sps:$4 sm:$0xff]  }
  0x22   : > { %502 = vmatpush1.bf16.msra.mxu0 %v761_v12  ;;  %v797_v38 = vld [vmem:[%s877_s25 + $0xe0] ss:$8 sps:$4 sm:$0xff]   ;;  %v798_v39 = vld [vmem:[%s877_s25 + $0xf4] ss:$8 sps:$4 sm:$0xff]   ;;  %v800_v40 = vld [vmem:[%s877_s25 + $0xf0] ss:$8 sps:$4 sm:$0xff]  }
  0x23   : > { %503 = vmatprep.subr.bf16.mxu0 %v762_v13  ;;  %v295_v42 = vld [vmem:[#allocation2] sm:$0xff]  ;;  %v296_v43 = vld [vmem:[#allocation2 + $0x8] sm:$0xff] }
  0x26   : > { %504 = vmatpush1.bf16.msra.mxu0 %v764_v14 }
  0x27   : > { %505 = vmatprep.subr.bf16.mxu0 %v765_v15 }
  0x2a   : > { %506 = vmatpush1.bf16.msra.mxu0 %v767_v16 }
  0x2b   : > { %507 = vmatprep.subr.bf16.mxu0 %v768_v17 }
  0x2e   : > { %508 = vmatpush1.bf16.msra.mxu0 %v770_v18 }
  0x2f   : > { %509 = vmatprep.subr.bf16.mxu0 %v771_v19 }
  0x32   : > { %510 = vmatpush1.bf16.msra.mxu0 %v773_v22 }
  0x33   : > { %511 = vmatprep.subr.bf16.mxu0 %v774_v23 }
  0x36   : > { %512 = vmatpush1.bf16.msra.mxu0 %v776_v24 }
  0x37   : > { %513 = vmatprep.subr.bf16.mxu0 %v777_v25 }
  0x3a   : > { %514 = vmatpush1.bf16.msra.mxu0 %v779_v26 }
  0x3b   : > { %515 = vmatprep.subr.bf16.mxu0 %v780_v27 }
  0x3e   : > { %516 = vmatpush1.bf16.msra.mxu0 %v782_v28 }
  0x3f   : > { %517 = vmatprep.subr.bf16.mxu0 %v783_v29 }
  0x42   : > { %518 = vmatpush1.bf16.msra.mxu0 %v785_v30 }
  0x43   : > { %519 = vmatprep.subr.bf16.mxu0 %v786_v31 }
  0x46   : > { %520 = vmatpush1.bf16.msra.mxu0 %v788_v32 }
  0x47   : > { %521 = vmatprep.subr.bf16.mxu0 %v789_v33 }
  0x4a   : > { %522 = vmatpush1.bf16.msra.mxu0 %v791_v34 }
  0x4b   : > { %523 = vmatprep.subr.bf16.mxu0 %v792_v35 }
  0x4e   : > { %524 = vmatpush1.bf16.msra.mxu0 %v794_v36 }
  0x4f   : > { %525 = vmatprep.subr.bf16.mxu0 %v795_v37 }
  0x52   : > { %526 = vmatpush1.bf16.msra.mxu0 %v797_v38 }
  0x53   : > { %527 = vmatprep.subr.bf16.mxu0 %v798_v39 }
  0x56   : > { %528 = vmatpush1.bf16.msra.mxu0 %v800_v40 }
  0x59   : > { %530 = vmatmul.mubr.bf16.vlgmr.msra.gmra.mrb[0].mxu0 %v687_v41 }
 0x12a   : > { %545 = sbr.rel (%p721_p7) target bundleno = 317 (0x13d), region = 40 }
 0x12c   : > { %v531_v44 = vpop.f32.mrb[0].mxu0 }
 0x12d   : > { %v538_v45 = vadd.f32 %v531_v44, %v295_v42  ;;  %v533_v46 = vpop.f32.mrb[1].mxu0 }
 0x12e   : > { %v539_v47 = vadd.f32 %v533_v46, %v296_v43  ;;  %v535_v48 = vpop.f32.mrb[2].mxu0 }
 0x12f   : > { %540 = vst [vmem:[#allocation2] sm:$0xff] %v538_v45  ;;  %v536_v49 = vpop.f32.mrb[3].mxu0 }
 0x130   : > { %541 = vst [vmem:[#allocation2 + $0x8] sm:$0xff] %v539_v47 }
 0x136   : > { %v546_v50 = vld [vmem:[#allocation2] sm:$0xff] }
 0x137   : > { %v547_v51 = vld [vmem:[#allocation2 + $0x8] sm:$0xff]  ;;  %v548_v52 = vmax.f32 %v546_v50, 0.0 }
 0x138   : > { %v549_v53 = vmax.f32 %v547_v51, 0.0 }
 0x13a   : > { %v728_v54 = vpack.c.bf16 %v549_v53, %v548_v52 }
 0x13c   : > { %558 = vst [vmem:[%s932_s3] sm:$0xff] %v728_v54 }
 0x13d PF: > { %s13_s14 = sadd.s32 1, %s825_s14   ;;  %s933_s12 = smov %s821_s13 }
 0x13e   : > { %p10_p8 = scmp.ge.s32.totalorder %s13_s14, 7   ;;  %s934_s13 = smov %s936_s15 }
 0x140   :  { %12 = sbr.rel (!%p10_p8) target bundleno = 2 (0x2), region = 76 }

// kernel: _lambda_.16
= control target key start
LH: loop header
LB: loop body
LE: loop exit
PB: predicated region body
PF: predicated region fallthrough
CT: control target
= control target key end

     0   :  { %s847_s12 = smov 0   ;;  %s849_s13 = smov 0   ;;  %s929_s0 = inlined_call_operand.vmem [shape: bf16[8,2304], index: 0, kind: input, shape index: {}]   ;;  %s930_s1 = inlined_call_operand.vmem [shape: bf16[2304,256], index: 1, kind: input, shape index: {}]   ;;  %s931_s2 = inlined_call_operand.vmem [shape: f32[1,256], index: 2, kind: input, shape index: {}]   ;;  %s932_s3 = inlined_call_operand.vmem [shape: bf16[8,256], index: 3, kind: output, shape index: {}]  }
   0x1   :  { %s851_s14 = smov 0  }
   0x2 LB: > { %s25_s15 = sadd.s32 1, %s821_s13  ;;  %p680_p0 = scmp.ge.s32.totalorder %s825_s14, 1  ;;  %s825_s14 = sphi %s851_s14, %s13_s14   ;;  %s821_s13 = sphi %s849_s13, %s934_s13   ;;  %s817_s12 = sphi %s847_s12, %s933_s12  }
   0x3   : > { %p26_p1 = scmp.ge.s32.totalorder %s25_s15, 9  ;;  %p194_p2 = scmp.lt.s32.totalorder %s825_s14, 10 }
   0x5   : > { %s936_s15 = smov (%p26_p1, %s25_s15), 0  ;;  %p195_p3 = pnand %p680_p0, %p194_p2 }
   0x6   : > { %s681_s16 = sshll.u32 (!%p195_p3), %s817_s12, 1  ;;  %s683_s17 = sshll.u32 (!%p195_p3), %s817_s12, 5 }
   0x7   : > { %198 = sbr.rel (%p195_p3) target bundleno = 317 (0x13d), region = 32  ;;  %p243_p4 = scmp.lt.s32.totalorder (!%p195_p3), %s681_s16, 17 }
   0x8   : > { %p252_p5 = scmp.lt.s32.totalorder (!%p195_p3), %s683_s17, 287  ;;  %p686_p6 = scmp.ne.s32.totalorder (!%p195_p3), %s817_s12, 0 }
   0xe   : > { %s938_s16 = smov (!%p243_p4, %s681_s16), 17  ;;  %s940_s17 = smov (!%p252_p5, %s683_s17), 287 }
   0xf   : > { %s682_s18 = sshll.u32 %s938_s16, 2  ;;  %s727_s22 = sshll.u32 %s940_s17, 3  ;;  %v283_v0 = vlaneseq (!%p686_p6)  ;;  %v281_v2 = vld [vmem:[%s931_s2] sm:$0x3] (!%p686_p6) }
  0x10   : > { %s872_s21 = scalar_lea.vmem %s929_s0, %s682_s18  ;;  %s877_s25 = scalar_lea.vmem %s930_s1, %s727_s22 }
  0x11   : > { %280 = sbr.rel (%p686_p6) target bundleno = 24 (0x18), region = 36  ;;  %v284_v1 = vshrl.u32 (!%p686_p6), %v283_v0, 7 }
  0x13   : > { %v285_v3 = vsub.s32 (!%p686_p6), 0, %v284_v1  ;;  %v289_v4 = vsub.s32 (!%p686_p6), 1, %v284_v1 }
  0x15   : > { %v286_v5 = vrot.slane (!%p686_p6), %v281_v2, %v285_v3  ;;  %v290_v6 = vrot.slane (!%p686_p6), %v281_v2, %v289_v4 }
  0x17   : > { %293 = vst [vmem:[#allocation2] sm:$0xff] (!%p686_p6), %v286_v5  ;;  %294 = vst [vmem:[#allocation2 + $0x8] sm:$0xff] (!%p686_p6), %v290_v6 }
  0x18 PF: > { %v753_v7 = vld [vmem:[%s877_s25 + $0x4] ss:$8 sps:$4 sm:$0xff]   ;;  %v755_v8 = vld [vmem:[%s877_s25] ss:$8 sps:$4 sm:$0xff]   ;;  %v756_v9 = vld [vmem:[%s877_s25 + $0x14] ss:$8 sps:$4 sm:$0xff]  }
  0x19   : > { %497 = vmatprep.subr.bf16.mxu0 %v753_v7  ;;  %v758_v10 = vld [vmem:[%s877_s25 + $0x10] ss:$8 sps:$4 sm:$0xff]   ;;  %v759_v11 = vld [vmem:[%s877_s25 + $0x24] ss:$8 sps:$4 sm:$0xff]   ;;  %v761_v12 = vld [vmem:[%s877_s25 + $0x20] ss:$8 sps:$4 sm:$0xff]  }
  0x1a   : > { %498 = vmatpush1.bf16.msra.mxu0 %v755_v8  ;;  %v762_v13 = vld [vmem:[%s877_s25 + $0x34] ss:$8 sps:$4 sm:$0xff]   ;;  %v764_v14 = vld [vmem:[%s877_s25 + $0x30] ss:$8 sps:$4 sm:$0xff]   ;;  %v765_v15 = vld [vmem:[%s877_s25 + $0x44] ss:$8 sps:$4 sm:$0xff]  }
  0x1b   : > { %499 = vmatprep.subr.bf16.mxu0 %v756_v9  ;;  %v767_v16 = vld [vmem:[%s877_s25 + $0x40] ss:$8 sps:$4 sm:$0xff]   ;;  %v768_v17 = vld [vmem:[%s877_s25 + $0x54] ss:$8 sps:$4 sm:$0xff]   ;;  %v770_v18 = vld [vmem:[%s877_s25 + $0x50] ss:$8 sps:$4 sm:$0xff]  }
  0x1c   : > { %v771_v19 = vld [vmem:[%s877_s25 + $0x64] ss:$8 sps:$4 sm:$0xff]   ;;  %v773_v22 = vld [vmem:[%s877_s25 + $0x60] ss:$8 sps:$4 sm:$0xff]   ;;  %v774_v23 = vld [vmem:[%s877_s25 + $0x74] ss:$8 sps:$4 sm:$0xff]  }
  0x1d   : > { %v297_v20 = vld [vmem:[%s872_s21] sm:$0xff]  ;;  %v776_v24 = vld [vmem:[%s877_s25 + $0x70] ss:$8 sps:$4 sm:$0xff]   ;;  %v780_v27 = vld [vmem:[%s877_s25 + $0x94] ss:$8 sps:$4 sm:$0xff]   ;;  %p721_p7 = scmp.ne.s32.totalorder %s817_s12, 8 }
  0x1e   : > { %500 = vmatpush1.bf16.msra.mxu0 %v758_v10  ;;  %v688_v21 = vcombine.high %v297_v20, %v297_v20  ;;  %v777_v25 = vld [vmem:[%s877_s25 + $0x84] ss:$8 sps:$4 sm:$0xff]   ;;  %v779_v26 = vld [vmem:[%s877_s25 + $0x80] ss:$8 sps:$4 sm:$0xff]   ;;  %v782_v28 = vld [vmem:[%s877_s25 + $0x90] ss:$8 sps:$4 sm:$0xff]   ;;  %v687_v41 = vcombine.low %v297_v20, %v297_v20 }
  0x1f   : > { %501 = vmatprep.subr.bf16.mxu0 %v759_v11  ;;  %v783_v29 = vld [vmem:[%s877_s25 + $0xa4] ss:$8 sps:$4 sm:$0xff]   ;;  %v785_v30 = vld [vmem:[%s877_s25 + $0xa0] ss:$8 sps:$4 sm:$0xff]   ;;  %v786_v31 = vld [vmem:[%s877_s25 + $0xb4] ss:$8 sps:$4 sm:$0xff]  }
  0x20   : > { %529 = vmatprep.mubr.bf16.mxu0 %v688_v21  ;;  %v788_v32 = vld [vmem:[%s877_s25 + $0xb0] ss:$8 sps:$4 sm:$0xff]   ;;  %v789_v33 = vld [vmem:[%s877_s25 + $0xc4] ss:$8 sps:$4 sm:$0xff]   ;;  %v791_v34 = vld [vmem:[%s877_s25 + $0xc0] ss:$8 sps:$4 sm:$0xff]  }
  0x21   : > { %v792_v35 = vld [vmem:[%s877_s25 + $0xd4] ss:$8 sps:$4 sm:$0xff]   ;;  %v794_v36 = vld [vmem:[%s877_s25 + $0xd0] ss:$8 sps:$4 sm:$0xff]   ;;  %v795_v37 = vld [vmem:[%s877_s25 + $0xe4] ss:$8 sps:$4 sm:$0xff]  }
  0x22   : > { %502 = vmatpush1.bf16.msra.mxu0 %v761_v12  ;;  %v797_v38 = vld [vmem:[%s877_s25 + $0xe0] ss:$8 sps:$4 sm:$0xff]   ;;  %v798_v39 = vld [vmem:[%s877_s25 + $0xf4] ss:$8 sps:$4 sm:$0xff]   ;;  %v800_v40 = vld [vmem:[%s877_s25 + $0xf0] ss:$8 sps:$4 sm:$0xff]  }
  0x23   : > { %503 = vmatprep.subr.bf16.mxu0 %v762_v13  ;;  %v295_v42 = vld [vmem:[#allocation2] sm:$0xff]  ;;  %v296_v43 = vld [vmem:[#allocation2 + $0x8] sm:$0xff] }
  0x26   : > { %504 = vmatpush1.bf16.msra.mxu0 %v764_v14 }
  0x27   : > { %505 = vmatprep.subr.bf16.mxu0 %v765_v15 }
  0x2a   : > { %506 = vmatpush1.bf16.msra.mxu0 %v767_v16 }
  0x2b   : > { %507 = vmatprep.subr.bf16.mxu0 %v768_v17 }
  0x2e   : > { %508 = vmatpush1.bf16.msra.mxu0 %v770_v18 }
  0x2f   : > { %509 = vmatprep.subr.bf16.mxu0 %v771_v19 }
  0x32   : > { %510 = vmatpush1.bf16.msra.mxu0 %v773_v22 }
  0x33   : > { %511 = vmatprep.subr.bf16.mxu0 %v774_v23 }
  0x36   : > { %512 = vmatpush1.bf16.msra.mxu0 %v776_v24 }
  0x37   : > { %513 = vmatprep.subr.bf16.mxu0 %v777_v25 }
  0x3a   : > { %514 = vmatpush1.bf16.msra.mxu0 %v779_v26 }
  0x3b   : > { %515 = vmatprep.subr.bf16.mxu0 %v780_v27 }
  0x3e   : > { %516 = vmatpush1.bf16.msra.mxu0 %v782_v28 }
  0x3f   : > { %517 = vmatprep.subr.bf16.mxu0 %v783_v29 }
  0x42   : > { %518 = vmatpush1.bf16.msra.mxu0 %v785_v30 }
  0x43   : > { %519 = vmatprep.subr.bf16.mxu0 %v786_v31 }
  0x46   : > { %520 = vmatpush1.bf16.msra.mxu0 %v788_v32 }
  0x47   : > { %521 = vmatprep.subr.bf16.mxu0 %v789_v33 }
  0x4a   : > { %522 = vmatpush1.bf16.msra.mxu0 %v791_v34 }
  0x4b   : > { %523 = vmatprep.subr.bf16.mxu0 %v792_v35 }
  0x4e   : > { %524 = vmatpush1.bf16.msra.mxu0 %v794_v36 }
  0x4f   : > { %525 = vmatprep.subr.bf16.mxu0 %v795_v37 }
  0x52   : > { %526 = vmatpush1.bf16.msra.mxu0 %v797_v38 }
  0x53   : > { %527 = vmatprep.subr.bf16.mxu0 %v798_v39 }
  0x56   : > { %528 = vmatpush1.bf16.msra.mxu0 %v800_v40 }
  0x59   : > { %530 = vmatmul.mubr.bf16.vlgmr.msra.gmra.mrb[0].mxu0 %v687_v41 }
 0x12a   : > { %545 = sbr.rel (%p721_p7) target bundleno = 317 (0x13d), region = 40 }
 0x12c   : > { %v531_v44 = vpop.f32.mrb[0].mxu0 }
 0x12d   : > { %v538_v45 = vadd.f32 %v531_v44, %v295_v42  ;;  %v533_v46 = vpop.f32.mrb[1].mxu0 }
 0x12e   : > { %v539_v47 = vadd.f32 %v533_v46, %v296_v43  ;;  %v535_v48 = vpop.f32.mrb[2].mxu0 }
 0x12f   : > { %540 = vst [vmem:[#allocation2] sm:$0xff] %v538_v45  ;;  %v536_v49 = vpop.f32.mrb[3].mxu0 }
 0x130   : > { %541 = vst [vmem:[#allocation2 + $0x8] sm:$0xff] %v539_v47 }
 0x136   : > { %v546_v50 = vld [vmem:[#allocation2] sm:$0xff] }
 0x137   : > { %v547_v51 = vld [vmem:[#allocation2 + $0x8] sm:$0xff]  ;;  %v548_v52 = vmax.f32 %v546_v50, 0.0 }
 0x138   : > { %v549_v53 = vmax.f32 %v547_v51, 0.0 }
 0x13a   : > { %v728_v54 = vpack.c.bf16 %v549_v53, %v548_v52 }
 0x13c   : > { %558 = vst [vmem:[%s932_s3] sm:$0xff] %v728_v54 }
 0x13d PF: > { %s13_s14 = sadd.s32 1, %s825_s14   ;;  %s933_s12 = smov %s821_s13 }
 0x13e   : > { %p10_p8 = scmp.ge.s32.totalorder %s13_s14, 11   ;;  %s934_s13 = smov %s936_s15 }
 0x140   :  { %12 = sbr.rel (!%p10_p8) target bundleno = 2 (0x2), region = 76 }

// kernel: _lambda_.17
= control target key start
LH: loop header
LB: loop body
LE: loop exit
PB: predicated region body
PF: predicated region fallthrough
CT: control target
= control target key end

     0   :  { %v20_v35 = vlaneseq  ;;  %s510_s1 = inlined_call_operand.vmem [shape: bf16[256,256], index: 1, kind: input, shape index: {}]   ;;  %s511_s0 = inlined_call_operand.vmem [shape: bf16[8,256], index: 0, kind: input, shape index: {}]   ;;  %s512_s2 = inlined_call_operand.vmem [shape: f32[1,256], index: 2, kind: input, shape index: {}]   ;;  %s513_s3 = inlined_call_operand.vmem [shape: bf16[8,256], index: 3, kind: output, shape index: {}]  }
   0x1   :  { %v335_v0 = vld [vmem:[%s510_s1 + $0x4] ss:$8 sps:$4 sm:$0xff]   ;;  %v337_v1 = vld [vmem:[%s510_s1] ss:$8 sps:$4 sm:$0xff]   ;;  %v338_v2 = vld [vmem:[%s510_s1 + $0x14] ss:$8 sps:$4 sm:$0xff]  }
   0x2   :  { %234 = vmatprep.subr.bf16.mxu0 %v335_v0  ;;  %v340_v3 = vld [vmem:[%s510_s1 + $0x10] ss:$8 sps:$4 sm:$0xff]   ;;  %v341_v4 = vld [vmem:[%s510_s1 + $0x24] ss:$8 sps:$4 sm:$0xff]   ;;  %v343_v5 = vld [vmem:[%s510_s1 + $0x20] ss:$8 sps:$4 sm:$0xff]  }
   0x3   :  { %235 = vmatpush1.bf16.msra.mxu0 %v337_v1  ;;  %v344_v6 = vld [vmem:[%s510_s1 + $0x34] ss:$8 sps:$4 sm:$0xff]   ;;  %v346_v7 = vld [vmem:[%s510_s1 + $0x30] ss:$8 sps:$4 sm:$0xff]   ;;  %v347_v8 = vld [vmem:[%s510_s1 + $0x44] ss:$8 sps:$4 sm:$0xff]  }
   0x4   :  { %236 = vmatprep.subr.bf16.mxu0 %v338_v2  ;;  %v349_v9 = vld [vmem:[%s510_s1 + $0x40] ss:$8 sps:$4 sm:$0xff]   ;;  %v350_v10 = vld [vmem:[%s510_s1 + $0x54] ss:$8 sps:$4 sm:$0xff]   ;;  %v352_v11 = vld [vmem:[%s510_s1 + $0x50] ss:$8 sps:$4 sm:$0xff]  }
   0x5   :  { %v353_v12 = vld [vmem:[%s510_s1 + $0x64] ss:$8 sps:$4 sm:$0xff]   ;;  %v355_v15 = vld [vmem:[%s510_s1 + $0x60] ss:$8 sps:$4 sm:$0xff]   ;;  %v356_v16 = vld [vmem:[%s510_s1 + $0x74] ss:$8 sps:$4 sm:$0xff]  }
   0x6   :  { %v34_v13 = vld [vmem:[%s511_s0] sm:$0xff]  ;;  %v358_v17 = vld [vmem:[%s510_s1 + $0x70] ss:$8 sps:$4 sm:$0xff]   ;;  %v362_v20 = vld [vmem:[%s510_s1 + $0x94] ss:$8 sps:$4 sm:$0xff]   ;;  %v21_v36 = vshrl.u32 %v20_v35, 7 }
   0x7   :  { %237 = vmatpush1.bf16.msra.mxu0 %v340_v3  ;;  %v300_v14 = vcombine.high %v34_v13, %v34_v13  ;;  %v359_v18 = vld [vmem:[%s510_s1 + $0x84] ss:$8 sps:$4 sm:$0xff]   ;;  %v361_v19 = vld [vmem:[%s510_s1 + $0x80] ss:$8 sps:$4 sm:$0xff]   ;;  %v364_v21 = vld [vmem:[%s510_s1 + $0x90] ss:$8 sps:$4 sm:$0xff]   ;;  %v299_v34 = vcombine.low %v34_v13, %v34_v13 }
   0x8   :  { %238 = vmatprep.subr.bf16.mxu0 %v341_v4  ;;  %v365_v22 = vld [vmem:[%s510_s1 + $0xa4] ss:$8 sps:$4 sm:$0xff]   ;;  %v367_v23 = vld [vmem:[%s510_s1 + $0xa0] ss:$8 sps:$4 sm:$0xff]   ;;  %v368_v24 = vld [vmem:[%s510_s1 + $0xb4] ss:$8 sps:$4 sm:$0xff]  }
   0x9   :  { %266 = vmatprep.mubr.bf16.mxu0 %v300_v14  ;;  %v370_v25 = vld [vmem:[%s510_s1 + $0xb0] ss:$8 sps:$4 sm:$0xff]   ;;  %v371_v26 = vld [vmem:[%s510_s1 + $0xc4] ss:$8 sps:$4 sm:$0xff]   ;;  %v373_v27 = vld [vmem:[%s510_s1 + $0xc0] ss:$8 sps:$4 sm:$0xff]  }
   0xa   :  { %v374_v28 = vld [vmem:[%s510_s1 + $0xd4] ss:$8 sps:$4 sm:$0xff]   ;;  %v376_v29 = vld [vmem:[%s510_s1 + $0xd0] ss:$8 sps:$4 sm:$0xff]   ;;  %v377_v30 = vld [vmem:[%s510_s1 + $0xe4] ss:$8 sps:$4 sm:$0xff]  }
   0xb   :  { %239 = vmatpush1.bf16.msra.mxu0 %v343_v5  ;;  %v379_v31 = vld [vmem:[%s510_s1 + $0xe0] ss:$8 sps:$4 sm:$0xff]   ;;  %v380_v32 = vld [vmem:[%s510_s1 + $0xf4] ss:$8 sps:$4 sm:$0xff]   ;;  %v382_v33 = vld [vmem:[%s510_s1 + $0xf0] ss:$8 sps:$4 sm:$0xff]  }
   0xc   :  { %240 = vmatprep.subr.bf16.mxu0 %v344_v6  ;;  %v22_v37 = vsub.s32 0, %v21_v36  ;;  %v18_v38 = vld [vmem:[%s512_s2] sm:$0x3]  ;;  %v26_v39 = vsub.s32 1, %v21_v36 }
   0xe   :  { %v23_v40 = vrot.slane %v18_v38, %v22_v37  ;;  %v27_v41 = vrot.slane %v18_v38, %v26_v39 }
   0xf   :  { %241 = vmatpush1.bf16.msra.mxu0 %v346_v7 }
  0x10   :  { %242 = vmatprep.subr.bf16.mxu0 %v347_v8 }
  0x13   :  { %243 = vmatpush1.bf16.msra.mxu0 %v349_v9 }
  0x14   :  { %244 = vmatprep.subr.bf16.mxu0 %v350_v10 }
  0x17   :  { %245 = vmatpush1.bf16.msra.mxu0 %v352_v11 }
  0x18   :  { %246 = vmatprep.subr.bf16.mxu0 %v353_v12 }
  0x1b   :  { %247 = vmatpush1.bf16.msra.mxu0 %v355_v15 }
  0x1c   :  { %248 = vmatprep.subr.bf16.mxu0 %v356_v16 }
  0x1f   :  { %249 = vmatpush1.bf16.msra.mxu0 %v358_v17 }
  0x20   :  { %250 = vmatprep.subr.bf16.mxu0 %v359_v18 }
  0x23   :  { %251 = vmatpush1.bf16.msra.mxu0 %v361_v19 }
  0x24   :  { %252 = vmatprep.subr.bf16.mxu0 %v362_v20 }
  0x27   :  { %253 = vmatpush1.bf16.msra.mxu0 %v364_v21 }
  0x28   :  { %254 = vmatprep.subr.bf16.mxu0 %v365_v22 }
  0x2b   :  { %255 = vmatpush1.bf16.msra.mxu0 %v367_v23 }
  0x2c   :  { %256 = vmatprep.subr.bf16.mxu0 %v368_v24 }
  0x2f   :  { %257 = vmatpush1.bf16.msra.mxu0 %v370_v25 }
  0x30   :  { %258 = vmatprep.subr.bf16.mxu0 %v371_v26 }
  0x33   :  { %259 = vmatpush1.bf16.msra.mxu0 %v373_v27 }
  0x34   :  { %260 = vmatprep.subr.bf16.mxu0 %v374_v28 }
  0x37   :  { %261 = vmatpush1.bf16.msra.mxu0 %v376_v29 }
  0x38   :  { %262 = vmatprep.subr.bf16.mxu0 %v377_v30 }
  0x3b   :  { %263 = vmatpush1.bf16.msra.mxu0 %v379_v31 }
  0x3c   :  { %264 = vmatprep.subr.bf16.mxu0 %v380_v32 }
  0x3f   :  { %265 = vmatpush1.bf16.msra.mxu0 %v382_v33 }
  0x42   :  { %267 = vmatmul.mubr.bf16.vlgmr.msra.gmra.mrb[0].mxu0 %v299_v34 }
 0x115   :  { %v268_v42 = vpop.f32.mrb[0].mxu0 }
 0x116   :  { %v275_v43 = vadd.f32 %v268_v42, %v23_v40  ;;  %v270_v44 = vpop.f32.mrb[1].mxu0 }
 0x117   :  { %v276_v45 = vadd.f32 %v270_v44, %v27_v41  ;;  %v272_v46 = vpop.f32.mrb[2].mxu0 }
 0x118   :  { %v284_v47 = vmax.f32 %v275_v43, 0.0  ;;  %v273_v48 = vpop.f32.mrb[3].mxu0 }
 0x119   :  { %v285_v49 = vmax.f32 %v276_v45, 0.0 }
 0x11b   :  { %v334_v50 = vpack.c.bf16 %v285_v49, %v284_v47 }
 0x11d   :  { %294 = vst [vmem:[%s513_s3] sm:$0xff] %v334_v50 }

// kernel: _lambda_.22
= control target key start
LH: loop header
LB: loop body
LE: loop exit
PB: predicated region body
PF: predicated region fallthrough
CT: control target
= control target key end

     0   :  { %s352_s1 = inlined_call_operand.vmem [shape: bf16[256,128], index: 1, kind: input, shape index: {}]   ;;  %s353_s0 = inlined_call_operand.vmem [shape: bf16[8,256], index: 0, kind: input, shape index: {}]   ;;  %s354_s2 = inlined_call_operand.vmem [shape: f32[1,128], index: 2, kind: input, shape index: {}]   ;;  %s355_s3 = inlined_call_operand.vmem [shape: bf16[8,128], index: 3, kind: output, shape index: {}]  }
   0x1   :  { %v257_v0 = vld [vmem:[%s352_s1 + $0x40] sm:$0xff]   ;;  %v259_v2 = vld [vmem:[%s352_s1 + $0x48] sm:$0xff]   ;;  %v261_v4 = vld [vmem:[%s352_s1 + $0x50] sm:$0xff]  }
   0x2   :  { %v258_v1 = vld [vmem:[%s352_s1] sm:$0xff]   ;;  %235 = vmatprep.subr.bf16.mxu0 %v257_v0  ;;  %v260_v3 = vld [vmem:[%s352_s1 + $0x8] sm:$0xff]   ;;  %v262_v5 = vld [vmem:[%s352_s1 + $0x10] sm:$0xff]  }
   0x3   :  { %236 = vmatpush3.bf16.msra.mxu0 %v258_v1  ;;  %v263_v6 = vld [vmem:[%s352_s1 + $0x58] sm:$0xff]   ;;  %v265_v8 = vld [vmem:[%s352_s1 + $0x60] sm:$0xff]   ;;  %v267_v10 = vld [vmem:[%s352_s1 + $0x68] sm:$0xff]  }
   0x4   :  { %237 = vmatprep.subr.bf16.mxu0 %v259_v2  ;;  %v264_v7 = vld [vmem:[%s352_s1 + $0x18] sm:$0xff]   ;;  %v266_v9 = vld [vmem:[%s352_s1 + $0x20] sm:$0xff]   ;;  %v268_v13 = vld [vmem:[%s352_s1 + $0x28] sm:$0xff]  }
   0x5   :  { %v28_v11 = vld [vmem:[%s353_s0] sm:$0xff]  ;;  %v269_v14 = vld [vmem:[%s352_s1 + $0x70] sm:$0xff]   ;;  %v271_v16 = vld [vmem:[%s352_s1 + $0x78] sm:$0xff]  }
   0x6   :  { %v218_v12 = vcombine.high %v28_v11, %v28_v11  ;;  %v270_v15 = vld [vmem:[%s352_s1 + $0x30] sm:$0xff]   ;;  %v272_v17 = vld [vmem:[%s352_s1 + $0x38] sm:$0xff]   ;;  %v217_v18 = vcombine.low %v28_v11, %v28_v11  ;;  %v216_v20 = vld [vmem:[%s354_s2] ss:$0 sm:$0xff] }
   0x7   :  { %238 = vmatpush3.bf16.msra.mxu0 %v260_v3 }
   0x8   :  { %239 = vmatprep.subr.bf16.mxu0 %v261_v4  ;;  %196 = vmatprep.mubr.bf16.mxu0 %v218_v12 }
   0xb   :  { %240 = vmatpush3.bf16.msra.mxu0 %v262_v5 }
   0xc   :  { %241 = vmatprep.subr.bf16.mxu0 %v263_v6 }
   0xf   :  { %242 = vmatpush3.bf16.msra.mxu0 %v264_v7 }
  0x10   :  { %243 = vmatprep.subr.bf16.mxu0 %v265_v8 }
  0x13   :  { %244 = vmatpush3.bf16.msra.mxu0 %v266_v9 }
  0x14   :  { %245 = vmatprep.subr.bf16.mxu0 %v267_v10 }
  0x17   :  { %246 = vmatpush3.bf16.msra.mxu0 %v268_v13 }
  0x18   :  { %247 = vmatprep.subr.bf16.mxu0 %v269_v14 }
  0x1b   :  { %248 = vmatpush3.bf16.msra.mxu0 %v270_v15 }
  0x1c   :  { %249 = vmatprep.subr.bf16.mxu0 %v271_v16 }
  0x1f   :  { %250 = vmatpush3.bf16.msra.mxu0 %v272_v17 }
  0x22   :  { %197 = vmatmul.mubr.bf16.vlgmr.msra.gmra.mrb[0].mxu0 %v217_v18 }
  0xf5   :  { %v251_v19 = vpop.f32.mrb[0].mxu0 }
  0xf6   :  { %v252_v21 = vpop.f32.mrb[1].mxu0 }
  0xf7   :  { %v253_v22 = vadd.f32 %v252_v21, %v251_v19  ;;  %v254_v23 = vpop.f32.mrb[2].mxu0 }
  0xf8   :  { %v255_v24 = vpop.f32.mrb[3].mxu0 }
  0xf9   :  { %v204_v25 = vadd.f32 %v253_v22, %v216_v20 }
  0xfb   :  { %v210_v26 = vpack.c.bf16 %v204_v25, %v204_v25 }
  0xfd   :  { %211 = vst [vmem:[%s355_s3] sm:$0xf] %v210_v26 }

// kernel: _lambda_.19
= control target key start
LH: loop header
LB: loop body
LE: loop exit
PB: predicated region body
PF: predicated region fallthrough
CT: control target
= control target key end

     0   :  { %s1066_s12 = smov 0   ;;  %s1068_s13 = smov 0   ;;  %s1271_s0 = inlined_call_operand.vmem [shape: bf16[8,2304], index: 0, kind: input, shape index: {}]   ;;  %s1272_s1 = inlined_call_operand.vmem [shape: bf16[2304,512], index: 1, kind: input, shape index: {}]   ;;  %s1273_s2 = inlined_call_operand.vmem [shape: f32[1,512], index: 2, kind: input, shape index: {}]   ;;  %s1274_s3 = inlined_call_operand.vmem [shape: bf16[8,512], index: 3, kind: output, shape index: {}]  }
   0x1   :  { %s1070_s14 = smov 0   ;;  %s1072_s15 = smov 0  }
   0x2   :  { %s1074_s16 = smov 0   ;;  %s1076_s17 = smov 0  }
   0x3   :  { %s1078_s18 = smov 0  }
   0x4 LB: > { %s25_s19 = sadd.s32 1, %s1036_s16  ;;  %s28_s20 = sadd.s32 1, %s1040_s17  ;;  %s1044_s18 = sphi %s1078_s18, %s13_s18   ;;  %s1040_s17 = sphi %s1076_s17, %s1280_s17   ;;  %s1036_s16 = sphi %s1074_s16, %s1279_s16   ;;  %s1032_s15 = sphi %s1072_s15, %s1278_s15   ;;  %s1028_s14 = sphi %s1070_s14, %s1277_s14   ;;  %s1024_s13 = sphi %s1068_s13, %s1276_s13   ;;  %s1020_s12 = sphi %s1066_s12, %s1275_s12  }
   0x5   : > { %p26_p0 = scmp.ge.s32.totalorder %s25_s19, 9  ;;  %p76_p1 = scmp.ne.s32.totalorder %s1024_s13, %s1020_s12 }
   0x6   : > { %p77_p2 = scmp.eq.s32.totalorder %s1044_s18, 0  ;;  %s69_s24 = sadd.s32 1, %s1024_s13 }
   0x7   : > { %s1282_s19 = smov (%p26_p0, %s25_s19), 0  ;;  %s1284_s20 = smov (!%p26_p0, %s28_s20), %s1040_s17 }
   0x8   : > { %p78_p3 = por %p77_p2, %p76_p1  ;;  %p30_p4 = scmp.ge.s32.totalorder %s1284_s20, 2 }
   0x9   : > { %s64_s21 = ssub.s32 %s1036_s16, %s1282_s19  ;;  %p830_p6 = scmp.ge.s32.totalorder %s1044_s18, 18 }
   0xa   : > { %s1286_s20 = smov (%p30_p4, %s1284_s20), 0 }
   0xb   : > { %s65_s22 = ssub.s32 %s1040_s17, %s1286_s20  ;;  %156 = sbr.rel (%p830_p6) target bundleno = 41 (0x29), region = 16 }
   0xc   : > { %s66_s23 = sor.u32 %s65_s22, %s64_s21 }
   0xd   : > { %p67_p5 = scmp.eq.s32.totalorder %s66_s23, 0 }
   0xf   : > { %s1117_s25 = scalar_select %p67_p5, %s1024_s13, %s69_s24  }
  0x12   : > { %172 = sbr.rel (!%p78_p3) target bundleno = 41 (0x29), region = 24  ;;  %s174_s26 = sand.u32 (%p78_p3), 1, %s1024_s13  }
  0x13   : > { %s833_s27 = sshll.u32 (%p78_p3), %s1040_s17, 1  ;;  %s831_s28 = sshll.u32 (%p78_p3), %s174_s26, 8 }
  0x14   : > { %s882_s29 = sshll.u32 (%p78_p3), %s1036_s16, 7  ;;  %s1131_s8 = scalar_lea.vmem (%p78_p3), [#allocation3], %s831_s28 }
  0x15   : > { %s180_s30 = sadd.s32 (%p78_p3), %s882_s29, %s833_s27 }
  0x16   : > { %s835_s4 = sshll.u32 (%p78_p3), %s180_s30, 2 }
  0x17   : > { %s1126_s7 = scalar_lea.vmem (%p78_p3), %s1272_s1, %s835_s4 }
  0x18   : > { %v272_v0 = vld [vmem:[%s1126_s7] sm:$0xff] (%p78_p3)  ;;  %v274_v1 = vld [vmem:[%s1126_s7 + $0x10] sm:$0xff] (%p78_p3) }
  0x19   : > { %v276_v2 = vld [vmem:[%s1126_s7 + $0x20] sm:$0xff]  ;;  %273 = vst [vmem:[%s1131_s8] sm:$0xff] %v272_v0  ;;  %275 = vst [vmem:[%s1131_s8 + $0x8] sm:$0xff] %v274_v1  ;;  %v278_v3 = vld [vmem:[%s1126_s7 + $0x30] sm:$0xff] }
  0x1a   : > { %277 = vst [vmem:[%s1131_s8 + $0x10] sm:$0xff] %v276_v2  ;;  %v280_v4 = vld [vmem:[%s1126_s7 + $0x40] sm:$0xff]  ;;  %v282_v5 = vld [vmem:[%s1126_s7 + $0x50] sm:$0xff]  ;;  %279 = vst [vmem:[%s1131_s8 + $0x18] sm:$0xff] %v278_v3 }
  0x1b   : > { %281 = vst [vmem:[%s1131_s8 + $0x20] sm:$0xff] %v280_v4  ;;  %283 = vst [vmem:[%s1131_s8 + $0x28] sm:$0xff] %v282_v5  ;;  %v284_v6 = vld [vmem:[%s1126_s7 + $0x60] sm:$0xff]  ;;  %v286_v7 = vld [vmem:[%s1126_s7 + $0x70] sm:$0xff] }
  0x1c   : > { %v288_v8 = vld [vmem:[%s1126_s7 + $0x80] sm:$0xff]  ;;  %285 = vst [vmem:[%s1131_s8 + $0x30] sm:$0xff] %v284_v6  ;;  %287 = vst [vmem:[%s1131_s8 + $0x38] sm:$0xff] %v286_v7  ;;  %v290_v9 = vld [vmem:[%s1126_s7 + $0x90] sm:$0xff] }
  0x1d   : > { %289 = vst [vmem:[%s1131_s8 + $0x40] sm:$0xff] %v288_v8  ;;  %v292_v10 = vld [vmem:[%s1126_s7 + $0xa0] sm:$0xff]  ;;  %v294_v11 = vld [vmem:[%s1126_s7 + $0xb0] sm:$0xff]  ;;  %291 = vst [vmem:[%s1131_s8 + $0x48] sm:$0xff] %v290_v9 }
  0x1e   : > { %293 = vst [vmem:[%s1131_s8 + $0x50] sm:$0xff] %v292_v10  ;;  %295 = vst [vmem:[%s1131_s8 + $0x58] sm:$0xff] %v294_v11  ;;  %v296_v12 = vld [vmem:[%s1126_s7 + $0xc0] sm:$0xff]  ;;  %v298_v13 = vld [vmem:[%s1126_s7 + $0xd0] sm:$0xff] }
  0x1f   : > { %v300_v14 = vld [vmem:[%s1126_s7 + $0xe0] sm:$0xff]  ;;  %297 = vst [vmem:[%s1131_s8 + $0x60] sm:$0xff] %v296_v12  ;;  %299 = vst [vmem:[%s1131_s8 + $0x68] sm:$0xff] %v298_v13  ;;  %v302_v15 = vld [vmem:[%s1126_s7 + $0xf0] sm:$0xff] }
  0x20   : > { %301 = vst [vmem:[%s1131_s8 + $0x70] sm:$0xff] %v300_v14  ;;  %v304_v16 = vld [vmem:[%s1126_s7 + $0x100] sm:$0xff]  ;;  %v306_v17 = vld [vmem:[%s1126_s7 + $0x110] sm:$0xff]  ;;  %303 = vst [vmem:[%s1131_s8 + $0x78] sm:$0xff] %v302_v15 }
  0x21   : > { %305 = vst [vmem:[%s1131_s8 + $0x80] sm:$0xff] %v304_v16  ;;  %307 = vst [vmem:[%s1131_s8 + $0x88] sm:$0xff] %v306_v17  ;;  %v308_v18 = vld [vmem:[%s1126_s7 + $0x120] sm:$0xff]  ;;  %v310_v19 = vld [vmem:[%s1126_s7 + $0x130] sm:$0xff] }
  0x22   : > { %v312_v20 = vld [vmem:[%s1126_s7 + $0x140] sm:$0xff]  ;;  %309 = vst [vmem:[%s1131_s8 + $0x90] sm:$0xff] %v308_v18  ;;  %311 = vst [vmem:[%s1131_s8 + $0x98] sm:$0xff] %v310_v19  ;;  %v314_v21 = vld [vmem:[%s1126_s7 + $0x150] sm:$0xff] }
  0x23   : > { %313 = vst [vmem:[%s1131_s8 + $0xa0] sm:$0xff] %v312_v20  ;;  %v316_v22 = vld [vmem:[%s1126_s7 + $0x160] sm:$0xff]  ;;  %v318_v23 = vld [vmem:[%s1126_s7 + $0x170] sm:$0xff]  ;;  %315 = vst [vmem:[%s1131_s8 + $0xa8] sm:$0xff] %v314_v21 }
  0x24   : > { %317 = vst [vmem:[%s1131_s8 + $0xb0] sm:$0xff] %v316_v22  ;;  %319 = vst [vmem:[%s1131_s8 + $0xb8] sm:$0xff] %v318_v23  ;;  %v320_v24 = vld [vmem:[%s1126_s7 + $0x180] sm:$0xff]  ;;  %v322_v25 = vld [vmem:[%s1126_s7 + $0x190] sm:$0xff] }
  0x25   : > { %v324_v26 = vld [vmem:[%s1126_s7 + $0x1a0] sm:$0xff]  ;;  %321 = vst [vmem:[%s1131_s8 + $0xc0] sm:$0xff] %v320_v24  ;;  %323 = vst [vmem:[%s1131_s8 + $0xc8] sm:$0xff] %v322_v25  ;;  %v326_v27 = vld [vmem:[%s1126_s7 + $0x1b0] sm:$0xff] }
  0x26   : > { %325 = vst [vmem:[%s1131_s8 + $0xd0] sm:$0xff] %v324_v26  ;;  %v328_v28 = vld [vmem:[%s1126_s7 + $0x1c0] sm:$0xff]  ;;  %v330_v29 = vld [vmem:[%s1126_s7 + $0x1d0] sm:$0xff]  ;;  %327 = vst [vmem:[%s1131_s8 + $0xd8] sm:$0xff] %v326_v27 }
  0x27   : > { %329 = vst [vmem:[%s1131_s8 + $0xe0] sm:$0xff] %v328_v28  ;;  %331 = vst [vmem:[%s1131_s8 + $0xe8] sm:$0xff] %v330_v29  ;;  %v332_v30 = vld [vmem:[%s1126_s7 + $0x1e0] sm:$0xff]  ;;  %v334_v31 = vld [vmem:[%s1126_s7 + $0x1f0] sm:$0xff] }
  0x28   : > { %333 = vst [vmem:[%s1131_s8 + $0xf0] sm:$0xff] %v332_v30  ;;  %335 = vst [vmem:[%s1131_s8 + $0xf8] sm:$0xff] %v334_v31 }
  0x29 PF: > { %p836_p7 = scmp.ge.s32.totalorder %s1044_s18, 1  ;;  %p348_p8 = scmp.lt.s32.totalorder %s1044_s18, 19 }
  0x2b   : > { %p349_p9 = pnand %p836_p7, %p348_p8 }
  0x2c   : > { %s355_s9 = sand.u32 (!%p349_p9), 1, %s1020_s12   ;;  %s838_s10 = sshll.u32 (!%p349_p9), %s1028_s14, 1 }
  0x2d   : > { %352 = sbr.rel (%p349_p9) target bundleno = 355 (0x163), region = 66  ;;  %s837_s11 = sshll.u32 (!%p349_p9), %s355_s9, 8 }
  0x2e   : > { %p398_p10 = scmp.lt.s32.totalorder (!%p349_p9), %s838_s10, 17  ;;  %s840_s21 = sshll.u32 (!%p349_p9), %s1032_s15, 1 }
  0x2f   : > { %p408_p11 = scmp.lt.s32.totalorder (!%p349_p9), %s840_s21, 3  ;;  %s1212_s15 = scalar_lea.vmem (!%p349_p9), [#allocation3], %s837_s11 }
  0x30   : > { %p843_p12 = scmp.ne.s32.totalorder (!%p349_p9), %s1028_s14, 0 }
  0x34   : > { %s1288_s10 = smov (!%p398_p10, %s838_s10), 17  ;;  %s1290_s21 = smov (!%p408_p11, %s840_s21), 3 }
  0x35   : > { %s839_s22 = sshll.u32 %s1288_s10, 2  ;;  %s410_s29 = scalar_lea.vmem %s1273_s2, %s1290_s21  ;;  %v428_v32 = vlaneseq (!%p843_p12) }
  0x36   : > { %s1202_s26 = scalar_lea.vmem %s1271_s0, %s839_s22  ;;  %s842_s30 = sshll.u32 %s1290_s21, 2  ;;  %v426_v34 = vld [vmem:[%s410_s29] sm:$0x3] (!%p843_p12) }
  0x37   : > { %s1210_s5 = scalar_lea.vmem %s1274_s3, %s842_s30  ;;  %425 = sbr.rel (%p843_p12) target bundleno = 62 (0x3e), region = 74  ;;  %v429_v33 = vshrl.u32 (!%p843_p12), %v428_v32, 7 }
  0x39   : > { %v430_v35 = vsub.s32 (!%p843_p12), 0, %v429_v33  ;;  %v434_v36 = vsub.s32 (!%p843_p12), 1, %v429_v33 }
  0x3b   : > { %v431_v37 = vrot.slane (!%p843_p12), %v426_v34, %v430_v35  ;;  %v435_v38 = vrot.slane (!%p843_p12), %v426_v34, %v434_v36 }
  0x3d   : > { %438 = vst [vmem:[#allocation2] sm:$0xff] (!%p843_p12), %v431_v37  ;;  %439 = vst [vmem:[#allocation2 + $0x8] sm:$0xff] (!%p843_p12), %v435_v38 }
  0x3e PF: > { %v940_v39 = vld [vmem:[%s1212_s15 + $0x4] ss:$8 sps:$4 sm:$0xff]   ;;  %v942_v40 = vld [vmem:[%s1212_s15] ss:$8 sps:$4 sm:$0xff]   ;;  %v943_v41 = vld [vmem:[%s1212_s15 + $0x14] ss:$8 sps:$4 sm:$0xff]  }
  0x3f   : > { %642 = vmatprep.subr.bf16.mxu0 %v940_v39  ;;  %v945_v42 = vld [vmem:[%s1212_s15 + $0x10] ss:$8 sps:$4 sm:$0xff]   ;;  %v946_v43 = vld [vmem:[%s1212_s15 + $0x24] ss:$8 sps:$4 sm:$0xff]   ;;  %v948_v44 = vld [vmem:[%s1212_s15 + $0x20] ss:$8 sps:$4 sm:$0xff]  }
  0x40   : > { %643 = vmatpush1.bf16.msra.mxu0 %v942_v40  ;;  %v949_v45 = vld [vmem:[%s1212_s15 + $0x34] ss:$8 sps:$4 sm:$0xff]   ;;  %v951_v46 = vld [vmem:[%s1212_s15 + $0x30] ss:$8 sps:$4 sm:$0xff]   ;;  %v952_v47 = vld [vmem:[%s1212_s15 + $0x44] ss:$8 sps:$4 sm:$0xff]  }
  0x41   : > { %644 = vmatprep.subr.bf16.mxu0 %v943_v41  ;;  %v954_v48 = vld [vmem:[%s1212_s15 + $0x40] ss:$8 sps:$4 sm:$0xff]   ;;  %v955_v49 = vld [vmem:[%s1212_s15 + $0x54] ss:$8 sps:$4 sm:$0xff]   ;;  %v957_v50 = vld [vmem:[%s1212_s15 + $0x50] ss:$8 sps:$4 sm:$0xff]  }
  0x42   : > { %v958_v51 = vld [vmem:[%s1212_s15 + $0x64] ss:$8 sps:$4 sm:$0xff]   ;;  %v442_v52 = vld [vmem:[%s1202_s26] sm:$0xff]  ;;  %v960_v54 = vld [vmem:[%s1212_s15 + $0x60] ss:$8 sps:$4 sm:$0xff]   ;;  %p878_p13 = scmp.ne.s32.totalorder %s1028_s14, 8 }
  0x43   : > { %v845_v53 = vcombine.high %v442_v52, %v442_v52  ;;  %v961_v55 = vld [vmem:[%s1212_s15 + $0x74] ss:$8 sps:$4 sm:$0xff]   ;;  %v963_v56 = vld [vmem:[%s1212_s15 + $0x70] ss:$8 sps:$4 sm:$0xff]   ;;  %v964_v57 = vld [vmem:[%s1212_s15 + $0x84] ss:$8 sps:$4 sm:$0xff]   ;;  %v844_v9 = vcombine.low %v442_v52, %v442_v52 }
  0x44   : > { %645 = vmatpush1.bf16.msra.mxu0 %v945_v42  ;;  %v966_v58 = vld [vmem:[%s1212_s15 + $0x80] ss:$8 sps:$4 sm:$0xff]   ;;  %v967_v59 = vld [vmem:[%s1212_s15 + $0x94] ss:$8 sps:$4 sm:$0xff]   ;;  %v969_v60 = vld [vmem:[%s1212_s15 + $0x90] ss:$8 sps:$4 sm:$0xff]  }
  0x45   : > { %646 = vmatprep.subr.bf16.mxu0 %v946_v43  ;;  %674 = vmatprep.mubr.bf16.mxu0 %v845_v53  ;;  %v970_v61 = vld [vmem:[%s1212_s15 + $0xa4] ss:$8 sps:$4 sm:$0xff]   ;;  %v972_v62 = vld [vmem:[%s1212_s15 + $0xa0] ss:$8 sps:$4 sm:$0xff]   ;;  %v973_v63 = vld [vmem:[%s1212_s15 + $0xb4] ss:$8 sps:$4 sm:$0xff]  }
  0x46   : > { %v975_v0 = vld [vmem:[%s1212_s15 + $0xb0] ss:$8 sps:$4 sm:$0xff]   ;;  %v976_v1 = vld [vmem:[%s1212_s15 + $0xc4] ss:$8 sps:$4 sm:$0xff]   ;;  %v978_v2 = vld [vmem:[%s1212_s15 + $0xc0] ss:$8 sps:$4 sm:$0xff]  }
  0x47   : > { %v979_v3 = vld [vmem:[%s1212_s15 + $0xd4] ss:$8 sps:$4 sm:$0xff]   ;;  %v981_v4 = vld [vmem:[%s1212_s15 + $0xd0] ss:$8 sps:$4 sm:$0xff]   ;;  %v982_v5 = vld [vmem:[%s1212_s15 + $0xe4] ss:$8 sps:$4 sm:$0xff]  }
  0x48   : > { %647 = vmatpush1.bf16.msra.mxu0 %v948_v44  ;;  %v984_v6 = vld [vmem:[%s1212_s15 + $0xe0] ss:$8 sps:$4 sm:$0xff]   ;;  %v985_v7 = vld [vmem:[%s1212_s15 + $0xf4] ss:$8 sps:$4 sm:$0xff]   ;;  %v987_v8 = vld [vmem:[%s1212_s15 + $0xf0] ss:$8 sps:$4 sm:$0xff]  }
  0x49   : > { %648 = vmatprep.subr.bf16.mxu0 %v949_v45  ;;  %v440_v10 = vld [vmem:[#allocation2] sm:$0xff]  ;;  %v441_v11 = vld [vmem:[#allocation2 + $0x8] sm:$0xff] }
  0x4c   : > { %649 = vmatpush1.bf16.msra.mxu0 %v951_v46 }
  0x4d   : > { %650 = vmatprep.subr.bf16.mxu0 %v952_v47 }
  0x50   : > { %651 = vmatpush1.bf16.msra.mxu0 %v954_v48 }
  0x51   : > { %652 = vmatprep.subr.bf16.mxu0 %v955_v49 }
  0x54   : > { %653 = vmatpush1.bf16.msra.mxu0 %v957_v50 }
  0x55   : > { %654 = vmatprep.subr.bf16.mxu0 %v958_v51 }
  0x58   : > { %655 = vmatpush1.bf16.msra.mxu0 %v960_v54 }
  0x59   : > { %656 = vmatprep.subr.bf16.mxu0 %v961_v55 }
  0x5c   : > { %657 = vmatpush1.bf16.msra.mxu0 %v963_v56 }
  0x5d   : > { %658 = vmatprep.subr.bf16.mxu0 %v964_v57 }
  0x60   : > { %659 = vmatpush1.bf16.msra.mxu0 %v966_v58 }
  0x61   : > { %660 = vmatprep.subr.bf16.mxu0 %v967_v59 }
  0x64   : > { %661 = vmatpush1.bf16.msra.mxu0 %v969_v60 }
  0x65   : > { %662 = vmatprep.subr.bf16.mxu0 %v970_v61 }
  0x68   : > { %663 = vmatpush1.bf16.msra.mxu0 %v972_v62 }
  0x69   : > { %664 = vmatprep.subr.bf16.mxu0 %v973_v63 }
  0x6c   : > { %665 = vmatpush1.bf16.msra.mxu0 %v975_v0 }
  0x6d   : > { %666 = vmatprep.subr.bf16.mxu0 %v976_v1 }
  0x70   : > { %667 = vmatpush1.bf16.msra.mxu0 %v978_v2 }
  0x71   : > { %668 = vmatprep.subr.bf16.mxu0 %v979_v3 }
  0x74   : > { %669 = vmatpush1.bf16.msra.mxu0 %v981_v4 }
  0x75   : > { %670 = vmatprep.subr.bf16.mxu0 %v982_v5 }
  0x78   : > { %671 = vmatpush1.bf16.msra.mxu0 %v984_v6 }
  0x79   : > { %672 = vmatprep.subr.bf16.mxu0 %v985_v7 }
  0x7c   : > { %673 = vmatpush1.bf16.msra.mxu0 %v987_v8 }
  0x7f   : > { %675 = vmatmul.mubr.bf16.vlgmr.msra.gmra.mrb[0].mxu0 %v844_v9 }
 0x150   : > { %690 = sbr.rel (%p878_p13) target bundleno = 355 (0x163), region = 78 }
 0x152   : > { %v676_v12 = vpop.f32.mrb[0].mxu0 }
 0x153   : > { %v683_v13 = vadd.f32 %v676_v12, %v440_v10  ;;  %v678_v14 = vpop.f32.mrb[1].mxu0 }
 0x154   : > { %v684_v15 = vadd.f32 %v678_v14, %v441_v11  ;;  %v680_v16 = vpop.f32.mrb[2].mxu0 }
 0x155   : > { %685 = vst [vmem:[#allocation2] sm:$0xff] %v683_v13  ;;  %v681_v17 = vpop.f32.mrb[3].mxu0 }
 0x156   : > { %686 = vst [vmem:[#allocation2 + $0x8] sm:$0xff] %v684_v15 }
 0x15c   : > { %v691_v18 = vld [vmem:[#allocation2] sm:$0xff] }
 0x15d   : > { %v692_v19 = vld [vmem:[#allocation2 + $0x8] sm:$0xff]  ;;  %v693_v20 = vmax.f32 %v691_v18, 0.0 }
 0x15e   : > { %v694_v21 = vmax.f32 %v692_v19, 0.0 }
 0x160   : > { %v883_v22 = vpack.c.bf16 %v694_v21, %v693_v20 }
 0x162   : > { %703 = vst [vmem:[%s1210_s5] sm:$0xff] %v883_v22 }
 0x163 PF: > { %s13_s18 = sadd.s32 1, %s1044_s18   ;;  %s1275_s12 = smov %s1024_s13 }
 0x164   : > { %p10_p0 = scmp.ge.s32.totalorder %s13_s18, 20   ;;  %s1276_s13 = smov %s1117_s25 }
 0x165   : > { %s1277_s14 = smov %s1036_s16  ;;  %s1278_s15 = smov %s1040_s17 }
 0x166   : > { %s1279_s16 = smov %s1282_s19  ;;  %s1280_s17 = smov %s1286_s20 }
 0x167   :  { %12 = sbr.rel (!%p10_p0) target bundleno = 4 (0x4), region = 119 }

// kernel: _lambda_.20
= control target key start
LH: loop header
LB: loop body
LE: loop exit
PB: predicated region body
PF: predicated region fallthrough
CT: control target
= control target key end

     0   :  { %s1066_s12 = smov 0   ;;  %s1068_s13 = smov 0   ;;  %s1271_s0 = inlined_call_operand.vmem [shape: bf16[8,512], index: 0, kind: input, shape index: {}]   ;;  %s1272_s1 = inlined_call_operand.vmem [shape: bf16[512,512], index: 1, kind: input, shape index: {}]   ;;  %s1273_s2 = inlined_call_operand.vmem [shape: f32[1,512], index: 2, kind: input, shape index: {}]   ;;  %s1274_s3 = inlined_call_operand.vmem [shape: bf16[8,512], index: 3, kind: output, shape index: {}]  }
   0x1   :  { %s1070_s14 = smov 0   ;;  %s1072_s15 = smov 0  }
   0x2   :  { %s1074_s16 = smov 0   ;;  %s1076_s17 = smov 0  }
   0x3   :  { %s1078_s18 = smov 0  }
   0x4 LB: > { %s25_s19 = sadd.s32 1, %s1036_s16  ;;  %s28_s20 = sadd.s32 1, %s1040_s17  ;;  %s1044_s18 = sphi %s1078_s18, %s13_s18   ;;  %s1040_s17 = sphi %s1076_s17, %s1280_s17   ;;  %s1036_s16 = sphi %s1074_s16, %s1279_s16   ;;  %s1032_s15 = sphi %s1072_s15, %s1278_s15   ;;  %s1028_s14 = sphi %s1070_s14, %s1277_s14   ;;  %s1024_s13 = sphi %s1068_s13, %s1276_s13   ;;  %s1020_s12 = sphi %s1066_s12, %s1275_s12  }
   0x5   : > { %p26_p0 = scmp.ge.s32.totalorder %s25_s19, 2  ;;  %p76_p1 = scmp.ne.s32.totalorder %s1024_s13, %s1020_s12 }
   0x6   : > { %p77_p2 = scmp.eq.s32.totalorder %s1044_s18, 0  ;;  %s69_s24 = sadd.s32 1, %s1024_s13 }
   0x7   : > { %s1282_s19 = smov (%p26_p0, %s25_s19), 0  ;;  %s1284_s20 = smov (!%p26_p0, %s28_s20), %s1040_s17 }
   0x8   : > { %p78_p3 = por %p77_p2, %p76_p1  ;;  %p30_p4 = scmp.ge.s32.totalorder %s1284_s20, 2 }
   0x9   : > { %s64_s21 = ssub.s32 %s1036_s16, %s1282_s19  ;;  %p830_p6 = scmp.ge.s32.totalorder %s1044_s18, 4 }
   0xa   : > { %s1286_s20 = smov (%p30_p4, %s1284_s20), 0 }
   0xb   : > { %s65_s22 = ssub.s32 %s1040_s17, %s1286_s20  ;;  %156 = sbr.rel (%p830_p6) target bundleno = 41 (0x29), region = 16 }
   0xc   : > { %s66_s23 = sor.u32 %s65_s22, %s64_s21 }
   0xd   : > { %p67_p5 = scmp.eq.s32.totalorder %s66_s23, 0 }
   0xf   : > { %s1117_s25 = scalar_select %p67_p5, %s1024_s13, %s69_s24  }
  0x12   : > { %172 = sbr.rel (!%p78_p3) target bundleno = 41 (0x29), region = 24  ;;  %s174_s26 = sand.u32 (%p78_p3), 1, %s1024_s13  }
  0x13   : > { %s833_s27 = sshll.u32 (%p78_p3), %s1040_s17, 1  ;;  %s831_s28 = sshll.u32 (%p78_p3), %s174_s26, 8 }
  0x14   : > { %s882_s29 = sshll.u32 (%p78_p3), %s1036_s16, 7  ;;  %s1131_s8 = scalar_lea.vmem (%p78_p3), [#allocation3], %s831_s28 }
  0x15   : > { %s180_s30 = sadd.s32 (%p78_p3), %s882_s29, %s833_s27 }
  0x16   : > { %s835_s4 = sshll.u32 (%p78_p3), %s180_s30, 2 }
  0x17   : > { %s1126_s7 = scalar_lea.vmem (%p78_p3), %s1272_s1, %s835_s4 }
  0x18   : > { %v272_v0 = vld [vmem:[%s1126_s7] sm:$0xff] (%p78_p3)  ;;  %v274_v1 = vld [vmem:[%s1126_s7 + $0x10] sm:$0xff] (%p78_p3) }
  0x19   : > { %v276_v2 = vld [vmem:[%s1126_s7 + $0x20] sm:$0xff]  ;;  %273 = vst [vmem:[%s1131_s8] sm:$0xff] %v272_v0  ;;  %275 = vst [vmem:[%s1131_s8 + $0x8] sm:$0xff] %v274_v1  ;;  %v278_v3 = vld [vmem:[%s1126_s7 + $0x30] sm:$0xff] }
  0x1a   : > { %277 = vst [vmem:[%s1131_s8 + $0x10] sm:$0xff] %v276_v2  ;;  %v280_v4 = vld [vmem:[%s1126_s7 + $0x40] sm:$0xff]  ;;  %v282_v5 = vld [vmem:[%s1126_s7 + $0x50] sm:$0xff]  ;;  %279 = vst [vmem:[%s1131_s8 + $0x18] sm:$0xff] %v278_v3 }
  0x1b   : > { %281 = vst [vmem:[%s1131_s8 + $0x20] sm:$0xff] %v280_v4  ;;  %283 = vst [vmem:[%s1131_s8 + $0x28] sm:$0xff] %v282_v5  ;;  %v284_v6 = vld [vmem:[%s1126_s7 + $0x60] sm:$0xff]  ;;  %v286_v7 = vld [vmem:[%s1126_s7 + $0x70] sm:$0xff] }
  0x1c   : > { %v288_v8 = vld [vmem:[%s1126_s7 + $0x80] sm:$0xff]  ;;  %285 = vst [vmem:[%s1131_s8 + $0x30] sm:$0xff] %v284_v6  ;;  %287 = vst [vmem:[%s1131_s8 + $0x38] sm:$0xff] %v286_v7  ;;  %v290_v9 = vld [vmem:[%s1126_s7 + $0x90] sm:$0xff] }
  0x1d   : > { %289 = vst [vmem:[%s1131_s8 + $0x40] sm:$0xff] %v288_v8  ;;  %v292_v10 = vld [vmem:[%s1126_s7 + $0xa0] sm:$0xff]  ;;  %v294_v11 = vld [vmem:[%s1126_s7 + $0xb0] sm:$0xff]  ;;  %291 = vst [vmem:[%s1131_s8 + $0x48] sm:$0xff] %v290_v9 }
  0x1e   : > { %293 = vst [vmem:[%s1131_s8 + $0x50] sm:$0xff] %v292_v10  ;;  %295 = vst [vmem:[%s1131_s8 + $0x58] sm:$0xff] %v294_v11  ;;  %v296_v12 = vld [vmem:[%s1126_s7 + $0xc0] sm:$0xff]  ;;  %v298_v13 = vld [vmem:[%s1126_s7 + $0xd0] sm:$0xff] }
  0x1f   : > { %v300_v14 = vld [vmem:[%s1126_s7 + $0xe0] sm:$0xff]  ;;  %297 = vst [vmem:[%s1131_s8 + $0x60] sm:$0xff] %v296_v12  ;;  %299 = vst [vmem:[%s1131_s8 + $0x68] sm:$0xff] %v298_v13  ;;  %v302_v15 = vld [vmem:[%s1126_s7 + $0xf0] sm:$0xff] }
  0x20   : > { %301 = vst [vmem:[%s1131_s8 + $0x70] sm:$0xff] %v300_v14  ;;  %v304_v16 = vld [vmem:[%s1126_s7 + $0x100] sm:$0xff]  ;;  %v306_v17 = vld [vmem:[%s1126_s7 + $0x110] sm:$0xff]  ;;  %303 = vst [vmem:[%s1131_s8 + $0x78] sm:$0xff] %v302_v15 }
  0x21   : > { %305 = vst [vmem:[%s1131_s8 + $0x80] sm:$0xff] %v304_v16  ;;  %307 = vst [vmem:[%s1131_s8 + $0x88] sm:$0xff] %v306_v17  ;;  %v308_v18 = vld [vmem:[%s1126_s7 + $0x120] sm:$0xff]  ;;  %v310_v19 = vld [vmem:[%s1126_s7 + $0x130] sm:$0xff] }
  0x22   : > { %v312_v20 = vld [vmem:[%s1126_s7 + $0x140] sm:$0xff]  ;;  %309 = vst [vmem:[%s1131_s8 + $0x90] sm:$0xff] %v308_v18  ;;  %311 = vst [vmem:[%s1131_s8 + $0x98] sm:$0xff] %v310_v19  ;;  %v314_v21 = vld [vmem:[%s1126_s7 + $0x150] sm:$0xff] }
  0x23   : > { %313 = vst [vmem:[%s1131_s8 + $0xa0] sm:$0xff] %v312_v20  ;;  %v316_v22 = vld [vmem:[%s1126_s7 + $0x160] sm:$0xff]  ;;  %v318_v23 = vld [vmem:[%s1126_s7 + $0x170] sm:$0xff]  ;;  %315 = vst [vmem:[%s1131_s8 + $0xa8] sm:$0xff] %v314_v21 }
  0x24   : > { %317 = vst [vmem:[%s1131_s8 + $0xb0] sm:$0xff] %v316_v22  ;;  %319 = vst [vmem:[%s1131_s8 + $0xb8] sm:$0xff] %v318_v23  ;;  %v320_v24 = vld [vmem:[%s1126_s7 + $0x180] sm:$0xff]  ;;  %v322_v25 = vld [vmem:[%s1126_s7 + $0x190] sm:$0xff] }
  0x25   : > { %v324_v26 = vld [vmem:[%s1126_s7 + $0x1a0] sm:$0xff]  ;;  %321 = vst [vmem:[%s1131_s8 + $0xc0] sm:$0xff] %v320_v24  ;;  %323 = vst [vmem:[%s1131_s8 + $0xc8] sm:$0xff] %v322_v25  ;;  %v326_v27 = vld [vmem:[%s1126_s7 + $0x1b0] sm:$0xff] }
  0x26   : > { %325 = vst [vmem:[%s1131_s8 + $0xd0] sm:$0xff] %v324_v26  ;;  %v328_v28 = vld [vmem:[%s1126_s7 + $0x1c0] sm:$0xff]  ;;  %v330_v29 = vld [vmem:[%s1126_s7 + $0x1d0] sm:$0xff]  ;;  %327 = vst [vmem:[%s1131_s8 + $0xd8] sm:$0xff] %v326_v27 }
  0x27   : > { %329 = vst [vmem:[%s1131_s8 + $0xe0] sm:$0xff] %v328_v28  ;;  %331 = vst [vmem:[%s1131_s8 + $0xe8] sm:$0xff] %v330_v29  ;;  %v332_v30 = vld [vmem:[%s1126_s7 + $0x1e0] sm:$0xff]  ;;  %v334_v31 = vld [vmem:[%s1126_s7 + $0x1f0] sm:$0xff] }
  0x28   : > { %333 = vst [vmem:[%s1131_s8 + $0xf0] sm:$0xff] %v332_v30  ;;  %335 = vst [vmem:[%s1131_s8 + $0xf8] sm:$0xff] %v334_v31 }
  0x29 PF: > { %p836_p7 = scmp.ge.s32.totalorder %s1044_s18, 1  ;;  %p348_p8 = scmp.lt.s32.totalorder %s1044_s18, 5 }
  0x2b   : > { %p349_p9 = pnand %p836_p7, %p348_p8 }
  0x2c   : > { %s355_s9 = sand.u32 (!%p349_p9), 1, %s1020_s12   ;;  %s838_s10 = sshll.u32 (!%p349_p9), %s1028_s14, 1 }
  0x2d   : > { %352 = sbr.rel (%p349_p9) target bundleno = 355 (0x163), region = 66  ;;  %s837_s11 = sshll.u32 (!%p349_p9), %s355_s9, 8 }
  0x2e   : > { %p398_p10 = scmp.lt.s32.totalorder (!%p349_p9), %s838_s10, 3  ;;  %s840_s21 = sshll.u32 (!%p349_p9), %s1032_s15, 1 }
  0x2f   : > { %p408_p11 = scmp.lt.s32.totalorder (!%p349_p9), %s840_s21, 3  ;;  %s1212_s15 = scalar_lea.vmem (!%p349_p9), [#allocation3], %s837_s11 }
  0x30   : > { %p843_p12 = scmp.ne.s32.totalorder (!%p349_p9), %s1028_s14, 0 }
  0x34   : > { %s1288_s10 = smov (!%p398_p10, %s838_s10), 3  ;;  %s1290_s21 = smov (!%p408_p11, %s840_s21), 3 }
  0x35   : > { %s839_s22 = sshll.u32 %s1288_s10, 2  ;;  %s410_s29 = scalar_lea.vmem %s1273_s2, %s1290_s21  ;;  %v428_v32 = vlaneseq (!%p843_p12) }
  0x36   : > { %s1202_s26 = scalar_lea.vmem %s1271_s0, %s839_s22  ;;  %s842_s30 = sshll.u32 %s1290_s21, 2  ;;  %v426_v34 = vld [vmem:[%s410_s29] sm:$0x3] (!%p843_p12) }
  0x37   : > { %s1210_s5 = scalar_lea.vmem %s1274_s3, %s842_s30  ;;  %425 = sbr.rel (%p843_p12) target bundleno = 62 (0x3e), region = 74  ;;  %v429_v33 = vshrl.u32 (!%p843_p12), %v428_v32, 7 }
  0x39   : > { %v430_v35 = vsub.s32 (!%p843_p12), 0, %v429_v33  ;;  %v434_v36 = vsub.s32 (!%p843_p12), 1, %v429_v33 }
  0x3b   : > { %v431_v37 = vrot.slane (!%p843_p12), %v426_v34, %v430_v35  ;;  %v435_v38 = vrot.slane (!%p843_p12), %v426_v34, %v434_v36 }
  0x3d   : > { %438 = vst [vmem:[#allocation2] sm:$0xff] (!%p843_p12), %v431_v37  ;;  %439 = vst [vmem:[#allocation2 + $0x8] sm:$0xff] (!%p843_p12), %v435_v38 }
  0x3e PF: > { %v940_v39 = vld [vmem:[%s1212_s15 + $0x4] ss:$8 sps:$4 sm:$0xff]   ;;  %v942_v40 = vld [vmem:[%s1212_s15] ss:$8 sps:$4 sm:$0xff]   ;;  %v943_v41 = vld [vmem:[%s1212_s15 + $0x14] ss:$8 sps:$4 sm:$0xff]  }
  0x3f   : > { %642 = vmatprep.subr.bf16.mxu0 %v940_v39  ;;  %v945_v42 = vld [vmem:[%s1212_s15 + $0x10] ss:$8 sps:$4 sm:$0xff]   ;;  %v946_v43 = vld [vmem:[%s1212_s15 + $0x24] ss:$8 sps:$4 sm:$0xff]   ;;  %v948_v44 = vld [vmem:[%s1212_s15 + $0x20] ss:$8 sps:$4 sm:$0xff]  }
  0x40   : > { %643 = vmatpush1.bf16.msra.mxu0 %v942_v40  ;;  %v949_v45 = vld [vmem:[%s1212_s15 + $0x34] ss:$8 sps:$4 sm:$0xff]   ;;  %v951_v46 = vld [vmem:[%s1212_s15 + $0x30] ss:$8 sps:$4 sm:$0xff]   ;;  %v952_v47 = vld [vmem:[%s1212_s15 + $0x44] ss:$8 sps:$4 sm:$0xff]  }
  0x41   : > { %644 = vmatprep.subr.bf16.mxu0 %v943_v41  ;;  %v954_v48 = vld [vmem:[%s1212_s15 + $0x40] ss:$8 sps:$4 sm:$0xff]   ;;  %v955_v49 = vld [vmem:[%s1212_s15 + $0x54] ss:$8 sps:$4 sm:$0xff]   ;;  %v957_v50 = vld [vmem:[%s1212_s15 + $0x50] ss:$8 sps:$4 sm:$0xff]  }
  0x42   : > { %v958_v51 = vld [vmem:[%s1212_s15 + $0x64] ss:$8 sps:$4 sm:$0xff]   ;;  %v442_v52 = vld [vmem:[%s1202_s26] sm:$0xff]  ;;  %v960_v54 = vld [vmem:[%s1212_s15 + $0x60] ss:$8 sps:$4 sm:$0xff]   ;;  %p878_p13 = scmp.ne.s32.totalorder %s1028_s14, 1 }
  0x43   : > { %v845_v53 = vcombine.high %v442_v52, %v442_v52  ;;  %v961_v55 = vld [vmem:[%s1212_s15 + $0x74] ss:$8 sps:$4 sm:$0xff]   ;;  %v963_v56 = vld [vmem:[%s1212_s15 + $0x70] ss:$8 sps:$4 sm:$0xff]   ;;  %v964_v57 = vld [vmem:[%s1212_s15 + $0x84] ss:$8 sps:$4 sm:$0xff]   ;;  %v844_v9 = vcombine.low %v442_v52, %v442_v52 }
  0x44   : > { %645 = vmatpush1.bf16.msra.mxu0 %v945_v42  ;;  %v966_v58 = vld [vmem:[%s1212_s15 + $0x80] ss:$8 sps:$4 sm:$0xff]   ;;  %v967_v59 = vld [vmem:[%s1212_s15 + $0x94] ss:$8 sps:$4 sm:$0xff]   ;;  %v969_v60 = vld [vmem:[%s1212_s15 + $0x90] ss:$8 sps:$4 sm:$0xff]  }
  0x45   : > { %646 = vmatprep.subr.bf16.mxu0 %v946_v43  ;;  %674 = vmatprep.mubr.bf16.mxu0 %v845_v53  ;;  %v970_v61 = vld [vmem:[%s1212_s15 + $0xa4] ss:$8 sps:$4 sm:$0xff]   ;;  %v972_v62 = vld [vmem:[%s1212_s15 + $0xa0] ss:$8 sps:$4 sm:$0xff]   ;;  %v973_v63 = vld [vmem:[%s1212_s15 + $0xb4] ss:$8 sps:$4 sm:$0xff]  }
  0x46   : > { %v975_v0 = vld [vmem:[%s1212_s15 + $0xb0] ss:$8 sps:$4 sm:$0xff]   ;;  %v976_v1 = vld [vmem:[%s1212_s15 + $0xc4] ss:$8 sps:$4 sm:$0xff]   ;;  %v978_v2 = vld [vmem:[%s1212_s15 + $0xc0] ss:$8 sps:$4 sm:$0xff]  }
  0x47   : > { %v979_v3 = vld [vmem:[%s1212_s15 + $0xd4] ss:$8 sps:$4 sm:$0xff]   ;;  %v981_v4 = vld [vmem:[%s1212_s15 + $0xd0] ss:$8 sps:$4 sm:$0xff]   ;;  %v982_v5 = vld [vmem:[%s1212_s15 + $0xe4] ss:$8 sps:$4 sm:$0xff]  }
  0x48   : > { %647 = vmatpush1.bf16.msra.mxu0 %v948_v44  ;;  %v984_v6 = vld [vmem:[%s1212_s15 + $0xe0] ss:$8 sps:$4 sm:$0xff]   ;;  %v985_v7 = vld [vmem:[%s1212_s15 + $0xf4] ss:$8 sps:$4 sm:$0xff]   ;;  %v987_v8 = vld [vmem:[%s1212_s15 + $0xf0] ss:$8 sps:$4 sm:$0xff]  }
  0x49   : > { %648 = vmatprep.subr.bf16.mxu0 %v949_v45  ;;  %v440_v10 = vld [vmem:[#allocation2] sm:$0xff]  ;;  %v441_v11 = vld [vmem:[#allocation2 + $0x8] sm:$0xff] }
  0x4c   : > { %649 = vmatpush1.bf16.msra.mxu0 %v951_v46 }
  0x4d   : > { %650 = vmatprep.subr.bf16.mxu0 %v952_v47 }
  0x50   : > { %651 = vmatpush1.bf16.msra.mxu0 %v954_v48 }
  0x51   : > { %652 = vmatprep.subr.bf16.mxu0 %v955_v49 }
  0x54   : > { %653 = vmatpush1.bf16.msra.mxu0 %v957_v50 }
  0x55   : > { %654 = vmatprep.subr.bf16.mxu0 %v958_v51 }
  0x58   : > { %655 = vmatpush1.bf16.msra.mxu0 %v960_v54 }
  0x59   : > { %656 = vmatprep.subr.bf16.mxu0 %v961_v55 }
  0x5c   : > { %657 = vmatpush1.bf16.msra.mxu0 %v963_v56 }
  0x5d   : > { %658 = vmatprep.subr.bf16.mxu0 %v964_v57 }
  0x60   : > { %659 = vmatpush1.bf16.msra.mxu0 %v966_v58 }
  0x61   : > { %660 = vmatprep.subr.bf16.mxu0 %v967_v59 }
  0x64   : > { %661 = vmatpush1.bf16.msra.mxu0 %v969_v60 }
  0x65   : > { %662 = vmatprep.subr.bf16.mxu0 %v970_v61 }
  0x68   : > { %663 = vmatpush1.bf16.msra.mxu0 %v972_v62 }
  0x69   : > { %664 = vmatprep.subr.bf16.mxu0 %v973_v63 }
  0x6c   : > { %665 = vmatpush1.bf16.msra.mxu0 %v975_v0 }
  0x6d   : > { %666 = vmatprep.subr.bf16.mxu0 %v976_v1 }
  0x70   : > { %667 = vmatpush1.bf16.msra.mxu0 %v978_v2 }
  0x71   : > { %668 = vmatprep.subr.bf16.mxu0 %v979_v3 }
  0x74   : > { %669 = vmatpush1.bf16.msra.mxu0 %v981_v4 }
  0x75   : > { %670 = vmatprep.subr.bf16.mxu0 %v982_v5 }
  0x78   : > { %671 = vmatpush1.bf16.msra.mxu0 %v984_v6 }
  0x79   : > { %672 = vmatprep.subr.bf16.mxu0 %v985_v7 }
  0x7c   : > { %673 = vmatpush1.bf16.msra.mxu0 %v987_v8 }
  0x7f   : > { %675 = vmatmul.mubr.bf16.vlgmr.msra.gmra.mrb[0].mxu0 %v844_v9 }
 0x150   : > { %690 = sbr.rel (%p878_p13) target bundleno = 355 (0x163), region = 78 }
 0x152   : > { %v676_v12 = vpop.f32.mrb[0].mxu0 }
 0x153   : > { %v683_v13 = vadd.f32 %v676_v12, %v440_v10  ;;  %v678_v14 = vpop.f32.mrb[1].mxu0 }
 0x154   : > { %v684_v15 = vadd.f32 %v678_v14, %v441_v11  ;;  %v680_v16 = vpop.f32.mrb[2].mxu0 }
 0x155   : > { %685 = vst [vmem:[#allocation2] sm:$0xff] %v683_v13  ;;  %v681_v17 = vpop.f32.mrb[3].mxu0 }
 0x156   : > { %686 = vst [vmem:[#allocation2 + $0x8] sm:$0xff] %v684_v15 }
 0x15c   : > { %v691_v18 = vld [vmem:[#allocation2] sm:$0xff] }
 0x15d   : > { %v692_v19 = vld [vmem:[#allocation2 + $0x8] sm:$0xff]  ;;  %v693_v20 = vmax.f32 %v691_v18, 0.0 }
 0x15e   : > { %v694_v21 = vmax.f32 %v692_v19, 0.0 }
 0x160   : > { %v883_v22 = vpack.c.bf16 %v694_v21, %v693_v20 }
 0x162   : > { %703 = vst [vmem:[%s1210_s5] sm:$0xff] %v883_v22 }
 0x163 PF: > { %s13_s18 = sadd.s32 1, %s1044_s18   ;;  %s1275_s12 = smov %s1024_s13 }
 0x164   : > { %p10_p0 = scmp.ge.s32.totalorder %s13_s18, 6   ;;  %s1276_s13 = smov %s1117_s25 }
 0x165   : > { %s1277_s14 = smov %s1036_s16  ;;  %s1278_s15 = smov %s1040_s17 }
 0x166   : > { %s1279_s16 = smov %s1282_s19  ;;  %s1280_s17 = smov %s1286_s20 }
 0x167   :  { %12 = sbr.rel (!%p10_p0) target bundleno = 4 (0x4), region = 119 }

// kernel: _lambda_.21
= control target key start
LH: loop header
LB: loop body
LE: loop exit
PB: predicated region body
PF: predicated region fallthrough
CT: control target
= control target key end

     0   :  { %s705_s12 = smov 0   ;;  %s707_s13 = smov 0   ;;  %s768_s0 = inlined_call_operand.vmem [shape: bf16[8,4608], index: 0, kind: input, shape index: {}]   ;;  %s769_s1 = inlined_call_operand.vmem [shape: bf16[4608,128], index: 1, kind: input, shape index: {}]   ;;  %s770_s2 = inlined_call_operand.vmem [shape: f32[1,128], index: 2, kind: input, shape index: {}]   ;;  %s771_s3 = inlined_call_operand.vmem [shape: bf16[8,128], index: 3, kind: output, shape index: {}]  }
   0x1   :  { %s709_s14 = smov 0  }
   0x2 LB: > { %s25_s15 = sadd.s32 1, %s679_s13  ;;  %p568_p0 = scmp.ge.s32.totalorder %s683_s14, 1  ;;  %s683_s14 = sphi %s709_s14, %s13_s14   ;;  %s679_s13 = sphi %s707_s13, %s773_s13   ;;  %s675_s12 = sphi %s705_s12, %s772_s12  }
   0x3   : > { %p26_p1 = scmp.ge.s32.totalorder %s25_s15, 18  ;;  %p189_p2 = scmp.lt.s32.totalorder %s683_s14, 19 }
   0x5   : > { %s775_s15 = smov (%p26_p1, %s25_s15), 0  ;;  %p190_p3 = pnand %p568_p0, %p189_p2 }
   0x6   : > { %s569_s16 = sshll.u32 (!%p190_p3), %s675_s12, 1  ;;  %s571_s17 = sshll.u32 (!%p190_p3), %s675_s12, 5 }
   0x7   : > { %193 = sbr.rel (%p190_p3) target bundleno = 287 (0x11f), region = 32  ;;  %p233_p4 = scmp.lt.s32.totalorder (!%p190_p3), %s569_s16, 35 }
   0x8   : > { %p241_p5 = scmp.lt.s32.totalorder (!%p190_p3), %s571_s17, 575  ;;  %p573_p6 = scmp.ne.s32.totalorder (!%p190_p3), %s675_s12, 0 }
   0xe   : > { %s777_s16 = smov (!%p233_p4, %s569_s16), 35  ;;  %s779_s17 = smov (!%p241_p5, %s571_s17), 575 }
   0xf   : > { %s570_s18 = sshll.u32 %s777_s16, 2  ;;  %s572_s22 = sshll.u32 %s779_s17, 2  ;;  %v574_v0 = vld [vmem:[%s770_s2] ss:$0 sm:$0xff] (!%p573_p6) }
  0x10   : > { %s238_s21 = scalar_lea.vmem %s768_s0, %s570_s18  ;;  %s733_s25 = scalar_lea.vmem %s769_s1, %s572_s22  ;;  %271 = vst [vmem:[#allocation2] sm:$0xff] (!%p573_p6), %v574_v0 }
  0x11   : > { %263 = sbr.rel (%p573_p6) target bundleno = 24 (0x18), region = 36 }
  0x18 PF: > { %v643_v1 = vld [vmem:[%s733_s25 + $0x40] sm:$0xff]   ;;  %v645_v3 = vld [vmem:[%s733_s25 + $0x48] sm:$0xff]   ;;  %v647_v5 = vld [vmem:[%s733_s25 + $0x50] sm:$0xff]   ;;  %p593_p7 = scmp.ne.s32.totalorder %s675_s12, 17 }
  0x19   : > { %v644_v2 = vld [vmem:[%s733_s25] sm:$0xff]   ;;  %597 = vmatprep.subr.bf16.mxu0 %v643_v1  ;;  %v646_v4 = vld [vmem:[%s733_s25 + $0x8] sm:$0xff]   ;;  %v648_v6 = vld [vmem:[%s733_s25 + $0x10] sm:$0xff]  }
  0x1a   : > { %598 = vmatpush3.bf16.msra.mxu0 %v644_v2  ;;  %v649_v7 = vld [vmem:[%s733_s25 + $0x58] sm:$0xff]   ;;  %v651_v9 = vld [vmem:[%s733_s25 + $0x60] sm:$0xff]   ;;  %v653_v11 = vld [vmem:[%s733_s25 + $0x68] sm:$0xff]  }
  0x1b   : > { %599 = vmatprep.subr.bf16.mxu0 %v645_v3  ;;  %v650_v8 = vld [vmem:[%s733_s25 + $0x18] sm:$0xff]   ;;  %v652_v10 = vld [vmem:[%s733_s25 + $0x20] sm:$0xff]   ;;  %v654_v14 = vld [vmem:[%s733_s25 + $0x28] sm:$0xff]  }
  0x1c   : > { %v273_v12 = vld [vmem:[%s238_s21] sm:$0xff]  ;;  %v655_v15 = vld [vmem:[%s733_s25 + $0x70] sm:$0xff]   ;;  %v657_v17 = vld [vmem:[%s733_s25 + $0x78] sm:$0xff]  }
  0x1d   : > { %v576_v13 = vcombine.high %v273_v12, %v273_v12  ;;  %v656_v16 = vld [vmem:[%s733_s25 + $0x30] sm:$0xff]   ;;  %v658_v18 = vld [vmem:[%s733_s25 + $0x38] sm:$0xff]   ;;  %v575_v19 = vcombine.low %v273_v12, %v273_v12  ;;  %v272_v21 = vld [vmem:[#allocation2] sm:$0xff] }
  0x1e   : > { %600 = vmatpush3.bf16.msra.mxu0 %v646_v4 }
  0x1f   : > { %601 = vmatprep.subr.bf16.mxu0 %v647_v5  ;;  %441 = vmatprep.mubr.bf16.mxu0 %v576_v13 }
  0x22   : > { %602 = vmatpush3.bf16.msra.mxu0 %v648_v6 }
  0x23   : > { %603 = vmatprep.subr.bf16.mxu0 %v649_v7 }
  0x26   : > { %604 = vmatpush3.bf16.msra.mxu0 %v650_v8 }
  0x27   : > { %605 = vmatprep.subr.bf16.mxu0 %v651_v9 }
  0x2a   : > { %606 = vmatpush3.bf16.msra.mxu0 %v652_v10 }
  0x2b   : > { %607 = vmatprep.subr.bf16.mxu0 %v653_v11 }
  0x2e   : > { %608 = vmatpush3.bf16.msra.mxu0 %v654_v14 }
  0x2f   : > { %609 = vmatprep.subr.bf16.mxu0 %v655_v15 }
  0x32   : > { %610 = vmatpush3.bf16.msra.mxu0 %v656_v16 }
  0x33   : > { %611 = vmatprep.subr.bf16.mxu0 %v657_v17 }
  0x36   : > { %612 = vmatpush3.bf16.msra.mxu0 %v658_v18 }
  0x39   : > { %442 = vmatmul.mubr.bf16.vlgmr.msra.gmra.mrb[0].mxu0 %v575_v19 }
 0x10c   : > { %v613_v20 = vpop.f32.mrb[0].mxu0  ;;  %454 = sbr.rel (%p593_p7) target bundleno = 287 (0x11f), region = 40 }
 0x10d   : > { %v614_v22 = vpop.f32.mrb[1].mxu0 }
 0x10e   : > { %v615_v23 = vadd.f32 %v614_v22, %v613_v20  ;;  %v616_v24 = vpop.f32.mrb[2].mxu0 }
 0x10f   : > { %v617_v25 = vpop.f32.mrb[3].mxu0 }
 0x110   : > { %v449_v26 = vadd.f32 %v615_v23, %v272_v21 }
 0x112   : > { %450 = vst [vmem:[#allocation2] sm:$0xff] %v449_v26 }
 0x119   : > { %v455_v27 = vld [vmem:[#allocation2] sm:$0xff] }
 0x11a   : > { %v456_v28 = vmax.f32 %v455_v27, 0.0 }
 0x11c   : > { %v457_v29 = vpack.c.bf16 %v456_v28, %v456_v28 }
 0x11e   : > { %458 = vst [vmem:[%s771_s3] sm:$0xf] %v457_v29 }
 0x11f PF: > { %s13_s14 = sadd.s32 1, %s683_s14   ;;  %s772_s12 = smov %s679_s13 }
 0x120   : > { %p10_p8 = scmp.ge.s32.totalorder %s13_s14, 20   ;;  %s773_s13 = smov %s775_s15 }
 0x122   :  { %12 = sbr.rel (!%p10_p8) target bundleno = 2 (0x2), region = 76 }

// kernel: _lambda_.23
= control target key start
LH: loop header
LB: loop body
LE: loop exit
PB: predicated region body
PF: predicated region fallthrough
CT: control target
= control target key end

     0   :  { %s13704_s0 = inlined_call_operand.vmem [shape: bf16[8,128], index: 0, kind: input, shape index: {}]   ;;  %s13705_s1 = inlined_call_operand.vmem [shape: bf16[128,512], index: 1, kind: input, shape index: {}]   ;;  %s13706_s2 = inlined_call_operand.vmem [shape: f32[1,512], index: 2, kind: input, shape index: {}]   ;;  %s13707_s3 = inlined_call_operand.vmem [shape: bf16[512,512], index: 3, kind: input, shape index: {}]   ;;  %s13708_s4 = inlined_call_operand.vmem [shape: f32[1,512], index: 4, kind: input, shape index: {}]   ;;  %s13709_s5 = inlined_call_operand.vmem [shape: bf16[512,512], index: 5, kind: input, shape index: {}]   ;;  %s13710_s6 = inlined_call_operand.vmem [shape: f32[1,512], index: 6, kind: input, shape index: {}]   ;;  %s13711_s7 = inlined_call_operand.vmem [shape: bf16[128,512], index: 7, kind: input, shape index: {}]   ;;  %s13712_s8 = inlined_call_operand.vmem [shape: f32[1,512], index: 8, kind: input, shape index: {}]   ;;  %s13713_s9 = inlined_call_operand.vmem [shape: bf16[512,512], index: 9, kind: input, shape index: {}]   ;;  %s13714_s10 = inlined_call_operand.vmem [shape: f32[1,512], index: 10, kind: input, shape index: {}]   ;;  %s13715_s11 = inlined_call_operand.vmem [shape: bf16[512,512], index: 11, kind: input, shape index: {}]   ;;  %s13716_s12 = inlined_call_operand.vmem [shape: f32[1,512], index: 12, kind: input, shape index: {}]   ;;  %s13717_s13 = inlined_call_operand.vmem [shape: bf16[512,512], index: 13, kind: input, shape index: {}]   ;;  %s13718_s14 = inlined_call_operand.vmem [shape: f32[1,512], index: 14, kind: input, shape index: {}]   ;;  %s13719_s15 = inlined_call_operand.vmem [shape: bf16[512,512], index: 15, kind: input, shape index: {}]   ;;  %s13720_s16 = inlined_call_operand.vmem [shape: f32[1,512], index: 16, kind: input, shape index: {}]   ;;  %s13721_s17 = inlined_call_operand.vmem [shape: bf16[512,512], index: 17, kind: input, shape index: {}]   ;;  %s13722_s18 = inlined_call_operand.vmem [shape: f32[1,512], index: 18, kind: input, shape index: {}]   ;;  %s13723_s19 = inlined_call_operand.vmem [shape: bf16[512,128], index: 19, kind: input, shape index: {}]   ;;  %s13724_s20 = inlined_call_operand.vmem [shape: f32[1,128], index: 20, kind: input, shape index: {}]   ;;  %s13725_s21 = inlined_call_operand.vmem [shape: f32[1,128], index: 21, kind: input, shape index: {}]   ;;  %s13726_s22 = inlined_call_operand.hbm [shape: f32[8,128], index: 22, kind: output, shape index: {}]  }
   0x1   :  { %13731 = sst [smem:[#allocation5_spill]] %s13704_s0 }
   0x2   :  { %13732 = sst [smem:[#allocation6_spill]] %s13705_s1 }
   0x3   :  { %13733 = sst [smem:[#allocation7_spill]] %s13706_s2 }
   0x4   :  { %13734 = sst [smem:[#allocation8_spill]] %s13707_s3 }
   0x5   :  { %13735 = sst [smem:[#allocation9_spill]] %s13708_s4 }
   0x6   :  { %13736 = sst [smem:[#allocation10_spill]] %s13709_s5 }
   0x7   :  { %13737 = sst [smem:[#allocation11_spill]] %s13710_s6 }
   0x8   :  { %s13738_s29 = sld [smem:[#allocation6_spill]]  ;;  %v10431_v2 = vmov 0   ;;  %s13739_s3 = sld [smem:[#allocation8_spill]] }
   0x9   :  { %320 = vmatprep.mubr.bf16.mxu0 %v10431_v2  ;;  %361 = vmatprep.mubr.bf16.mxu1 %v10431_v2  ;;  %s13740_s4 = sld [smem:[#allocation5_spill]]  ;;  %s13741_s23 = sld [smem:[#allocation7_spill]] }
   0xa   :  { %s13742_s28 = sld [smem:[#allocation10_spill]] }
   0xe   :  { %v8928_v0 = vld [vmem:[%s13738_s29 + $0x4] ss:$16 sps:$4 sm:$0xff]   ;;  %v8930_v1 = vld [vmem:[%s13738_s29] ss:$16 sps:$4 sm:$0xff]   ;;  %v8952_v10 = vld [vmem:[%s13738_s29 + $0xc] ss:$16 sps:$4 sm:$0xff]  }
   0xf   :  { %288 = vmatprep.subr.bf16.mxu0 %v8928_v0  ;;  %v8931_v3 = vld [vmem:[%s13738_s29 + $0x24] ss:$16 sps:$4 sm:$0xff]   ;;  %v8933_v4 = vld [vmem:[%s13738_s29 + $0x20] ss:$16 sps:$4 sm:$0xff]   ;;  %v8954_v11 = vld [vmem:[%s13738_s29 + $0x8] ss:$16 sps:$4 sm:$0xff]   ;;  %329 = vmatprep.subr.bf16.mxu1 %v8952_v10 }
  0x10   :  { %289 = vmatpush1.bf16.msra.mxu0 %v8930_v1  ;;  %v8934_v5 = vld [vmem:[%s13738_s29 + $0x44] ss:$16 sps:$4 sm:$0xff]   ;;  %v8936_v6 = vld [vmem:[%s13738_s29 + $0x40] ss:$16 sps:$4 sm:$0xff]   ;;  %v8955_v12 = vld [vmem:[%s13738_s29 + $0x2c] ss:$16 sps:$4 sm:$0xff]   ;;  %330 = vmatpush1.bf16.msra.mxu1 %v8954_v11 }
  0x11   :  { %290 = vmatprep.subr.bf16.mxu0 %v8931_v3  ;;  %v8937_v7 = vld [vmem:[%s13738_s29 + $0x64] ss:$16 sps:$4 sm:$0xff]   ;;  %v8939_v8 = vld [vmem:[%s13738_s29 + $0x60] ss:$16 sps:$4 sm:$0xff]   ;;  %v8957_v14 = vld [vmem:[%s13738_s29 + $0x28] ss:$16 sps:$4 sm:$0xff]   ;;  %331 = vmatprep.subr.bf16.mxu1 %v8955_v12 }
  0x12   :  { %v8940_v9 = vld [vmem:[%s13738_s29 + $0x84] ss:$16 sps:$4 sm:$0xff]   ;;  %v8942_v13 = vld [vmem:[%s13738_s29 + $0x80] ss:$16 sps:$4 sm:$0xff]   ;;  %v8958_v15 = vld [vmem:[%s13738_s29 + $0x4c] ss:$16 sps:$4 sm:$0xff]  }
  0x13   :  { %v8943_v16 = vld [vmem:[%s13738_s29 + $0xa4] ss:$16 sps:$4 sm:$0xff]   ;;  %v8945_v17 = vld [vmem:[%s13738_s29 + $0xa0] ss:$16 sps:$4 sm:$0xff]   ;;  %v8960_v18 = vld [vmem:[%s13738_s29 + $0x48] ss:$16 sps:$4 sm:$0xff]  }
  0x14   :  { %291 = vmatpush1.bf16.msra.mxu0 %v8933_v4  ;;  %332 = vmatpush1.bf16.msra.mxu1 %v8957_v14  ;;  %v8961_v19 = vld [vmem:[%s13738_s29 + $0x6c] ss:$16 sps:$4 sm:$0xff]   ;;  %v8946_v20 = vld [vmem:[%s13738_s29 + $0xc4] ss:$16 sps:$4 sm:$0xff]   ;;  %v8948_v21 = vld [vmem:[%s13738_s29 + $0xc0] ss:$16 sps:$4 sm:$0xff]  }
  0x15   :  { %292 = vmatprep.subr.bf16.mxu0 %v8934_v5  ;;  %333 = vmatprep.subr.bf16.mxu1 %v8958_v15  ;;  %v8963_v22 = vld [vmem:[%s13738_s29 + $0x68] ss:$16 sps:$4 sm:$0xff]   ;;  %v8964_v23 = vld [vmem:[%s13738_s29 + $0x8c] ss:$16 sps:$4 sm:$0xff]   ;;  %v8949_v24 = vld [vmem:[%s13738_s29 + $0xe4] ss:$16 sps:$4 sm:$0xff]  }
  0x16   :  { %v8951_v25 = vld [vmem:[%s13738_s29 + $0xe0] ss:$16 sps:$4 sm:$0xff]   ;;  %v8966_v26 = vld [vmem:[%s13738_s29 + $0x88] ss:$16 sps:$4 sm:$0xff]   ;;  %v8967_v27 = vld [vmem:[%s13738_s29 + $0xac] ss:$16 sps:$4 sm:$0xff]  }
  0x17   :  { %v8978_v28 = vld [vmem:[%s13739_s3 + $0x4] ss:$16 sps:$4 sm:$0xff]   ;;  %v73_v29 = vld [vmem:[%s13740_s4] sm:$0xf]  ;;  %v8969_v30 = vld [vmem:[%s13738_s29 + $0xa8] ss:$16 sps:$4 sm:$0xff]  }
  0x18   :  { %293 = vmatpush1.bf16.msra.mxu0 %v8936_v6  ;;  %334 = vmatpush1.bf16.msra.mxu1 %v8960_v18  ;;  %v8970_v31 = vld [vmem:[%s13738_s29 + $0xcc] ss:$16 sps:$4 sm:$0xff]   ;;  %v8976_v32 = vld [vmem:[%s13739_s3] ss:$16 sps:$4 sm:$0xff]   ;;  %v8984_v33 = vld [vmem:[%s13739_s3 + $0x24] ss:$16 sps:$4 sm:$0xff]  }
  0x19   :  { %294 = vmatprep.subr.bf16.mxu0 %v8937_v7  ;;  %335 = vmatprep.subr.bf16.mxu1 %v8961_v19  ;;  %v8972_v34 = vld [vmem:[%s13738_s29 + $0xc8] ss:$16 sps:$4 sm:$0xff]   ;;  %v8973_v35 = vld [vmem:[%s13738_s29 + $0xec] ss:$16 sps:$4 sm:$0xff]   ;;  %v8982_v36 = vld [vmem:[%s13739_s3 + $0x20] ss:$16 sps:$4 sm:$0xff]  }
  0x1a   :  { %v8990_v37 = vld [vmem:[%s13739_s3 + $0x44] ss:$16 sps:$4 sm:$0xff]   ;;  %v8975_v38 = vld [vmem:[%s13738_s29 + $0xe8] ss:$16 sps:$4 sm:$0xff]   ;;  %v8981_v39 = vld [vmem:[%s13739_s3 + $0xc] ss:$16 sps:$4 sm:$0xff]  }
  0x1b   :  { %v8988_v40 = vld [vmem:[%s13739_s3 + $0x40] ss:$16 sps:$4 sm:$0xff]   ;;  %v8996_v41 = vld [vmem:[%s13739_s3 + $0x64] ss:$16 sps:$4 sm:$0xff]   ;;  %v8979_v42 = vld [vmem:[%s13739_s3 + $0x8] ss:$16 sps:$4 sm:$0xff]  }
  0x1c   :  { %295 = vmatpush1.bf16.msra.mxu0 %v8939_v8  ;;  %336 = vmatpush1.bf16.msra.mxu1 %v8963_v22  ;;  %v8987_v43 = vld [vmem:[%s13739_s3 + $0x2c] ss:$16 sps:$4 sm:$0xff]   ;;  %v8994_v44 = vld [vmem:[%s13739_s3 + $0x60] ss:$16 sps:$4 sm:$0xff]   ;;  %v9002_v45 = vld [vmem:[%s13739_s3 + $0x84] ss:$16 sps:$4 sm:$0xff]  }
  0x1d   :  { %296 = vmatprep.subr.bf16.mxu0 %v8940_v9  ;;  %337 = vmatprep.subr.bf16.mxu1 %v8964_v23  ;;  %v8985_v46 = vld [vmem:[%s13739_s3 + $0x28] ss:$16 sps:$4 sm:$0xff]   ;;  %v8993_v47 = vld [vmem:[%s13739_s3 + $0x4c] ss:$16 sps:$4 sm:$0xff]   ;;  %v9000_v48 = vld [vmem:[%s13739_s3 + $0x80] ss:$16 sps:$4 sm:$0xff]  }
  0x1e   :  { %v9008_v49 = vld [vmem:[%s13739_s3 + $0xa4] ss:$16 sps:$4 sm:$0xff]   ;;  %v8991_v50 = vld [vmem:[%s13739_s3 + $0x48] ss:$16 sps:$4 sm:$0xff]   ;;  %v8999_v51 = vld [vmem:[%s13739_s3 + $0x6c] ss:$16 sps:$4 sm:$0xff]  }
  0x1f   :  { %v9006_v52 = vld [vmem:[%s13739_s3 + $0xa0] ss:$16 sps:$4 sm:$0xff]   ;;  %v9014_v53 = vld [vmem:[%s13739_s3 + $0xc4] ss:$16 sps:$4 sm:$0xff]   ;;  %v8997_v54 = vld [vmem:[%s13739_s3 + $0x68] ss:$16 sps:$4 sm:$0xff]  }
  0x20   :  { %297 = vmatpush1.bf16.msra.mxu0 %v8942_v13  ;;  %338 = vmatpush1.bf16.msra.mxu1 %v8966_v26  ;;  %v9005_v55 = vld [vmem:[%s13739_s3 + $0x8c] ss:$16 sps:$4 sm:$0xff]   ;;  %v9012_v56 = vld [vmem:[%s13739_s3 + $0xc0] ss:$16 sps:$4 sm:$0xff]   ;;  %v9020_v57 = vld [vmem:[%s13739_s3 + $0xe4] ss:$16 sps:$4 sm:$0xff]  }
  0x21   :  { %298 = vmatprep.subr.bf16.mxu0 %v8943_v16  ;;  %339 = vmatprep.subr.bf16.mxu1 %v8967_v27  ;;  %v9003_v58 = vld [vmem:[%s13739_s3 + $0x88] ss:$16 sps:$4 sm:$0xff]   ;;  %v9011_v59 = vld [vmem:[%s13739_s3 + $0xac] ss:$16 sps:$4 sm:$0xff]   ;;  %v9018_v60 = vld [vmem:[%s13739_s3 + $0xe0] ss:$16 sps:$4 sm:$0xff]  }
  0x22   :  { %v9026_v61 = vld [vmem:[%s13739_s3 + $0x104] ss:$16 sps:$4 sm:$0xff]   ;;  %v9009_v62 = vld [vmem:[%s13739_s3 + $0xa8] ss:$16 sps:$4 sm:$0xff]   ;;  %v9017_v63 = vld [vmem:[%s13739_s3 + $0xcc] ss:$16 sps:$4 sm:$0xff]  }
  0x23   :  { %v9024_v0 = vld [vmem:[%s13739_s3 + $0x100] ss:$16 sps:$4 sm:$0xff]   ;;  %v9032_v1 = vld [vmem:[%s13739_s3 + $0x124] ss:$16 sps:$4 sm:$0xff]   ;;  %v9015_v3 = vld [vmem:[%s13739_s3 + $0xc8] ss:$16 sps:$4 sm:$0xff]  }
  0x24   :  { %299 = vmatpush1.bf16.msra.mxu0 %v8945_v17  ;;  %340 = vmatpush1.bf16.msra.mxu1 %v8969_v30  ;;  %v9023_v4 = vld [vmem:[%s13739_s3 + $0xec] ss:$16 sps:$4 sm:$0xff]   ;;  %v9030_v5 = vld [vmem:[%s13739_s3 + $0x120] ss:$16 sps:$4 sm:$0xff]   ;;  %v9038_v6 = vld [vmem:[%s13739_s3 + $0x144] ss:$16 sps:$4 sm:$0xff]  }
  0x25   :  { %300 = vmatprep.subr.bf16.mxu0 %v8946_v20  ;;  %341 = vmatprep.subr.bf16.mxu1 %v8970_v31  ;;  %v9021_v7 = vld [vmem:[%s13739_s3 + $0xe8] ss:$16 sps:$4 sm:$0xff]   ;;  %v9029_v8 = vld [vmem:[%s13739_s3 + $0x10c] ss:$16 sps:$4 sm:$0xff]   ;;  %v9036_v9 = vld [vmem:[%s13739_s3 + $0x140] ss:$16 sps:$4 sm:$0xff]  }
  0x26   :  { %v9044_v10 = vld [vmem:[%s13739_s3 + $0x164] ss:$16 sps:$4 sm:$0xff]   ;;  %v9027_v11 = vld [vmem:[%s13739_s3 + $0x108] ss:$16 sps:$4 sm:$0xff]   ;;  %v9035_v12 = vld [vmem:[%s13739_s3 + $0x12c] ss:$16 sps:$4 sm:$0xff]  }
  0x27   :  { %v9042_v13 = vld [vmem:[%s13739_s3 + $0x160] ss:$16 sps:$4 sm:$0xff]   ;;  %v9050_v14 = vld [vmem:[%s13739_s3 + $0x184] ss:$16 sps:$4 sm:$0xff]   ;;  %v9033_v15 = vld [vmem:[%s13739_s3 + $0x128] ss:$16 sps:$4 sm:$0xff]  }
  0x28   :  { %301 = vmatpush1.bf16.msra.mxu0 %v8948_v21  ;;  %342 = vmatpush1.bf16.msra.mxu1 %v8972_v34  ;;  %v9041_v16 = vld [vmem:[%s13739_s3 + $0x14c] ss:$16 sps:$4 sm:$0xff]   ;;  %v9048_v17 = vld [vmem:[%s13739_s3 + $0x180] ss:$16 sps:$4 sm:$0xff]   ;;  %v9056_v18 = vld [vmem:[%s13739_s3 + $0x1a4] ss:$16 sps:$4 sm:$0xff]  }
  0x29   :  { %302 = vmatprep.subr.bf16.mxu0 %v8949_v24  ;;  %343 = vmatprep.subr.bf16.mxu1 %v8973_v35  ;;  %v9039_v19 = vld [vmem:[%s13739_s3 + $0x148] ss:$16 sps:$4 sm:$0xff]   ;;  %v9047_v20 = vld [vmem:[%s13739_s3 + $0x16c] ss:$16 sps:$4 sm:$0xff]   ;;  %v9054_v21 = vld [vmem:[%s13739_s3 + $0x1a0] ss:$16 sps:$4 sm:$0xff]  }
  0x2a   :  { %v9045_v22 = vld [vmem:[%s13739_s3 + $0x168] ss:$16 sps:$4 sm:$0xff]   ;;  %v9053_v23 = vld [vmem:[%s13739_s3 + $0x18c] ss:$16 sps:$4 sm:$0xff]   ;;  %v9062_v27 = vld [vmem:[%s13739_s3 + $0x1c4] ss:$16 sps:$4 sm:$0xff]  }
  0x2b   :  { %v9051_v24 = vld [vmem:[%s13739_s3 + $0x188] ss:$16 sps:$4 sm:$0xff]   ;;  %v9068_v31 = vld [vmem:[%s13739_s3 + $0x1e4] ss:$16 sps:$4 sm:$0xff]  }
  0x2c   :  { %303 = vmatpush1.bf16.msra.mxu0 %v8951_v25  ;;  %344 = vmatpush1.bf16.msra.mxu1 %v8975_v38  ;;  %v9059_v25 = vld [vmem:[%s13739_s3 + $0x1ac] ss:$16 sps:$4 sm:$0xff]   ;;  %v9057_v26 = vld [vmem:[%s13739_s3 + $0x1a8] ss:$16 sps:$4 sm:$0xff]   ;;  %v9074_v35 = vld [vmem:[%s13739_s3 + $0x204] ss:$16 sps:$4 sm:$0xff]  }
  0x2d   :  { %1168 = vmatprep.subr.bf16.mxu0 %v8978_v28  ;;  %1250 = vmatprep.subr.bf16.mxu1 %v8981_v39  ;;  %v9065_v28 = vld [vmem:[%s13739_s3 + $0x1cc] ss:$16 sps:$4 sm:$0xff]   ;;  %v9063_v30 = vld [vmem:[%s13739_s3 + $0x1c8] ss:$16 sps:$4 sm:$0xff]  }
  0x2e   :  { %v9069_v34 = vld [vmem:[%s13739_s3 + $0x1e8] ss:$16 sps:$4 sm:$0xff]  }
  0x2f   :  { %321 = vmatmul.mubr.bf16.vlgmr.msra.gmra.mrb[0].mxu0 %v73_v29  ;;  %362 = vmatmul.mubr.bf16.vlgmr.msra.gmra.mrb[0].mxu1 %v73_v29  ;;  %v9060_v29 = vld [vmem:[%s13739_s3 + $0x1c0] ss:$16 sps:$4 sm:$0xff]  }
  0x30   :  { %1169 = vmatpush1.bf16.msra.mxu0 %v8976_v32  ;;  %1251 = vmatpush1.bf16.msra.mxu1 %v8979_v42  ;;  %v9071_v32 = vld [vmem:[%s13739_s3 + $0x1ec] ss:$16 sps:$4 sm:$0xff]  }
  0x31   :  { %1170 = vmatprep.subr.bf16.mxu0 %v8984_v33  ;;  %1252 = vmatprep.subr.bf16.mxu1 %v8987_v43  ;;  %v9066_v33 = vld [vmem:[%s13739_s3 + $0x1e0] ss:$16 sps:$4 sm:$0xff]  }
  0x34   :  { %1171 = vmatpush1.bf16.msra.mxu0 %v8982_v36  ;;  %1253 = vmatpush1.bf16.msra.mxu1 %v8985_v46  ;;  %v9077_v36 = vld [vmem:[%s13739_s3 + $0x20c] ss:$16 sps:$4 sm:$0xff]  }
  0x35   :  { %1172 = vmatprep.subr.bf16.mxu0 %v8990_v37  ;;  %1254 = vmatprep.subr.bf16.mxu1 %v8993_v47  ;;  %v108_v37 = vlaneseq }
  0x37   :  { %v10848_v38 = vshrl.u32 %v108_v37, 7  ;;  %v9129_v37 = vld [vmem:[%s13739_s3 + $0x328] ss:$16 sps:$4 sm:$0xff]  }
  0x38   :  { %1173 = vmatpush1.bf16.msra.mxu0 %v8988_v40  ;;  %1255 = vmatpush1.bf16.msra.mxu1 %v8991_v50  ;;  %v10856_v40 = vld [vmem:[%s13741_s23] sm:$0xf] }
  0x39   :  { %1174 = vmatprep.subr.bf16.mxu0 %v8996_v41  ;;  %1256 = vmatprep.subr.bf16.mxu1 %v8999_v51  ;;  %v10851_v39 = vsub.s32 0, %v10848_v38  ;;  %v10859_v41 = vsub.s32 1, %v10848_v38 }
  0x3b   :  { %v111_v42 = vrot.slane %v10856_v40, %v10851_v39  ;;  %v115_v43 = vrot.slane %v10856_v40, %v10859_v41 }
  0x3c   :  { %1175 = vmatpush1.bf16.msra.mxu0 %v8994_v44  ;;  %1257 = vmatpush1.bf16.msra.mxu1 %v8997_v54  ;;  %v9080_v54 = vld [vmem:[%s13739_s3 + $0x224] ss:$16 sps:$4 sm:$0xff]  }
  0x3d   :  { %1176 = vmatprep.subr.bf16.mxu0 %v9002_v45  ;;  %1258 = vmatprep.subr.bf16.mxu1 %v9005_v55  ;;  %v9083_v55 = vld [vmem:[%s13739_s3 + $0x22c] ss:$16 sps:$4 sm:$0xff]  }
  0x40   :  { %1177 = vmatpush1.bf16.msra.mxu0 %v9000_v48  ;;  %1259 = vmatpush1.bf16.msra.mxu1 %v9003_v58 }
  0x41   :  { %1178 = vmatprep.subr.bf16.mxu0 %v9008_v49  ;;  %1260 = vmatprep.subr.bf16.mxu1 %v9011_v59  ;;  %v9078_v59 = vld [vmem:[%s13739_s3 + $0x220] ss:$16 sps:$4 sm:$0xff]  }
  0x44   :  { %1179 = vmatpush1.bf16.msra.mxu0 %v9006_v52  ;;  %1261 = vmatpush1.bf16.msra.mxu1 %v9009_v62  ;;  %v9072_v52 = vld [vmem:[%s13739_s3 + $0x200] ss:$16 sps:$4 sm:$0xff]   ;;  %v9089_v62 = vld [vmem:[%s13739_s3 + $0x24c] ss:$16 sps:$4 sm:$0xff]  }
  0x45   :  { %1180 = vmatprep.subr.bf16.mxu0 %v9014_v53  ;;  %1262 = vmatprep.subr.bf16.mxu1 %v9017_v63  ;;  %v9075_v53 = vld [vmem:[%s13739_s3 + $0x208] ss:$16 sps:$4 sm:$0xff]  }
  0x48   :  { %1181 = vmatpush1.bf16.msra.mxu0 %v9012_v56  ;;  %1263 = vmatpush1.bf16.msra.mxu1 %v9015_v3  ;;  %v10878_v56 = vsub.s32 3, %v10848_v38  ;;  %v9087_v3 = vld [vmem:[%s13739_s3 + $0x248] ss:$16 sps:$4 sm:$0xff]  }
  0x49   :  { %1182 = vmatprep.subr.bf16.mxu0 %v9020_v57  ;;  %1264 = vmatprep.subr.bf16.mxu1 %v9023_v4 }
  0x4a   :  { %v123_v63 = vrot.slane %v10856_v40, %v10878_v56 }
  0x4c   :  { %1183 = vmatpush1.bf16.msra.mxu0 %v9018_v60  ;;  %1265 = vmatpush1.bf16.msra.mxu1 %v9021_v7  ;;  %v9081_v60 = vld [vmem:[%s13739_s3 + $0x228] ss:$16 sps:$4 sm:$0xff]  }
  0x4d   :  { %1184 = vmatprep.subr.bf16.mxu0 %v9026_v61  ;;  %1266 = vmatprep.subr.bf16.mxu1 %v9029_v8  ;;  %v9086_v61 = vld [vmem:[%s13739_s3 + $0x244] ss:$16 sps:$4 sm:$0xff]  }
  0x50   :  { %1185 = vmatpush1.bf16.msra.mxu0 %v9024_v0  ;;  %1267 = vmatpush1.bf16.msra.mxu1 %v9027_v11  ;;  %v9090_v11 = vld [vmem:[%s13739_s3 + $0x260] ss:$16 sps:$4 sm:$0xff]  }
  0x51   :  { %1186 = vmatprep.subr.bf16.mxu0 %v9032_v1  ;;  %1268 = vmatprep.subr.bf16.mxu1 %v9035_v12  ;;  %v9084_v1 = vld [vmem:[%s13739_s3 + $0x240] ss:$16 sps:$4 sm:$0xff]   ;;  %v9093_v12 = vld [vmem:[%s13739_s3 + $0x268] ss:$16 sps:$4 sm:$0xff]  }
  0x54   :  { %1187 = vmatpush1.bf16.msra.mxu0 %v9030_v5  ;;  %1269 = vmatpush1.bf16.msra.mxu1 %v9033_v15  ;;  %v9092_v5 = vld [vmem:[%s13739_s3 + $0x264] ss:$16 sps:$4 sm:$0xff]  }
  0x55   :  { %1188 = vmatprep.subr.bf16.mxu0 %v9038_v6  ;;  %1270 = vmatprep.subr.bf16.mxu1 %v9041_v16  ;;  %v9095_v6 = vld [vmem:[%s13739_s3 + $0x26c] ss:$16 sps:$4 sm:$0xff]   ;;  %v9096_v16 = vld [vmem:[%s13739_s3 + $0x280] ss:$16 sps:$4 sm:$0xff]  }
  0x58   :  { %1189 = vmatpush1.bf16.msra.mxu0 %v9036_v9  ;;  %1271 = vmatpush1.bf16.msra.mxu1 %v9039_v19  ;;  %v9107_v19 = vld [vmem:[%s13739_s3 + $0x2ac] ss:$16 sps:$4 sm:$0xff]  }
  0x59   :  { %1190 = vmatprep.subr.bf16.mxu0 %v9044_v10  ;;  %1272 = vmatprep.subr.bf16.mxu1 %v9047_v20  ;;  %v9102_v20 = vld [vmem:[%s13739_s3 + $0x2a0] ss:$16 sps:$4 sm:$0xff]  }
  0x5c   :  { %1191 = vmatpush1.bf16.msra.mxu0 %v9042_v13  ;;  %1273 = vmatpush1.bf16.msra.mxu1 %v9045_v22  ;;  %v9098_v13 = vld [vmem:[%s13739_s3 + $0x284] ss:$16 sps:$4 sm:$0xff]  }
  0x5d   :  { %1192 = vmatprep.subr.bf16.mxu0 %v9050_v14  ;;  %1274 = vmatprep.subr.bf16.mxu1 %v9053_v23  ;;  %v9101_v14 = vld [vmem:[%s13739_s3 + $0x28c] ss:$16 sps:$4 sm:$0xff]   ;;  %v9110_v22 = vld [vmem:[%s13739_s3 + $0x2c4] ss:$16 sps:$4 sm:$0xff]  }
  0x5e   :  { %v9113_v23 = vld [vmem:[%s13739_s3 + $0x2cc] ss:$16 sps:$4 sm:$0xff]  }
  0x60   :  { %1193 = vmatpush1.bf16.msra.mxu0 %v9048_v17  ;;  %1275 = vmatpush1.bf16.msra.mxu1 %v9051_v24  ;;  %v9099_v17 = vld [vmem:[%s13739_s3 + $0x288] ss:$16 sps:$4 sm:$0xff]   ;;  %v9108_v24 = vld [vmem:[%s13739_s3 + $0x2c0] ss:$16 sps:$4 sm:$0xff]  }
  0x61   :  { %1194 = vmatprep.subr.bf16.mxu0 %v9056_v18  ;;  %1276 = vmatprep.subr.bf16.mxu1 %v9059_v25  ;;  %v9104_v18 = vld [vmem:[%s13739_s3 + $0x2a4] ss:$16 sps:$4 sm:$0xff]   ;;  %v9111_v25 = vld [vmem:[%s13739_s3 + $0x2c8] ss:$16 sps:$4 sm:$0xff]  }
  0x64   :  { %1195 = vmatpush1.bf16.msra.mxu0 %v9054_v21  ;;  %1277 = vmatpush1.bf16.msra.mxu1 %v9057_v26  ;;  %v9105_v21 = vld [vmem:[%s13739_s3 + $0x2a8] ss:$16 sps:$4 sm:$0xff]   ;;  %v9116_v26 = vld [vmem:[%s13739_s3 + $0x2e4] ss:$16 sps:$4 sm:$0xff]  }
  0x65   :  { %1196 = vmatprep.subr.bf16.mxu0 %v9062_v27  ;;  %1278 = vmatprep.subr.bf16.mxu1 %v9065_v28  ;;  %v9119_v27 = vld [vmem:[%s13739_s3 + $0x2ec] ss:$16 sps:$4 sm:$0xff]   ;;  %v9114_v28 = vld [vmem:[%s13739_s3 + $0x2e0] ss:$16 sps:$4 sm:$0xff]  }
  0x68   :  { %1197 = vmatpush1.bf16.msra.mxu0 %v9060_v29  ;;  %1279 = vmatpush1.bf16.msra.mxu1 %v9063_v30  ;;  %v9117_v29 = vld [vmem:[%s13739_s3 + $0x2e8] ss:$16 sps:$4 sm:$0xff]   ;;  %v9122_v30 = vld [vmem:[%s13739_s3 + $0x304] ss:$16 sps:$4 sm:$0xff]  }
  0x69   :  { %1198 = vmatprep.subr.bf16.mxu0 %v9068_v31  ;;  %1280 = vmatprep.subr.bf16.mxu1 %v9071_v32  ;;  %v9125_v31 = vld [vmem:[%s13739_s3 + $0x30c] ss:$16 sps:$4 sm:$0xff]   ;;  %v9120_v32 = vld [vmem:[%s13739_s3 + $0x300] ss:$16 sps:$4 sm:$0xff]  }
  0x6c   :  { %1199 = vmatpush1.bf16.msra.mxu0 %v9066_v33  ;;  %1281 = vmatpush1.bf16.msra.mxu1 %v9069_v34  ;;  %v9123_v33 = vld [vmem:[%s13739_s3 + $0x308] ss:$16 sps:$4 sm:$0xff]   ;;  %v9128_v34 = vld [vmem:[%s13739_s3 + $0x324] ss:$16 sps:$4 sm:$0xff]  }
  0x6d   :  { %1209 = vmatprep.subr.bf16.mxu0 %v9074_v35  ;;  %1291 = vmatprep.subr.bf16.mxu1 %v9077_v36  ;;  %v9131_v35 = vld [vmem:[%s13739_s3 + $0x32c] ss:$16 sps:$4 sm:$0xff]   ;;  %v9126_v36 = vld [vmem:[%s13739_s3 + $0x320] ss:$16 sps:$4 sm:$0xff]  }
 0x102   :  { %v322_v44 = vpop.f32.mrb[0].mxu0  ;;  %v10894_v0 = vpop.f32.mrb[0].mxu1 }
 0x103   :  { %v323_v45 = vadd.f32 %v322_v44, %v111_v42  ;;  %v324_v46 = vpop.f32.mrb[1].mxu0  ;;  %v365_v4 = vpop.f32.mrb[1].mxu1  ;;  %v9134_v42 = vld [vmem:[%s13739_s3 + $0x344] ss:$16 sps:$4 sm:$0xff]   ;;  %v9132_v44 = vld [vmem:[%s13739_s3 + $0x340] ss:$16 sps:$4 sm:$0xff]  }
 0x104   :  { %v325_v47 = vadd.f32 %v324_v46, %v115_v43  ;;  %v326_v48 = vpop.f32.mrb[2].mxu0  ;;  %v366_v7 = vadd.f32 %v365_v4, %v123_v63  ;;  %v367_v8 = vpop.f32.mrb[2].mxu1  ;;  %v9137_v43 = vld [vmem:[%s13739_s3 + $0x34c] ss:$16 sps:$4 sm:$0xff]   ;;  %v9140_v46 = vld [vmem:[%s13739_s3 + $0x364] ss:$16 sps:$4 sm:$0xff]  }
 0x105   :  { %v370_v49 = vmax.f32 %v323_v45, 0.0  ;;  %v327_v50 = vpop.f32.mrb[3].mxu0  ;;  %v368_v9 = vpop.f32.mrb[3].mxu1  ;;  %v9135_v45 = vld [vmem:[%s13739_s3 + $0x348] ss:$16 sps:$4 sm:$0xff]  }
 0x106   :  { %v371_v51 = vmax.f32 %v325_v47, 0.0  ;;  %v373_v10 = vmax.f32 %v366_v7, 0.0  ;;  %v9143_v47 = vld [vmem:[%s13739_s3 + $0x36c] ss:$16 sps:$4 sm:$0xff]   ;;  %v9138_v48 = vld [vmem:[%s13739_s3 + $0x360] ss:$16 sps:$4 sm:$0xff]  }
 0x107   :  { %v374_v58 = vpack.c.bf16 %v370_v49, %v370_v49  ;;  %v9141_v49 = vld [vmem:[%s13739_s3 + $0x368] ss:$16 sps:$4 sm:$0xff]   ;;  %v9146_v50 = vld [vmem:[%s13739_s3 + $0x384] ss:$16 sps:$4 sm:$0xff]   ;;  %v9162_v4 = vld [vmem:[%s13739_s3 + $0x3e0] ss:$16 sps:$4 sm:$0xff]  }
 0x108   :  { %v375_v57 = vpack.c.bf16 %v371_v51, %v371_v51  ;;  %v377_v15 = vpack.c.bf16 %v373_v10, %v373_v10  ;;  %v9149_v51 = vld [vmem:[%s13739_s3 + $0x38c] ss:$16 sps:$4 sm:$0xff]   ;;  %v9159_v63 = vld [vmem:[%s13739_s3 + $0x3c8] ss:$16 sps:$4 sm:$0xff]   ;;  %v9168_v8 = vld [vmem:[%s13742_s28] ss:$16 sps:$4 sm:$0xff]  }
 0x109   :  { %v9173_v7 = vld [vmem:[%s13742_s28 + $0xc] ss:$16 sps:$4 sm:$0xff]   ;;  %v9171_v9 = vld [vmem:[%s13742_s28 + $0x8] ss:$16 sps:$4 sm:$0xff]   ;;  %v9176_v10 = vld [vmem:[%s13742_s28 + $0x24] ss:$16 sps:$4 sm:$0xff]  }
 0x10a   :  { %1200 = vmatprep.mubr.bf16.mxu0 %v375_v57  ;;  %1282 = vmatprep.mubr.bf16.mxu1 %v375_v57  ;;  %v11029_v57 = vsub.s32 2, %v10848_v38 }
 0x10b   :  { %1201 = vmatmul.mubr.bf16.vlgmr.msra.gmra.mrb[4].mxu0 %v374_v58  ;;  %1283 = vmatmul.mubr.bf16.vlgmr.msra.gmra.mrb[4].mxu1 %v374_v58  ;;  %v9150_v58 = vld [vmem:[%s13739_s3 + $0x3a0] ss:$16 sps:$4 sm:$0xff]  }
 0x10c   :  { %1210 = vmatpush1.bf16.msra.mxu0 %v9072_v52  ;;  %1292 = vmatpush1.bf16.msra.mxu1 %v9075_v53  ;;  %v9144_v52 = vld [vmem:[%s13739_s3 + $0x380] ss:$16 sps:$4 sm:$0xff]   ;;  %v9147_v53 = vld [vmem:[%s13739_s3 + $0x388] ss:$16 sps:$4 sm:$0xff]   ;;  %v119_v38 = vrot.slane %v10856_v40, %v11029_v57 }
 0x10d   :  { %1211 = vmatprep.subr.bf16.mxu0 %v9080_v54  ;;  %1293 = vmatprep.subr.bf16.mxu1 %v9083_v55  ;;  %v9152_v54 = vld [vmem:[%s13739_s3 + $0x3a4] ss:$16 sps:$4 sm:$0xff]   ;;  %v9155_v55 = vld [vmem:[%s13739_s3 + $0x3ac] ss:$16 sps:$4 sm:$0xff]  }
 0x10e   :  { %1241 = vmatprep.mubr.bf16.mxu0 %v377_v15  ;;  %1323 = vmatprep.mubr.bf16.mxu1 %v377_v15  ;;  %v364_v40 = vadd.f32 %v10894_v0, %v119_v38  ;;  %v9182_v15 = vld [vmem:[%s13742_s28 + $0x44] ss:$16 sps:$4 sm:$0xff]   ;;  %v9245_v38 = vld [vmem:[%s13742_s28 + $0x18c] ss:$16 sps:$4 sm:$0xff]  }
 0x110   :  { %1212 = vmatpush1.bf16.msra.mxu0 %v9078_v59  ;;  %1294 = vmatpush1.bf16.msra.mxu1 %v9081_v60  ;;  %v9153_v59 = vld [vmem:[%s13739_s3 + $0x3a8] ss:$16 sps:$4 sm:$0xff]   ;;  %v9158_v60 = vld [vmem:[%s13739_s3 + $0x3c4] ss:$16 sps:$4 sm:$0xff]   ;;  %v372_v0 = vmax.f32 %v364_v40, 0.0 }
 0x111   :  { %1213 = vmatprep.subr.bf16.mxu0 %v9086_v61  ;;  %1295 = vmatprep.subr.bf16.mxu1 %v9089_v62  ;;  %v9161_v61 = vld [vmem:[%s13739_s3 + $0x3cc] ss:$16 sps:$4 sm:$0xff]   ;;  %v9156_v62 = vld [vmem:[%s13739_s3 + $0x3c0] ss:$16 sps:$4 sm:$0xff]  }
 0x112   :  { %v9246_v40 = vld [vmem:[%s13742_s28 + $0x1a0] ss:$16 sps:$4 sm:$0xff]  }
 0x114   :  { %1214 = vmatpush1.bf16.msra.mxu0 %v9084_v1  ;;  %1296 = vmatpush1.bf16.msra.mxu1 %v9087_v3  ;;  %v9164_v1 = vld [vmem:[%s13739_s3 + $0x3e4] ss:$16 sps:$4 sm:$0xff]   ;;  %v9167_v3 = vld [vmem:[%s13739_s3 + $0x3ec] ss:$16 sps:$4 sm:$0xff]  }
 0x115   :  { %1215 = vmatprep.subr.bf16.mxu0 %v9092_v5  ;;  %1297 = vmatprep.subr.bf16.mxu1 %v9095_v6  ;;  %v9165_v5 = vld [vmem:[%s13739_s3 + $0x3e8] ss:$16 sps:$4 sm:$0xff]   ;;  %v9170_v6 = vld [vmem:[%s13742_s28 + $0x4] ss:$16 sps:$4 sm:$0xff]  }
 0x118   :  { %1216 = vmatpush1.bf16.msra.mxu0 %v9090_v11  ;;  %1298 = vmatpush1.bf16.msra.mxu1 %v9093_v12  ;;  %v9179_v11 = vld [vmem:[%s13742_s28 + $0x2c] ss:$16 sps:$4 sm:$0xff]   ;;  %v376_v12 = vpack.c.bf16 %v372_v0, %v372_v0  ;;  %v9255_v0 = vld [vmem:[%s13742_s28 + $0x1c8] ss:$16 sps:$4 sm:$0xff]  }
 0x119   :  { %1217 = vmatprep.subr.bf16.mxu0 %v9098_v13  ;;  %1299 = vmatprep.subr.bf16.mxu1 %v9101_v14  ;;  %v9174_v13 = vld [vmem:[%s13742_s28 + $0x20] ss:$16 sps:$4 sm:$0xff]   ;;  %v9177_v14 = vld [vmem:[%s13742_s28 + $0x28] ss:$16 sps:$4 sm:$0xff]  }
 0x11c   :  { %1218 = vmatpush1.bf16.msra.mxu0 %v9096_v16  ;;  %1300 = vmatpush1.bf16.msra.mxu1 %v9099_v17  ;;  %v9185_v16 = vld [vmem:[%s13742_s28 + $0x4c] ss:$16 sps:$4 sm:$0xff]   ;;  %v9180_v17 = vld [vmem:[%s13742_s28 + $0x40] ss:$16 sps:$4 sm:$0xff]  }
 0x11d   :  { %1219 = vmatprep.subr.bf16.mxu0 %v9104_v18  ;;  %1301 = vmatprep.subr.bf16.mxu1 %v9107_v19  ;;  %v9183_v18 = vld [vmem:[%s13742_s28 + $0x48] ss:$16 sps:$4 sm:$0xff]   ;;  %v9188_v19 = vld [vmem:[%s13742_s28 + $0x64] ss:$16 sps:$4 sm:$0xff]  }
 0x120   :  { %1220 = vmatpush1.bf16.msra.mxu0 %v9102_v20  ;;  %1302 = vmatpush1.bf16.msra.mxu1 %v9105_v21  ;;  %v9191_v20 = vld [vmem:[%s13742_s28 + $0x6c] ss:$16 sps:$4 sm:$0xff]   ;;  %v9186_v21 = vld [vmem:[%s13742_s28 + $0x60] ss:$16 sps:$4 sm:$0xff]  }
 0x121   :  { %1221 = vmatprep.subr.bf16.mxu0 %v9110_v22  ;;  %1303 = vmatprep.subr.bf16.mxu1 %v9113_v23  ;;  %v9189_v22 = vld [vmem:[%s13742_s28 + $0x68] ss:$16 sps:$4 sm:$0xff]   ;;  %v9194_v23 = vld [vmem:[%s13742_s28 + $0x84] ss:$16 sps:$4 sm:$0xff]  }
 0x124   :  { %1222 = vmatpush1.bf16.msra.mxu0 %v9108_v24  ;;  %1304 = vmatpush1.bf16.msra.mxu1 %v9111_v25  ;;  %v9197_v24 = vld [vmem:[%s13742_s28 + $0x8c] ss:$16 sps:$4 sm:$0xff]   ;;  %v9192_v25 = vld [vmem:[%s13742_s28 + $0x80] ss:$16 sps:$4 sm:$0xff]  }
 0x125   :  { %1223 = vmatprep.subr.bf16.mxu0 %v9116_v26  ;;  %1305 = vmatprep.subr.bf16.mxu1 %v9119_v27  ;;  %v9195_v26 = vld [vmem:[%s13742_s28 + $0x88] ss:$16 sps:$4 sm:$0xff]   ;;  %v9200_v27 = vld [vmem:[%s13742_s28 + $0xa4] ss:$16 sps:$4 sm:$0xff]  }
 0x128   :  { %1224 = vmatpush1.bf16.msra.mxu0 %v9114_v28  ;;  %1306 = vmatpush1.bf16.msra.mxu1 %v9117_v29  ;;  %v9203_v28 = vld [vmem:[%s13742_s28 + $0xac] ss:$16 sps:$4 sm:$0xff]   ;;  %v9198_v29 = vld [vmem:[%s13742_s28 + $0xa0] ss:$16 sps:$4 sm:$0xff]  }
 0x129   :  { %1225 = vmatprep.subr.bf16.mxu0 %v9122_v30  ;;  %1307 = vmatprep.subr.bf16.mxu1 %v9125_v31  ;;  %v9201_v30 = vld [vmem:[%s13742_s28 + $0xa8] ss:$16 sps:$4 sm:$0xff]   ;;  %v9206_v31 = vld [vmem:[%s13742_s28 + $0xc4] ss:$16 sps:$4 sm:$0xff]  }
 0x12c   :  { %1226 = vmatpush1.bf16.msra.mxu0 %v9120_v32  ;;  %1308 = vmatpush1.bf16.msra.mxu1 %v9123_v33  ;;  %v9209_v32 = vld [vmem:[%s13742_s28 + $0xcc] ss:$16 sps:$4 sm:$0xff]   ;;  %v9204_v33 = vld [vmem:[%s13742_s28 + $0xc0] ss:$16 sps:$4 sm:$0xff]  }
 0x12d   :  { %1227 = vmatprep.subr.bf16.mxu0 %v9128_v34  ;;  %1309 = vmatprep.subr.bf16.mxu1 %v9131_v35  ;;  %v9207_v34 = vld [vmem:[%s13742_s28 + $0xc8] ss:$16 sps:$4 sm:$0xff]   ;;  %v9212_v35 = vld [vmem:[%s13742_s28 + $0xe4] ss:$16 sps:$4 sm:$0xff]  }
 0x130   :  { %1228 = vmatpush1.bf16.msra.mxu0 %v9126_v36  ;;  %1310 = vmatpush1.bf16.msra.mxu1 %v9129_v37  ;;  %v9215_v36 = vld [vmem:[%s13742_s28 + $0xec] ss:$16 sps:$4 sm:$0xff]   ;;  %v9210_v37 = vld [vmem:[%s13742_s28 + $0xe0] ss:$16 sps:$4 sm:$0xff]  }
 0x131   :  { %1229 = vmatprep.subr.bf16.mxu0 %v9134_v42  ;;  %1311 = vmatprep.subr.bf16.mxu1 %v9137_v43  ;;  %v9213_v42 = vld [vmem:[%s13742_s28 + $0xe8] ss:$16 sps:$4 sm:$0xff]   ;;  %v9218_v43 = vld [vmem:[%s13742_s28 + $0x104] ss:$16 sps:$4 sm:$0xff]  }
 0x134   :  { %1230 = vmatpush1.bf16.msra.mxu0 %v9132_v44  ;;  %1312 = vmatpush1.bf16.msra.mxu1 %v9135_v45  ;;  %v9221_v44 = vld [vmem:[%s13742_s28 + $0x10c] ss:$16 sps:$4 sm:$0xff]   ;;  %v9216_v45 = vld [vmem:[%s13742_s28 + $0x100] ss:$16 sps:$4 sm:$0xff]  }
 0x135   :  { %1231 = vmatprep.subr.bf16.mxu0 %v9140_v46  ;;  %1313 = vmatprep.subr.bf16.mxu1 %v9143_v47  ;;  %v9219_v46 = vld [vmem:[%s13742_s28 + $0x108] ss:$16 sps:$4 sm:$0xff]   ;;  %v9224_v47 = vld [vmem:[%s13742_s28 + $0x124] ss:$16 sps:$4 sm:$0xff]  }
 0x138   :  { %1232 = vmatpush1.bf16.msra.mxu0 %v9138_v48  ;;  %1314 = vmatpush1.bf16.msra.mxu1 %v9141_v49  ;;  %v9227_v48 = vld [vmem:[%s13742_s28 + $0x12c] ss:$16 sps:$4 sm:$0xff]   ;;  %v9222_v49 = vld [vmem:[%s13742_s28 + $0x120] ss:$16 sps:$4 sm:$0xff]  }
 0x139   :  { %1233 = vmatprep.subr.bf16.mxu0 %v9146_v50  ;;  %1315 = vmatprep.subr.bf16.mxu1 %v9149_v51  ;;  %v9225_v50 = vld [vmem:[%s13742_s28 + $0x128] ss:$16 sps:$4 sm:$0xff]   ;;  %v9230_v51 = vld [vmem:[%s13742_s28 + $0x144] ss:$16 sps:$4 sm:$0xff]  }
 0x13c   :  { %1234 = vmatpush1.bf16.msra.mxu0 %v9144_v52  ;;  %1316 = vmatpush1.bf16.msra.mxu1 %v9147_v53  ;;  %v9233_v52 = vld [vmem:[%s13742_s28 + $0x14c] ss:$16 sps:$4 sm:$0xff]   ;;  %v9228_v53 = vld [vmem:[%s13742_s28 + $0x140] ss:$16 sps:$4 sm:$0xff]  }
 0x13d   :  { %1235 = vmatprep.subr.bf16.mxu0 %v9152_v54  ;;  %1317 = vmatprep.subr.bf16.mxu1 %v9155_v55  ;;  %v9231_v54 = vld [vmem:[%s13742_s28 + $0x148] ss:$16 sps:$4 sm:$0xff]   ;;  %v9236_v55 = vld [vmem:[%s13742_s28 + $0x164] ss:$16 sps:$4 sm:$0xff]  }
 0x140   :  { %1236 = vmatpush1.bf16.msra.mxu0 %v9150_v58  ;;  %1318 = vmatpush1.bf16.msra.mxu1 %v9153_v59  ;;  %v9239_v58 = vld [vmem:[%s13742_s28 + $0x16c] ss:$16 sps:$4 sm:$0xff]   ;;  %v9234_v59 = vld [vmem:[%s13742_s28 + $0x160] ss:$16 sps:$4 sm:$0xff]  }
 0x141   :  { %1237 = vmatprep.subr.bf16.mxu0 %v9158_v60  ;;  %1319 = vmatprep.subr.bf16.mxu1 %v9161_v61  ;;  %v9237_v60 = vld [vmem:[%s13742_s28 + $0x168] ss:$16 sps:$4 sm:$0xff]   ;;  %v9242_v61 = vld [vmem:[%s13742_s28 + $0x184] ss:$16 sps:$4 sm:$0xff]  }
 0x144   :  { %1238 = vmatpush1.bf16.msra.mxu0 %v9156_v62  ;;  %1320 = vmatpush1.bf16.msra.mxu1 %v9159_v63  ;;  %v9240_v62 = vld [vmem:[%s13742_s28 + $0x180] ss:$16 sps:$4 sm:$0xff]   ;;  %v9243_v63 = vld [vmem:[%s13742_s28 + $0x188] ss:$16 sps:$4 sm:$0xff]  }
 0x145   :  { %1239 = vmatprep.subr.bf16.mxu0 %v9164_v1  ;;  %1321 = vmatprep.subr.bf16.mxu1 %v9167_v3  ;;  %v9248_v1 = vld [vmem:[%s13742_s28 + $0x1a4] ss:$16 sps:$4 sm:$0xff]   ;;  %v9251_v3 = vld [vmem:[%s13742_s28 + $0x1ac] ss:$16 sps:$4 sm:$0xff]  }
 0x148   :  { %1240 = vmatpush1.bf16.msra.mxu0 %v9162_v4  ;;  %1322 = vmatpush1.bf16.msra.mxu1 %v9165_v5  ;;  %v9249_v4 = vld [vmem:[%s13742_s28 + $0x1a8] ss:$16 sps:$4 sm:$0xff]   ;;  %v9254_v5 = vld [vmem:[%s13742_s28 + $0x1c4] ss:$16 sps:$4 sm:$0xff]  }
 0x149   :  { %2130 = vmatprep.subr.bf16.mxu0 %v9170_v6  ;;  %2212 = vmatprep.subr.bf16.mxu1 %v9173_v7  ;;  %v9257_v6 = vld [vmem:[%s13742_s28 + $0x1cc] ss:$16 sps:$4 sm:$0xff]   ;;  %v9252_v7 = vld [vmem:[%s13742_s28 + $0x1c0] ss:$16 sps:$4 sm:$0xff]  }
 0x14b   :  { %1242 = vmatmul.mubr.bf16.vlgmr.msra.gmra.mrb[4].mxu0 %v376_v12  ;;  %1324 = vmatmul.mubr.bf16.vlgmr.msra.gmra.mrb[4].mxu1 %v376_v12  ;;  %v9266_v12 = vld [vmem:[%s13742_s28 + $0x204] ss:$16 sps:$4 sm:$0xff]  }
 0x14c   :  { %2131 = vmatpush1.bf16.msra.mxu0 %v9168_v8  ;;  %2213 = vmatpush1.bf16.msra.mxu1 %v9171_v9  ;;  %v9260_v8 = vld [vmem:[%s13742_s28 + $0x1e4] ss:$16 sps:$4 sm:$0xff]   ;;  %v9263_v9 = vld [vmem:[%s13742_s28 + $0x1ec] ss:$16 sps:$4 sm:$0xff]  }
 0x14d   :  { %2132 = vmatprep.subr.bf16.mxu0 %v9176_v10  ;;  %2214 = vmatprep.subr.bf16.mxu1 %v9179_v11  ;;  %v9258_v10 = vld [vmem:[%s13742_s28 + $0x1e0] ss:$16 sps:$4 sm:$0xff]   ;;  %v9261_v11 = vld [vmem:[%s13742_s28 + $0x1e8] ss:$16 sps:$4 sm:$0xff]  }
 0x150   :  { %2133 = vmatpush1.bf16.msra.mxu0 %v9174_v13  ;;  %2215 = vmatpush1.bf16.msra.mxu1 %v9177_v14  ;;  %v9269_v13 = vld [vmem:[%s13742_s28 + $0x20c] ss:$16 sps:$4 sm:$0xff]  }
 0x151   :  { %2134 = vmatprep.subr.bf16.mxu0 %v9182_v15  ;;  %2216 = vmatprep.subr.bf16.mxu1 %v9185_v16 }
 0x154   :  { %2135 = vmatpush1.bf16.msra.mxu0 %v9180_v17  ;;  %2217 = vmatpush1.bf16.msra.mxu1 %v9183_v18 }
 0x155   :  { %2136 = vmatprep.subr.bf16.mxu0 %v9188_v19  ;;  %2218 = vmatprep.subr.bf16.mxu1 %v9191_v20 }
 0x158   :  { %2137 = vmatpush1.bf16.msra.mxu0 %v9186_v21  ;;  %2219 = vmatpush1.bf16.msra.mxu1 %v9189_v22 }
 0x159   :  { %2138 = vmatprep.subr.bf16.mxu0 %v9194_v23  ;;  %2220 = vmatprep.subr.bf16.mxu1 %v9197_v24 }
 0x15c   :  { %2139 = vmatpush1.bf16.msra.mxu0 %v9192_v25  ;;  %2221 = vmatpush1.bf16.msra.mxu1 %v9195_v26 }
 0x15d   :  { %2140 = vmatprep.subr.bf16.mxu0 %v9200_v27  ;;  %2222 = vmatprep.subr.bf16.mxu1 %v9203_v28 }
 0x160   :  { %2141 = vmatpush1.bf16.msra.mxu0 %v9198_v29  ;;  %2223 = vmatpush1.bf16.msra.mxu1 %v9201_v30 }
 0x161   :  { %2142 = vmatprep.subr.bf16.mxu0 %v9206_v31  ;;  %2224 = vmatprep.subr.bf16.mxu1 %v9209_v32 }
 0x164   :  { %2143 = vmatpush1.bf16.msra.mxu0 %v9204_v33  ;;  %2225 = vmatpush1.bf16.msra.mxu1 %v9207_v34 }
 0x165   :  { %2144 = vmatprep.subr.bf16.mxu0 %v9212_v35  ;;  %2226 = vmatprep.subr.bf16.mxu1 %v9215_v36 }
 0x168   :  { %2145 = vmatpush1.bf16.msra.mxu0 %v9210_v37  ;;  %2227 = vmatpush1.bf16.msra.mxu1 %v9213_v42 }
 0x169   :  { %2146 = vmatprep.subr.bf16.mxu0 %v9218_v43  ;;  %2228 = vmatprep.subr.bf16.mxu1 %v9221_v44 }
 0x16c   :  { %2147 = vmatpush1.bf16.msra.mxu0 %v9216_v45  ;;  %2229 = vmatpush1.bf16.msra.mxu1 %v9219_v46 }
 0x16d   :  { %2148 = vmatprep.subr.bf16.mxu0 %v9224_v47  ;;  %2230 = vmatprep.subr.bf16.mxu1 %v9227_v48 }
 0x170   :  { %2149 = vmatpush1.bf16.msra.mxu0 %v9222_v49  ;;  %2231 = vmatpush1.bf16.msra.mxu1 %v9225_v50 }
 0x171   :  { %2150 = vmatprep.subr.bf16.mxu0 %v9230_v51  ;;  %2232 = vmatprep.subr.bf16.mxu1 %v9233_v52 }
 0x174   :  { %2151 = vmatpush1.bf16.msra.mxu0 %v9228_v53  ;;  %2233 = vmatpush1.bf16.msra.mxu1 %v9231_v54 }
 0x175   :  { %2152 = vmatprep.subr.bf16.mxu0 %v9236_v55  ;;  %2234 = vmatprep.subr.bf16.mxu1 %v9239_v58 }
 0x178   :  { %2153 = vmatpush1.bf16.msra.mxu0 %v9234_v59  ;;  %2235 = vmatpush1.bf16.msra.mxu1 %v9237_v60 }
 0x179   :  { %2154 = vmatprep.subr.bf16.mxu0 %v9242_v61  ;;  %2236 = vmatprep.subr.bf16.mxu1 %v9245_v38 }
 0x17c   :  { %2155 = vmatpush1.bf16.msra.mxu0 %v9240_v62  ;;  %2237 = vmatpush1.bf16.msra.mxu1 %v9243_v63 }
 0x17d   :  { %2156 = vmatprep.subr.bf16.mxu0 %v9248_v1  ;;  %2238 = vmatprep.subr.bf16.mxu1 %v9251_v3 }
 0x180   :  { %2157 = vmatpush1.bf16.msra.mxu0 %v9246_v40  ;;  %2239 = vmatpush1.bf16.msra.mxu1 %v9249_v4 }
 0x181   :  { %2158 = vmatprep.subr.bf16.mxu0 %v9254_v5  ;;  %2240 = vmatprep.subr.bf16.mxu1 %v9257_v6 }
 0x184   :  { %2159 = vmatpush1.bf16.msra.mxu0 %v9252_v7  ;;  %2241 = vmatpush1.bf16.msra.mxu1 %v9255_v0 }
 0x185   :  { %2160 = vmatprep.subr.bf16.mxu0 %v9260_v8  ;;  %2242 = vmatprep.subr.bf16.mxu1 %v9263_v9 }
 0x188   :  { %2161 = vmatpush1.bf16.msra.mxu0 %v9258_v10  ;;  %2243 = vmatpush1.bf16.msra.mxu1 %v9261_v11 }
 0x189   :  { %2171 = vmatprep.subr.bf16.mxu0 %v9266_v12  ;;  %2253 = vmatprep.subr.bf16.mxu1 %v9269_v13 }
 0x18a   :  { %27 = vsyncpa [#allocation3], 0  ;;  %s13743_s23 = sld [smem:[#allocation9_spill]]  ;;  %v9264_v33 = vld [vmem:[%s13742_s28 + $0x200] ss:$16 sps:$4 sm:$0xff]   ;;  %s10433_s5 = smov [#allocation2]  }
 0x18b   :  { %v9267_v34 = vld [vmem:[%s13742_s28 + $0x208] ss:$16 sps:$4 sm:$0xff]   ;;  %v9272_v36 = vld [vmem:[%s13742_s28 + $0x224] ss:$16 sps:$4 sm:$0xff]   ;;  %v9275_v37 = vld [vmem:[%s13742_s28 + $0x22c] ss:$16 sps:$4 sm:$0xff]  }
 0x18c   :  { %v9270_v43 = vld [vmem:[%s13742_s28 + $0x220] ss:$16 sps:$4 sm:$0xff]   ;;  %v9273_v44 = vld [vmem:[%s13742_s28 + $0x228] ss:$16 sps:$4 sm:$0xff]   ;;  %v9278_v45 = vld [vmem:[%s13742_s28 + $0x244] ss:$16 sps:$4 sm:$0xff]  }
 0x18d   :  { %v9281_v46 = vld [vmem:[%s13742_s28 + $0x24c] ss:$16 sps:$4 sm:$0xff]   ;;  %v9276_v47 = vld [vmem:[%s13742_s28 + $0x240] ss:$16 sps:$4 sm:$0xff]   ;;  %v9279_v48 = vld [vmem:[%s13742_s28 + $0x248] ss:$16 sps:$4 sm:$0xff]  }
 0x18e   :  { %v9284_v49 = vld [vmem:[%s13742_s28 + $0x264] ss:$16 sps:$4 sm:$0xff]   ;;  %v9287_v50 = vld [vmem:[%s13742_s28 + $0x26c] ss:$16 sps:$4 sm:$0xff]   ;;  %v9282_v51 = vld [vmem:[%s13742_s28 + $0x260] ss:$16 sps:$4 sm:$0xff]  }
 0x18f   :  { %v9285_v52 = vld [vmem:[%s13742_s28 + $0x268] ss:$16 sps:$4 sm:$0xff]   ;;  %v9290_v53 = vld [vmem:[%s13742_s28 + $0x284] ss:$16 sps:$4 sm:$0xff]   ;;  %v9293_v54 = vld [vmem:[%s13742_s28 + $0x28c] ss:$16 sps:$4 sm:$0xff]  }
 0x190   :  { %v11265_v14 = vld [vmem:[%s13743_s23] sm:$0xf]  ;;  %v9291_v58 = vld [vmem:[%s13742_s28 + $0x288] ss:$16 sps:$4 sm:$0xff]   ;;  %v9296_v59 = vld [vmem:[%s13742_s28 + $0x2a4] ss:$16 sps:$4 sm:$0xff]  }
 0x191   :  { %v511_v15 = vrot.slane %v11265_v14, %v10851_v39  ;;  %v515_v16 = vrot.slane %v11265_v14, %v10859_v41  ;;  %v523_v17 = vrot.slane %v11265_v14, %v10878_v56  ;;  %v9288_v55 = vld [vmem:[%s13742_s28 + $0x280] ss:$16 sps:$4 sm:$0xff]   ;;  %v9299_v60 = vld [vmem:[%s13742_s28 + $0x2ac] ss:$16 sps:$4 sm:$0xff]   ;;  %v9297_v38 = vld [vmem:[%s13742_s28 + $0x2a8] ss:$16 sps:$4 sm:$0xff]  }
 0x192   :  { %v9294_v61 = vld [vmem:[%s13742_s28 + $0x2a0] ss:$16 sps:$4 sm:$0xff]   ;;  %v9302_v62 = vld [vmem:[%s13742_s28 + $0x2c4] ss:$16 sps:$4 sm:$0xff]   ;;  %v9305_v63 = vld [vmem:[%s13742_s28 + $0x2cc] ss:$16 sps:$4 sm:$0xff]  }
 0x193   :  { %v9300_v1 = vld [vmem:[%s13742_s28 + $0x2c0] ss:$16 sps:$4 sm:$0xff]   ;;  %v9303_v3 = vld [vmem:[%s13742_s28 + $0x2c8] ss:$16 sps:$4 sm:$0xff]   ;;  %v9308_v40 = vld [vmem:[%s13742_s28 + $0x2e4] ss:$16 sps:$4 sm:$0xff]  }
 0x194   :  { %v9311_v4 = vld [vmem:[%s13742_s28 + $0x2ec] ss:$16 sps:$4 sm:$0xff]   ;;  %v9306_v5 = vld [vmem:[%s13742_s28 + $0x2e0] ss:$16 sps:$4 sm:$0xff]   ;;  %v9309_v6 = vld [vmem:[%s13742_s28 + $0x2e8] ss:$16 sps:$4 sm:$0xff]  }
 0x195   :  { %v9314_v7 = vld [vmem:[%s13742_s28 + $0x304] ss:$16 sps:$4 sm:$0xff]   ;;  %v9317_v0 = vld [vmem:[%s13742_s28 + $0x30c] ss:$16 sps:$4 sm:$0xff]   ;;  %v9312_v8 = vld [vmem:[%s13742_s28 + $0x300] ss:$16 sps:$4 sm:$0xff]  }
 0x196   :  { %v9315_v9 = vld [vmem:[%s13742_s28 + $0x308] ss:$16 sps:$4 sm:$0xff]   ;;  %v9320_v10 = vld [vmem:[%s13742_s28 + $0x324] ss:$16 sps:$4 sm:$0xff]   ;;  %v9323_v11 = vld [vmem:[%s13742_s28 + $0x32c] ss:$16 sps:$4 sm:$0xff]  }
 0x197   :  { %v9318_v12 = vld [vmem:[%s13742_s28 + $0x320] ss:$16 sps:$4 sm:$0xff]   ;;  %v9321_v13 = vld [vmem:[%s13742_s28 + $0x328] ss:$16 sps:$4 sm:$0xff]   ;;  %s7794_s3 = sshll.u32 %s10433_s5, 4  ;;  %s7795_s3 = int_to_ptr.vmem [resolvable:$true] %s7794_s3 }
 0x198   :  { %s10407_s24 = scalar_lea.vmem %s7795_s3, 128  ;;  %p10412_p1 = scmp.lt.s32.totalorder %s7795_s3, %s7795_s3 }
 0x199   :  { %p10408_p0 = scmp.ne.s32.totalorder %s7795_s3, %s10407_s24  ;;  %p10413_p2 = scmp.lt.s32.totalorder %s10407_s24, %s10407_s24 }
 0x19b   :  { %p10414_p3 = por %p10413_p2, %p10412_p1 }
 0x19d   :  { %p10415_p4 = pnand %p10414_p3, %p10408_p0 }
 0x21e   :  { %v1243_v18 = vpop.f32.mrb[4].mxu0  ;;  %v11273_v19 = vpop.f32.mrb[4].mxu1 }
 0x21f   :  { %v8840_v20 = vadd.f32 %v1243_v18, %v511_v15  ;;  %v1245_v21 = vpop.f32.mrb[5].mxu0  ;;  %v1327_v22 = vpop.f32.mrb[5].mxu1  ;;  %v9326_v15 = vld [vmem:[%s13742_s28 + $0x344] ss:$16 sps:$4 sm:$0xff]   ;;  %v9327_v18 = vld [vmem:[%s13742_s28 + $0x348] ss:$16 sps:$4 sm:$0xff]  }
 0x220   :  { %v8841_v23 = vadd.f32 %v1245_v21, %v515_v16  ;;  %v8843_v24 = vadd.f32 %v1327_v22, %v523_v17  ;;  %v1247_v25 = vpop.f32.mrb[6].mxu0  ;;  %v1329_v26 = vpop.f32.mrb[6].mxu1  ;;  %v9329_v16 = vld [vmem:[%s13742_s28 + $0x34c] ss:$16 sps:$4 sm:$0xff]   ;;  %v9324_v17 = vld [vmem:[%s13742_s28 + $0x340] ss:$16 sps:$4 sm:$0xff]  }
 0x221   :  { %v1332_v27 = vmax.f32 %v8840_v20, 0.0  ;;  %v1248_v28 = vpop.f32.mrb[7].mxu0  ;;  %v1330_v29 = vpop.f32.mrb[7].mxu1  ;;  %v9332_v20 = vld [vmem:[%s13742_s28 + $0x364] ss:$16 sps:$4 sm:$0xff]  }
 0x222   :  { %v1333_v30 = vmax.f32 %v8841_v23, 0.0  ;;  %v1335_v31 = vmax.f32 %v8843_v24, 0.0  ;;  %v9335_v21 = vld [vmem:[%s13742_s28 + $0x36c] ss:$16 sps:$4 sm:$0xff]   ;;  %v9330_v22 = vld [vmem:[%s13742_s28 + $0x360] ss:$16 sps:$4 sm:$0xff]  }
 0x223   :  { %v1336_v35 = vpack.c.bf16 %v1332_v27, %v1332_v27  ;;  %v9333_v23 = vld [vmem:[%s13742_s28 + $0x368] ss:$16 sps:$4 sm:$0xff]   ;;  %v9338_v24 = vld [vmem:[%s13742_s28 + $0x384] ss:$16 sps:$4 sm:$0xff]   ;;  %v9341_v25 = vld [vmem:[%s13742_s28 + $0x38c] ss:$16 sps:$4 sm:$0xff]  }
 0x224   :  { %v1337_v32 = vpack.c.bf16 %v1333_v30, %v1333_v30  ;;  %v1339_v42 = vpack.c.bf16 %v1335_v31, %v1335_v31  ;;  %v9336_v26 = vld [vmem:[%s13742_s28 + $0x380] ss:$16 sps:$4 sm:$0xff]   ;;  %v9339_v27 = vld [vmem:[%s13742_s28 + $0x388] ss:$16 sps:$4 sm:$0xff]   ;;  %v9344_v28 = vld [vmem:[%s13742_s28 + $0x3a4] ss:$16 sps:$4 sm:$0xff]  }
 0x225   :  { %v9347_v29 = vld [vmem:[%s13742_s28 + $0x3ac] ss:$16 sps:$4 sm:$0xff]   ;;  %v9342_v30 = vld [vmem:[%s13742_s28 + $0x3a0] ss:$16 sps:$4 sm:$0xff]   ;;  %v9345_v31 = vld [vmem:[%s13742_s28 + $0x3a8] ss:$16 sps:$4 sm:$0xff]  }
 0x226   :  { %2162 = vmatprep.mubr.bf16.mxu0 %v1337_v32  ;;  %2244 = vmatprep.mubr.bf16.mxu1 %v1337_v32  ;;  %v519_v32 = vrot.slane %v11265_v14, %v11029_v57  ;;  %v9351_v14 = vld [vmem:[%s13742_s28 + $0x3c8] ss:$16 sps:$4 sm:$0xff]  }
 0x227   :  { %2163 = vmatmul.mubr.bf16.vlgmr.msra.gmra.mrb[8].mxu0 %v1336_v35  ;;  %2245 = vmatmul.mubr.bf16.vlgmr.msra.gmra.mrb[8].mxu1 %v1336_v35  ;;  %v9348_v35 = vld [vmem:[%s13742_s28 + $0x3c0] ss:$16 sps:$4 sm:$0xff]  }
 0x228   :  { %2172 = vmatpush1.bf16.msra.mxu0 %v9264_v33  ;;  %2254 = vmatpush1.bf16.msra.mxu1 %v9267_v34  ;;  %v9350_v33 = vld [vmem:[%s13742_s28 + $0x3c4] ss:$16 sps:$4 sm:$0xff]   ;;  %v9353_v34 = vld [vmem:[%s13742_s28 + $0x3cc] ss:$16 sps:$4 sm:$0xff]  }
 0x229   :  { %2203 = vmatprep.mubr.bf16.mxu0 %v1339_v42  ;;  %2285 = vmatprep.mubr.bf16.mxu1 %v1339_v42  ;;  %v9359_v42 = vld [vmem:[%s13742_s28 + $0x3ec] ss:$16 sps:$4 sm:$0xff]  }
 0x22a   :  { %2173 = vmatprep.subr.bf16.mxu0 %v9272_v36  ;;  %2255 = vmatprep.subr.bf16.mxu1 %v9275_v37  ;;  %v8842_v36 = vadd.f32 %v11273_v19, %v519_v32  ;;  %v9356_v37 = vld [vmem:[%s13742_s28 + $0x3e4] ss:$16 sps:$4 sm:$0xff]   ;;  %v9357_v19 = vld [vmem:[%s13742_s28 + $0x3e8] ss:$16 sps:$4 sm:$0xff]  }
 0x22b   :  { %v9429_v32 = vld [vmem:[%s13713_s9 + $0x68] ss:$16 sps:$4 sm:$0xff]  }
 0x22c   :  { %2174 = vmatpush1.bf16.msra.mxu0 %v9270_v43  ;;  %2256 = vmatpush1.bf16.msra.mxu1 %v9273_v44  ;;  %v9354_v43 = vld [vmem:[%s13742_s28 + $0x3e0] ss:$16 sps:$4 sm:$0xff]   ;;  %v1334_v44 = vmax.f32 %v8842_v36, 0.0  ;;  %v9440_v36 = vld [vmem:[%s13713_s9 + $0xa4] ss:$16 sps:$4 sm:$0xff]  }
 0x22d   :  { %2175 = vmatprep.subr.bf16.mxu0 %v9278_v45  ;;  %2257 = vmatprep.subr.bf16.mxu1 %v9281_v46  ;;  %v9362_v45 = vld [vmem:[%s13711_s7 + $0x4] ss:$16 sps:$4 sm:$0xff]   ;;  %v9365_v46 = vld [vmem:[%s13711_s7 + $0xc] ss:$16 sps:$4 sm:$0xff]  }
 0x230   :  { %2176 = vmatpush1.bf16.msra.mxu0 %v9276_v47  ;;  %2258 = vmatpush1.bf16.msra.mxu1 %v9279_v48  ;;  %v9360_v47 = vld [vmem:[%s13711_s7] ss:$16 sps:$4 sm:$0xff]   ;;  %v9363_v48 = vld [vmem:[%s13711_s7 + $0x8] ss:$16 sps:$4 sm:$0xff]  }
 0x231   :  { %2177 = vmatprep.subr.bf16.mxu0 %v9284_v49  ;;  %2259 = vmatprep.subr.bf16.mxu1 %v9287_v50  ;;  %v1338_v49 = vpack.c.bf16 %v1334_v44, %v1334_v44  ;;  %v9368_v50 = vld [vmem:[%s13711_s7 + $0x24] ss:$16 sps:$4 sm:$0xff]   ;;  %v9449_v44 = vld [vmem:[%s13713_s9 + $0xcc] ss:$16 sps:$4 sm:$0xff]  }
 0x234   :  { %2178 = vmatpush1.bf16.msra.mxu0 %v9282_v51  ;;  %2260 = vmatpush1.bf16.msra.mxu1 %v9285_v52  ;;  %v9371_v51 = vld [vmem:[%s13711_s7 + $0x2c] ss:$16 sps:$4 sm:$0xff]   ;;  %v9366_v52 = vld [vmem:[%s13711_s7 + $0x20] ss:$16 sps:$4 sm:$0xff]  }
 0x235   :  { %2179 = vmatprep.subr.bf16.mxu0 %v9290_v53  ;;  %2261 = vmatprep.subr.bf16.mxu1 %v9293_v54  ;;  %v9369_v53 = vld [vmem:[%s13711_s7 + $0x28] ss:$16 sps:$4 sm:$0xff]   ;;  %v9374_v54 = vld [vmem:[%s13711_s7 + $0x44] ss:$16 sps:$4 sm:$0xff]  }
 0x238   :  { %2180 = vmatpush1.bf16.msra.mxu0 %v9288_v55  ;;  %2262 = vmatpush1.bf16.msra.mxu1 %v9291_v58  ;;  %v9377_v55 = vld [vmem:[%s13711_s7 + $0x4c] ss:$16 sps:$4 sm:$0xff]   ;;  %v9372_v58 = vld [vmem:[%s13711_s7 + $0x40] ss:$16 sps:$4 sm:$0xff]  }
 0x239   :  { %2181 = vmatprep.subr.bf16.mxu0 %v9296_v59  ;;  %2263 = vmatprep.subr.bf16.mxu1 %v9299_v60  ;;  %v9375_v59 = vld [vmem:[%s13711_s7 + $0x48] ss:$16 sps:$4 sm:$0xff]   ;;  %v9380_v60 = vld [vmem:[%s13711_s7 + $0x64] ss:$16 sps:$4 sm:$0xff]  }
 0x23c   :  { %2182 = vmatpush1.bf16.msra.mxu0 %v9294_v61  ;;  %2264 = vmatpush1.bf16.msra.mxu1 %v9297_v38  ;;  %v9378_v61 = vld [vmem:[%s13711_s7 + $0x60] ss:$16 sps:$4 sm:$0xff]   ;;  %v9381_v38 = vld [vmem:[%s13711_s7 + $0x68] ss:$16 sps:$4 sm:$0xff]  }
 0x23d   :  { %2183 = vmatprep.subr.bf16.mxu0 %v9302_v62  ;;  %2265 = vmatprep.subr.bf16.mxu1 %v9305_v63  ;;  %v9386_v62 = vld [vmem:[%s13711_s7 + $0x84] ss:$16 sps:$4 sm:$0xff]   ;;  %v9389_v63 = vld [vmem:[%s13711_s7 + $0x8c] ss:$16 sps:$4 sm:$0xff]  }
 0x240   :  { %2184 = vmatpush1.bf16.msra.mxu0 %v9300_v1  ;;  %2266 = vmatpush1.bf16.msra.mxu1 %v9303_v3  ;;  %v9384_v1 = vld [vmem:[%s13711_s7 + $0x80] ss:$16 sps:$4 sm:$0xff]   ;;  %v9387_v3 = vld [vmem:[%s13711_s7 + $0x88] ss:$16 sps:$4 sm:$0xff]  }
 0x241   :  { %2185 = vmatprep.subr.bf16.mxu0 %v9308_v40  ;;  %2267 = vmatprep.subr.bf16.mxu1 %v9311_v4  ;;  %v9392_v40 = vld [vmem:[%s13711_s7 + $0xa4] ss:$16 sps:$4 sm:$0xff]   ;;  %v9395_v4 = vld [vmem:[%s13711_s7 + $0xac] ss:$16 sps:$4 sm:$0xff]  }
 0x244   :  { %2186 = vmatpush1.bf16.msra.mxu0 %v9306_v5  ;;  %2268 = vmatpush1.bf16.msra.mxu1 %v9309_v6  ;;  %v9390_v5 = vld [vmem:[%s13711_s7 + $0xa0] ss:$16 sps:$4 sm:$0xff]   ;;  %v9393_v6 = vld [vmem:[%s13711_s7 + $0xa8] ss:$16 sps:$4 sm:$0xff]  }
 0x245   :  { %2187 = vmatprep.subr.bf16.mxu0 %v9314_v7  ;;  %2269 = vmatprep.subr.bf16.mxu1 %v9317_v0  ;;  %v9398_v7 = vld [vmem:[%s13711_s7 + $0xc4] ss:$16 sps:$4 sm:$0xff]   ;;  %v9401_v0 = vld [vmem:[%s13711_s7 + $0xcc] ss:$16 sps:$4 sm:$0xff]  }
 0x248   :  { %2188 = vmatpush1.bf16.msra.mxu0 %v9312_v8  ;;  %2270 = vmatpush1.bf16.msra.mxu1 %v9315_v9  ;;  %v9396_v8 = vld [vmem:[%s13711_s7 + $0xc0] ss:$16 sps:$4 sm:$0xff]   ;;  %v9399_v9 = vld [vmem:[%s13711_s7 + $0xc8] ss:$16 sps:$4 sm:$0xff]  }
 0x249   :  { %2189 = vmatprep.subr.bf16.mxu0 %v9320_v10  ;;  %2271 = vmatprep.subr.bf16.mxu1 %v9323_v11  ;;  %v9404_v10 = vld [vmem:[%s13711_s7 + $0xe4] ss:$16 sps:$4 sm:$0xff]   ;;  %v9407_v11 = vld [vmem:[%s13711_s7 + $0xec] ss:$16 sps:$4 sm:$0xff]  }
 0x24c   :  { %2190 = vmatpush1.bf16.msra.mxu0 %v9318_v12  ;;  %2272 = vmatpush1.bf16.msra.mxu1 %v9321_v13  ;;  %v9402_v12 = vld [vmem:[%s13711_s7 + $0xe0] ss:$16 sps:$4 sm:$0xff]   ;;  %v9405_v13 = vld [vmem:[%s13711_s7 + $0xe8] ss:$16 sps:$4 sm:$0xff]  }
 0x24d   :  { %2191 = vmatprep.subr.bf16.mxu0 %v9326_v15  ;;  %2273 = vmatprep.subr.bf16.mxu1 %v9329_v16  ;;  %v9410_v15 = vld [vmem:[%s13713_s9 + $0x4] ss:$16 sps:$4 sm:$0xff]   ;;  %v9413_v16 = vld [vmem:[%s13713_s9 + $0xc] ss:$16 sps:$4 sm:$0xff]  }
 0x250   :  { %2192 = vmatpush1.bf16.msra.mxu0 %v9324_v17  ;;  %2274 = vmatpush1.bf16.msra.mxu1 %v9327_v18  ;;  %v9408_v17 = vld [vmem:[%s13713_s9] ss:$16 sps:$4 sm:$0xff]   ;;  %v9411_v18 = vld [vmem:[%s13713_s9 + $0x8] ss:$16 sps:$4 sm:$0xff]  }
 0x251   :  { %2193 = vmatprep.subr.bf16.mxu0 %v9332_v20  ;;  %2275 = vmatprep.subr.bf16.mxu1 %v9335_v21  ;;  %v9416_v20 = vld [vmem:[%s13713_s9 + $0x24] ss:$16 sps:$4 sm:$0xff]   ;;  %v9419_v21 = vld [vmem:[%s13713_s9 + $0x2c] ss:$16 sps:$4 sm:$0xff]  }
 0x254   :  { %2194 = vmatpush1.bf16.msra.mxu0 %v9330_v22  ;;  %2276 = vmatpush1.bf16.msra.mxu1 %v9333_v23  ;;  %v10406_v22 = vld [vmem:[%s13740_s4] sm:$0xf] }
 0x255   :  { %2195 = vmatprep.subr.bf16.mxu0 %v9338_v24  ;;  %2277 = vmatprep.subr.bf16.mxu1 %v9341_v25  ;;  %v9414_v23 = vld [vmem:[%s13713_s9 + $0x20] ss:$16 sps:$4 sm:$0xff]   ;;  %v9417_v24 = vld [vmem:[%s13713_s9 + $0x28] ss:$16 sps:$4 sm:$0xff]   ;;  %v9422_v25 = vld [vmem:[%s13713_s9 + $0x44] ss:$16 sps:$4 sm:$0xff]  }
 0x258   :  { %2196 = vmatpush1.bf16.msra.mxu0 %v9336_v26  ;;  %2278 = vmatpush1.bf16.msra.mxu1 %v9339_v27  ;;  %v9425_v26 = vld [vmem:[%s13713_s9 + $0x4c] ss:$16 sps:$4 sm:$0xff]   ;;  %v9420_v27 = vld [vmem:[%s13713_s9 + $0x40] ss:$16 sps:$4 sm:$0xff]  }
 0x259   :  { %2197 = vmatprep.subr.bf16.mxu0 %v9344_v28  ;;  %2279 = vmatprep.subr.bf16.mxu1 %v9347_v29  ;;  %v9423_v28 = vld [vmem:[%s13713_s9 + $0x48] ss:$16 sps:$4 sm:$0xff]   ;;  %v9428_v29 = vld [vmem:[%s13713_s9 + $0x64] ss:$16 sps:$4 sm:$0xff]  }
 0x25c   :  { %2198 = vmatpush1.bf16.msra.mxu0 %v9342_v30  ;;  %2280 = vmatpush1.bf16.msra.mxu1 %v9345_v31  ;;  %v9431_v30 = vld [vmem:[%s13713_s9 + $0x6c] ss:$16 sps:$4 sm:$0xff]   ;;  %v9426_v31 = vld [vmem:[%s13713_s9 + $0x60] ss:$16 sps:$4 sm:$0xff]  }
 0x25d   :  { %2199 = vmatprep.subr.bf16.mxu0 %v9350_v33  ;;  %2281 = vmatprep.subr.bf16.mxu1 %v9353_v34  ;;  %v9434_v33 = vld [vmem:[%s13713_s9 + $0x84] ss:$16 sps:$4 sm:$0xff]   ;;  %v9437_v34 = vld [vmem:[%s13713_s9 + $0x8c] ss:$16 sps:$4 sm:$0xff]  }
 0x260   :  { %2200 = vmatpush1.bf16.msra.mxu0 %v9348_v35  ;;  %2282 = vmatpush1.bf16.msra.mxu1 %v9351_v14  ;;  %v9432_v35 = vld [vmem:[%s13713_s9 + $0x80] ss:$16 sps:$4 sm:$0xff]   ;;  %v9435_v14 = vld [vmem:[%s13713_s9 + $0x88] ss:$16 sps:$4 sm:$0xff]  }
 0x261   :  { %2201 = vmatprep.subr.bf16.mxu0 %v9356_v37  ;;  %2283 = vmatprep.subr.bf16.mxu1 %v9359_v42  ;;  %v9443_v37 = vld [vmem:[%s13713_s9 + $0xac] ss:$16 sps:$4 sm:$0xff]   ;;  %v9438_v42 = vld [vmem:[%s13713_s9 + $0xa0] ss:$16 sps:$4 sm:$0xff]  }
 0x264   :  { %2202 = vmatpush1.bf16.msra.mxu0 %v9354_v43  ;;  %2284 = vmatpush1.bf16.msra.mxu1 %v9357_v19  ;;  %v9441_v43 = vld [vmem:[%s13713_s9 + $0xa8] ss:$16 sps:$4 sm:$0xff]   ;;  %v9446_v19 = vld [vmem:[%s13713_s9 + $0xc4] ss:$16 sps:$4 sm:$0xff]  }
 0x265   :  { %2512 = vmatprep.subr.bf16.mxu0 %v9362_v45  ;;  %2553 = vmatprep.subr.bf16.mxu1 %v9365_v46  ;;  %v9444_v45 = vld [vmem:[%s13713_s9 + $0xc0] ss:$16 sps:$4 sm:$0xff]   ;;  %v9447_v46 = vld [vmem:[%s13713_s9 + $0xc8] ss:$16 sps:$4 sm:$0xff]  }
 0x267   :  { %2204 = vmatmul.mubr.bf16.vlgmr.msra.gmra.mrb[8].mxu0 %v1338_v49  ;;  %2286 = vmatmul.mubr.bf16.vlgmr.msra.gmra.mrb[8].mxu1 %v1338_v49  ;;  %v9450_v49 = vld [vmem:[%s13713_s9 + $0xe0] ss:$16 sps:$4 sm:$0xff]  }
 0x268   :  { %2513 = vmatpush1.bf16.msra.mxu0 %v9360_v47  ;;  %2554 = vmatpush1.bf16.msra.mxu1 %v9363_v48  ;;  %v9452_v47 = vld [vmem:[%s13713_s9 + $0xe4] ss:$16 sps:$4 sm:$0xff]   ;;  %v9455_v48 = vld [vmem:[%s13713_s9 + $0xec] ss:$16 sps:$4 sm:$0xff]  }
 0x269   :  { %2514 = vmatprep.subr.bf16.mxu0 %v9368_v50  ;;  %2555 = vmatprep.subr.bf16.mxu1 %v9371_v51  ;;  %v9453_v50 = vld [vmem:[%s13713_s9 + $0xe8] ss:$16 sps:$4 sm:$0xff]   ;;  %v9458_v51 = vld [vmem:[%s13713_s9 + $0x104] ss:$16 sps:$4 sm:$0xff]  }
 0x26a   :  { %2544 = vmatprep.mubr.bf16.mxu0 %v10431_v2  ;;  %2585 = vmatprep.mubr.bf16.mxu1 %v10431_v2  ;;  %v9383_v2 = vld [vmem:[%s13711_s7 + $0x6c] ss:$16 sps:$4 sm:$0xff]   ;;  %s13744_s7 = sld [smem:[#allocation11_spill]] }
 0x26c   :  { %2515 = vmatpush1.bf16.msra.mxu0 %v9366_v52  ;;  %2556 = vmatpush1.bf16.msra.mxu1 %v9369_v53  ;;  %v9456_v52 = vld [vmem:[%s13713_s9 + $0x100] ss:$16 sps:$4 sm:$0xff]   ;;  %v9459_v53 = vld [vmem:[%s13713_s9 + $0x108] ss:$16 sps:$4 sm:$0xff]  }
 0x26d   :  { %2516 = vmatprep.subr.bf16.mxu0 %v9374_v54  ;;  %2557 = vmatprep.subr.bf16.mxu1 %v9377_v55  ;;  %v9461_v54 = vld [vmem:[%s13713_s9 + $0x10c] ss:$16 sps:$4 sm:$0xff]   ;;  %v9464_v55 = vld [vmem:[%s13713_s9 + $0x124] ss:$16 sps:$4 sm:$0xff]  }
 0x270   :  { %2517 = vmatpush1.bf16.msra.mxu0 %v9372_v58  ;;  %2558 = vmatpush1.bf16.msra.mxu1 %v9375_v59  ;;  %v9467_v58 = vld [vmem:[%s13713_s9 + $0x12c] ss:$16 sps:$4 sm:$0xff]   ;;  %v9462_v59 = vld [vmem:[%s13713_s9 + $0x120] ss:$16 sps:$4 sm:$0xff]  }
 0x271   :  { %2518 = vmatprep.subr.bf16.mxu0 %v9380_v60  ;;  %2559 = vmatprep.subr.bf16.mxu1 %v9383_v2  ;;  %v9465_v60 = vld [vmem:[%s13713_s9 + $0x128] ss:$16 sps:$4 sm:$0xff]   ;;  %v9470_v2 = vld [vmem:[%s13713_s9 + $0x144] ss:$16 sps:$4 sm:$0xff]  }
 0x274   :  { %2519 = vmatpush1.bf16.msra.mxu0 %v9378_v61  ;;  %2560 = vmatpush1.bf16.msra.mxu1 %v9381_v38  ;;  %v9473_v61 = vld [vmem:[%s13713_s9 + $0x14c] ss:$16 sps:$4 sm:$0xff]   ;;  %v9468_v38 = vld [vmem:[%s13713_s9 + $0x140] ss:$16 sps:$4 sm:$0xff]  }
 0x275   :  { %2520 = vmatprep.subr.bf16.mxu0 %v9386_v62  ;;  %2561 = vmatprep.subr.bf16.mxu1 %v9389_v63  ;;  %v9471_v62 = vld [vmem:[%s13713_s9 + $0x148] ss:$16 sps:$4 sm:$0xff]   ;;  %v9476_v63 = vld [vmem:[%s13713_s9 + $0x164] ss:$16 sps:$4 sm:$0xff]  }
 0x278   :  { %2521 = vmatpush1.bf16.msra.mxu0 %v9384_v1  ;;  %2562 = vmatpush1.bf16.msra.mxu1 %v9387_v3  ;;  %v9479_v1 = vld [vmem:[%s13713_s9 + $0x16c] ss:$16 sps:$4 sm:$0xff]   ;;  %v9474_v3 = vld [vmem:[%s13713_s9 + $0x160] ss:$16 sps:$4 sm:$0xff]  }
 0x279   :  { %2522 = vmatprep.subr.bf16.mxu0 %v9392_v40  ;;  %2563 = vmatprep.subr.bf16.mxu1 %v9395_v4  ;;  %v9477_v40 = vld [vmem:[%s13713_s9 + $0x168] ss:$16 sps:$4 sm:$0xff]   ;;  %v9482_v4 = vld [vmem:[%s13713_s9 + $0x184] ss:$16 sps:$4 sm:$0xff]  }
 0x27c   :  { %2523 = vmatpush1.bf16.msra.mxu0 %v9390_v5  ;;  %2564 = vmatpush1.bf16.msra.mxu1 %v9393_v6  ;;  %v9485_v5 = vld [vmem:[%s13713_s9 + $0x18c] ss:$16 sps:$4 sm:$0xff]   ;;  %v9480_v6 = vld [vmem:[%s13713_s9 + $0x180] ss:$16 sps:$4 sm:$0xff]  }
 0x27d   :  { %2524 = vmatprep.subr.bf16.mxu0 %v9398_v7  ;;  %2565 = vmatprep.subr.bf16.mxu1 %v9401_v0  ;;  %v9483_v7 = vld [vmem:[%s13713_s9 + $0x188] ss:$16 sps:$4 sm:$0xff]   ;;  %v9488_v0 = vld [vmem:[%s13713_s9 + $0x1a4] ss:$16 sps:$4 sm:$0xff]  }
 0x280   :  { %2525 = vmatpush1.bf16.msra.mxu0 %v9396_v8  ;;  %2566 = vmatpush1.bf16.msra.mxu1 %v9399_v9  ;;  %v9491_v8 = vld [vmem:[%s13713_s9 + $0x1ac] ss:$16 sps:$4 sm:$0xff]   ;;  %v9486_v9 = vld [vmem:[%s13713_s9 + $0x1a0] ss:$16 sps:$4 sm:$0xff]  }
 0x281   :  { %2526 = vmatprep.subr.bf16.mxu0 %v9404_v10  ;;  %2567 = vmatprep.subr.bf16.mxu1 %v9407_v11  ;;  %v9489_v10 = vld [vmem:[%s13713_s9 + $0x1a8] ss:$16 sps:$4 sm:$0xff]   ;;  %v9494_v11 = vld [vmem:[%s13713_s9 + $0x1c4] ss:$16 sps:$4 sm:$0xff]  }
 0x284   :  { %2527 = vmatpush1.bf16.msra.mxu0 %v9402_v12  ;;  %2568 = vmatpush1.bf16.msra.mxu1 %v9405_v13  ;;  %v9497_v12 = vld [vmem:[%s13713_s9 + $0x1cc] ss:$16 sps:$4 sm:$0xff]   ;;  %v9492_v13 = vld [vmem:[%s13713_s9 + $0x1c0] ss:$16 sps:$4 sm:$0xff]  }
 0x285   :  { %3392 = vmatprep.subr.bf16.mxu0 %v9410_v15  ;;  %3474 = vmatprep.subr.bf16.mxu1 %v9413_v16  ;;  %v9495_v15 = vld [vmem:[%s13713_s9 + $0x1c8] ss:$16 sps:$4 sm:$0xff]   ;;  %v9500_v16 = vld [vmem:[%s13713_s9 + $0x1e4] ss:$16 sps:$4 sm:$0xff]  }
 0x287   :  { %2545 = vmatmul.mubr.bf16.vlgmr.msra.gmra.mrb[12].mxu0 %v10406_v22  ;;  %2586 = vmatmul.mubr.bf16.vlgmr.msra.gmra.mrb[12].mxu1 %v10406_v22  ;;  %v9509_v22 = vld [vmem:[%s13713_s9 + $0x20c] ss:$16 sps:$4 sm:$0xff]  }
 0x288   :  { %3393 = vmatpush1.bf16.msra.mxu0 %v9408_v17  ;;  %3475 = vmatpush1.bf16.msra.mxu1 %v9411_v18  ;;  %v9503_v17 = vld [vmem:[%s13713_s9 + $0x1ec] ss:$16 sps:$4 sm:$0xff]   ;;  %v9498_v18 = vld [vmem:[%s13713_s9 + $0x1e0] ss:$16 sps:$4 sm:$0xff]  }
 0x289   :  { %3394 = vmatprep.subr.bf16.mxu0 %v9416_v20  ;;  %3476 = vmatprep.subr.bf16.mxu1 %v9419_v21  ;;  %v9501_v20 = vld [vmem:[%s13713_s9 + $0x1e8] ss:$16 sps:$4 sm:$0xff]   ;;  %v9506_v21 = vld [vmem:[%s13713_s9 + $0x204] ss:$16 sps:$4 sm:$0xff]  }
 0x28c   :  { %3395 = vmatpush1.bf16.msra.mxu0 %v9414_v23  ;;  %3477 = vmatpush1.bf16.msra.mxu1 %v9417_v24 }
 0x28d   :  { %3396 = vmatprep.subr.bf16.mxu0 %v9422_v25  ;;  %3478 = vmatprep.subr.bf16.mxu1 %v9425_v26 }
 0x290   :  { %3397 = vmatpush1.bf16.msra.mxu0 %v9420_v27  ;;  %3479 = vmatpush1.bf16.msra.mxu1 %v9423_v28 }
 0x291   :  { %3398 = vmatprep.subr.bf16.mxu0 %v9428_v29  ;;  %3480 = vmatprep.subr.bf16.mxu1 %v9431_v30 }
 0x294   :  { %3399 = vmatpush1.bf16.msra.mxu0 %v9426_v31  ;;  %3481 = vmatpush1.bf16.msra.mxu1 %v9429_v32  ;;  %v1468_v31 = vld [vmem:[%s13744_s7] sm:$0xf] }
 0x295   :  { %3400 = vmatprep.subr.bf16.mxu0 %v9434_v33  ;;  %3482 = vmatprep.subr.bf16.mxu1 %v9437_v34  ;;  %v1473_v32 = vrot.slane %v1468_v31, %v10851_v39  ;;  %v1481_v33 = vrot.slane %v1468_v31, %v11029_v57  ;;  %v1477_v34 = vrot.slane %v1468_v31, %v10859_v41 }
 0x298   :  { %3401 = vmatpush1.bf16.msra.mxu0 %v9432_v35  ;;  %3483 = vmatpush1.bf16.msra.mxu1 %v9435_v14  ;;  %v1485_v35 = vrot.slane %v1468_v31, %v10878_v56  ;;  %v2330_v14 = vld [vmem:[%s13712_s8] sm:$0xf]  ;;  %v9545_v31 = vld [vmem:[%s13713_s9 + $0x2cc] ss:$16 sps:$4 sm:$0xff]  }
 0x299   :  { %3402 = vmatprep.subr.bf16.mxu0 %v9440_v36  ;;  %3484 = vmatprep.subr.bf16.mxu1 %v9443_v37 }
 0x29c   :  { %3403 = vmatpush1.bf16.msra.mxu0 %v9438_v42  ;;  %3485 = vmatpush1.bf16.msra.mxu1 %v9441_v43  ;;  %v2335_v42 = vrot.slane %v2330_v14, %v10851_v39  ;;  %v2343_v43 = vrot.slane %v2330_v14, %v11029_v57 }
 0x29d   :  { %3404 = vmatprep.subr.bf16.mxu0 %v9446_v19  ;;  %3486 = vmatprep.subr.bf16.mxu1 %v9449_v44 }
 0x2a0   :  { %3405 = vmatpush1.bf16.msra.mxu0 %v9444_v45  ;;  %3487 = vmatpush1.bf16.msra.mxu1 %v9447_v46  ;;  %v2339_v45 = vrot.slane %v2330_v14, %v10859_v41  ;;  %v2347_v46 = vrot.slane %v2330_v14, %v10878_v56  ;;  %v9546_v14 = vld [vmem:[%s13713_s9 + $0x2e0] ss:$16 sps:$4 sm:$0xff]  }
 0x2a1   :  { %3406 = vmatprep.subr.bf16.mxu0 %v9452_v47  ;;  %3488 = vmatprep.subr.bf16.mxu1 %v9455_v48 }
 0x2a4   :  { %3407 = vmatpush1.bf16.msra.mxu0 %v9450_v49  ;;  %3489 = vmatpush1.bf16.msra.mxu1 %v9453_v50 }
 0x2a5   :  { %3408 = vmatprep.subr.bf16.mxu0 %v9458_v51  ;;  %3490 = vmatprep.subr.bf16.mxu1 %v9461_v54 }
 0x2a8   :  { %3409 = vmatpush1.bf16.msra.mxu0 %v9456_v52  ;;  %3491 = vmatpush1.bf16.msra.mxu1 %v9459_v53 }
 0x2a9   :  { %3410 = vmatprep.subr.bf16.mxu0 %v9464_v55  ;;  %3492 = vmatprep.subr.bf16.mxu1 %v9467_v58 }
 0x2ac   :  { %3411 = vmatpush1.bf16.msra.mxu0 %v9462_v59  ;;  %3493 = vmatpush1.bf16.msra.mxu1 %v9465_v60 }
 0x2ad   :  { %3412 = vmatprep.subr.bf16.mxu0 %v9470_v2  ;;  %3494 = vmatprep.subr.bf16.mxu1 %v9473_v61 }
 0x2b0   :  { %3413 = vmatpush1.bf16.msra.mxu0 %v9468_v38  ;;  %3495 = vmatpush1.bf16.msra.mxu1 %v9471_v62 }
 0x2b1   :  { %3414 = vmatprep.subr.bf16.mxu0 %v9476_v63  ;;  %3496 = vmatprep.subr.bf16.mxu1 %v9479_v1 }
 0x2b4   :  { %3415 = vmatpush1.bf16.msra.mxu0 %v9474_v3  ;;  %3497 = vmatpush1.bf16.msra.mxu1 %v9477_v40 }
 0x2b5   :  { %3416 = vmatprep.subr.bf16.mxu0 %v9482_v4  ;;  %3498 = vmatprep.subr.bf16.mxu1 %v9485_v5  ;;  %v9504_v5 = vld [vmem:[%s13713_s9 + $0x200] ss:$16 sps:$4 sm:$0xff]  }
 0x2b8   :  { %3417 = vmatpush1.bf16.msra.mxu0 %v9480_v6  ;;  %3499 = vmatpush1.bf16.msra.mxu1 %v9483_v7  ;;  %v9507_v6 = vld [vmem:[%s13713_s9 + $0x208] ss:$16 sps:$4 sm:$0xff]  }
 0x2b9   :  { %3418 = vmatprep.subr.bf16.mxu0 %v9488_v0  ;;  %3500 = vmatprep.subr.bf16.mxu1 %v9491_v8  ;;  %v9512_v0 = vld [vmem:[%s13713_s9 + $0x224] ss:$16 sps:$4 sm:$0xff]   ;;  %v9515_v8 = vld [vmem:[%s13713_s9 + $0x22c] ss:$16 sps:$4 sm:$0xff]  }
 0x2bc   :  { %3419 = vmatpush1.bf16.msra.mxu0 %v9486_v9  ;;  %3501 = vmatpush1.bf16.msra.mxu1 %v9489_v10  ;;  %v9510_v10 = vld [vmem:[%s13713_s9 + $0x220] ss:$16 sps:$4 sm:$0xff]  }
 0x2bd   :  { %3420 = vmatprep.subr.bf16.mxu0 %v9494_v11  ;;  %3502 = vmatprep.subr.bf16.mxu1 %v9497_v12  ;;  %v9513_v11 = vld [vmem:[%s13713_s9 + $0x228] ss:$16 sps:$4 sm:$0xff]   ;;  %v9518_v12 = vld [vmem:[%s13713_s9 + $0x244] ss:$16 sps:$4 sm:$0xff]  }
 0x2c0   :  { %3421 = vmatpush1.bf16.msra.mxu0 %v9492_v13  ;;  %3503 = vmatpush1.bf16.msra.mxu1 %v9495_v15  ;;  %v9521_v13 = vld [vmem:[%s13713_s9 + $0x24c] ss:$16 sps:$4 sm:$0xff]   ;;  %v9516_v15 = vld [vmem:[%s13713_s9 + $0x240] ss:$16 sps:$4 sm:$0xff]  }
 0x2c1   :  { %3422 = vmatprep.subr.bf16.mxu0 %v9500_v16  ;;  %3504 = vmatprep.subr.bf16.mxu1 %v9503_v17  ;;  %v9519_v16 = vld [vmem:[%s13713_s9 + $0x248] ss:$16 sps:$4 sm:$0xff]   ;;  %v9524_v17 = vld [vmem:[%s13713_s9 + $0x264] ss:$16 sps:$4 sm:$0xff]  }
 0x2c4   :  { %3423 = vmatpush1.bf16.msra.mxu0 %v9498_v18  ;;  %3505 = vmatpush1.bf16.msra.mxu1 %v9501_v20  ;;  %v9527_v18 = vld [vmem:[%s13713_s9 + $0x26c] ss:$16 sps:$4 sm:$0xff]   ;;  %v9522_v20 = vld [vmem:[%s13713_s9 + $0x260] ss:$16 sps:$4 sm:$0xff]  }
 0x2c5   :  { %3433 = vmatprep.subr.bf16.mxu0 %v9506_v21  ;;  %3515 = vmatprep.subr.bf16.mxu1 %v9509_v22  ;;  %v9525_v21 = vld [vmem:[%s13713_s9 + $0x268] ss:$16 sps:$4 sm:$0xff]   ;;  %v9530_v22 = vld [vmem:[%s13713_s9 + $0x284] ss:$16 sps:$4 sm:$0xff]  }
 0x33a   :  { %v2205_v23 = vpop.f32.mrb[8].mxu0  ;;  %v2287_v24 = vpop.f32.mrb[8].mxu1 }
 0x33b   :  { %v2207_v25 = vpop.f32.mrb[9].mxu0  ;;  %v2289_v26 = vpop.f32.mrb[9].mxu1  ;;  %v8844_v36 = vadd.f32 %v2205_v23, %v1473_v32  ;;  %v8846_v37 = vadd.f32 %v2287_v24, %v1481_v33  ;;  %v9533_v23 = vld [vmem:[%s13713_s9 + $0x28c] ss:$16 sps:$4 sm:$0xff]   ;;  %v9528_v24 = vld [vmem:[%s13713_s9 + $0x280] ss:$16 sps:$4 sm:$0xff]  }
 0x33c   :  { %v2209_v27 = vpop.f32.mrb[10].mxu0  ;;  %v2291_v28 = vpop.f32.mrb[10].mxu1  ;;  %v8845_v19 = vadd.f32 %v2207_v25, %v1477_v34  ;;  %v8847_v44 = vadd.f32 %v2289_v26, %v1485_v35  ;;  %v9531_v25 = vld [vmem:[%s13713_s9 + $0x288] ss:$16 sps:$4 sm:$0xff]   ;;  %v9536_v26 = vld [vmem:[%s13713_s9 + $0x2a4] ss:$16 sps:$4 sm:$0xff]  }
 0x33d   :  { %v2210_v29 = vpop.f32.mrb[11].mxu0  ;;  %v2292_v30 = vpop.f32.mrb[11].mxu1  ;;  %v2294_v49 = vmax.f32 %v8844_v36, 0.0  ;;  %v2296_v50 = vmax.f32 %v8846_v37, 0.0  ;;  %v9539_v27 = vld [vmem:[%s13713_s9 + $0x2ac] ss:$16 sps:$4 sm:$0xff]  }
 0x33e   :  { %v2295_v55 = vmax.f32 %v8845_v19, 0.0  ;;  %v2297_v58 = vmax.f32 %v8847_v44, 0.0  ;;  %v9534_v28 = vld [vmem:[%s13713_s9 + $0x2a0] ss:$16 sps:$4 sm:$0xff]   ;;  %v9537_v29 = vld [vmem:[%s13713_s9 + $0x2a8] ss:$16 sps:$4 sm:$0xff]  }
 0x33f   :  { %v9542_v30 = vld [vmem:[%s13713_s9 + $0x2c4] ss:$16 sps:$4 sm:$0xff]   ;;  %v9540_v32 = vld [vmem:[%s13713_s9 + $0x2c0] ss:$16 sps:$4 sm:$0xff]   ;;  %v9543_v33 = vld [vmem:[%s13713_s9 + $0x2c8] ss:$16 sps:$4 sm:$0xff]  }
 0x340   :  { %v9548_v34 = vld [vmem:[%s13713_s9 + $0x2e4] ss:$16 sps:$4 sm:$0xff]   ;;  %v9551_v35 = vld [vmem:[%s13713_s9 + $0x2ec] ss:$16 sps:$4 sm:$0xff]   ;;  %v9549_v36 = vld [vmem:[%s13713_s9 + $0x2e8] ss:$16 sps:$4 sm:$0xff]  }
 0x341   :  { %v9554_v37 = vld [vmem:[%s13713_s9 + $0x304] ss:$16 sps:$4 sm:$0xff]   ;;  %v9555_v19 = vld [vmem:[%s13713_s9 + $0x308] ss:$16 sps:$4 sm:$0xff]  }
 0x342   :  { %v9560_v44 = vld [vmem:[%s13713_s9 + $0x324] ss:$16 sps:$4 sm:$0xff]  }
 0x35a   :  { %v2546_v47 = vpop.f32.mrb[12].mxu0  ;;  %v2587_v48 = vpop.f32.mrb[12].mxu1 }
 0x35b   :  { %v2547_v51 = vadd.f32 %v2546_v47, %v2335_v42  ;;  %v2588_v52 = vadd.f32 %v2587_v48, %v2343_v43  ;;  %v2548_v53 = vpop.f32.mrb[13].mxu0  ;;  %v2589_v54 = vpop.f32.mrb[13].mxu1  ;;  %v9557_v42 = vld [vmem:[%s13713_s9 + $0x30c] ss:$16 sps:$4 sm:$0xff]   ;;  %v9552_v43 = vld [vmem:[%s13713_s9 + $0x300] ss:$16 sps:$4 sm:$0xff]  }
 0x35c   :  { %v2549_v59 = vadd.f32 %v2548_v53, %v2339_v45  ;;  %v2590_v60 = vadd.f32 %v2589_v54, %v2347_v46  ;;  %v2550_v2 = vpop.f32.mrb[14].mxu0  ;;  %v2591_v61 = vpop.f32.mrb[14].mxu1  ;;  %v9563_v45 = vld [vmem:[%s13713_s9 + $0x32c] ss:$16 sps:$4 sm:$0xff]   ;;  %v9558_v46 = vld [vmem:[%s13713_s9 + $0x320] ss:$16 sps:$4 sm:$0xff]  }
 0x35d   :  { %v11777_v38 = vadd.f32 %v2547_v51, %v2294_v49  ;;  %v11779_v62 = vadd.f32 %v2588_v52, %v2296_v50  ;;  %v2551_v63 = vpop.f32.mrb[15].mxu0  ;;  %v2592_v1 = vpop.f32.mrb[15].mxu1  ;;  %v9561_v47 = vld [vmem:[%s13713_s9 + $0x328] ss:$16 sps:$4 sm:$0xff]   ;;  %v9566_v48 = vld [vmem:[%s13713_s9 + $0x344] ss:$16 sps:$4 sm:$0xff]  }
 0x35e   :  { %v11781_v3 = vadd.f32 %v2549_v59, %v2295_v55  ;;  %v11783_v40 = vadd.f32 %v2590_v60, %v2297_v58  ;;  %v9569_v49 = vld [vmem:[%s13713_s9 + $0x34c] ss:$16 sps:$4 sm:$0xff]   ;;  %v9564_v50 = vld [vmem:[%s13713_s9 + $0x340] ss:$16 sps:$4 sm:$0xff]   ;;  %v9567_v51 = vld [vmem:[%s13713_s9 + $0x348] ss:$16 sps:$4 sm:$0xff]  }
 0x35f   :  { %v2598_v7 = vpack.c.bf16 %v11777_v38, %v11777_v38  ;;  %v9572_v52 = vld [vmem:[%s13713_s9 + $0x364] ss:$16 sps:$4 sm:$0xff]   ;;  %v9575_v53 = vld [vmem:[%s13713_s9 + $0x36c] ss:$16 sps:$4 sm:$0xff]   ;;  %v9570_v54 = vld [vmem:[%s13713_s9 + $0x360] ss:$16 sps:$4 sm:$0xff]  }
 0x360   :  { %v2599_v4 = vpack.c.bf16 %v11781_v3, %v11781_v3  ;;  %v2601_v9 = vpack.c.bf16 %v11783_v40, %v11783_v40  ;;  %v9573_v55 = vld [vmem:[%s13713_s9 + $0x368] ss:$16 sps:$4 sm:$0xff]   ;;  %v9578_v58 = vld [vmem:[%s13713_s9 + $0x384] ss:$16 sps:$4 sm:$0xff]   ;;  %v9581_v59 = vld [vmem:[%s13713_s9 + $0x38c] ss:$16 sps:$4 sm:$0xff]  }
 0x361   :  { %v9576_v60 = vld [vmem:[%s13713_s9 + $0x380] ss:$16 sps:$4 sm:$0xff]   ;;  %v9579_v2 = vld [vmem:[%s13713_s9 + $0x388] ss:$16 sps:$4 sm:$0xff]   ;;  %v9584_v61 = vld [vmem:[%s13713_s9 + $0x3a4] ss:$16 sps:$4 sm:$0xff]  }
 0x362   :  { %3424 = vmatprep.mubr.bf16.mxu0 %v2599_v4  ;;  %3506 = vmatprep.mubr.bf16.mxu1 %v2599_v4  ;;  %v9587_v63 = vld [vmem:[%s13713_s9 + $0x3ac] ss:$16 sps:$4 sm:$0xff]   ;;  %v9582_v1 = vld [vmem:[%s13713_s9 + $0x3a0] ss:$16 sps:$4 sm:$0xff]   ;;  %v9585_v4 = vld [vmem:[%s13713_s9 + $0x3a8] ss:$16 sps:$4 sm:$0xff]  }
 0x363   :  { %3425 = vmatmul.mubr.bf16.vlgmr.msra.gmra.mrb[16].mxu0 %v2598_v7  ;;  %3507 = vmatmul.mubr.bf16.vlgmr.msra.gmra.mrb[16].mxu1 %v2598_v7  ;;  %v9588_v7 = vld [vmem:[%s13713_s9 + $0x3c0] ss:$16 sps:$4 sm:$0xff]  }
 0x364   :  { %3434 = vmatpush1.bf16.msra.mxu0 %v9504_v5  ;;  %3516 = vmatpush1.bf16.msra.mxu1 %v9507_v6  ;;  %v9590_v5 = vld [vmem:[%s13713_s9 + $0x3c4] ss:$16 sps:$4 sm:$0xff]   ;;  %v9593_v6 = vld [vmem:[%s13713_s9 + $0x3cc] ss:$16 sps:$4 sm:$0xff]  }
 0x365   :  { %3465 = vmatprep.mubr.bf16.mxu0 %v2601_v9  ;;  %3547 = vmatprep.mubr.bf16.mxu1 %v2601_v9  ;;  %v9599_v9 = vld [vmem:[%s13713_s9 + $0x3ec] ss:$16 sps:$4 sm:$0xff]  }
 0x366   :  { %3435 = vmatprep.subr.bf16.mxu0 %v9512_v0  ;;  %3517 = vmatprep.subr.bf16.mxu1 %v9515_v8  ;;  %v9591_v0 = vld [vmem:[%s13713_s9 + $0x3c8] ss:$16 sps:$4 sm:$0xff]   ;;  %v9596_v8 = vld [vmem:[%s13713_s9 + $0x3e4] ss:$16 sps:$4 sm:$0xff]  }
 0x368   :  { %3436 = vmatpush1.bf16.msra.mxu0 %v9510_v10  ;;  %3518 = vmatpush1.bf16.msra.mxu1 %v9513_v11  ;;  %v9594_v10 = vld [vmem:[%s13713_s9 + $0x3e0] ss:$16 sps:$4 sm:$0xff]   ;;  %v9597_v11 = vld [vmem:[%s13713_s9 + $0x3e8] ss:$16 sps:$4 sm:$0xff]  }
 0x369   :  { %3437 = vmatprep.subr.bf16.mxu0 %v9518_v12  ;;  %3519 = vmatprep.subr.bf16.mxu1 %v9521_v13  ;;  %v9602_v12 = vld [vmem:[%s13715_s11 + $0x4] ss:$16 sps:$4 sm:$0xff]   ;;  %v9605_v13 = vld [vmem:[%s13715_s11 + $0xc] ss:$16 sps:$4 sm:$0xff]  }
 0x36c   :  { %3438 = vmatpush1.bf16.msra.mxu0 %v9516_v15  ;;  %3520 = vmatpush1.bf16.msra.mxu1 %v9519_v16  ;;  %v9600_v15 = vld [vmem:[%s13715_s11] ss:$16 sps:$4 sm:$0xff]   ;;  %v9603_v16 = vld [vmem:[%s13715_s11 + $0x8] ss:$16 sps:$4 sm:$0xff]  }
 0x36d   :  { %3439 = vmatprep.subr.bf16.mxu0 %v9524_v17  ;;  %3521 = vmatprep.subr.bf16.mxu1 %v9527_v18  ;;  %v2600_v17 = vpack.c.bf16 %v11779_v62, %v11779_v62  ;;  %v9608_v18 = vld [vmem:[%s13715_s11 + $0x24] ss:$16 sps:$4 sm:$0xff]  }
 0x370   :  { %3440 = vmatpush1.bf16.msra.mxu0 %v9522_v20  ;;  %3522 = vmatpush1.bf16.msra.mxu1 %v9525_v21  ;;  %v9611_v20 = vld [vmem:[%s13715_s11 + $0x2c] ss:$16 sps:$4 sm:$0xff]   ;;  %v9606_v21 = vld [vmem:[%s13715_s11 + $0x20] ss:$16 sps:$4 sm:$0xff]  }
 0x371   :  { %3441 = vmatprep.subr.bf16.mxu0 %v9530_v22  ;;  %3523 = vmatprep.subr.bf16.mxu1 %v9533_v23  ;;  %v9609_v22 = vld [vmem:[%s13715_s11 + $0x28] ss:$16 sps:$4 sm:$0xff]   ;;  %v9614_v23 = vld [vmem:[%s13715_s11 + $0x44] ss:$16 sps:$4 sm:$0xff]  }
 0x374   :  { %3442 = vmatpush1.bf16.msra.mxu0 %v9528_v24  ;;  %3524 = vmatpush1.bf16.msra.mxu1 %v9531_v25  ;;  %v9617_v24 = vld [vmem:[%s13715_s11 + $0x4c] ss:$16 sps:$4 sm:$0xff]   ;;  %v9612_v25 = vld [vmem:[%s13715_s11 + $0x40] ss:$16 sps:$4 sm:$0xff]  }
 0x375   :  { %3443 = vmatprep.subr.bf16.mxu0 %v9536_v26  ;;  %3525 = vmatprep.subr.bf16.mxu1 %v9539_v27  ;;  %v9615_v26 = vld [vmem:[%s13715_s11 + $0x48] ss:$16 sps:$4 sm:$0xff]   ;;  %v9620_v27 = vld [vmem:[%s13715_s11 + $0x64] ss:$16 sps:$4 sm:$0xff]  }
 0x378   :  { %3444 = vmatpush1.bf16.msra.mxu0 %v9534_v28  ;;  %3526 = vmatpush1.bf16.msra.mxu1 %v9537_v29  ;;  %v9623_v28 = vld [vmem:[%s13715_s11 + $0x6c] ss:$16 sps:$4 sm:$0xff]   ;;  %v9618_v29 = vld [vmem:[%s13715_s11 + $0x60] ss:$16 sps:$4 sm:$0xff]  }
 0x379   :  { %3445 = vmatprep.subr.bf16.mxu0 %v9542_v30  ;;  %3527 = vmatprep.subr.bf16.mxu1 %v9545_v31  ;;  %v9621_v30 = vld [vmem:[%s13715_s11 + $0x68] ss:$16 sps:$4 sm:$0xff]   ;;  %v9626_v31 = vld [vmem:[%s13715_s11 + $0x84] ss:$16 sps:$4 sm:$0xff]  }
 0x37c   :  { %3446 = vmatpush1.bf16.msra.mxu0 %v9540_v32  ;;  %3528 = vmatpush1.bf16.msra.mxu1 %v9543_v33  ;;  %v9629_v32 = vld [vmem:[%s13715_s11 + $0x8c] ss:$16 sps:$4 sm:$0xff]   ;;  %v9624_v33 = vld [vmem:[%s13715_s11 + $0x80] ss:$16 sps:$4 sm:$0xff]  }
 0x37d   :  { %3447 = vmatprep.subr.bf16.mxu0 %v9548_v34  ;;  %3529 = vmatprep.subr.bf16.mxu1 %v9551_v35  ;;  %v9627_v34 = vld [vmem:[%s13715_s11 + $0x88] ss:$16 sps:$4 sm:$0xff]   ;;  %v9632_v35 = vld [vmem:[%s13715_s11 + $0xa4] ss:$16 sps:$4 sm:$0xff]  }
 0x380   :  { %3448 = vmatpush1.bf16.msra.mxu0 %v9546_v14  ;;  %3530 = vmatpush1.bf16.msra.mxu1 %v9549_v36  ;;  %v9635_v14 = vld [vmem:[%s13715_s11 + $0xac] ss:$16 sps:$4 sm:$0xff]   ;;  %v9630_v36 = vld [vmem:[%s13715_s11 + $0xa0] ss:$16 sps:$4 sm:$0xff]  }
 0x381   :  { %3449 = vmatprep.subr.bf16.mxu0 %v9554_v37  ;;  %3531 = vmatprep.subr.bf16.mxu1 %v9557_v42  ;;  %v9633_v37 = vld [vmem:[%s13715_s11 + $0xa8] ss:$16 sps:$4 sm:$0xff]   ;;  %v9638_v42 = vld [vmem:[%s13715_s11 + $0xc4] ss:$16 sps:$4 sm:$0xff]  }
 0x384   :  { %3450 = vmatpush1.bf16.msra.mxu0 %v9552_v43  ;;  %3532 = vmatpush1.bf16.msra.mxu1 %v9555_v19  ;;  %v9641_v43 = vld [vmem:[%s13715_s11 + $0xcc] ss:$16 sps:$4 sm:$0xff]   ;;  %v9636_v19 = vld [vmem:[%s13715_s11 + $0xc0] ss:$16 sps:$4 sm:$0xff]  }
 0x385   :  { %3451 = vmatprep.subr.bf16.mxu0 %v9560_v44  ;;  %3533 = vmatprep.subr.bf16.mxu1 %v9563_v45  ;;  %v9639_v44 = vld [vmem:[%s13715_s11 + $0xc8] ss:$16 sps:$4 sm:$0xff]   ;;  %v9644_v45 = vld [vmem:[%s13715_s11 + $0xe4] ss:$16 sps:$4 sm:$0xff]  }
 0x388   :  { %3452 = vmatpush1.bf16.msra.mxu0 %v9558_v46  ;;  %3534 = vmatpush1.bf16.msra.mxu1 %v9561_v47  ;;  %v9647_v46 = vld [vmem:[%s13715_s11 + $0xec] ss:$16 sps:$4 sm:$0xff]   ;;  %v9642_v47 = vld [vmem:[%s13715_s11 + $0xe0] ss:$16 sps:$4 sm:$0xff]  }
 0x389   :  { %3453 = vmatprep.subr.bf16.mxu0 %v9566_v48  ;;  %3535 = vmatprep.subr.bf16.mxu1 %v9569_v49  ;;  %v9645_v48 = vld [vmem:[%s13715_s11 + $0xe8] ss:$16 sps:$4 sm:$0xff]   ;;  %v9650_v49 = vld [vmem:[%s13715_s11 + $0x104] ss:$16 sps:$4 sm:$0xff]  }
 0x38c   :  { %3454 = vmatpush1.bf16.msra.mxu0 %v9564_v50  ;;  %3536 = vmatpush1.bf16.msra.mxu1 %v9567_v51  ;;  %v9653_v50 = vld [vmem:[%s13715_s11 + $0x10c] ss:$16 sps:$4 sm:$0xff]   ;;  %v9648_v51 = vld [vmem:[%s13715_s11 + $0x100] ss:$16 sps:$4 sm:$0xff]  }
 0x38d   :  { %3455 = vmatprep.subr.bf16.mxu0 %v9572_v52  ;;  %3537 = vmatprep.subr.bf16.mxu1 %v9575_v53  ;;  %v9651_v52 = vld [vmem:[%s13715_s11 + $0x108] ss:$16 sps:$4 sm:$0xff]   ;;  %v9656_v53 = vld [vmem:[%s13715_s11 + $0x124] ss:$16 sps:$4 sm:$0xff]  }
 0x390   :  { %3456 = vmatpush1.bf16.msra.mxu0 %v9570_v54  ;;  %3538 = vmatpush1.bf16.msra.mxu1 %v9573_v55  ;;  %v9659_v54 = vld [vmem:[%s13715_s11 + $0x12c] ss:$16 sps:$4 sm:$0xff]   ;;  %v9654_v55 = vld [vmem:[%s13715_s11 + $0x120] ss:$16 sps:$4 sm:$0xff]  }
 0x391   :  { %3457 = vmatprep.subr.bf16.mxu0 %v9578_v58  ;;  %3539 = vmatprep.subr.bf16.mxu1 %v9581_v59  ;;  %v9657_v58 = vld [vmem:[%s13715_s11 + $0x128] ss:$16 sps:$4 sm:$0xff]   ;;  %v9662_v59 = vld [vmem:[%s13715_s11 + $0x144] ss:$16 sps:$4 sm:$0xff]  }
 0x394   :  { %3458 = vmatpush1.bf16.msra.mxu0 %v9576_v60  ;;  %3540 = vmatpush1.bf16.msra.mxu1 %v9579_v2  ;;  %v9665_v60 = vld [vmem:[%s13715_s11 + $0x14c] ss:$16 sps:$4 sm:$0xff]   ;;  %v9660_v2 = vld [vmem:[%s13715_s11 + $0x140] ss:$16 sps:$4 sm:$0xff]  }
 0x395   :  { %3459 = vmatprep.subr.bf16.mxu0 %v9584_v61  ;;  %3541 = vmatprep.subr.bf16.mxu1 %v9587_v63  ;;  %v9663_v61 = vld [vmem:[%s13715_s11 + $0x148] ss:$16 sps:$4 sm:$0xff]   ;;  %v9668_v63 = vld [vmem:[%s13715_s11 + $0x164] ss:$16 sps:$4 sm:$0xff]  }
 0x398   :  { %3460 = vmatpush1.bf16.msra.mxu0 %v9582_v1  ;;  %3542 = vmatpush1.bf16.msra.mxu1 %v9585_v4  ;;  %v9671_v1 = vld [vmem:[%s13715_s11 + $0x16c] ss:$16 sps:$4 sm:$0xff]   ;;  %v9666_v4 = vld [vmem:[%s13715_s11 + $0x160] ss:$16 sps:$4 sm:$0xff]  }
 0x399   :  { %3461 = vmatprep.subr.bf16.mxu0 %v9590_v5  ;;  %3543 = vmatprep.subr.bf16.mxu1 %v9593_v6  ;;  %v9669_v5 = vld [vmem:[%s13715_s11 + $0x168] ss:$16 sps:$4 sm:$0xff]   ;;  %v9674_v6 = vld [vmem:[%s13715_s11 + $0x184] ss:$16 sps:$4 sm:$0xff]  }
 0x39c   :  { %3462 = vmatpush1.bf16.msra.mxu0 %v9588_v7  ;;  %3544 = vmatpush1.bf16.msra.mxu1 %v9591_v0  ;;  %v9677_v7 = vld [vmem:[%s13715_s11 + $0x18c] ss:$16 sps:$4 sm:$0xff]   ;;  %v9672_v0 = vld [vmem:[%s13715_s11 + $0x180] ss:$16 sps:$4 sm:$0xff]  }
 0x39d   :  { %3463 = vmatprep.subr.bf16.mxu0 %v9596_v8  ;;  %3545 = vmatprep.subr.bf16.mxu1 %v9599_v9  ;;  %v9675_v8 = vld [vmem:[%s13715_s11 + $0x188] ss:$16 sps:$4 sm:$0xff]   ;;  %v9680_v9 = vld [vmem:[%s13715_s11 + $0x1a4] ss:$16 sps:$4 sm:$0xff]  }
 0x3a0   :  { %3464 = vmatpush1.bf16.msra.mxu0 %v9594_v10  ;;  %3546 = vmatpush1.bf16.msra.mxu1 %v9597_v11  ;;  %v9683_v10 = vld [vmem:[%s13715_s11 + $0x1ac] ss:$16 sps:$4 sm:$0xff]   ;;  %v9678_v11 = vld [vmem:[%s13715_s11 + $0x1a0] ss:$16 sps:$4 sm:$0xff]  }
 0x3a1   :  { %4354 = vmatprep.subr.bf16.mxu0 %v9602_v12  ;;  %4436 = vmatprep.subr.bf16.mxu1 %v9605_v13  ;;  %v9681_v12 = vld [vmem:[%s13715_s11 + $0x1a8] ss:$16 sps:$4 sm:$0xff]   ;;  %v9686_v13 = vld [vmem:[%s13715_s11 + $0x1c4] ss:$16 sps:$4 sm:$0xff]  }
 0x3a3   :  { %3466 = vmatmul.mubr.bf16.vlgmr.msra.gmra.mrb[16].mxu0 %v2600_v17  ;;  %3548 = vmatmul.mubr.bf16.vlgmr.msra.gmra.mrb[16].mxu1 %v2600_v17  ;;  %v9687_v17 = vld [vmem:[%s13715_s11 + $0x1c8] ss:$16 sps:$4 sm:$0xff]  }
 0x3a4   :  { %4355 = vmatpush1.bf16.msra.mxu0 %v9600_v15  ;;  %4437 = vmatpush1.bf16.msra.mxu1 %v9603_v16  ;;  %v9689_v15 = vld [vmem:[%s13715_s11 + $0x1cc] ss:$16 sps:$4 sm:$0xff]   ;;  %v9684_v16 = vld [vmem:[%s13715_s11 + $0x1c0] ss:$16 sps:$4 sm:$0xff]  }
 0x3a5   :  { %4356 = vmatprep.subr.bf16.mxu0 %v9608_v18  ;;  %4438 = vmatprep.subr.bf16.mxu1 %v9611_v20  ;;  %v9692_v18 = vld [vmem:[%s13715_s11 + $0x1e4] ss:$16 sps:$4 sm:$0xff]   ;;  %v9695_v20 = vld [vmem:[%s13715_s11 + $0x1ec] ss:$16 sps:$4 sm:$0xff]  }
 0x3a8   :  { %4357 = vmatpush1.bf16.msra.mxu0 %v9606_v21  ;;  %4439 = vmatpush1.bf16.msra.mxu1 %v9609_v22  ;;  %v9690_v21 = vld [vmem:[%s13715_s11 + $0x1e0] ss:$16 sps:$4 sm:$0xff]   ;;  %v9693_v22 = vld [vmem:[%s13715_s11 + $0x1e8] ss:$16 sps:$4 sm:$0xff]  }
 0x3a9   :  { %4358 = vmatprep.subr.bf16.mxu0 %v9614_v23  ;;  %4440 = vmatprep.subr.bf16.mxu1 %v9617_v24  ;;  %v9698_v23 = vld [vmem:[%s13715_s11 + $0x204] ss:$16 sps:$4 sm:$0xff]   ;;  %v9701_v24 = vld [vmem:[%s13715_s11 + $0x20c] ss:$16 sps:$4 sm:$0xff]  }
 0x3ac   :  { %4359 = vmatpush1.bf16.msra.mxu0 %v9612_v25  ;;  %4441 = vmatpush1.bf16.msra.mxu1 %v9615_v26  ;;  %v12180_v25 = vld [vmem:[%s13714_s10] sm:$0xf] }
 0x3ad   :  { %4360 = vmatprep.subr.bf16.mxu0 %v9620_v27  ;;  %4442 = vmatprep.subr.bf16.mxu1 %v9623_v28  ;;  %v2735_v26 = vrot.slane %v12180_v25, %v10851_v39  ;;  %v2739_v27 = vrot.slane %v12180_v25, %v10859_v41  ;;  %v2747_v28 = vrot.slane %v12180_v25, %v10878_v56 }
 0x3b0   :  { %4361 = vmatpush1.bf16.msra.mxu0 %v9618_v29  ;;  %4443 = vmatpush1.bf16.msra.mxu1 %v9621_v30 }
 0x3b1   :  { %4362 = vmatprep.subr.bf16.mxu0 %v9626_v31  ;;  %4444 = vmatprep.subr.bf16.mxu1 %v9629_v32 }
 0x3b4   :  { %4363 = vmatpush1.bf16.msra.mxu0 %v9624_v33  ;;  %4445 = vmatpush1.bf16.msra.mxu1 %v9627_v34 }
 0x3b5   :  { %4364 = vmatprep.subr.bf16.mxu0 %v9632_v35  ;;  %4446 = vmatprep.subr.bf16.mxu1 %v9635_v14 }
 0x3b8   :  { %4365 = vmatpush1.bf16.msra.mxu0 %v9630_v36  ;;  %4447 = vmatpush1.bf16.msra.mxu1 %v9633_v37 }
 0x3b9   :  { %4366 = vmatprep.subr.bf16.mxu0 %v9638_v42  ;;  %4448 = vmatprep.subr.bf16.mxu1 %v9641_v43 }
 0x3bc   :  { %4367 = vmatpush1.bf16.msra.mxu0 %v9636_v19  ;;  %4449 = vmatpush1.bf16.msra.mxu1 %v9639_v44 }
 0x3bd   :  { %4368 = vmatprep.subr.bf16.mxu0 %v9644_v45  ;;  %4450 = vmatprep.subr.bf16.mxu1 %v9647_v46  ;;  %v9696_v46 = vld [vmem:[%s13715_s11 + $0x200] ss:$16 sps:$4 sm:$0xff]  }
 0x3c0   :  { %4369 = vmatpush1.bf16.msra.mxu0 %v9642_v47  ;;  %4451 = vmatpush1.bf16.msra.mxu1 %v9645_v48  ;;  %v9699_v47 = vld [vmem:[%s13715_s11 + $0x208] ss:$16 sps:$4 sm:$0xff]  }
 0x3c1   :  { %4370 = vmatprep.subr.bf16.mxu0 %v9650_v49  ;;  %4452 = vmatprep.subr.bf16.mxu1 %v9653_v50  ;;  %v9704_v49 = vld [vmem:[%s13715_s11 + $0x224] ss:$16 sps:$4 sm:$0xff]   ;;  %v9707_v50 = vld [vmem:[%s13715_s11 + $0x22c] ss:$16 sps:$4 sm:$0xff]  }
 0x3c4   :  { %4371 = vmatpush1.bf16.msra.mxu0 %v9648_v51  ;;  %4453 = vmatpush1.bf16.msra.mxu1 %v9651_v52  ;;  %v9702_v52 = vld [vmem:[%s13715_s11 + $0x220] ss:$16 sps:$4 sm:$0xff]  }
 0x3c5   :  { %4372 = vmatprep.subr.bf16.mxu0 %v9656_v53  ;;  %4454 = vmatprep.subr.bf16.mxu1 %v9659_v54  ;;  %v9705_v53 = vld [vmem:[%s13715_s11 + $0x228] ss:$16 sps:$4 sm:$0xff]   ;;  %v9710_v54 = vld [vmem:[%s13715_s11 + $0x244] ss:$16 sps:$4 sm:$0xff]  }
 0x3c8   :  { %4373 = vmatpush1.bf16.msra.mxu0 %v9654_v55  ;;  %4455 = vmatpush1.bf16.msra.mxu1 %v9657_v58  ;;  %v9713_v55 = vld [vmem:[%s13715_s11 + $0x24c] ss:$16 sps:$4 sm:$0xff]   ;;  %v9708_v58 = vld [vmem:[%s13715_s11 + $0x240] ss:$16 sps:$4 sm:$0xff]  }
 0x3c9   :  { %4374 = vmatprep.subr.bf16.mxu0 %v9662_v59  ;;  %4456 = vmatprep.subr.bf16.mxu1 %v9665_v60  ;;  %v9711_v59 = vld [vmem:[%s13715_s11 + $0x248] ss:$16 sps:$4 sm:$0xff]   ;;  %v9716_v60 = vld [vmem:[%s13715_s11 + $0x264] ss:$16 sps:$4 sm:$0xff]  }
 0x3cc   :  { %4375 = vmatpush1.bf16.msra.mxu0 %v9660_v2  ;;  %4457 = vmatpush1.bf16.msra.mxu1 %v9663_v61  ;;  %v9719_v2 = vld [vmem:[%s13715_s11 + $0x26c] ss:$16 sps:$4 sm:$0xff]   ;;  %v9714_v61 = vld [vmem:[%s13715_s11 + $0x260] ss:$16 sps:$4 sm:$0xff]  }
 0x3cd   :  { %4376 = vmatprep.subr.bf16.mxu0 %v9668_v63  ;;  %4458 = vmatprep.subr.bf16.mxu1 %v9671_v1  ;;  %v9717_v63 = vld [vmem:[%s13715_s11 + $0x268] ss:$16 sps:$4 sm:$0xff]   ;;  %v9722_v1 = vld [vmem:[%s13715_s11 + $0x284] ss:$16 sps:$4 sm:$0xff]  }
 0x3d0   :  { %4377 = vmatpush1.bf16.msra.mxu0 %v9666_v4  ;;  %4459 = vmatpush1.bf16.msra.mxu1 %v9669_v5  ;;  %v9725_v4 = vld [vmem:[%s13715_s11 + $0x28c] ss:$16 sps:$4 sm:$0xff]   ;;  %v9720_v5 = vld [vmem:[%s13715_s11 + $0x280] ss:$16 sps:$4 sm:$0xff]  }
 0x3d1   :  { %4378 = vmatprep.subr.bf16.mxu0 %v9674_v6  ;;  %4460 = vmatprep.subr.bf16.mxu1 %v9677_v7  ;;  %v9723_v6 = vld [vmem:[%s13715_s11 + $0x288] ss:$16 sps:$4 sm:$0xff]   ;;  %v9728_v7 = vld [vmem:[%s13715_s11 + $0x2a4] ss:$16 sps:$4 sm:$0xff]  }
 0x3d4   :  { %4379 = vmatpush1.bf16.msra.mxu0 %v9672_v0  ;;  %4461 = vmatpush1.bf16.msra.mxu1 %v9675_v8  ;;  %v9731_v0 = vld [vmem:[%s13715_s11 + $0x2ac] ss:$16 sps:$4 sm:$0xff]   ;;  %v9726_v8 = vld [vmem:[%s13715_s11 + $0x2a0] ss:$16 sps:$4 sm:$0xff]  }
 0x3d5   :  { %4380 = vmatprep.subr.bf16.mxu0 %v9680_v9  ;;  %4462 = vmatprep.subr.bf16.mxu1 %v9683_v10  ;;  %v9729_v9 = vld [vmem:[%s13715_s11 + $0x2a8] ss:$16 sps:$4 sm:$0xff]   ;;  %v9734_v10 = vld [vmem:[%s13715_s11 + $0x2c4] ss:$16 sps:$4 sm:$0xff]  }
 0x3d8   :  { %4381 = vmatpush1.bf16.msra.mxu0 %v9678_v11  ;;  %4463 = vmatpush1.bf16.msra.mxu1 %v9681_v12  ;;  %v9737_v11 = vld [vmem:[%s13715_s11 + $0x2cc] ss:$16 sps:$4 sm:$0xff]   ;;  %v9732_v12 = vld [vmem:[%s13715_s11 + $0x2c0] ss:$16 sps:$4 sm:$0xff]  }
 0x3d9   :  { %4382 = vmatprep.subr.bf16.mxu0 %v9686_v13  ;;  %4464 = vmatprep.subr.bf16.mxu1 %v9689_v15  ;;  %v9735_v13 = vld [vmem:[%s13715_s11 + $0x2c8] ss:$16 sps:$4 sm:$0xff]   ;;  %v9740_v15 = vld [vmem:[%s13715_s11 + $0x2e4] ss:$16 sps:$4 sm:$0xff]  }
 0x3dc   :  { %4383 = vmatpush1.bf16.msra.mxu0 %v9684_v16  ;;  %4465 = vmatpush1.bf16.msra.mxu1 %v9687_v17  ;;  %v9743_v16 = vld [vmem:[%s13715_s11 + $0x2ec] ss:$16 sps:$4 sm:$0xff]   ;;  %v9738_v17 = vld [vmem:[%s13715_s11 + $0x2e0] ss:$16 sps:$4 sm:$0xff]  }
 0x3dd   :  { %4384 = vmatprep.subr.bf16.mxu0 %v9692_v18  ;;  %4466 = vmatprep.subr.bf16.mxu1 %v9695_v20  ;;  %v9741_v18 = vld [vmem:[%s13715_s11 + $0x2e8] ss:$16 sps:$4 sm:$0xff]   ;;  %v9746_v20 = vld [vmem:[%s13715_s11 + $0x304] ss:$16 sps:$4 sm:$0xff]  }
 0x3e0   :  { %4385 = vmatpush1.bf16.msra.mxu0 %v9690_v21  ;;  %4467 = vmatpush1.bf16.msra.mxu1 %v9693_v22  ;;  %v9749_v21 = vld [vmem:[%s13715_s11 + $0x30c] ss:$16 sps:$4 sm:$0xff]   ;;  %v9744_v22 = vld [vmem:[%s13715_s11 + $0x300] ss:$16 sps:$4 sm:$0xff]  }
 0x3e1   :  { %4395 = vmatprep.subr.bf16.mxu0 %v9698_v23  ;;  %4477 = vmatprep.subr.bf16.mxu1 %v9701_v24  ;;  %v9747_v23 = vld [vmem:[%s13715_s11 + $0x308] ss:$16 sps:$4 sm:$0xff]   ;;  %v9752_v24 = vld [vmem:[%s13715_s11 + $0x324] ss:$16 sps:$4 sm:$0xff]  }
 0x476   :  { %v3467_v29 = vpop.f32.mrb[16].mxu0  ;;  %v12188_v30 = vpop.f32.mrb[16].mxu1 }
 0x477   :  { %v8848_v31 = vadd.f32 %v3467_v29, %v2735_v26  ;;  %v3469_v32 = vpop.f32.mrb[17].mxu0  ;;  %v3551_v33 = vpop.f32.mrb[17].mxu1  ;;  %v9755_v26 = vld [vmem:[%s13715_s11 + $0x32c] ss:$16 sps:$4 sm:$0xff]   ;;  %v9758_v29 = vld [vmem:[%s13715_s11 + $0x344] ss:$16 sps:$4 sm:$0xff]  }
 0x478   :  { %v8849_v34 = vadd.f32 %v3469_v32, %v2739_v27  ;;  %v8851_v35 = vadd.f32 %v3551_v33, %v2747_v28  ;;  %v3471_v14 = vpop.f32.mrb[18].mxu0  ;;  %v3553_v36 = vpop.f32.mrb[18].mxu1  ;;  %v9750_v27 = vld [vmem:[%s13715_s11 + $0x320] ss:$16 sps:$4 sm:$0xff]   ;;  %v9753_v28 = vld [vmem:[%s13715_s11 + $0x328] ss:$16 sps:$4 sm:$0xff]  }
 0x479   :  { %v3556_v37 = vmax.f32 %v8848_v31, 0.0  ;;  %v3472_v42 = vpop.f32.mrb[19].mxu0  ;;  %v3554_v43 = vpop.f32.mrb[19].mxu1  ;;  %v9761_v31 = vld [vmem:[%s13715_s11 + $0x34c] ss:$16 sps:$4 sm:$0xff]  }
 0x47a   :  { %v3557_v19 = vmax.f32 %v8849_v34, 0.0  ;;  %v3559_v44 = vmax.f32 %v8851_v35, 0.0  ;;  %v9756_v32 = vld [vmem:[%s13715_s11 + $0x340] ss:$16 sps:$4 sm:$0xff]   ;;  %v9759_v33 = vld [vmem:[%s13715_s11 + $0x348] ss:$16 sps:$4 sm:$0xff]  }
 0x47b   :  { %v3560_v48 = vpack.c.bf16 %v3556_v37, %v3556_v37  ;;  %v9764_v34 = vld [vmem:[%s13715_s11 + $0x364] ss:$16 sps:$4 sm:$0xff]   ;;  %v9767_v35 = vld [vmem:[%s13715_s11 + $0x36c] ss:$16 sps:$4 sm:$0xff]   ;;  %v9762_v14 = vld [vmem:[%s13715_s11 + $0x360] ss:$16 sps:$4 sm:$0xff]  }
 0x47c   :  { %v3561_v45 = vpack.c.bf16 %v3557_v19, %v3557_v19  ;;  %v3563_v51 = vpack.c.bf16 %v3559_v44, %v3559_v44  ;;  %v9765_v36 = vld [vmem:[%s13715_s11 + $0x368] ss:$16 sps:$4 sm:$0xff]   ;;  %v9770_v37 = vld [vmem:[%s13715_s11 + $0x384] ss:$16 sps:$4 sm:$0xff]   ;;  %v9773_v42 = vld [vmem:[%s13715_s11 + $0x38c] ss:$16 sps:$4 sm:$0xff]  }
 0x47d   :  { %v9768_v43 = vld [vmem:[%s13715_s11 + $0x380] ss:$16 sps:$4 sm:$0xff]   ;;  %v9771_v19 = vld [vmem:[%s13715_s11 + $0x388] ss:$16 sps:$4 sm:$0xff]   ;;  %v9776_v44 = vld [vmem:[%s13715_s11 + $0x3a4] ss:$16 sps:$4 sm:$0xff]  }
 0x47e   :  { %4386 = vmatprep.mubr.bf16.mxu0 %v3561_v45  ;;  %4468 = vmatprep.mubr.bf16.mxu1 %v3561_v45  ;;  %v9779_v45 = vld [vmem:[%s13715_s11 + $0x3ac] ss:$16 sps:$4 sm:$0xff]  }
 0x47f   :  { %4387 = vmatmul.mubr.bf16.vlgmr.msra.gmra.mrb[20].mxu0 %v3560_v48  ;;  %4469 = vmatmul.mubr.bf16.vlgmr.msra.gmra.mrb[20].mxu1 %v3560_v48  ;;  %v2743_v48 = vrot.slane %v12180_v25, %v11029_v57  ;;  %v9783_v25 = vld [vmem:[%s13715_s11 + $0x3c8] ss:$16 sps:$4 sm:$0xff]  }
 0x480   :  { %4396 = vmatpush1.bf16.msra.mxu0 %v9696_v46  ;;  %4478 = vmatpush1.bf16.msra.mxu1 %v9699_v47  ;;  %v9774_v46 = vld [vmem:[%s13715_s11 + $0x3a0] ss:$16 sps:$4 sm:$0xff]   ;;  %v9777_v47 = vld [vmem:[%s13715_s11 + $0x3a8] ss:$16 sps:$4 sm:$0xff]  }
 0x481   :  { %4427 = vmatprep.mubr.bf16.mxu0 %v3563_v51  ;;  %4509 = vmatprep.mubr.bf16.mxu1 %v3563_v51  ;;  %v9780_v51 = vld [vmem:[%s13715_s11 + $0x3c0] ss:$16 sps:$4 sm:$0xff]  }
 0x482   :  { %4397 = vmatprep.subr.bf16.mxu0 %v9704_v49  ;;  %4479 = vmatprep.subr.bf16.mxu1 %v9707_v50  ;;  %v9782_v49 = vld [vmem:[%s13715_s11 + $0x3c4] ss:$16 sps:$4 sm:$0xff]   ;;  %v9785_v50 = vld [vmem:[%s13715_s11 + $0x3cc] ss:$16 sps:$4 sm:$0xff]  }
 0x484   :  { %4398 = vmatpush1.bf16.msra.mxu0 %v9702_v52  ;;  %4480 = vmatpush1.bf16.msra.mxu1 %v9705_v53  ;;  %v8850_v52 = vadd.f32 %v12188_v30, %v2743_v48  ;;  %v9788_v53 = vld [vmem:[%s13715_s11 + $0x3e4] ss:$16 sps:$4 sm:$0xff]   ;;  %v9789_v30 = vld [vmem:[%s13715_s11 + $0x3e8] ss:$16 sps:$4 sm:$0xff]  }
 0x485   :  { %4399 = vmatprep.subr.bf16.mxu0 %v9710_v54  ;;  %4481 = vmatprep.subr.bf16.mxu1 %v9713_v55  ;;  %v9791_v54 = vld [vmem:[%s13715_s11 + $0x3ec] ss:$16 sps:$4 sm:$0xff]   ;;  %v9786_v55 = vld [vmem:[%s13715_s11 + $0x3e0] ss:$16 sps:$4 sm:$0xff]   ;;  %v9860_v48 = vld [vmem:[%s13717_s13 + $0x164] ss:$16 sps:$4 sm:$0xff]  }
 0x488   :  { %4400 = vmatpush1.bf16.msra.mxu0 %v9708_v58  ;;  %4482 = vmatpush1.bf16.msra.mxu1 %v9711_v59  ;;  %v3558_v58 = vmax.f32 %v8850_v52, 0.0  ;;  %v9794_v59 = vld [vmem:[%s13717_s13 + $0x4] ss:$16 sps:$4 sm:$0xff]   ;;  %v9869_v52 = vld [vmem:[%s13717_s13 + $0x18c] ss:$16 sps:$4 sm:$0xff]  }
 0x489   :  { %4401 = vmatprep.subr.bf16.mxu0 %v9716_v60  ;;  %4483 = vmatprep.subr.bf16.mxu1 %v9719_v2  ;;  %v9797_v60 = vld [vmem:[%s13717_s13 + $0xc] ss:$16 sps:$4 sm:$0xff]   ;;  %v9792_v2 = vld [vmem:[%s13717_s13] ss:$16 sps:$4 sm:$0xff]  }
 0x48c   :  { %4402 = vmatpush1.bf16.msra.mxu0 %v9714_v61  ;;  %4484 = vmatpush1.bf16.msra.mxu1 %v9717_v63  ;;  %v9795_v61 = vld [vmem:[%s13717_s13 + $0x8] ss:$16 sps:$4 sm:$0xff]   ;;  %v3562_v63 = vpack.c.bf16 %v3558_v58, %v3558_v58  ;;  %v9870_v58 = vld [vmem:[%s13717_s13 + $0x1a0] ss:$16 sps:$4 sm:$0xff]  }
 0x48d   :  { %4403 = vmatprep.subr.bf16.mxu0 %v9722_v1  ;;  %4485 = vmatprep.subr.bf16.mxu1 %v9725_v4  ;;  %v9800_v1 = vld [vmem:[%s13717_s13 + $0x24] ss:$16 sps:$4 sm:$0xff]   ;;  %v9803_v4 = vld [vmem:[%s13717_s13 + $0x2c] ss:$16 sps:$4 sm:$0xff]  }
 0x490   :  { %4404 = vmatpush1.bf16.msra.mxu0 %v9720_v5  ;;  %4486 = vmatpush1.bf16.msra.mxu1 %v9723_v6  ;;  %v9798_v5 = vld [vmem:[%s13717_s13 + $0x20] ss:$16 sps:$4 sm:$0xff]   ;;  %v9801_v6 = vld [vmem:[%s13717_s13 + $0x28] ss:$16 sps:$4 sm:$0xff]  }
 0x491   :  { %4405 = vmatprep.subr.bf16.mxu0 %v9728_v7  ;;  %4487 = vmatprep.subr.bf16.mxu1 %v9731_v0  ;;  %v9806_v7 = vld [vmem:[%s13717_s13 + $0x44] ss:$16 sps:$4 sm:$0xff]   ;;  %v9809_v0 = vld [vmem:[%s13717_s13 + $0x4c] ss:$16 sps:$4 sm:$0xff]  }
 0x494   :  { %4406 = vmatpush1.bf16.msra.mxu0 %v9726_v8  ;;  %4488 = vmatpush1.bf16.msra.mxu1 %v9729_v9  ;;  %v9804_v8 = vld [vmem:[%s13717_s13 + $0x40] ss:$16 sps:$4 sm:$0xff]   ;;  %v9807_v9 = vld [vmem:[%s13717_s13 + $0x48] ss:$16 sps:$4 sm:$0xff]  }
 0x495   :  { %4407 = vmatprep.subr.bf16.mxu0 %v9734_v10  ;;  %4489 = vmatprep.subr.bf16.mxu1 %v9737_v11  ;;  %v9812_v10 = vld [vmem:[%s13717_s13 + $0x64] ss:$16 sps:$4 sm:$0xff]   ;;  %v9815_v11 = vld [vmem:[%s13717_s13 + $0x6c] ss:$16 sps:$4 sm:$0xff]  }
 0x498   :  { %4408 = vmatpush1.bf16.msra.mxu0 %v9732_v12  ;;  %4490 = vmatpush1.bf16.msra.mxu1 %v9735_v13  ;;  %v9810_v12 = vld [vmem:[%s13717_s13 + $0x60] ss:$16 sps:$4 sm:$0xff]   ;;  %v9813_v13 = vld [vmem:[%s13717_s13 + $0x68] ss:$16 sps:$4 sm:$0xff]  }
 0x499   :  { %4409 = vmatprep.subr.bf16.mxu0 %v9740_v15  ;;  %4491 = vmatprep.subr.bf16.mxu1 %v9743_v16  ;;  %v9818_v15 = vld [vmem:[%s13717_s13 + $0x84] ss:$16 sps:$4 sm:$0xff]   ;;  %v9821_v16 = vld [vmem:[%s13717_s13 + $0x8c] ss:$16 sps:$4 sm:$0xff]  }
 0x49c   :  { %4410 = vmatpush1.bf16.msra.mxu0 %v9738_v17  ;;  %4492 = vmatpush1.bf16.msra.mxu1 %v9741_v18  ;;  %v9816_v17 = vld [vmem:[%s13717_s13 + $0x80] ss:$16 sps:$4 sm:$0xff]   ;;  %v9819_v18 = vld [vmem:[%s13717_s13 + $0x88] ss:$16 sps:$4 sm:$0xff]  }
 0x49d   :  { %4411 = vmatprep.subr.bf16.mxu0 %v9746_v20  ;;  %4493 = vmatprep.subr.bf16.mxu1 %v9749_v21  ;;  %v9824_v20 = vld [vmem:[%s13717_s13 + $0xa4] ss:$16 sps:$4 sm:$0xff]   ;;  %v9827_v21 = vld [vmem:[%s13717_s13 + $0xac] ss:$16 sps:$4 sm:$0xff]  }
 0x4a0   :  { %4412 = vmatpush1.bf16.msra.mxu0 %v9744_v22  ;;  %4494 = vmatpush1.bf16.msra.mxu1 %v9747_v23  ;;  %v9822_v22 = vld [vmem:[%s13717_s13 + $0xa0] ss:$16 sps:$4 sm:$0xff]   ;;  %v9825_v23 = vld [vmem:[%s13717_s13 + $0xa8] ss:$16 sps:$4 sm:$0xff]  }
 0x4a1   :  { %4413 = vmatprep.subr.bf16.mxu0 %v9752_v24  ;;  %4495 = vmatprep.subr.bf16.mxu1 %v9755_v26  ;;  %v9830_v24 = vld [vmem:[%s13717_s13 + $0xc4] ss:$16 sps:$4 sm:$0xff]   ;;  %v9833_v26 = vld [vmem:[%s13717_s13 + $0xcc] ss:$16 sps:$4 sm:$0xff]  }
 0x4a4   :  { %4414 = vmatpush1.bf16.msra.mxu0 %v9750_v27  ;;  %4496 = vmatpush1.bf16.msra.mxu1 %v9753_v28  ;;  %v9828_v27 = vld [vmem:[%s13717_s13 + $0xc0] ss:$16 sps:$4 sm:$0xff]   ;;  %v9831_v28 = vld [vmem:[%s13717_s13 + $0xc8] ss:$16 sps:$4 sm:$0xff]  }
 0x4a5   :  { %4415 = vmatprep.subr.bf16.mxu0 %v9758_v29  ;;  %4497 = vmatprep.subr.bf16.mxu1 %v9761_v31  ;;  %v9836_v29 = vld [vmem:[%s13717_s13 + $0xe4] ss:$16 sps:$4 sm:$0xff]   ;;  %v9839_v31 = vld [vmem:[%s13717_s13 + $0xec] ss:$16 sps:$4 sm:$0xff]  }
 0x4a8   :  { %4416 = vmatpush1.bf16.msra.mxu0 %v9756_v32  ;;  %4498 = vmatpush1.bf16.msra.mxu1 %v9759_v33  ;;  %v9834_v32 = vld [vmem:[%s13717_s13 + $0xe0] ss:$16 sps:$4 sm:$0xff]   ;;  %v9837_v33 = vld [vmem:[%s13717_s13 + $0xe8] ss:$16 sps:$4 sm:$0xff]  }
 0x4a9   :  { %4417 = vmatprep.subr.bf16.mxu0 %v9764_v34  ;;  %4499 = vmatprep.subr.bf16.mxu1 %v9767_v35  ;;  %v9842_v34 = vld [vmem:[%s13717_s13 + $0x104] ss:$16 sps:$4 sm:$0xff]   ;;  %v9845_v35 = vld [vmem:[%s13717_s13 + $0x10c] ss:$16 sps:$4 sm:$0xff]  }
 0x4ac   :  { %4418 = vmatpush1.bf16.msra.mxu0 %v9762_v14  ;;  %4500 = vmatpush1.bf16.msra.mxu1 %v9765_v36  ;;  %v9840_v14 = vld [vmem:[%s13717_s13 + $0x100] ss:$16 sps:$4 sm:$0xff]   ;;  %v9843_v36 = vld [vmem:[%s13717_s13 + $0x108] ss:$16 sps:$4 sm:$0xff]  }
 0x4ad   :  { %4419 = vmatprep.subr.bf16.mxu0 %v9770_v37  ;;  %4501 = vmatprep.subr.bf16.mxu1 %v9773_v42  ;;  %v9848_v37 = vld [vmem:[%s13717_s13 + $0x124] ss:$16 sps:$4 sm:$0xff]   ;;  %v9851_v42 = vld [vmem:[%s13717_s13 + $0x12c] ss:$16 sps:$4 sm:$0xff]  }
 0x4b0   :  { %4420 = vmatpush1.bf16.msra.mxu0 %v9768_v43  ;;  %4502 = vmatpush1.bf16.msra.mxu1 %v9771_v19  ;;  %v9846_v43 = vld [vmem:[%s13717_s13 + $0x120] ss:$16 sps:$4 sm:$0xff]   ;;  %v9849_v19 = vld [vmem:[%s13717_s13 + $0x128] ss:$16 sps:$4 sm:$0xff]  }
 0x4b1   :  { %4421 = vmatprep.subr.bf16.mxu0 %v9776_v44  ;;  %4503 = vmatprep.subr.bf16.mxu1 %v9779_v45  ;;  %v9854_v44 = vld [vmem:[%s13717_s13 + $0x144] ss:$16 sps:$4 sm:$0xff]   ;;  %v9857_v45 = vld [vmem:[%s13717_s13 + $0x14c] ss:$16 sps:$4 sm:$0xff]  }
 0x4b4   :  { %4422 = vmatpush1.bf16.msra.mxu0 %v9774_v46  ;;  %4504 = vmatpush1.bf16.msra.mxu1 %v9777_v47  ;;  %v9852_v46 = vld [vmem:[%s13717_s13 + $0x140] ss:$16 sps:$4 sm:$0xff]   ;;  %v9855_v47 = vld [vmem:[%s13717_s13 + $0x148] ss:$16 sps:$4 sm:$0xff]  }
 0x4b5   :  { %4423 = vmatprep.subr.bf16.mxu0 %v9782_v49  ;;  %4505 = vmatprep.subr.bf16.mxu1 %v9785_v50  ;;  %v9863_v49 = vld [vmem:[%s13717_s13 + $0x16c] ss:$16 sps:$4 sm:$0xff]   ;;  %v9858_v50 = vld [vmem:[%s13717_s13 + $0x160] ss:$16 sps:$4 sm:$0xff]  }
 0x4b8   :  { %4424 = vmatpush1.bf16.msra.mxu0 %v9780_v51  ;;  %4506 = vmatpush1.bf16.msra.mxu1 %v9783_v25  ;;  %v9861_v51 = vld [vmem:[%s13717_s13 + $0x168] ss:$16 sps:$4 sm:$0xff]   ;;  %v9866_v25 = vld [vmem:[%s13717_s13 + $0x184] ss:$16 sps:$4 sm:$0xff]  }
 0x4b9   :  { %4425 = vmatprep.subr.bf16.mxu0 %v9788_v53  ;;  %4507 = vmatprep.subr.bf16.mxu1 %v9791_v54  ;;  %v9864_v53 = vld [vmem:[%s13717_s13 + $0x180] ss:$16 sps:$4 sm:$0xff]   ;;  %v9867_v54 = vld [vmem:[%s13717_s13 + $0x188] ss:$16 sps:$4 sm:$0xff]  }
 0x4bc   :  { %4426 = vmatpush1.bf16.msra.mxu0 %v9786_v55  ;;  %4508 = vmatpush1.bf16.msra.mxu1 %v9789_v30  ;;  %v9872_v55 = vld [vmem:[%s13717_s13 + $0x1a4] ss:$16 sps:$4 sm:$0xff]   ;;  %v9875_v30 = vld [vmem:[%s13717_s13 + $0x1ac] ss:$16 sps:$4 sm:$0xff]  }
 0x4bd   :  { %5316 = vmatprep.subr.bf16.mxu0 %v9794_v59  ;;  %5398 = vmatprep.subr.bf16.mxu1 %v9797_v60  ;;  %v9873_v59 = vld [vmem:[%s13717_s13 + $0x1a8] ss:$16 sps:$4 sm:$0xff]   ;;  %v9878_v60 = vld [vmem:[%s13717_s13 + $0x1c4] ss:$16 sps:$4 sm:$0xff]  }
 0x4bf   :  { %4428 = vmatmul.mubr.bf16.vlgmr.msra.gmra.mrb[20].mxu0 %v3562_v63  ;;  %4510 = vmatmul.mubr.bf16.vlgmr.msra.gmra.mrb[20].mxu1 %v3562_v63  ;;  %v9879_v63 = vld [vmem:[%s13717_s13 + $0x1c8] ss:$16 sps:$4 sm:$0xff]  }
 0x4c0   :  { %5317 = vmatpush1.bf16.msra.mxu0 %v9792_v2  ;;  %5399 = vmatpush1.bf16.msra.mxu1 %v9795_v61  ;;  %v9881_v2 = vld [vmem:[%s13717_s13 + $0x1cc] ss:$16 sps:$4 sm:$0xff]   ;;  %v9876_v61 = vld [vmem:[%s13717_s13 + $0x1c0] ss:$16 sps:$4 sm:$0xff]  }
 0x4c1   :  { %5318 = vmatprep.subr.bf16.mxu0 %v9800_v1  ;;  %5400 = vmatprep.subr.bf16.mxu1 %v9803_v4  ;;  %v9884_v1 = vld [vmem:[%s13717_s13 + $0x1e4] ss:$16 sps:$4 sm:$0xff]   ;;  %v9887_v4 = vld [vmem:[%s13717_s13 + $0x1ec] ss:$16 sps:$4 sm:$0xff]  }
 0x4c4   :  { %5319 = vmatpush1.bf16.msra.mxu0 %v9798_v5  ;;  %5401 = vmatpush1.bf16.msra.mxu1 %v9801_v6  ;;  %v9882_v5 = vld [vmem:[%s13717_s13 + $0x1e0] ss:$16 sps:$4 sm:$0xff]   ;;  %v9885_v6 = vld [vmem:[%s13717_s13 + $0x1e8] ss:$16 sps:$4 sm:$0xff]  }
 0x4c5   :  { %5320 = vmatprep.subr.bf16.mxu0 %v9806_v7  ;;  %5402 = vmatprep.subr.bf16.mxu1 %v9809_v0  ;;  %v9890_v7 = vld [vmem:[%s13717_s13 + $0x204] ss:$16 sps:$4 sm:$0xff]   ;;  %v9893_v0 = vld [vmem:[%s13717_s13 + $0x20c] ss:$16 sps:$4 sm:$0xff]  }
 0x4c8   :  { %5321 = vmatpush1.bf16.msra.mxu0 %v9804_v8  ;;  %5403 = vmatpush1.bf16.msra.mxu1 %v9807_v9  ;;  %v12580_v8 = vld [vmem:[%s13716_s12] sm:$0xf] }
 0x4c9   :  { %5322 = vmatprep.subr.bf16.mxu0 %v9812_v10  ;;  %5404 = vmatprep.subr.bf16.mxu1 %v9815_v11  ;;  %v3697_v9 = vrot.slane %v12580_v8, %v10851_v39  ;;  %v3701_v10 = vrot.slane %v12580_v8, %v10859_v41  ;;  %v3709_v11 = vrot.slane %v12580_v8, %v10878_v56 }
 0x4cc   :  { %5323 = vmatpush1.bf16.msra.mxu0 %v9810_v12  ;;  %5405 = vmatpush1.bf16.msra.mxu1 %v9813_v13 }
 0x4cd   :  { %5324 = vmatprep.subr.bf16.mxu0 %v9818_v15  ;;  %5406 = vmatprep.subr.bf16.mxu1 %v9821_v16 }
 0x4d0   :  { %5325 = vmatpush1.bf16.msra.mxu0 %v9816_v17  ;;  %5407 = vmatpush1.bf16.msra.mxu1 %v9819_v18 }
 0x4d1   :  { %5326 = vmatprep.subr.bf16.mxu0 %v9824_v20  ;;  %5408 = vmatprep.subr.bf16.mxu1 %v9827_v21 }
 0x4d4   :  { %5327 = vmatpush1.bf16.msra.mxu0 %v9822_v22  ;;  %5409 = vmatpush1.bf16.msra.mxu1 %v9825_v23 }
 0x4d5   :  { %5328 = vmatprep.subr.bf16.mxu0 %v9830_v24  ;;  %5410 = vmatprep.subr.bf16.mxu1 %v9833_v26 }
 0x4d8   :  { %5329 = vmatpush1.bf16.msra.mxu0 %v9828_v27  ;;  %5411 = vmatpush1.bf16.msra.mxu1 %v9831_v28 }
 0x4d9   :  { %5330 = vmatprep.subr.bf16.mxu0 %v9836_v29  ;;  %5412 = vmatprep.subr.bf16.mxu1 %v9839_v31  ;;  %v9888_v31 = vld [vmem:[%s13717_s13 + $0x200] ss:$16 sps:$4 sm:$0xff]  }
 0x4dc   :  { %5331 = vmatpush1.bf16.msra.mxu0 %v9834_v32  ;;  %5413 = vmatpush1.bf16.msra.mxu1 %v9837_v33  ;;  %v9891_v32 = vld [vmem:[%s13717_s13 + $0x208] ss:$16 sps:$4 sm:$0xff]  }
 0x4dd   :  { %5332 = vmatprep.subr.bf16.mxu0 %v9842_v34  ;;  %5414 = vmatprep.subr.bf16.mxu1 %v9845_v35  ;;  %v9896_v34 = vld [vmem:[%s13717_s13 + $0x224] ss:$16 sps:$4 sm:$0xff]   ;;  %v9899_v35 = vld [vmem:[%s13717_s13 + $0x22c] ss:$16 sps:$4 sm:$0xff]  }
 0x4e0   :  { %5333 = vmatpush1.bf16.msra.mxu0 %v9840_v14  ;;  %5415 = vmatpush1.bf16.msra.mxu1 %v9843_v36  ;;  %v9894_v36 = vld [vmem:[%s13717_s13 + $0x220] ss:$16 sps:$4 sm:$0xff]  }
 0x4e1   :  { %5334 = vmatprep.subr.bf16.mxu0 %v9848_v37  ;;  %5416 = vmatprep.subr.bf16.mxu1 %v9851_v42  ;;  %v9897_v37 = vld [vmem:[%s13717_s13 + $0x228] ss:$16 sps:$4 sm:$0xff]   ;;  %v9902_v42 = vld [vmem:[%s13717_s13 + $0x244] ss:$16 sps:$4 sm:$0xff]  }
 0x4e4   :  { %5335 = vmatpush1.bf16.msra.mxu0 %v9846_v43  ;;  %5417 = vmatpush1.bf16.msra.mxu1 %v9849_v19  ;;  %v9905_v43 = vld [vmem:[%s13717_s13 + $0x24c] ss:$16 sps:$4 sm:$0xff]   ;;  %v9900_v19 = vld [vmem:[%s13717_s13 + $0x240] ss:$16 sps:$4 sm:$0xff]  }
 0x4e5   :  { %5336 = vmatprep.subr.bf16.mxu0 %v9854_v44  ;;  %5418 = vmatprep.subr.bf16.mxu1 %v9857_v45  ;;  %v9903_v44 = vld [vmem:[%s13717_s13 + $0x248] ss:$16 sps:$4 sm:$0xff]   ;;  %v9908_v45 = vld [vmem:[%s13717_s13 + $0x264] ss:$16 sps:$4 sm:$0xff]  }
 0x4e8   :  { %5337 = vmatpush1.bf16.msra.mxu0 %v9852_v46  ;;  %5419 = vmatpush1.bf16.msra.mxu1 %v9855_v47  ;;  %v9911_v46 = vld [vmem:[%s13717_s13 + $0x26c] ss:$16 sps:$4 sm:$0xff]   ;;  %v9906_v47 = vld [vmem:[%s13717_s13 + $0x260] ss:$16 sps:$4 sm:$0xff]  }
 0x4e9   :  { %5338 = vmatprep.subr.bf16.mxu0 %v9860_v48  ;;  %5420 = vmatprep.subr.bf16.mxu1 %v9863_v49  ;;  %v9909_v48 = vld [vmem:[%s13717_s13 + $0x268] ss:$16 sps:$4 sm:$0xff]   ;;  %v9914_v49 = vld [vmem:[%s13717_s13 + $0x284] ss:$16 sps:$4 sm:$0xff]  }
 0x4ec   :  { %5339 = vmatpush1.bf16.msra.mxu0 %v9858_v50  ;;  %5421 = vmatpush1.bf16.msra.mxu1 %v9861_v51  ;;  %v9917_v50 = vld [vmem:[%s13717_s13 + $0x28c] ss:$16 sps:$4 sm:$0xff]   ;;  %v9912_v51 = vld [vmem:[%s13717_s13 + $0x280] ss:$16 sps:$4 sm:$0xff]  }
 0x4ed   :  { %5340 = vmatprep.subr.bf16.mxu0 %v9866_v25  ;;  %5422 = vmatprep.subr.bf16.mxu1 %v9869_v52  ;;  %v9915_v25 = vld [vmem:[%s13717_s13 + $0x288] ss:$16 sps:$4 sm:$0xff]   ;;  %v9920_v52 = vld [vmem:[%s13717_s13 + $0x2a4] ss:$16 sps:$4 sm:$0xff]  }
 0x4f0   :  { %5341 = vmatpush1.bf16.msra.mxu0 %v9864_v53  ;;  %5423 = vmatpush1.bf16.msra.mxu1 %v9867_v54  ;;  %v9923_v53 = vld [vmem:[%s13717_s13 + $0x2ac] ss:$16 sps:$4 sm:$0xff]   ;;  %v9918_v54 = vld [vmem:[%s13717_s13 + $0x2a0] ss:$16 sps:$4 sm:$0xff]  }
 0x4f1   :  { %5342 = vmatprep.subr.bf16.mxu0 %v9872_v55  ;;  %5424 = vmatprep.subr.bf16.mxu1 %v9875_v30  ;;  %v9921_v55 = vld [vmem:[%s13717_s13 + $0x2a8] ss:$16 sps:$4 sm:$0xff]   ;;  %v9926_v30 = vld [vmem:[%s13717_s13 + $0x2c4] ss:$16 sps:$4 sm:$0xff]  }
 0x4f4   :  { %5343 = vmatpush1.bf16.msra.mxu0 %v9870_v58  ;;  %5425 = vmatpush1.bf16.msra.mxu1 %v9873_v59  ;;  %v9929_v58 = vld [vmem:[%s13717_s13 + $0x2cc] ss:$16 sps:$4 sm:$0xff]   ;;  %v9924_v59 = vld [vmem:[%s13717_s13 + $0x2c0] ss:$16 sps:$4 sm:$0xff]  }
 0x4f5   :  { %5344 = vmatprep.subr.bf16.mxu0 %v9878_v60  ;;  %5426 = vmatprep.subr.bf16.mxu1 %v9881_v2  ;;  %v9927_v60 = vld [vmem:[%s13717_s13 + $0x2c8] ss:$16 sps:$4 sm:$0xff]   ;;  %v9932_v2 = vld [vmem:[%s13717_s13 + $0x2e4] ss:$16 sps:$4 sm:$0xff]  }
 0x4f8   :  { %5345 = vmatpush1.bf16.msra.mxu0 %v9876_v61  ;;  %5427 = vmatpush1.bf16.msra.mxu1 %v9879_v63  ;;  %v9935_v61 = vld [vmem:[%s13717_s13 + $0x2ec] ss:$16 sps:$4 sm:$0xff]   ;;  %v9930_v63 = vld [vmem:[%s13717_s13 + $0x2e0] ss:$16 sps:$4 sm:$0xff]  }
 0x4f9   :  { %5346 = vmatprep.subr.bf16.mxu0 %v9884_v1  ;;  %5428 = vmatprep.subr.bf16.mxu1 %v9887_v4  ;;  %v9933_v1 = vld [vmem:[%s13717_s13 + $0x2e8] ss:$16 sps:$4 sm:$0xff]   ;;  %v9938_v4 = vld [vmem:[%s13717_s13 + $0x304] ss:$16 sps:$4 sm:$0xff]  }
 0x4fc   :  { %5347 = vmatpush1.bf16.msra.mxu0 %v9882_v5  ;;  %5429 = vmatpush1.bf16.msra.mxu1 %v9885_v6  ;;  %v9941_v5 = vld [vmem:[%s13717_s13 + $0x30c] ss:$16 sps:$4 sm:$0xff]   ;;  %v9936_v6 = vld [vmem:[%s13717_s13 + $0x300] ss:$16 sps:$4 sm:$0xff]  }
 0x4fd   :  { %5357 = vmatprep.subr.bf16.mxu0 %v9890_v7  ;;  %5439 = vmatprep.subr.bf16.mxu1 %v9893_v0  ;;  %v9939_v7 = vld [vmem:[%s13717_s13 + $0x308] ss:$16 sps:$4 sm:$0xff]   ;;  %v9944_v0 = vld [vmem:[%s13717_s13 + $0x324] ss:$16 sps:$4 sm:$0xff]  }
 0x592   :  { %v4429_v12 = vpop.f32.mrb[20].mxu0  ;;  %v12588_v13 = vpop.f32.mrb[20].mxu1 }
 0x593   :  { %v8852_v15 = vadd.f32 %v4429_v12, %v3697_v9  ;;  %v4431_v16 = vpop.f32.mrb[21].mxu0  ;;  %v4513_v17 = vpop.f32.mrb[21].mxu1  ;;  %v9947_v9 = vld [vmem:[%s13717_s13 + $0x32c] ss:$16 sps:$4 sm:$0xff]   ;;  %v9950_v12 = vld [vmem:[%s13717_s13 + $0x344] ss:$16 sps:$4 sm:$0xff]  }
 0x594   :  { %v8853_v18 = vadd.f32 %v4431_v16, %v3701_v10  ;;  %v8855_v20 = vadd.f32 %v4513_v17, %v3709_v11  ;;  %v4433_v21 = vpop.f32.mrb[22].mxu0  ;;  %v4515_v22 = vpop.f32.mrb[22].mxu1  ;;  %v9942_v10 = vld [vmem:[%s13717_s13 + $0x320] ss:$16 sps:$4 sm:$0xff]   ;;  %v9945_v11 = vld [vmem:[%s13717_s13 + $0x328] ss:$16 sps:$4 sm:$0xff]  }
 0x595   :  { %v4518_v23 = vmax.f32 %v8852_v15, 0.0  ;;  %v4434_v24 = vpop.f32.mrb[23].mxu0  ;;  %v4516_v26 = vpop.f32.mrb[23].mxu1  ;;  %v9953_v15 = vld [vmem:[%s13717_s13 + $0x34c] ss:$16 sps:$4 sm:$0xff]  }
 0x596   :  { %v4519_v27 = vmax.f32 %v8853_v18, 0.0  ;;  %v4521_v28 = vmax.f32 %v8855_v20, 0.0  ;;  %v9948_v16 = vld [vmem:[%s13717_s13 + $0x340] ss:$16 sps:$4 sm:$0xff]   ;;  %v9951_v17 = vld [vmem:[%s13717_s13 + $0x348] ss:$16 sps:$4 sm:$0xff]  }
 0x597   :  { %v4522_v33 = vpack.c.bf16 %v4518_v23, %v4518_v23  ;;  %v9956_v18 = vld [vmem:[%s13717_s13 + $0x364] ss:$16 sps:$4 sm:$0xff]   ;;  %v9959_v20 = vld [vmem:[%s13717_s13 + $0x36c] ss:$16 sps:$4 sm:$0xff]   ;;  %v9954_v21 = vld [vmem:[%s13717_s13 + $0x360] ss:$16 sps:$4 sm:$0xff]  }
 0x598   :  { %v4523_v29 = vpack.c.bf16 %v4519_v27, %v4519_v27  ;;  %v4525_v14 = vpack.c.bf16 %v4521_v28, %v4521_v28  ;;  %v9957_v22 = vld [vmem:[%s13717_s13 + $0x368] ss:$16 sps:$4 sm:$0xff]   ;;  %v9962_v23 = vld [vmem:[%s13717_s13 + $0x384] ss:$16 sps:$4 sm:$0xff]   ;;  %v9965_v24 = vld [vmem:[%s13717_s13 + $0x38c] ss:$16 sps:$4 sm:$0xff]  }
 0x599   :  { %v9960_v26 = vld [vmem:[%s13717_s13 + $0x380] ss:$16 sps:$4 sm:$0xff]   ;;  %v9963_v27 = vld [vmem:[%s13717_s13 + $0x388] ss:$16 sps:$4 sm:$0xff]   ;;  %v9968_v28 = vld [vmem:[%s13717_s13 + $0x3a4] ss:$16 sps:$4 sm:$0xff]  }
 0x59a   :  { %5348 = vmatprep.mubr.bf16.mxu0 %v4523_v29  ;;  %5430 = vmatprep.mubr.bf16.mxu1 %v4523_v29  ;;  %v9971_v29 = vld [vmem:[%s13717_s13 + $0x3ac] ss:$16 sps:$4 sm:$0xff]  }
 0x59b   :  { %5349 = vmatmul.mubr.bf16.vlgmr.msra.gmra.mrb[24].mxu0 %v4522_v33  ;;  %5431 = vmatmul.mubr.bf16.vlgmr.msra.gmra.mrb[24].mxu1 %v4522_v33  ;;  %v3705_v33 = vrot.slane %v12580_v8, %v11029_v57  ;;  %v9975_v8 = vld [vmem:[%s13717_s13 + $0x3c8] ss:$16 sps:$4 sm:$0xff]  }
 0x59c   :  { %5358 = vmatpush1.bf16.msra.mxu0 %v9888_v31  ;;  %5440 = vmatpush1.bf16.msra.mxu1 %v9891_v32  ;;  %v9966_v31 = vld [vmem:[%s13717_s13 + $0x3a0] ss:$16 sps:$4 sm:$0xff]   ;;  %v9969_v32 = vld [vmem:[%s13717_s13 + $0x3a8] ss:$16 sps:$4 sm:$0xff]  }
 0x59d   :  { %5389 = vmatprep.mubr.bf16.mxu0 %v4525_v14  ;;  %5471 = vmatprep.mubr.bf16.mxu1 %v4525_v14  ;;  %v9972_v14 = vld [vmem:[%s13717_s13 + $0x3c0] ss:$16 sps:$4 sm:$0xff]  }
 0x59e   :  { %5359 = vmatprep.subr.bf16.mxu0 %v9896_v34  ;;  %5441 = vmatprep.subr.bf16.mxu1 %v9899_v35  ;;  %v9974_v34 = vld [vmem:[%s13717_s13 + $0x3c4] ss:$16 sps:$4 sm:$0xff]   ;;  %v9977_v35 = vld [vmem:[%s13717_s13 + $0x3cc] ss:$16 sps:$4 sm:$0xff]  }
 0x5a0   :  { %5360 = vmatpush1.bf16.msra.mxu0 %v9894_v36  ;;  %5442 = vmatpush1.bf16.msra.mxu1 %v9897_v37  ;;  %v8854_v36 = vadd.f32 %v12588_v13, %v3705_v33  ;;  %v9980_v37 = vld [vmem:[%s13717_s13 + $0x3e4] ss:$16 sps:$4 sm:$0xff]   ;;  %v9981_v13 = vld [vmem:[%s13717_s13 + $0x3e8] ss:$16 sps:$4 sm:$0xff]  }
 0x5a1   :  { %5361 = vmatprep.subr.bf16.mxu0 %v9902_v42  ;;  %5443 = vmatprep.subr.bf16.mxu1 %v9905_v43  ;;  %v9983_v42 = vld [vmem:[%s13717_s13 + $0x3ec] ss:$16 sps:$4 sm:$0xff]   ;;  %v9978_v43 = vld [vmem:[%s13717_s13 + $0x3e0] ss:$16 sps:$4 sm:$0xff]   ;;  %v10052_v33 = vld [vmem:[%s13719_s15 + $0x164] ss:$16 sps:$4 sm:$0xff]  }
 0x5a4   :  { %5362 = vmatpush1.bf16.msra.mxu0 %v9900_v19  ;;  %5444 = vmatpush1.bf16.msra.mxu1 %v9903_v44  ;;  %v4520_v19 = vmax.f32 %v8854_v36, 0.0  ;;  %v9986_v44 = vld [vmem:[%s13719_s15 + $0x4] ss:$16 sps:$4 sm:$0xff]   ;;  %v10061_v36 = vld [vmem:[%s13719_s15 + $0x18c] ss:$16 sps:$4 sm:$0xff]  }
 0x5a5   :  { %5363 = vmatprep.subr.bf16.mxu0 %v9908_v45  ;;  %5445 = vmatprep.subr.bf16.mxu1 %v9911_v46  ;;  %v9989_v45 = vld [vmem:[%s13719_s15 + $0xc] ss:$16 sps:$4 sm:$0xff]   ;;  %v9984_v46 = vld [vmem:[%s13719_s15] ss:$16 sps:$4 sm:$0xff]  }
 0x5a8   :  { %5364 = vmatpush1.bf16.msra.mxu0 %v9906_v47  ;;  %5446 = vmatpush1.bf16.msra.mxu1 %v9909_v48  ;;  %v9987_v47 = vld [vmem:[%s13719_s15 + $0x8] ss:$16 sps:$4 sm:$0xff]   ;;  %v4524_v48 = vpack.c.bf16 %v4520_v19, %v4520_v19  ;;  %v10062_v19 = vld [vmem:[%s13719_s15 + $0x1a0] ss:$16 sps:$4 sm:$0xff]  }
 0x5a9   :  { %5365 = vmatprep.subr.bf16.mxu0 %v9914_v49  ;;  %5447 = vmatprep.subr.bf16.mxu1 %v9917_v50  ;;  %v9992_v49 = vld [vmem:[%s13719_s15 + $0x24] ss:$16 sps:$4 sm:$0xff]   ;;  %v9995_v50 = vld [vmem:[%s13719_s15 + $0x2c] ss:$16 sps:$4 sm:$0xff]  }
 0x5ac   :  { %5366 = vmatpush1.bf16.msra.mxu0 %v9912_v51  ;;  %5448 = vmatpush1.bf16.msra.mxu1 %v9915_v25  ;;  %v9990_v51 = vld [vmem:[%s13719_s15 + $0x20] ss:$16 sps:$4 sm:$0xff]   ;;  %v9993_v25 = vld [vmem:[%s13719_s15 + $0x28] ss:$16 sps:$4 sm:$0xff]  }
 0x5ad   :  { %5367 = vmatprep.subr.bf16.mxu0 %v9920_v52  ;;  %5449 = vmatprep.subr.bf16.mxu1 %v9923_v53  ;;  %v9998_v52 = vld [vmem:[%s13719_s15 + $0x44] ss:$16 sps:$4 sm:$0xff]   ;;  %v10001_v53 = vld [vmem:[%s13719_s15 + $0x4c] ss:$16 sps:$4 sm:$0xff]  }
 0x5b0   :  { %5368 = vmatpush1.bf16.msra.mxu0 %v9918_v54  ;;  %5450 = vmatpush1.bf16.msra.mxu1 %v9921_v55  ;;  %v9996_v54 = vld [vmem:[%s13719_s15 + $0x40] ss:$16 sps:$4 sm:$0xff]   ;;  %v9999_v55 = vld [vmem:[%s13719_s15 + $0x48] ss:$16 sps:$4 sm:$0xff]  }
 0x5b1   :  { %5369 = vmatprep.subr.bf16.mxu0 %v9926_v30  ;;  %5451 = vmatprep.subr.bf16.mxu1 %v9929_v58  ;;  %v10004_v30 = vld [vmem:[%s13719_s15 + $0x64] ss:$16 sps:$4 sm:$0xff]   ;;  %v10007_v58 = vld [vmem:[%s13719_s15 + $0x6c] ss:$16 sps:$4 sm:$0xff]  }
 0x5b4   :  { %5370 = vmatpush1.bf16.msra.mxu0 %v9924_v59  ;;  %5452 = vmatpush1.bf16.msra.mxu1 %v9927_v60  ;;  %v10002_v59 = vld [vmem:[%s13719_s15 + $0x60] ss:$16 sps:$4 sm:$0xff]   ;;  %v10005_v60 = vld [vmem:[%s13719_s15 + $0x68] ss:$16 sps:$4 sm:$0xff]  }
 0x5b5   :  { %5371 = vmatprep.subr.bf16.mxu0 %v9932_v2  ;;  %5453 = vmatprep.subr.bf16.mxu1 %v9935_v61  ;;  %v10010_v2 = vld [vmem:[%s13719_s15 + $0x84] ss:$16 sps:$4 sm:$0xff]   ;;  %v10013_v61 = vld [vmem:[%s13719_s15 + $0x8c] ss:$16 sps:$4 sm:$0xff]  }
 0x5b8   :  { %5372 = vmatpush1.bf16.msra.mxu0 %v9930_v63  ;;  %5454 = vmatpush1.bf16.msra.mxu1 %v9933_v1  ;;  %v10008_v63 = vld [vmem:[%s13719_s15 + $0x80] ss:$16 sps:$4 sm:$0xff]   ;;  %v10011_v1 = vld [vmem:[%s13719_s15 + $0x88] ss:$16 sps:$4 sm:$0xff]  }
 0x5b9   :  { %5373 = vmatprep.subr.bf16.mxu0 %v9938_v4  ;;  %5455 = vmatprep.subr.bf16.mxu1 %v9941_v5  ;;  %v10016_v4 = vld [vmem:[%s13719_s15 + $0xa4] ss:$16 sps:$4 sm:$0xff]   ;;  %v10019_v5 = vld [vmem:[%s13719_s15 + $0xac] ss:$16 sps:$4 sm:$0xff]  }
 0x5bc   :  { %5374 = vmatpush1.bf16.msra.mxu0 %v9936_v6  ;;  %5456 = vmatpush1.bf16.msra.mxu1 %v9939_v7  ;;  %v10014_v6 = vld [vmem:[%s13719_s15 + $0xa0] ss:$16 sps:$4 sm:$0xff]   ;;  %v10017_v7 = vld [vmem:[%s13719_s15 + $0xa8] ss:$16 sps:$4 sm:$0xff]  }
 0x5bd   :  { %5375 = vmatprep.subr.bf16.mxu0 %v9944_v0  ;;  %5457 = vmatprep.subr.bf16.mxu1 %v9947_v9  ;;  %v10022_v0 = vld [vmem:[%s13719_s15 + $0xc4] ss:$16 sps:$4 sm:$0xff]   ;;  %v10025_v9 = vld [vmem:[%s13719_s15 + $0xcc] ss:$16 sps:$4 sm:$0xff]  }
 0x5c0   :  { %5376 = vmatpush1.bf16.msra.mxu0 %v9942_v10  ;;  %5458 = vmatpush1.bf16.msra.mxu1 %v9945_v11  ;;  %v10020_v10 = vld [vmem:[%s13719_s15 + $0xc0] ss:$16 sps:$4 sm:$0xff]   ;;  %v10023_v11 = vld [vmem:[%s13719_s15 + $0xc8] ss:$16 sps:$4 sm:$0xff]  }
 0x5c1   :  { %5377 = vmatprep.subr.bf16.mxu0 %v9950_v12  ;;  %5459 = vmatprep.subr.bf16.mxu1 %v9953_v15  ;;  %v10028_v12 = vld [vmem:[%s13719_s15 + $0xe4] ss:$16 sps:$4 sm:$0xff]   ;;  %v10031_v15 = vld [vmem:[%s13719_s15 + $0xec] ss:$16 sps:$4 sm:$0xff]  }
 0x5c4   :  { %5378 = vmatpush1.bf16.msra.mxu0 %v9948_v16  ;;  %5460 = vmatpush1.bf16.msra.mxu1 %v9951_v17  ;;  %v10026_v16 = vld [vmem:[%s13719_s15 + $0xe0] ss:$16 sps:$4 sm:$0xff]   ;;  %v10029_v17 = vld [vmem:[%s13719_s15 + $0xe8] ss:$16 sps:$4 sm:$0xff]  }
 0x5c5   :  { %5379 = vmatprep.subr.bf16.mxu0 %v9956_v18  ;;  %5461 = vmatprep.subr.bf16.mxu1 %v9959_v20  ;;  %v10034_v18 = vld [vmem:[%s13719_s15 + $0x104] ss:$16 sps:$4 sm:$0xff]   ;;  %v10037_v20 = vld [vmem:[%s13719_s15 + $0x10c] ss:$16 sps:$4 sm:$0xff]  }
 0x5c8   :  { %5380 = vmatpush1.bf16.msra.mxu0 %v9954_v21  ;;  %5462 = vmatpush1.bf16.msra.mxu1 %v9957_v22  ;;  %v10032_v21 = vld [vmem:[%s13719_s15 + $0x100] ss:$16 sps:$4 sm:$0xff]   ;;  %v10035_v22 = vld [vmem:[%s13719_s15 + $0x108] ss:$16 sps:$4 sm:$0xff]  }
 0x5c9   :  { %5381 = vmatprep.subr.bf16.mxu0 %v9962_v23  ;;  %5463 = vmatprep.subr.bf16.mxu1 %v9965_v24  ;;  %v10040_v23 = vld [vmem:[%s13719_s15 + $0x124] ss:$16 sps:$4 sm:$0xff]   ;;  %v10043_v24 = vld [vmem:[%s13719_s15 + $0x12c] ss:$16 sps:$4 sm:$0xff]  }
 0x5cc   :  { %5382 = vmatpush1.bf16.msra.mxu0 %v9960_v26  ;;  %5464 = vmatpush1.bf16.msra.mxu1 %v9963_v27  ;;  %v10038_v26 = vld [vmem:[%s13719_s15 + $0x120] ss:$16 sps:$4 sm:$0xff]   ;;  %v10041_v27 = vld [vmem:[%s13719_s15 + $0x128] ss:$16 sps:$4 sm:$0xff]  }
 0x5cd   :  { %5383 = vmatprep.subr.bf16.mxu0 %v9968_v28  ;;  %5465 = vmatprep.subr.bf16.mxu1 %v9971_v29  ;;  %v10046_v28 = vld [vmem:[%s13719_s15 + $0x144] ss:$16 sps:$4 sm:$0xff]   ;;  %v10049_v29 = vld [vmem:[%s13719_s15 + $0x14c] ss:$16 sps:$4 sm:$0xff]  }
 0x5d0   :  { %5384 = vmatpush1.bf16.msra.mxu0 %v9966_v31  ;;  %5466 = vmatpush1.bf16.msra.mxu1 %v9969_v32  ;;  %v10044_v31 = vld [vmem:[%s13719_s15 + $0x140] ss:$16 sps:$4 sm:$0xff]   ;;  %v10047_v32 = vld [vmem:[%s13719_s15 + $0x148] ss:$16 sps:$4 sm:$0xff]  }
 0x5d1   :  { %5385 = vmatprep.subr.bf16.mxu0 %v9974_v34  ;;  %5467 = vmatprep.subr.bf16.mxu1 %v9977_v35  ;;  %v10055_v34 = vld [vmem:[%s13719_s15 + $0x16c] ss:$16 sps:$4 sm:$0xff]   ;;  %v10050_v35 = vld [vmem:[%s13719_s15 + $0x160] ss:$16 sps:$4 sm:$0xff]  }
 0x5d4   :  { %5386 = vmatpush1.bf16.msra.mxu0 %v9972_v14  ;;  %5468 = vmatpush1.bf16.msra.mxu1 %v9975_v8  ;;  %v10053_v14 = vld [vmem:[%s13719_s15 + $0x168] ss:$16 sps:$4 sm:$0xff]   ;;  %v10058_v8 = vld [vmem:[%s13719_s15 + $0x184] ss:$16 sps:$4 sm:$0xff]  }
 0x5d5   :  { %5387 = vmatprep.subr.bf16.mxu0 %v9980_v37  ;;  %5469 = vmatprep.subr.bf16.mxu1 %v9983_v42  ;;  %v10056_v37 = vld [vmem:[%s13719_s15 + $0x180] ss:$16 sps:$4 sm:$0xff]   ;;  %v10059_v42 = vld [vmem:[%s13719_s15 + $0x188] ss:$16 sps:$4 sm:$0xff]  }
 0x5d8   :  { %5388 = vmatpush1.bf16.msra.mxu0 %v9978_v43  ;;  %5470 = vmatpush1.bf16.msra.mxu1 %v9981_v13  ;;  %v10064_v43 = vld [vmem:[%s13719_s15 + $0x1a4] ss:$16 sps:$4 sm:$0xff]   ;;  %v10067_v13 = vld [vmem:[%s13719_s15 + $0x1ac] ss:$16 sps:$4 sm:$0xff]  }
 0x5d9   :  { %6282 = vmatprep.subr.bf16.mxu0 %v9986_v44  ;;  %6364 = vmatprep.subr.bf16.mxu1 %v9989_v45  ;;  %v10065_v44 = vld [vmem:[%s13719_s15 + $0x1a8] ss:$16 sps:$4 sm:$0xff]   ;;  %v10070_v45 = vld [vmem:[%s13719_s15 + $0x1c4] ss:$16 sps:$4 sm:$0xff]  }
 0x5db   :  { %5390 = vmatmul.mubr.bf16.vlgmr.msra.gmra.mrb[24].mxu0 %v4524_v48  ;;  %5472 = vmatmul.mubr.bf16.vlgmr.msra.gmra.mrb[24].mxu1 %v4524_v48  ;;  %v10071_v48 = vld [vmem:[%s13719_s15 + $0x1c8] ss:$16 sps:$4 sm:$0xff]  }
 0x5dc   :  { %6283 = vmatpush1.bf16.msra.mxu0 %v9984_v46  ;;  %6365 = vmatpush1.bf16.msra.mxu1 %v9987_v47  ;;  %v10073_v46 = vld [vmem:[%s13719_s15 + $0x1cc] ss:$16 sps:$4 sm:$0xff]   ;;  %v10068_v47 = vld [vmem:[%s13719_s15 + $0x1c0] ss:$16 sps:$4 sm:$0xff]  }
 0x5dd   :  { %6284 = vmatprep.subr.bf16.mxu0 %v9992_v49  ;;  %6366 = vmatprep.subr.bf16.mxu1 %v9995_v50  ;;  %v10076_v49 = vld [vmem:[%s13719_s15 + $0x1e4] ss:$16 sps:$4 sm:$0xff]   ;;  %v10079_v50 = vld [vmem:[%s13719_s15 + $0x1ec] ss:$16 sps:$4 sm:$0xff]  }
 0x5e0   :  { %6285 = vmatpush1.bf16.msra.mxu0 %v9990_v51  ;;  %6367 = vmatpush1.bf16.msra.mxu1 %v9993_v25  ;;  %v10074_v51 = vld [vmem:[%s13719_s15 + $0x1e0] ss:$16 sps:$4 sm:$0xff]   ;;  %v10077_v25 = vld [vmem:[%s13719_s15 + $0x1e8] ss:$16 sps:$4 sm:$0xff]  }
 0x5e1   :  { %6286 = vmatprep.subr.bf16.mxu0 %v9998_v52  ;;  %6368 = vmatprep.subr.bf16.mxu1 %v10001_v53  ;;  %v10082_v52 = vld [vmem:[%s13719_s15 + $0x204] ss:$16 sps:$4 sm:$0xff]   ;;  %v10085_v53 = vld [vmem:[%s13719_s15 + $0x20c] ss:$16 sps:$4 sm:$0xff]  }
 0x5e4   :  { %6287 = vmatpush1.bf16.msra.mxu0 %v9996_v54  ;;  %6369 = vmatpush1.bf16.msra.mxu1 %v9999_v55  ;;  %v12980_v54 = vld [vmem:[%s13718_s14] sm:$0xf] }
 0x5e5   :  { %6288 = vmatprep.subr.bf16.mxu0 %v10004_v30  ;;  %6370 = vmatprep.subr.bf16.mxu1 %v10007_v58  ;;  %v4659_v55 = vrot.slane %v12980_v54, %v10851_v39  ;;  %v4663_v30 = vrot.slane %v12980_v54, %v10859_v41  ;;  %v4671_v58 = vrot.slane %v12980_v54, %v10878_v56 }
 0x5e8   :  { %6289 = vmatpush1.bf16.msra.mxu0 %v10002_v59  ;;  %6371 = vmatpush1.bf16.msra.mxu1 %v10005_v60 }
 0x5e9   :  { %6290 = vmatprep.subr.bf16.mxu0 %v10010_v2  ;;  %6372 = vmatprep.subr.bf16.mxu1 %v10013_v61 }
 0x5ec   :  { %6291 = vmatpush1.bf16.msra.mxu0 %v10008_v63  ;;  %6373 = vmatpush1.bf16.msra.mxu1 %v10011_v1 }
 0x5ed   :  { %6292 = vmatprep.subr.bf16.mxu0 %v10016_v4  ;;  %6374 = vmatprep.subr.bf16.mxu1 %v10019_v5 }
 0x5f0   :  { %6293 = vmatpush1.bf16.msra.mxu0 %v10014_v6  ;;  %6375 = vmatpush1.bf16.msra.mxu1 %v10017_v7 }
 0x5f1   :  { %6294 = vmatprep.subr.bf16.mxu0 %v10022_v0  ;;  %6376 = vmatprep.subr.bf16.mxu1 %v10025_v9 }
 0x5f4   :  { %6295 = vmatpush1.bf16.msra.mxu0 %v10020_v10  ;;  %6377 = vmatpush1.bf16.msra.mxu1 %v10023_v11 }
 0x5f5   :  { %6296 = vmatprep.subr.bf16.mxu0 %v10028_v12  ;;  %6378 = vmatprep.subr.bf16.mxu1 %v10031_v15 }
 0x5f8   :  { %6297 = vmatpush1.bf16.msra.mxu0 %v10026_v16  ;;  %6379 = vmatpush1.bf16.msra.mxu1 %v10029_v17 }
 0x5f9   :  { %6298 = vmatprep.subr.bf16.mxu0 %v10034_v18  ;;  %6380 = vmatprep.subr.bf16.mxu1 %v10037_v20  ;;  %v10080_v18 = vld [vmem:[%s13719_s15 + $0x200] ss:$16 sps:$4 sm:$0xff]   ;;  %v10083_v20 = vld [vmem:[%s13719_s15 + $0x208] ss:$16 sps:$4 sm:$0xff]  }
 0x5fc   :  { %6299 = vmatpush1.bf16.msra.mxu0 %v10032_v21  ;;  %6381 = vmatpush1.bf16.msra.mxu1 %v10035_v22  ;;  %v10086_v22 = vld [vmem:[%s13719_s15 + $0x220] ss:$16 sps:$4 sm:$0xff]  }
 0x5fd   :  { %6300 = vmatprep.subr.bf16.mxu0 %v10040_v23  ;;  %6382 = vmatprep.subr.bf16.mxu1 %v10043_v24  ;;  %v10089_v23 = vld [vmem:[%s13719_s15 + $0x228] ss:$16 sps:$4 sm:$0xff]   ;;  %v10094_v24 = vld [vmem:[%s13719_s15 + $0x244] ss:$16 sps:$4 sm:$0xff]  }
 0x600   :  { %6301 = vmatpush1.bf16.msra.mxu0 %v10038_v26  ;;  %6383 = vmatpush1.bf16.msra.mxu1 %v10041_v27  ;;  %v10097_v26 = vld [vmem:[%s13719_s15 + $0x24c] ss:$16 sps:$4 sm:$0xff]   ;;  %v10092_v27 = vld [vmem:[%s13719_s15 + $0x240] ss:$16 sps:$4 sm:$0xff]  }
 0x601   :  { %6302 = vmatprep.subr.bf16.mxu0 %v10046_v28  ;;  %6384 = vmatprep.subr.bf16.mxu1 %v10049_v29  ;;  %v10095_v28 = vld [vmem:[%s13719_s15 + $0x248] ss:$16 sps:$4 sm:$0xff]   ;;  %v10100_v29 = vld [vmem:[%s13719_s15 + $0x264] ss:$16 sps:$4 sm:$0xff]  }
 0x604   :  { %6303 = vmatpush1.bf16.msra.mxu0 %v10044_v31  ;;  %6385 = vmatpush1.bf16.msra.mxu1 %v10047_v32  ;;  %v10103_v31 = vld [vmem:[%s13719_s15 + $0x26c] ss:$16 sps:$4 sm:$0xff]   ;;  %v10098_v32 = vld [vmem:[%s13719_s15 + $0x260] ss:$16 sps:$4 sm:$0xff]  }
 0x605   :  { %6304 = vmatprep.subr.bf16.mxu0 %v10052_v33  ;;  %6386 = vmatprep.subr.bf16.mxu1 %v10055_v34  ;;  %v10101_v33 = vld [vmem:[%s13719_s15 + $0x268] ss:$16 sps:$4 sm:$0xff]   ;;  %v10106_v34 = vld [vmem:[%s13719_s15 + $0x284] ss:$16 sps:$4 sm:$0xff]  }
 0x608   :  { %6305 = vmatpush1.bf16.msra.mxu0 %v10050_v35  ;;  %6387 = vmatpush1.bf16.msra.mxu1 %v10053_v14  ;;  %v10109_v35 = vld [vmem:[%s13719_s15 + $0x28c] ss:$16 sps:$4 sm:$0xff]   ;;  %v10104_v14 = vld [vmem:[%s13719_s15 + $0x280] ss:$16 sps:$4 sm:$0xff]  }
 0x609   :  { %6306 = vmatprep.subr.bf16.mxu0 %v10058_v8  ;;  %6388 = vmatprep.subr.bf16.mxu1 %v10061_v36  ;;  %v10107_v8 = vld [vmem:[%s13719_s15 + $0x288] ss:$16 sps:$4 sm:$0xff]   ;;  %v10112_v36 = vld [vmem:[%s13719_s15 + $0x2a4] ss:$16 sps:$4 sm:$0xff]  }
 0x60c   :  { %6307 = vmatpush1.bf16.msra.mxu0 %v10056_v37  ;;  %6389 = vmatpush1.bf16.msra.mxu1 %v10059_v42  ;;  %v10115_v37 = vld [vmem:[%s13719_s15 + $0x2ac] ss:$16 sps:$4 sm:$0xff]   ;;  %v10110_v42 = vld [vmem:[%s13719_s15 + $0x2a0] ss:$16 sps:$4 sm:$0xff]  }
 0x60d   :  { %6308 = vmatprep.subr.bf16.mxu0 %v10064_v43  ;;  %6390 = vmatprep.subr.bf16.mxu1 %v10067_v13  ;;  %v10113_v43 = vld [vmem:[%s13719_s15 + $0x2a8] ss:$16 sps:$4 sm:$0xff]   ;;  %v10118_v13 = vld [vmem:[%s13719_s15 + $0x2c4] ss:$16 sps:$4 sm:$0xff]  }
 0x610   :  { %6309 = vmatpush1.bf16.msra.mxu0 %v10062_v19  ;;  %6391 = vmatpush1.bf16.msra.mxu1 %v10065_v44  ;;  %v10121_v19 = vld [vmem:[%s13719_s15 + $0x2cc] ss:$16 sps:$4 sm:$0xff]   ;;  %v10116_v44 = vld [vmem:[%s13719_s15 + $0x2c0] ss:$16 sps:$4 sm:$0xff]  }
 0x611   :  { %6310 = vmatprep.subr.bf16.mxu0 %v10070_v45  ;;  %6392 = vmatprep.subr.bf16.mxu1 %v10073_v46  ;;  %v10119_v45 = vld [vmem:[%s13719_s15 + $0x2c8] ss:$16 sps:$4 sm:$0xff]   ;;  %v10124_v46 = vld [vmem:[%s13719_s15 + $0x2e4] ss:$16 sps:$4 sm:$0xff]  }
 0x614   :  { %6311 = vmatpush1.bf16.msra.mxu0 %v10068_v47  ;;  %6393 = vmatpush1.bf16.msra.mxu1 %v10071_v48  ;;  %v10127_v47 = vld [vmem:[%s13719_s15 + $0x2ec] ss:$16 sps:$4 sm:$0xff]   ;;  %v10122_v48 = vld [vmem:[%s13719_s15 + $0x2e0] ss:$16 sps:$4 sm:$0xff]  }
 0x615   :  { %6312 = vmatprep.subr.bf16.mxu0 %v10076_v49  ;;  %6394 = vmatprep.subr.bf16.mxu1 %v10079_v50  ;;  %v10125_v49 = vld [vmem:[%s13719_s15 + $0x2e8] ss:$16 sps:$4 sm:$0xff]   ;;  %v10130_v50 = vld [vmem:[%s13719_s15 + $0x304] ss:$16 sps:$4 sm:$0xff]  }
 0x618   :  { %6313 = vmatpush1.bf16.msra.mxu0 %v10074_v51  ;;  %6395 = vmatpush1.bf16.msra.mxu1 %v10077_v25  ;;  %v10133_v51 = vld [vmem:[%s13719_s15 + $0x30c] ss:$16 sps:$4 sm:$0xff]   ;;  %v10128_v25 = vld [vmem:[%s13719_s15 + $0x300] ss:$16 sps:$4 sm:$0xff]  }
 0x619   :  { %6323 = vmatprep.subr.bf16.mxu0 %v10082_v52  ;;  %6405 = vmatprep.subr.bf16.mxu1 %v10085_v53  ;;  %v10131_v52 = vld [vmem:[%s13719_s15 + $0x308] ss:$16 sps:$4 sm:$0xff]   ;;  %v10136_v53 = vld [vmem:[%s13719_s15 + $0x324] ss:$16 sps:$4 sm:$0xff]  }
 0x6ae   :  { %v5391_v59 = vpop.f32.mrb[24].mxu0  ;;  %v12988_v60 = vpop.f32.mrb[24].mxu1 }
 0x6af   :  { %v8856_v2 = vadd.f32 %v5391_v59, %v4659_v55  ;;  %v5393_v61 = vpop.f32.mrb[25].mxu0  ;;  %v5475_v63 = vpop.f32.mrb[25].mxu1  ;;  %v10139_v55 = vld [vmem:[%s13719_s15 + $0x32c] ss:$16 sps:$4 sm:$0xff]   ;;  %v10142_v59 = vld [vmem:[%s13719_s15 + $0x344] ss:$16 sps:$4 sm:$0xff]  }
 0x6b0   :  { %v8857_v1 = vadd.f32 %v5393_v61, %v4663_v30  ;;  %v8859_v4 = vadd.f32 %v5475_v63, %v4671_v58  ;;  %v5395_v5 = vpop.f32.mrb[26].mxu0  ;;  %v5477_v6 = vpop.f32.mrb[26].mxu1  ;;  %v10134_v30 = vld [vmem:[%s13719_s15 + $0x320] ss:$16 sps:$4 sm:$0xff]   ;;  %v10137_v58 = vld [vmem:[%s13719_s15 + $0x328] ss:$16 sps:$4 sm:$0xff]  }
 0x6b1   :  { %v5480_v7 = vmax.f32 %v8856_v2, 0.0  ;;  %v5396_v0 = vpop.f32.mrb[27].mxu0  ;;  %v5478_v9 = vpop.f32.mrb[27].mxu1  ;;  %v10145_v2 = vld [vmem:[%s13719_s15 + $0x34c] ss:$16 sps:$4 sm:$0xff]  }
 0x6b2   :  { %v5481_v10 = vmax.f32 %v8857_v1, 0.0  ;;  %v5483_v11 = vmax.f32 %v8859_v4, 0.0  ;;  %v10140_v61 = vld [vmem:[%s13719_s15 + $0x340] ss:$16 sps:$4 sm:$0xff]   ;;  %v10143_v63 = vld [vmem:[%s13719_s15 + $0x348] ss:$16 sps:$4 sm:$0xff]  }
 0x6b3   :  { %v5484_v12 = vadd.f32 %v5480_v7, %v11777_v38  ;;  %v10088_v38 = vld [vmem:[%s13719_s15 + $0x224] ss:$16 sps:$4 sm:$0xff]   ;;  %v10151_v4 = vld [vmem:[%s13719_s15 + $0x36c] ss:$16 sps:$4 sm:$0xff]   ;;  %v10146_v5 = vld [vmem:[%s13719_s15 + $0x360] ss:$16 sps:$4 sm:$0xff]  }
 0x6b4   :  { %v5485_v15 = vadd.f32 %v5481_v10, %v11781_v3  ;;  %v5487_v16 = vadd.f32 %v5483_v11, %v11783_v40  ;;  %v10091_v3 = vld [vmem:[%s13719_s15 + $0x22c] ss:$16 sps:$4 sm:$0xff]   ;;  %v10148_v1 = vld [vmem:[%s13719_s15 + $0x364] ss:$16 sps:$4 sm:$0xff]   ;;  %v10149_v6 = vld [vmem:[%s13719_s15 + $0x368] ss:$16 sps:$4 sm:$0xff]   ;;  %v4667_v11 = vrot.slane %v12980_v54, %v11029_v57 }
 0x6b5   :  { %v5488_v21 = vpack.c.bf16 %v5484_v12, %v5484_v12  ;;  %v10154_v7 = vld [vmem:[%s13719_s15 + $0x384] ss:$16 sps:$4 sm:$0xff]   ;;  %v10157_v0 = vld [vmem:[%s13719_s15 + $0x38c] ss:$16 sps:$4 sm:$0xff]   ;;  %v10152_v9 = vld [vmem:[%s13719_s15 + $0x380] ss:$16 sps:$4 sm:$0xff]  }
 0x6b6   :  { %v5489_v17 = vpack.c.bf16 %v5485_v15, %v5485_v15  ;;  %v5491_v40 = vpack.c.bf16 %v5487_v16, %v5487_v16  ;;  %v10155_v10 = vld [vmem:[%s13719_s15 + $0x388] ss:$16 sps:$4 sm:$0xff]   ;;  %v10160_v12 = vld [vmem:[%s13719_s15 + $0x3a4] ss:$16 sps:$4 sm:$0xff]   ;;  %v10163_v15 = vld [vmem:[%s13719_s15 + $0x3ac] ss:$16 sps:$4 sm:$0xff]  }
 0x6b7   :  { %v10158_v16 = vld [vmem:[%s13719_s15 + $0x3a0] ss:$16 sps:$4 sm:$0xff]   ;;  %v10161_v54 = vld [vmem:[%s13719_s15 + $0x3a8] ss:$16 sps:$4 sm:$0xff]  }
 0x6b8   :  { %6314 = vmatprep.mubr.bf16.mxu0 %v5489_v17  ;;  %6396 = vmatprep.mubr.bf16.mxu1 %v5489_v17  ;;  %v8858_v17 = vadd.f32 %v12988_v60, %v4667_v11  ;;  %v10167_v60 = vld [vmem:[%s13719_s15 + $0x3c8] ss:$16 sps:$4 sm:$0xff]  }
 0x6b9   :  { %6315 = vmatmul.mubr.bf16.vlgmr.msra.gmra.mrb[28].mxu0 %v5488_v21  ;;  %6397 = vmatmul.mubr.bf16.vlgmr.msra.gmra.mrb[28].mxu1 %v5488_v21  ;;  %v10164_v21 = vld [vmem:[%s13719_s15 + $0x3c0] ss:$16 sps:$4 sm:$0xff]   ;;  %v10239_v11 = vld [vmem:[%s13721_s17 + $0x148] ss:$16 sps:$4 sm:$0xff]  }
 0x6ba   :  { %6324 = vmatpush1.bf16.msra.mxu0 %v10080_v18  ;;  %6406 = vmatpush1.bf16.msra.mxu1 %v10083_v20  ;;  %v10166_v18 = vld [vmem:[%s13719_s15 + $0x3c4] ss:$16 sps:$4 sm:$0xff]   ;;  %v10169_v20 = vld [vmem:[%s13719_s15 + $0x3cc] ss:$16 sps:$4 sm:$0xff]  }
 0x6bb   :  { %6355 = vmatprep.mubr.bf16.mxu0 %v5491_v40  ;;  %6437 = vmatprep.mubr.bf16.mxu1 %v5491_v40  ;;  %v10175_v40 = vld [vmem:[%s13719_s15 + $0x3ec] ss:$16 sps:$4 sm:$0xff]  }
 0x6bc   :  { %6325 = vmatprep.subr.bf16.mxu0 %v10088_v38  ;;  %6407 = vmatprep.subr.bf16.mxu1 %v10091_v3  ;;  %v5482_v38 = vmax.f32 %v8858_v17, 0.0  ;;  %v10172_v3 = vld [vmem:[%s13719_s15 + $0x3e4] ss:$16 sps:$4 sm:$0xff]  }
 0x6bd   :  { %v10250_v17 = vld [vmem:[%s13721_s17 + $0x184] ss:$16 sps:$4 sm:$0xff]  }
 0x6be   :  { %6326 = vmatpush1.bf16.msra.mxu0 %v10086_v22  ;;  %6408 = vmatpush1.bf16.msra.mxu1 %v10089_v23  ;;  %v10170_v22 = vld [vmem:[%s13719_s15 + $0x3e0] ss:$16 sps:$4 sm:$0xff]   ;;  %v10173_v23 = vld [vmem:[%s13719_s15 + $0x3e8] ss:$16 sps:$4 sm:$0xff]  }
 0x6bf   :  { %6327 = vmatprep.subr.bf16.mxu0 %v10094_v24  ;;  %6409 = vmatprep.subr.bf16.mxu1 %v10097_v26  ;;  %v5486_v24 = vadd.f32 %v5482_v38, %v11779_v62  ;;  %v10178_v26 = vld [vmem:[%s13721_s17 + $0x4] ss:$16 sps:$4 sm:$0xff]   ;;  %v10179_v62 = vld [vmem:[%s13721_s17 + $0x8] ss:$16 sps:$4 sm:$0xff]   ;;  %v10259_v38 = vld [vmem:[%s13721_s17 + $0x1ac] ss:$16 sps:$4 sm:$0xff]  }
 0x6c2   :  { %6328 = vmatpush1.bf16.msra.mxu0 %v10092_v27  ;;  %6410 = vmatpush1.bf16.msra.mxu1 %v10095_v28  ;;  %v10181_v27 = vld [vmem:[%s13721_s17 + $0xc] ss:$16 sps:$4 sm:$0xff]   ;;  %v10176_v28 = vld [vmem:[%s13721_s17] ss:$16 sps:$4 sm:$0xff]  }
 0x6c3   :  { %6329 = vmatprep.subr.bf16.mxu0 %v10100_v29  ;;  %6411 = vmatprep.subr.bf16.mxu1 %v10103_v31  ;;  %v5490_v29 = vpack.c.bf16 %v5486_v24, %v5486_v24  ;;  %v10184_v31 = vld [vmem:[%s13721_s17 + $0x24] ss:$16 sps:$4 sm:$0xff]   ;;  %v10260_v24 = vld [vmem:[%s13721_s17 + $0x1c0] ss:$16 sps:$4 sm:$0xff]  }
 0x6c6   :  { %6330 = vmatpush1.bf16.msra.mxu0 %v10098_v32  ;;  %6412 = vmatpush1.bf16.msra.mxu1 %v10101_v33  ;;  %v10187_v32 = vld [vmem:[%s13721_s17 + $0x2c] ss:$16 sps:$4 sm:$0xff]   ;;  %v10182_v33 = vld [vmem:[%s13721_s17 + $0x20] ss:$16 sps:$4 sm:$0xff]  }
 0x6c7   :  { %6331 = vmatprep.subr.bf16.mxu0 %v10106_v34  ;;  %6413 = vmatprep.subr.bf16.mxu1 %v10109_v35  ;;  %v10185_v34 = vld [vmem:[%s13721_s17 + $0x28] ss:$16 sps:$4 sm:$0xff]   ;;  %v10190_v35 = vld [vmem:[%s13721_s17 + $0x44] ss:$16 sps:$4 sm:$0xff]  }
 0x6ca   :  { %6332 = vmatpush1.bf16.msra.mxu0 %v10104_v14  ;;  %6414 = vmatpush1.bf16.msra.mxu1 %v10107_v8  ;;  %v10193_v14 = vld [vmem:[%s13721_s17 + $0x4c] ss:$16 sps:$4 sm:$0xff]   ;;  %v10188_v8 = vld [vmem:[%s13721_s17 + $0x40] ss:$16 sps:$4 sm:$0xff]  }
 0x6cb   :  { %6333 = vmatprep.subr.bf16.mxu0 %v10112_v36  ;;  %6415 = vmatprep.subr.bf16.mxu1 %v10115_v37  ;;  %v10191_v36 = vld [vmem:[%s13721_s17 + $0x48] ss:$16 sps:$4 sm:$0xff]   ;;  %v10196_v37 = vld [vmem:[%s13721_s17 + $0x64] ss:$16 sps:$4 sm:$0xff]  }
 0x6ce   :  { %6334 = vmatpush1.bf16.msra.mxu0 %v10110_v42  ;;  %6416 = vmatpush1.bf16.msra.mxu1 %v10113_v43  ;;  %v10199_v42 = vld [vmem:[%s13721_s17 + $0x6c] ss:$16 sps:$4 sm:$0xff]   ;;  %v10194_v43 = vld [vmem:[%s13721_s17 + $0x60] ss:$16 sps:$4 sm:$0xff]  }
 0x6cf   :  { %6335 = vmatprep.subr.bf16.mxu0 %v10118_v13  ;;  %6417 = vmatprep.subr.bf16.mxu1 %v10121_v19  ;;  %v10197_v13 = vld [vmem:[%s13721_s17 + $0x68] ss:$16 sps:$4 sm:$0xff]   ;;  %v10202_v19 = vld [vmem:[%s13721_s17 + $0x84] ss:$16 sps:$4 sm:$0xff]  }
 0x6d2   :  { %6336 = vmatpush1.bf16.msra.mxu0 %v10116_v44  ;;  %6418 = vmatpush1.bf16.msra.mxu1 %v10119_v45  ;;  %v10205_v44 = vld [vmem:[%s13721_s17 + $0x8c] ss:$16 sps:$4 sm:$0xff]   ;;  %v10200_v45 = vld [vmem:[%s13721_s17 + $0x80] ss:$16 sps:$4 sm:$0xff]  }
 0x6d3   :  { %6337 = vmatprep.subr.bf16.mxu0 %v10124_v46  ;;  %6419 = vmatprep.subr.bf16.mxu1 %v10127_v47  ;;  %v10203_v46 = vld [vmem:[%s13721_s17 + $0x88] ss:$16 sps:$4 sm:$0xff]   ;;  %v10208_v47 = vld [vmem:[%s13721_s17 + $0xa4] ss:$16 sps:$4 sm:$0xff]  }
 0x6d6   :  { %6338 = vmatpush1.bf16.msra.mxu0 %v10122_v48  ;;  %6420 = vmatpush1.bf16.msra.mxu1 %v10125_v49  ;;  %v10211_v48 = vld [vmem:[%s13721_s17 + $0xac] ss:$16 sps:$4 sm:$0xff]   ;;  %v10206_v49 = vld [vmem:[%s13721_s17 + $0xa0] ss:$16 sps:$4 sm:$0xff]  }
 0x6d7   :  { %6339 = vmatprep.subr.bf16.mxu0 %v10130_v50  ;;  %6421 = vmatprep.subr.bf16.mxu1 %v10133_v51  ;;  %v10209_v50 = vld [vmem:[%s13721_s17 + $0xa8] ss:$16 sps:$4 sm:$0xff]   ;;  %v10214_v51 = vld [vmem:[%s13721_s17 + $0xc4] ss:$16 sps:$4 sm:$0xff]  }
 0x6da   :  { %6340 = vmatpush1.bf16.msra.mxu0 %v10128_v25  ;;  %6422 = vmatpush1.bf16.msra.mxu1 %v10131_v52  ;;  %v10217_v25 = vld [vmem:[%s13721_s17 + $0xcc] ss:$16 sps:$4 sm:$0xff]   ;;  %v10212_v52 = vld [vmem:[%s13721_s17 + $0xc0] ss:$16 sps:$4 sm:$0xff]  }
 0x6db   :  { %6341 = vmatprep.subr.bf16.mxu0 %v10136_v53  ;;  %6423 = vmatprep.subr.bf16.mxu1 %v10139_v55  ;;  %v10215_v53 = vld [vmem:[%s13721_s17 + $0xc8] ss:$16 sps:$4 sm:$0xff]   ;;  %v10220_v55 = vld [vmem:[%s13721_s17 + $0xe4] ss:$16 sps:$4 sm:$0xff]  }
 0x6de   :  { %6342 = vmatpush1.bf16.msra.mxu0 %v10134_v30  ;;  %6424 = vmatpush1.bf16.msra.mxu1 %v10137_v58  ;;  %v10223_v30 = vld [vmem:[%s13721_s17 + $0xec] ss:$16 sps:$4 sm:$0xff]   ;;  %v10218_v58 = vld [vmem:[%s13721_s17 + $0xe0] ss:$16 sps:$4 sm:$0xff]  }
 0x6df   :  { %6343 = vmatprep.subr.bf16.mxu0 %v10142_v59  ;;  %6425 = vmatprep.subr.bf16.mxu1 %v10145_v2  ;;  %v10221_v59 = vld [vmem:[%s13721_s17 + $0xe8] ss:$16 sps:$4 sm:$0xff]   ;;  %v10226_v2 = vld [vmem:[%s13721_s17 + $0x104] ss:$16 sps:$4 sm:$0xff]  }
 0x6e2   :  { %6344 = vmatpush1.bf16.msra.mxu0 %v10140_v61  ;;  %6426 = vmatpush1.bf16.msra.mxu1 %v10143_v63  ;;  %v10229_v61 = vld [vmem:[%s13721_s17 + $0x10c] ss:$16 sps:$4 sm:$0xff]   ;;  %v10224_v63 = vld [vmem:[%s13721_s17 + $0x100] ss:$16 sps:$4 sm:$0xff]  }
 0x6e3   :  { %6345 = vmatprep.subr.bf16.mxu0 %v10148_v1  ;;  %6427 = vmatprep.subr.bf16.mxu1 %v10151_v4  ;;  %v10227_v1 = vld [vmem:[%s13721_s17 + $0x108] ss:$16 sps:$4 sm:$0xff]   ;;  %v10232_v4 = vld [vmem:[%s13721_s17 + $0x124] ss:$16 sps:$4 sm:$0xff]  }
 0x6e6   :  { %6346 = vmatpush1.bf16.msra.mxu0 %v10146_v5  ;;  %6428 = vmatpush1.bf16.msra.mxu1 %v10149_v6  ;;  %v10235_v5 = vld [vmem:[%s13721_s17 + $0x12c] ss:$16 sps:$4 sm:$0xff]   ;;  %v10230_v6 = vld [vmem:[%s13721_s17 + $0x120] ss:$16 sps:$4 sm:$0xff]  }
 0x6e7   :  { %6347 = vmatprep.subr.bf16.mxu0 %v10154_v7  ;;  %6429 = vmatprep.subr.bf16.mxu1 %v10157_v0  ;;  %v10233_v7 = vld [vmem:[%s13721_s17 + $0x128] ss:$16 sps:$4 sm:$0xff]   ;;  %v10238_v0 = vld [vmem:[%s13721_s17 + $0x144] ss:$16 sps:$4 sm:$0xff]  }
 0x6ea   :  { %6348 = vmatpush1.bf16.msra.mxu0 %v10152_v9  ;;  %6430 = vmatpush1.bf16.msra.mxu1 %v10155_v10  ;;  %v10241_v9 = vld [vmem:[%s13721_s17 + $0x14c] ss:$16 sps:$4 sm:$0xff]   ;;  %v10236_v10 = vld [vmem:[%s13721_s17 + $0x140] ss:$16 sps:$4 sm:$0xff]  }
 0x6eb   :  { %6349 = vmatprep.subr.bf16.mxu0 %v10160_v12  ;;  %6431 = vmatprep.subr.bf16.mxu1 %v10163_v15  ;;  %v10244_v12 = vld [vmem:[%s13721_s17 + $0x164] ss:$16 sps:$4 sm:$0xff]   ;;  %v10247_v15 = vld [vmem:[%s13721_s17 + $0x16c] ss:$16 sps:$4 sm:$0xff]  }
 0x6ee   :  { %6350 = vmatpush1.bf16.msra.mxu0 %v10158_v16  ;;  %6432 = vmatpush1.bf16.msra.mxu1 %v10161_v54  ;;  %v10242_v16 = vld [vmem:[%s13721_s17 + $0x160] ss:$16 sps:$4 sm:$0xff]   ;;  %v10245_v54 = vld [vmem:[%s13721_s17 + $0x168] ss:$16 sps:$4 sm:$0xff]  }
 0x6ef   :  { %6351 = vmatprep.subr.bf16.mxu0 %v10166_v18  ;;  %6433 = vmatprep.subr.bf16.mxu1 %v10169_v20  ;;  %v10253_v18 = vld [vmem:[%s13721_s17 + $0x18c] ss:$16 sps:$4 sm:$0xff]   ;;  %v10248_v20 = vld [vmem:[%s13721_s17 + $0x180] ss:$16 sps:$4 sm:$0xff]  }
 0x6f2   :  { %6352 = vmatpush1.bf16.msra.mxu0 %v10164_v21  ;;  %6434 = vmatpush1.bf16.msra.mxu1 %v10167_v60  ;;  %v10251_v21 = vld [vmem:[%s13721_s17 + $0x188] ss:$16 sps:$4 sm:$0xff]   ;;  %v10256_v60 = vld [vmem:[%s13721_s17 + $0x1a4] ss:$16 sps:$4 sm:$0xff]  }
 0x6f3   :  { %6353 = vmatprep.subr.bf16.mxu0 %v10172_v3  ;;  %6435 = vmatprep.subr.bf16.mxu1 %v10175_v40  ;;  %v10254_v3 = vld [vmem:[%s13721_s17 + $0x1a0] ss:$16 sps:$4 sm:$0xff]   ;;  %v10257_v40 = vld [vmem:[%s13721_s17 + $0x1a8] ss:$16 sps:$4 sm:$0xff]  }
 0x6f6   :  { %6354 = vmatpush1.bf16.msra.mxu0 %v10170_v22  ;;  %6436 = vmatpush1.bf16.msra.mxu1 %v10173_v23  ;;  %v10262_v22 = vld [vmem:[%s13721_s17 + $0x1c4] ss:$16 sps:$4 sm:$0xff]   ;;  %v10265_v23 = vld [vmem:[%s13721_s17 + $0x1cc] ss:$16 sps:$4 sm:$0xff]  }
 0x6f7   :  { %7244 = vmatprep.subr.bf16.mxu0 %v10178_v26  ;;  %7326 = vmatprep.subr.bf16.mxu1 %v10181_v27  ;;  %v10263_v26 = vld [vmem:[%s13721_s17 + $0x1c8] ss:$16 sps:$4 sm:$0xff]   ;;  %v10268_v27 = vld [vmem:[%s13721_s17 + $0x1e4] ss:$16 sps:$4 sm:$0xff]  }
 0x6f9   :  { %6356 = vmatmul.mubr.bf16.vlgmr.msra.gmra.mrb[28].mxu0 %v5490_v29  ;;  %6438 = vmatmul.mubr.bf16.vlgmr.msra.gmra.mrb[28].mxu1 %v5490_v29  ;;  %v10269_v29 = vld [vmem:[%s13721_s17 + $0x1e8] ss:$16 sps:$4 sm:$0xff]  }
 0x6fa   :  { %7245 = vmatpush1.bf16.msra.mxu0 %v10176_v28  ;;  %7327 = vmatpush1.bf16.msra.mxu1 %v10179_v62  ;;  %v10271_v28 = vld [vmem:[%s13721_s17 + $0x1ec] ss:$16 sps:$4 sm:$0xff]   ;;  %v10266_v62 = vld [vmem:[%s13721_s17 + $0x1e0] ss:$16 sps:$4 sm:$0xff]  }
 0x6fb   :  { %7246 = vmatprep.subr.bf16.mxu0 %v10184_v31  ;;  %7328 = vmatprep.subr.bf16.mxu1 %v10187_v32  ;;  %v10274_v31 = vld [vmem:[%s13721_s17 + $0x204] ss:$16 sps:$4 sm:$0xff]   ;;  %v10277_v32 = vld [vmem:[%s13721_s17 + $0x20c] ss:$16 sps:$4 sm:$0xff]  }
 0x6fe   :  { %7247 = vmatpush1.bf16.msra.mxu0 %v10182_v33  ;;  %7329 = vmatpush1.bf16.msra.mxu1 %v10185_v34  ;;  %v13384_v33 = vld [vmem:[%s13720_s16] sm:$0xf] }
 0x6ff   :  { %7248 = vmatprep.subr.bf16.mxu0 %v10190_v35  ;;  %7330 = vmatprep.subr.bf16.mxu1 %v10193_v14  ;;  %v5625_v34 = vrot.slane %v13384_v33, %v10851_v39  ;;  %v5629_v35 = vrot.slane %v13384_v33, %v10859_v41  ;;  %v5637_v14 = vrot.slane %v13384_v33, %v10878_v56 }
 0x702   :  { %7249 = vmatpush1.bf16.msra.mxu0 %v10188_v8  ;;  %7331 = vmatpush1.bf16.msra.mxu1 %v10191_v36 }
 0x703   :  { %7250 = vmatprep.subr.bf16.mxu0 %v10196_v37  ;;  %7332 = vmatprep.subr.bf16.mxu1 %v10199_v42 }
 0x706   :  { %7251 = vmatpush1.bf16.msra.mxu0 %v10194_v43  ;;  %7333 = vmatpush1.bf16.msra.mxu1 %v10197_v13 }
 0x707   :  { %7252 = vmatprep.subr.bf16.mxu0 %v10202_v19  ;;  %7334 = vmatprep.subr.bf16.mxu1 %v10205_v44 }
 0x70a   :  { %7253 = vmatpush1.bf16.msra.mxu0 %v10200_v45  ;;  %7335 = vmatpush1.bf16.msra.mxu1 %v10203_v46 }
 0x70b   :  { %7254 = vmatprep.subr.bf16.mxu0 %v10208_v47  ;;  %7336 = vmatprep.subr.bf16.mxu1 %v10211_v48 }
 0x70e   :  { %7255 = vmatpush1.bf16.msra.mxu0 %v10206_v49  ;;  %7337 = vmatpush1.bf16.msra.mxu1 %v10209_v50 }
 0x70f   :  { %7256 = vmatprep.subr.bf16.mxu0 %v10214_v51  ;;  %7338 = vmatprep.subr.bf16.mxu1 %v10217_v25  ;;  %v10272_v25 = vld [vmem:[%s13721_s17 + $0x200] ss:$16 sps:$4 sm:$0xff]  }
 0x712   :  { %7257 = vmatpush1.bf16.msra.mxu0 %v10212_v52  ;;  %7339 = vmatpush1.bf16.msra.mxu1 %v10215_v53  ;;  %v10275_v52 = vld [vmem:[%s13721_s17 + $0x208] ss:$16 sps:$4 sm:$0xff]  }
 0x713   :  { %7258 = vmatprep.subr.bf16.mxu0 %v10220_v55  ;;  %7340 = vmatprep.subr.bf16.mxu1 %v10223_v30  ;;  %v10280_v55 = vld [vmem:[%s13721_s17 + $0x224] ss:$16 sps:$4 sm:$0xff]   ;;  %v10283_v30 = vld [vmem:[%s13721_s17 + $0x22c] ss:$16 sps:$4 sm:$0xff]  }
 0x716   :  { %7259 = vmatpush1.bf16.msra.mxu0 %v10218_v58  ;;  %7341 = vmatpush1.bf16.msra.mxu1 %v10221_v59  ;;  %v10278_v59 = vld [vmem:[%s13721_s17 + $0x220] ss:$16 sps:$4 sm:$0xff]  }
 0x717   :  { %7260 = vmatprep.subr.bf16.mxu0 %v10226_v2  ;;  %7342 = vmatprep.subr.bf16.mxu1 %v10229_v61  ;;  %v10281_v2 = vld [vmem:[%s13721_s17 + $0x228] ss:$16 sps:$4 sm:$0xff]   ;;  %v10286_v61 = vld [vmem:[%s13721_s17 + $0x244] ss:$16 sps:$4 sm:$0xff]  }
 0x71a   :  { %7261 = vmatpush1.bf16.msra.mxu0 %v10224_v63  ;;  %7343 = vmatpush1.bf16.msra.mxu1 %v10227_v1  ;;  %v10289_v63 = vld [vmem:[%s13721_s17 + $0x24c] ss:$16 sps:$4 sm:$0xff]   ;;  %v10284_v1 = vld [vmem:[%s13721_s17 + $0x240] ss:$16 sps:$4 sm:$0xff]  }
 0x71b   :  { %7262 = vmatprep.subr.bf16.mxu0 %v10232_v4  ;;  %7344 = vmatprep.subr.bf16.mxu1 %v10235_v5  ;;  %v10287_v4 = vld [vmem:[%s13721_s17 + $0x248] ss:$16 sps:$4 sm:$0xff]   ;;  %v10292_v5 = vld [vmem:[%s13721_s17 + $0x264] ss:$16 sps:$4 sm:$0xff]  }
 0x71e   :  { %7263 = vmatpush1.bf16.msra.mxu0 %v10230_v6  ;;  %7345 = vmatpush1.bf16.msra.mxu1 %v10233_v7  ;;  %v10295_v6 = vld [vmem:[%s13721_s17 + $0x26c] ss:$16 sps:$4 sm:$0xff]   ;;  %v10290_v7 = vld [vmem:[%s13721_s17 + $0x260] ss:$16 sps:$4 sm:$0xff]  }
 0x71f   :  { %7264 = vmatprep.subr.bf16.mxu0 %v10238_v0  ;;  %7346 = vmatprep.subr.bf16.mxu1 %v10241_v9  ;;  %v10293_v0 = vld [vmem:[%s13721_s17 + $0x268] ss:$16 sps:$4 sm:$0xff]   ;;  %v10298_v9 = vld [vmem:[%s13721_s17 + $0x284] ss:$16 sps:$4 sm:$0xff]  }
 0x722   :  { %7265 = vmatpush1.bf16.msra.mxu0 %v10236_v10  ;;  %7347 = vmatpush1.bf16.msra.mxu1 %v10239_v11  ;;  %v10301_v10 = vld [vmem:[%s13721_s17 + $0x28c] ss:$16 sps:$4 sm:$0xff]   ;;  %v10296_v11 = vld [vmem:[%s13721_s17 + $0x280] ss:$16 sps:$4 sm:$0xff]  }
 0x723   :  { %7266 = vmatprep.subr.bf16.mxu0 %v10244_v12  ;;  %7348 = vmatprep.subr.bf16.mxu1 %v10247_v15  ;;  %v10299_v12 = vld [vmem:[%s13721_s17 + $0x288] ss:$16 sps:$4 sm:$0xff]   ;;  %v10304_v15 = vld [vmem:[%s13721_s17 + $0x2a4] ss:$16 sps:$4 sm:$0xff]  }
 0x726   :  { %7267 = vmatpush1.bf16.msra.mxu0 %v10242_v16  ;;  %7349 = vmatpush1.bf16.msra.mxu1 %v10245_v54  ;;  %v10307_v16 = vld [vmem:[%s13721_s17 + $0x2ac] ss:$16 sps:$4 sm:$0xff]   ;;  %v10302_v54 = vld [vmem:[%s13721_s17 + $0x2a0] ss:$16 sps:$4 sm:$0xff]  }
 0x727   :  { %7268 = vmatprep.subr.bf16.mxu0 %v10250_v17  ;;  %7350 = vmatprep.subr.bf16.mxu1 %v10253_v18  ;;  %v10305_v17 = vld [vmem:[%s13721_s17 + $0x2a8] ss:$16 sps:$4 sm:$0xff]   ;;  %v10310_v18 = vld [vmem:[%s13721_s17 + $0x2c4] ss:$16 sps:$4 sm:$0xff]  }
 0x72a   :  { %7269 = vmatpush1.bf16.msra.mxu0 %v10248_v20  ;;  %7351 = vmatpush1.bf16.msra.mxu1 %v10251_v21  ;;  %v10313_v20 = vld [vmem:[%s13721_s17 + $0x2cc] ss:$16 sps:$4 sm:$0xff]   ;;  %v10308_v21 = vld [vmem:[%s13721_s17 + $0x2c0] ss:$16 sps:$4 sm:$0xff]  }
 0x72b   :  { %7270 = vmatprep.subr.bf16.mxu0 %v10256_v60  ;;  %7352 = vmatprep.subr.bf16.mxu1 %v10259_v38  ;;  %v10311_v60 = vld [vmem:[%s13721_s17 + $0x2c8] ss:$16 sps:$4 sm:$0xff]   ;;  %v10316_v38 = vld [vmem:[%s13721_s17 + $0x2e4] ss:$16 sps:$4 sm:$0xff]  }
 0x72e   :  { %7271 = vmatpush1.bf16.msra.mxu0 %v10254_v3  ;;  %7353 = vmatpush1.bf16.msra.mxu1 %v10257_v40  ;;  %v10319_v3 = vld [vmem:[%s13721_s17 + $0x2ec] ss:$16 sps:$4 sm:$0xff]   ;;  %v10314_v40 = vld [vmem:[%s13721_s17 + $0x2e0] ss:$16 sps:$4 sm:$0xff]  }
 0x72f   :  { %7272 = vmatprep.subr.bf16.mxu0 %v10262_v22  ;;  %7354 = vmatprep.subr.bf16.mxu1 %v10265_v23  ;;  %v10317_v22 = vld [vmem:[%s13721_s17 + $0x2e8] ss:$16 sps:$4 sm:$0xff]   ;;  %v10322_v23 = vld [vmem:[%s13721_s17 + $0x304] ss:$16 sps:$4 sm:$0xff]  }
 0x732   :  { %7273 = vmatpush1.bf16.msra.mxu0 %v10260_v24  ;;  %7355 = vmatpush1.bf16.msra.mxu1 %v10263_v26  ;;  %v10325_v24 = vld [vmem:[%s13721_s17 + $0x30c] ss:$16 sps:$4 sm:$0xff]   ;;  %v10320_v26 = vld [vmem:[%s13721_s17 + $0x300] ss:$16 sps:$4 sm:$0xff]  }
 0x733   :  { %7274 = vmatprep.subr.bf16.mxu0 %v10268_v27  ;;  %7356 = vmatprep.subr.bf16.mxu1 %v10271_v28  ;;  %v10323_v27 = vld [vmem:[%s13721_s17 + $0x308] ss:$16 sps:$4 sm:$0xff]   ;;  %v10328_v28 = vld [vmem:[%s13721_s17 + $0x324] ss:$16 sps:$4 sm:$0xff]  }
 0x736   :  { %7275 = vmatpush1.bf16.msra.mxu0 %v10266_v62  ;;  %7357 = vmatpush1.bf16.msra.mxu1 %v10269_v29  ;;  %v10331_v62 = vld [vmem:[%s13721_s17 + $0x32c] ss:$16 sps:$4 sm:$0xff]   ;;  %v10326_v29 = vld [vmem:[%s13721_s17 + $0x320] ss:$16 sps:$4 sm:$0xff]  }
 0x737   :  { %7285 = vmatprep.subr.bf16.mxu0 %v10274_v31  ;;  %7367 = vmatprep.subr.bf16.mxu1 %v10277_v32  ;;  %v10329_v31 = vld [vmem:[%s13721_s17 + $0x328] ss:$16 sps:$4 sm:$0xff]   ;;  %v10334_v32 = vld [vmem:[%s13721_s17 + $0x344] ss:$16 sps:$4 sm:$0xff]  }
 0x7cc   :  { %v6357_v8 = vpop.f32.mrb[28].mxu0  ;;  %v13392_v36 = vpop.f32.mrb[28].mxu1 }
 0x7cd   :  { %v8860_v37 = vadd.f32 %v6357_v8, %v5625_v34  ;;  %v6359_v42 = vpop.f32.mrb[29].mxu0  ;;  %v6441_v43 = vpop.f32.mrb[29].mxu1  ;;  %v10337_v34 = vld [vmem:[%s13721_s17 + $0x34c] ss:$16 sps:$4 sm:$0xff]   ;;  %v10340_v8 = vld [vmem:[%s13721_s17 + $0x364] ss:$16 sps:$4 sm:$0xff]  }
 0x7ce   :  { %v8861_v13 = vadd.f32 %v6359_v42, %v5629_v35  ;;  %v8863_v19 = vadd.f32 %v6441_v43, %v5637_v14  ;;  %v6361_v44 = vpop.f32.mrb[30].mxu0  ;;  %v6443_v45 = vpop.f32.mrb[30].mxu1  ;;  %v10332_v35 = vld [vmem:[%s13721_s17 + $0x340] ss:$16 sps:$4 sm:$0xff]   ;;  %v10335_v14 = vld [vmem:[%s13721_s17 + $0x348] ss:$16 sps:$4 sm:$0xff]  }
 0x7cf   :  { %v6446_v46 = vmax.f32 %v8860_v37, 0.0  ;;  %v6362_v47 = vpop.f32.mrb[31].mxu0  ;;  %v6444_v48 = vpop.f32.mrb[31].mxu1  ;;  %v10343_v37 = vld [vmem:[%s13721_s17 + $0x36c] ss:$16 sps:$4 sm:$0xff]  }
 0x7d0   :  { %v6447_v49 = vmax.f32 %v8861_v13, 0.0  ;;  %v6449_v50 = vmax.f32 %v8863_v19, 0.0  ;;  %v10338_v42 = vld [vmem:[%s13721_s17 + $0x360] ss:$16 sps:$4 sm:$0xff]   ;;  %v10341_v43 = vld [vmem:[%s13721_s17 + $0x368] ss:$16 sps:$4 sm:$0xff]  }
 0x7d1   :  { %v6450_v53 = vpack.c.bf16 %v6446_v46, %v6446_v46  ;;  %v10346_v13 = vld [vmem:[%s13721_s17 + $0x384] ss:$16 sps:$4 sm:$0xff]   ;;  %v10349_v19 = vld [vmem:[%s13721_s17 + $0x38c] ss:$16 sps:$4 sm:$0xff]   ;;  %v10344_v44 = vld [vmem:[%s13721_s17 + $0x380] ss:$16 sps:$4 sm:$0xff]  }
 0x7d2   :  { %v6451_v51 = vpack.c.bf16 %v6447_v49, %v6447_v49  ;;  %v6453_v58 = vpack.c.bf16 %v6449_v50, %v6449_v50  ;;  %v10347_v45 = vld [vmem:[%s13721_s17 + $0x388] ss:$16 sps:$4 sm:$0xff]   ;;  %v10352_v46 = vld [vmem:[%s13721_s17 + $0x3a4] ss:$16 sps:$4 sm:$0xff]   ;;  %v10355_v47 = vld [vmem:[%s13721_s17 + $0x3ac] ss:$16 sps:$4 sm:$0xff]   ;;  %v5633_v50 = vrot.slane %v13384_v33, %v11029_v57 }
 0x7d3   :  { %v10350_v48 = vld [vmem:[%s13721_s17 + $0x3a0] ss:$16 sps:$4 sm:$0xff]   ;;  %v10353_v49 = vld [vmem:[%s13721_s17 + $0x3a8] ss:$16 sps:$4 sm:$0xff]  }
 0x7d4   :  { %7276 = vmatprep.mubr.bf16.mxu0 %v6451_v51  ;;  %7358 = vmatprep.mubr.bf16.mxu1 %v6451_v51  ;;  %v10358_v51 = vld [vmem:[%s13721_s17 + $0x3c4] ss:$16 sps:$4 sm:$0xff]   ;;  %v10359_v33 = vld [vmem:[%s13721_s17 + $0x3c8] ss:$16 sps:$4 sm:$0xff]  }
 0x7d5   :  { %7277 = vmatmul.mubr.bf16.vlgmr.msra.gmra.mrb[32].mxu0 %v6450_v53  ;;  %7359 = vmatmul.mubr.bf16.vlgmr.msra.gmra.mrb[32].mxu1 %v6450_v53  ;;  %v8862_v53 = vadd.f32 %v13392_v36, %v5633_v50  ;;  %v10365_v36 = vld [vmem:[%s13721_s17 + $0x3e8] ss:$16 sps:$4 sm:$0xff]  }
 0x7d6   :  { %7286 = vmatpush1.bf16.msra.mxu0 %v10272_v25  ;;  %7368 = vmatpush1.bf16.msra.mxu1 %v10275_v52  ;;  %v10361_v25 = vld [vmem:[%s13721_s17 + $0x3cc] ss:$16 sps:$4 sm:$0xff]   ;;  %v10356_v52 = vld [vmem:[%s13721_s17 + $0x3c0] ss:$16 sps:$4 sm:$0xff]  }
 0x7d7   :  { %7317 = vmatprep.mubr.bf16.mxu0 %v6453_v58  ;;  %7399 = vmatprep.mubr.bf16.mxu1 %v6453_v58  ;;  %v10362_v58 = vld [vmem:[%s13721_s17 + $0x3e0] ss:$16 sps:$4 sm:$0xff]  }
 0x7d8   :  { %7287 = vmatprep.subr.bf16.mxu0 %v10280_v55  ;;  %7369 = vmatprep.subr.bf16.mxu1 %v10283_v30  ;;  %v10364_v55 = vld [vmem:[%s13721_s17 + $0x3e4] ss:$16 sps:$4 sm:$0xff]   ;;  %v10367_v30 = vld [vmem:[%s13721_s17 + $0x3ec] ss:$16 sps:$4 sm:$0xff]  }
 0x7da   :  { %7288 = vmatpush1.bf16.msra.mxu0 %v10278_v59  ;;  %7370 = vmatpush1.bf16.msra.mxu1 %v10281_v2  ;;  %v6448_v59 = vmax.f32 %v8862_v53, 0.0  ;;  %v10368_v2 = vld [vmem:[%s13723_s19 + $0x40] sm:$0xff]   ;;  %v10432_v53 = vmov 3  }
 0x7db   :  { %7289 = vmatprep.subr.bf16.mxu0 %v10286_v61  ;;  %7371 = vmatprep.subr.bf16.mxu1 %v10289_v63  ;;  %v10369_v61 = vld [vmem:[%s13723_s19 + $0xc0] sm:$0xff]  }
 0x7dc   :  { %v10370_v63 = vld [vmem:[%s13723_s19] sm:$0xff]   ;;  %8927 = vset.pattern.permute.xlu0 %v10432_v53 }
 0x7de   :  { %7290 = vmatpush1.bf16.msra.mxu0 %v10284_v1  ;;  %7372 = vmatpush1.bf16.msra.mxu1 %v10287_v4  ;;  %v10371_v1 = vld [vmem:[%s13723_s19 + $0x80] sm:$0xff]   ;;  %v6452_v4 = vpack.c.bf16 %v6448_v59, %v6448_v59 }
 0x7df   :  { %7291 = vmatprep.subr.bf16.mxu0 %v10292_v5  ;;  %7373 = vmatprep.subr.bf16.mxu1 %v10295_v6  ;;  %v10372_v5 = vld [vmem:[%s13723_s19 + $0x48] sm:$0xff]  }
 0x7e0   :  { %v10373_v6 = vld [vmem:[%s13723_s19 + $0xc8] sm:$0xff]  }
 0x7e2   :  { %7292 = vmatpush1.bf16.msra.mxu0 %v10290_v7  ;;  %7374 = vmatpush1.bf16.msra.mxu1 %v10293_v0  ;;  %v10374_v7 = vld [vmem:[%s13723_s19 + $0x8] sm:$0xff]  }
 0x7e3   :  { %7293 = vmatprep.subr.bf16.mxu0 %v10298_v9  ;;  %7375 = vmatprep.subr.bf16.mxu1 %v10301_v10  ;;  %v10375_v0 = vld [vmem:[%s13723_s19 + $0x88] sm:$0xff]   ;;  %v10376_v9 = vld [vmem:[%s13723_s19 + $0x50] sm:$0xff]  }
 0x7e4   :  { %v10377_v10 = vld [vmem:[%s13723_s19 + $0xd0] sm:$0xff]  }
 0x7e6   :  { %7294 = vmatpush1.bf16.msra.mxu0 %v10296_v11  ;;  %7376 = vmatpush1.bf16.msra.mxu1 %v10299_v12  ;;  %v10378_v11 = vld [vmem:[%s13723_s19 + $0x10] sm:$0xff]  }
 0x7e7   :  { %7295 = vmatprep.subr.bf16.mxu0 %v10304_v15  ;;  %7377 = vmatprep.subr.bf16.mxu1 %v10307_v16  ;;  %v10379_v12 = vld [vmem:[%s13723_s19 + $0x90] sm:$0xff]   ;;  %v10380_v15 = vld [vmem:[%s13723_s19 + $0x58] sm:$0xff]  }
 0x7e8   :  { %v10381_v16 = vld [vmem:[%s13723_s19 + $0xd8] sm:$0xff]  }
 0x7ea   :  { %7296 = vmatpush1.bf16.msra.mxu0 %v10302_v54  ;;  %7378 = vmatpush1.bf16.msra.mxu1 %v10305_v17  ;;  %v10382_v54 = vld [vmem:[%s13723_s19 + $0x18] sm:$0xff]  }
 0x7eb   :  { %7297 = vmatprep.subr.bf16.mxu0 %v10310_v18  ;;  %7379 = vmatprep.subr.bf16.mxu1 %v10313_v20  ;;  %v10383_v17 = vld [vmem:[%s13723_s19 + $0x98] sm:$0xff]   ;;  %v10384_v18 = vld [vmem:[%s13723_s19 + $0x60] sm:$0xff]  }
 0x7ec   :  { %v10385_v20 = vld [vmem:[%s13723_s19 + $0xe0] sm:$0xff]  }
 0x7ee   :  { %7298 = vmatpush1.bf16.msra.mxu0 %v10308_v21  ;;  %7380 = vmatpush1.bf16.msra.mxu1 %v10311_v60  ;;  %v10386_v21 = vld [vmem:[%s13723_s19 + $0x20] sm:$0xff]  }
 0x7ef   :  { %7299 = vmatprep.subr.bf16.mxu0 %v10316_v38  ;;  %7381 = vmatprep.subr.bf16.mxu1 %v10319_v3  ;;  %v10387_v60 = vld [vmem:[%s13723_s19 + $0xa0] sm:$0xff]   ;;  %v10388_v38 = vld [vmem:[%s13723_s19 + $0x68] sm:$0xff]  }
 0x7f0   :  { %v10389_v3 = vld [vmem:[%s13723_s19 + $0xe8] sm:$0xff]  }
 0x7f2   :  { %7300 = vmatpush1.bf16.msra.mxu0 %v10314_v40  ;;  %7382 = vmatpush1.bf16.msra.mxu1 %v10317_v22  ;;  %v10390_v40 = vld [vmem:[%s13723_s19 + $0x28] sm:$0xff]  }
 0x7f3   :  { %7301 = vmatprep.subr.bf16.mxu0 %v10322_v23  ;;  %7383 = vmatprep.subr.bf16.mxu1 %v10325_v24  ;;  %v10391_v22 = vld [vmem:[%s13723_s19 + $0xa8] sm:$0xff]   ;;  %v10392_v23 = vld [vmem:[%s13723_s19 + $0x70] sm:$0xff]  }
 0x7f4   :  { %v10393_v24 = vld [vmem:[%s13723_s19 + $0xf0] sm:$0xff]  }
 0x7f6   :  { %7302 = vmatpush1.bf16.msra.mxu0 %v10320_v26  ;;  %7384 = vmatpush1.bf16.msra.mxu1 %v10323_v27  ;;  %v10394_v26 = vld [vmem:[%s13723_s19 + $0x30] sm:$0xff]  }
 0x7f7   :  { %7303 = vmatprep.subr.bf16.mxu0 %v10328_v28  ;;  %7385 = vmatprep.subr.bf16.mxu1 %v10331_v62  ;;  %v10395_v27 = vld [vmem:[%s13723_s19 + $0xb0] sm:$0xff]   ;;  %v10396_v28 = vld [vmem:[%s13723_s19 + $0x78] sm:$0xff]  }
 0x7f8   :  { %v10397_v62 = vld [vmem:[%s13723_s19 + $0xf8] sm:$0xff]  }
 0x7fa   :  { %7304 = vmatpush1.bf16.msra.mxu0 %v10326_v29  ;;  %7386 = vmatpush1.bf16.msra.mxu1 %v10329_v31  ;;  %v10398_v29 = vld [vmem:[%s13723_s19 + $0x38] sm:$0xff]  }
 0x7fb   :  { %7305 = vmatprep.subr.bf16.mxu0 %v10334_v32  ;;  %7387 = vmatprep.subr.bf16.mxu1 %v10337_v34  ;;  %v10399_v31 = vld [vmem:[%s13723_s19 + $0xb8] sm:$0xff]   ;;  %v6582_v32 = vld [vmem:[%s13722_s18] sm:$0xf] }
 0x7fc   :  { %v6587_v34 = vrot.slane %v6582_v32, %v10851_v39 }
 0x7fe   :  { %7306 = vmatpush1.bf16.msra.mxu0 %v10332_v35  ;;  %7388 = vmatpush1.bf16.msra.mxu1 %v10335_v14  ;;  %v6595_v35 = vrot.slane %v6582_v32, %v11029_v57  ;;  %v6591_v14 = vrot.slane %v6582_v32, %v10859_v41 }
 0x7ff   :  { %7307 = vmatprep.subr.bf16.mxu0 %v10340_v8  ;;  %7389 = vmatprep.subr.bf16.mxu1 %v10343_v37  ;;  %v6599_v8 = vrot.slane %v6582_v32, %v10878_v56 }
 0x802   :  { %7308 = vmatpush1.bf16.msra.mxu0 %v10338_v42  ;;  %7390 = vmatpush1.bf16.msra.mxu1 %v10341_v43 }
 0x803   :  { %7309 = vmatprep.subr.bf16.mxu0 %v10346_v13  ;;  %7391 = vmatprep.subr.bf16.mxu1 %v10349_v19 }
 0x806   :  { %7310 = vmatpush1.bf16.msra.mxu0 %v10344_v44  ;;  %7392 = vmatpush1.bf16.msra.mxu1 %v10347_v45 }
 0x807   :  { %7311 = vmatprep.subr.bf16.mxu0 %v10352_v46  ;;  %7393 = vmatprep.subr.bf16.mxu1 %v10355_v47 }
 0x80a   :  { %7312 = vmatpush1.bf16.msra.mxu0 %v10350_v48  ;;  %7394 = vmatpush1.bf16.msra.mxu1 %v10353_v49 }
 0x80b   :  { %7313 = vmatprep.subr.bf16.mxu0 %v10358_v51  ;;  %7395 = vmatprep.subr.bf16.mxu1 %v10361_v25 }
 0x80e   :  { %7314 = vmatpush1.bf16.msra.mxu0 %v10356_v52  ;;  %7396 = vmatpush1.bf16.msra.mxu1 %v10359_v33 }
 0x80f   :  { %7315 = vmatprep.subr.bf16.mxu0 %v10364_v55  ;;  %7397 = vmatprep.subr.bf16.mxu1 %v10367_v30 }
 0x812   :  { %7316 = vmatpush1.bf16.msra.mxu0 %v10362_v58  ;;  %7398 = vmatpush1.bf16.msra.mxu1 %v10365_v36  ;;  %v8762_v58 = vld [vmem:[%s13724_s20] ss:$0 sm:$0xff] }
 0x813   :  { %8796 = vmatprep.subr.bf16.mxu0 %v10368_v2  ;;  %8818 = vmatprep.subr.bf16.mxu1 %v10369_v61 }
 0x815   :  { %7318 = vmatmul.mubr.bf16.vlgmr.msra.gmra.mrb[32].mxu0 %v6452_v4  ;;  %7400 = vmatmul.mubr.bf16.vlgmr.msra.gmra.mrb[32].mxu1 %v6452_v4 }
 0x816   :  { %8797 = vmatpush3.bf16.msra.mxu0 %v10370_v63  ;;  %8819 = vmatpush3.bf16.msra.mxu1 %v10371_v1 }
 0x817   :  { %8798 = vmatprep.subr.bf16.mxu0 %v10372_v5  ;;  %8820 = vmatprep.subr.bf16.mxu1 %v10373_v6 }
 0x81a   :  { %8799 = vmatpush3.bf16.msra.mxu0 %v10374_v7  ;;  %8821 = vmatpush3.bf16.msra.mxu1 %v10375_v0 }
 0x81b   :  { %8800 = vmatprep.subr.bf16.mxu0 %v10376_v9  ;;  %8822 = vmatprep.subr.bf16.mxu1 %v10377_v10 }
 0x81e   :  { %8801 = vmatpush3.bf16.msra.mxu0 %v10378_v11  ;;  %8823 = vmatpush3.bf16.msra.mxu1 %v10379_v12 }
 0x81f   :  { %8802 = vmatprep.subr.bf16.mxu0 %v10380_v15  ;;  %8824 = vmatprep.subr.bf16.mxu1 %v10381_v16 }
 0x822   :  { %8803 = vmatpush3.bf16.msra.mxu0 %v10382_v54  ;;  %8825 = vmatpush3.bf16.msra.mxu1 %v10383_v17 }
 0x823   :  { %8804 = vmatprep.subr.bf16.mxu0 %v10384_v18  ;;  %8826 = vmatprep.subr.bf16.mxu1 %v10385_v20 }
 0x826   :  { %8805 = vmatpush3.bf16.msra.mxu0 %v10386_v21  ;;  %8827 = vmatpush3.bf16.msra.mxu1 %v10387_v60 }
 0x827   :  { %8806 = vmatprep.subr.bf16.mxu0 %v10388_v38  ;;  %8828 = vmatprep.subr.bf16.mxu1 %v10389_v3  ;;  %v8795_v38 = vld [vmem:[%s13725_s21] ss:$0 sm:$0xff] }
 0x82a   :  { %8807 = vmatpush3.bf16.msra.mxu0 %v10390_v40  ;;  %8829 = vmatpush3.bf16.msra.mxu1 %v10391_v22 }
 0x82b   :  { %8808 = vmatprep.subr.bf16.mxu0 %v10392_v23  ;;  %8830 = vmatprep.subr.bf16.mxu1 %v10393_v24 }
 0x82e   :  { %8809 = vmatpush3.bf16.msra.mxu0 %v10394_v26  ;;  %8831 = vmatpush3.bf16.msra.mxu1 %v10395_v27 }
 0x82f   :  { %8810 = vmatprep.subr.bf16.mxu0 %v10396_v28  ;;  %8832 = vmatprep.subr.bf16.mxu1 %v10397_v62 }
 0x832   :  { %8811 = vmatpush3.bf16.msra.mxu0 %v10398_v29  ;;  %8833 = vmatpush3.bf16.msra.mxu1 %v10399_v31 }
 0x8e8   :  { %v7319_v37 = vpop.f32.mrb[32].mxu0  ;;  %v7401_v42 = vpop.f32.mrb[32].mxu1 }
 0x8e9   :  { %v8864_v43 = vadd.f32 %v7319_v37, %v6587_v34  ;;  %v8866_v13 = vadd.f32 %v7401_v42, %v6595_v35  ;;  %v7321_v19 = vpop.f32.mrb[33].mxu0  ;;  %v7403_v44 = vpop.f32.mrb[33].mxu1 }
 0x8ea   :  { %v8865_v45 = vadd.f32 %v7321_v19, %v6591_v14  ;;  %v8867_v46 = vadd.f32 %v7403_v44, %v6599_v8  ;;  %v7323_v47 = vpop.f32.mrb[34].mxu0  ;;  %v7405_v48 = vpop.f32.mrb[34].mxu1 }
 0x8eb   :  { %v7408_v49 = vmax.f32 %v8864_v43, 0.0  ;;  %v7410_v50 = vmax.f32 %v8866_v13, 0.0  ;;  %v7324_v51 = vpop.f32.mrb[35].mxu0  ;;  %v7406_v39 = vpop.f32.mrb[35].mxu1 }
 0x8ec   :  { %v7409_v25 = vmax.f32 %v8865_v45, 0.0  ;;  %v7411_v57 = vmax.f32 %v8867_v46, 0.0 }
 0x8ed   :  { %v7412_v33 = vpack.c.bf16 %v7408_v49, %v7408_v49  ;;  %v7414_v56 = vpack.c.bf16 %v7410_v50, %v7410_v50 }
 0x8ee   :  { %v7413_v52 = vpack.c.bf16 %v7409_v25, %v7409_v25  ;;  %v7415_v41 = vpack.c.bf16 %v7411_v57, %v7411_v57 }
 0x8f0   :  { %7711 = vmatprep.mubr.bf16.mxu0 %v7413_v52  ;;  %7751 = vmatprep.mubr.bf16.mxu1 %v7415_v41 }
 0x8f1   :  { %7712 = vmatmul.mubr.bf16.vlgmr.msra.gmra.mrb[36].mxu0 %v7412_v33  ;;  %7752 = vmatmul.mubr.bf16.vlgmr.msra.gmra.mrb[36].mxu1 %v7414_v56 }
 0x9c4   :  { %v8812_v55 = vpop.f32.mrb[36].mxu0  ;;  %v8834_v30 = vpop.f32.mrb[36].mxu1 }
 0x9c5   :  { %v8813_v36 = vpop.f32.mrb[37].mxu0  ;;  %v8835_v59 = vpop.f32.mrb[37].mxu1 }
 0x9c6   :  { %v8814_v2 = vadd.f32 %v8813_v36, %v8812_v55  ;;  %v8836_v61 = vadd.f32 %v8835_v59, %v8834_v30  ;;  %v8815_v63 = vpop.f32.mrb[38].mxu0  ;;  %v8837_v1 = vpop.f32.mrb[38].mxu1 }
 0x9c7   :  { %v8816_v4 = vpop.f32.mrb[39].mxu0  ;;  %v8838_v5 = vpop.f32.mrb[39].mxu1 }
 0x9c8   :  { %v7714_v6 = vadd.f32 %v8814_v2, %v8762_v58 }
 0x9ca   :  { %v7754_v7 = vadd.f32 %v8836_v61, %v7714_v6 }
 0x9cc   :  { %v7759_v0 = vmul.f32 0.92419624, %v7754_v7 }
 0x9ce   :  { %v7761_v9 = vmin.f32 %v7759_v0, 20.0  ;;  %vm7760_vm0 = vcmp.gt.f32.partialorder %v7759_v0, 20.0 }
 0x9d0   :  { %v7762_v10 = vmul.f32 1.442695, %v7761_v9 }
 0x9d2   :  { %10400 = vpow2.f32 %v7762_v10 }
 0x9dc   :  { %v10401_v11 = vpop.eup %10400 }
 0x9dd   :  { %v7764_v12 = vadd.f32 1.0, %v10401_v11 }
 0x9df   :  { %10402 = vlog2.f32 %v7764_v12 }
 0x9e9   :  { %v10403_v15 = vpop.eup %10402 }
 0x9ea   :  { %v7766_v16 = vmul.f32 0.6931472, %v10403_v15 }
 0x9ec   :  { %v7768_v54 = vmul.f32 1.0820212, %v7766_v16 }
 0x9ee   :  { %v7769_v17 = vsel %vm7760_vm0, %v7754_v7, %v7768_v54 }
 0x9ef   :  { %v7770_v18 = vadd.f32 0.25, %v7769_v17 }
 0x9f1   :  { %v7771_v20 = vmin.f32 %v7770_v18, 100.0 }
 0x9f3   :  { %7774 = vperm.xlu0 %8927, %v7771_v20  }
 0xa72   :  { %v7775_v21 = vpop.permute.xlu0 %7774 }
 0xa73   :  { %10404 = vrcp.f32 %v7775_v21 }
 0xa7d   :  { %v10405_v60 = vpop.eup %10404 }
 0xa7e   :  { %v7778_v3 = vmul.f32 %v10405_v60, %v7754_v7 }
 0xa80   :  { %v7786_v40 = vadd.f32 %v8795_v38, %v7778_v3 }
 0xa82   :  { %7787 = vst [vmem:[#allocation2] sm:$0xff] %v7786_v40 }
 0xa83   :  { %10418 = shalt.err (!%p10415_p4)
}
 0xa84   :  { %s10419_s15 = scalar_lea.hbm %s13726_s22, 128 }
 0xa85   :  { %p10420_p5 = scmp.ne.s32.totalorder %s13726_s22, %s10419_s15  ;;  %p10423_p6 = scmp.lt.u32.totalorder %s10419_s15, %s13726_s22 }
 0xa87   :  { %p10425_p7 = pnand %p10423_p6, %p10420_p5 }
 0xa89   :  { %10428 = shalt.err (!%p10425_p7)
}
 0xa8a   :  { %7797 = dma.vmem_to_hbm [thread:$0]  %s7795_s3, 128, %s13726_s22, [#allocation3]  }
 0xa8b   :  { %10429 = dma.done.wait [#allocation3], 128  }
 0xa8c   :  { %10430 = vsyncadd [#allocation3], 4294967168 }
 0xa8d   :  { %7801 = vsyncpa [#allocation3], 1 }

</bundles_post_ra>
